<compile_context>
chip_gen: v7x
topology: tpu7x:2x2x1
jax: 0.10.0
libtpu: 0.0.40
codegen_flags: <defaults>
</compile_context>

<pallas_src>
import functools

import jax
import jax.numpy as jnp
from jax.experimental import pallas as pl
from jax.experimental.pallas import tpu as pltpu


DETECTOR_CONFIG = {
    'num_centrals': [256, 128, 128, 128, 128],
    'num_strides': [2, 2, 2, 2],
    'num_padding': [1, 1, 1, 1],
}

_LANE = 128
_VMEM_LIMIT = 32 * 1024 * 1024


def _round_up(x, m):
    return ((x + m - 1) // m) * m


# -----------------------------------------------------------------------------
# Pallas kernel: out = relu(X @ W + b), single K step (no accumulator, no
# pl.when phases).  X arrives f32 and is cast to bf16 in-kernel; W is already
# bf16; the accumulate + bias + ReLU epilogue stays in f32 and is written as a
# lane-dense (128-multiple wide) tile.
# -----------------------------------------------------------------------------
def _matmul_bias_relu_kernel(x_ref, w_ref, b_ref, o_ref):
    acc = jnp.dot(x_ref[...].astype(jnp.bfloat16), w_ref[...],
                  preferred_element_type=jnp.float32)
    o_ref[...] = jnp.maximum(acc + b_ref[...], 0.0).astype(o_ref.dtype)


def _pick_tm(m):
    # Prefer >=2 grid steps when M divides cleanly (lets v7x's second
    # TensorCore participate); otherwise one full-M block, which is legal for
    # any M (block == full array dim) and avoids padded-row MXU/DMA waste.
    for tm in (512, 256, 128):
        if m % tm == 0 and m >= 2 * tm:
            return tm
    for tm in (512, 256, 128):
        if m % tm == 0:
            return tm
    return m


def matmul_bias_relu(x, w_bf16, b):
    """relu(x @ w + b).  x: (M, K) f32, w: (K, Np) bf16, b: (1, Np) f32.
    K and Np are already multiples of 128 (channels stay padded between layers,
    weights are padded once at init)."""
    m, k = x.shape
    k2, n = w_bf16.shape
    assert k == k2 and k % _LANE == 0 and n % _LANE == 0, (x.shape, w_bf16.shape)
    assert b.shape == (1, n)

    tm = _pick_tm(m)
    # Double-buffered X/out blocks + resident W/bias; largest call here is
    # ~6 MiB, far under the 32 MiB scoped limit on every generation.
    vmem_est = 2 * (tm * k * 4 + k * n * 2 + n * 4 + tm * n * 4)
    assert vmem_est < _VMEM_LIMIT, vmem_est

    return pl.pallas_call(
        _matmul_bias_relu_kernel,
        out_shape=jax.ShapeDtypeStruct((m, n), jnp.float32),
        grid_spec=pltpu.PrefetchScalarGridSpec(
            num_scalar_prefetch=0,
            grid=(m // tm,),
            in_specs=[
                pl.BlockSpec((tm, k), lambda i: (i, 0)),   # X tile (full K)
                pl.BlockSpec((k, n), lambda i: (0, 0)),    # whole W, resident
                pl.BlockSpec((1, n), lambda i: (0, 0)),    # bias row
            ],
            out_specs=pl.BlockSpec((tm, n), lambda i: (i, 0)),
        ),
        compiler_params=pltpu.CompilerParams(
            dimension_semantics=("parallel",),
            vmem_limit_bytes=_VMEM_LIMIT,
        ),
    )(x, w_bf16, b)


# -----------------------------------------------------------------------------
# SSDHead parameters (PyTorch init replicated) + init-time weight preparation.
# -----------------------------------------------------------------------------
def _conv_params(key, cout, cin, kh, kw):
    kw_key, kb_key = jax.random.split(key)
    fan_in, fan_out = cin * kh * kw, cout * kh * kw
    std = (2.0 / (fan_in + fan_out)) ** 0.5            # nn.init.xavier_normal_
    w = std * jax.random.normal(kw_key, (cout, cin, kh, kw), dtype=jnp.float32)
    bound = 1.0 / (fan_in ** 0.5)                      # PyTorch Conv2d default bias
    b = jax.random.uniform(kb_key, (cout,), jnp.float32, -bound, bound)
    return w, b


def _prep_conv(w, b, cin_p, cout_p):
    """OIHW (Cout,Cin,kh,kw) -> (kh*kw*cin_p, cout_p) bf16 matmul weight whose
    row ordering (tap-major, channel-minor) matches the NHWC im2col in the
    forward, plus a zero-padded (1, cout_p) f32 bias.  Done once at init."""
    cout, cin, kh, kw = w.shape
    wt = jnp.transpose(w, (2, 3, 1, 0))                       # (kh,kw,Cin,Cout)
    wt = jnp.pad(wt, ((0, 0), (0, 0), (0, cin_p - cin), (0, cout_p - cout)))
    wm = wt.reshape(kh * kw * cin_p, cout_p).astype(jnp.bfloat16)
    bm = jnp.pad(b, (0, cout_p - cout)).reshape(1, cout_p)
    return wm, bm


def init_ssd_head_params(key, num_feature_list):
    nf = num_feature_list
    nc = DETECTOR_CONFIG['num_centrals']
    ns = DETECTOR_CONFIG['num_strides']
    npad = DETECTOR_CONFIG['num_padding']
    keys = jax.random.split(key, 10)
    raw, blocks = [], []

    def add_block(k1, k2, cin, cc, cout, kh, kw, stride, pad):
        w1, b1 = _conv_params(k1, cc, cin, 1, 1)
        w2, b2 = _conv_params(k2, cout, cc, kh, kw)
        cin_p = _round_up(cin, _LANE)
        cc_p = _round_up(cc, _LANE)
        cout_p = _round_up(cout, _LANE)
        w1m, b1m = _prep_conv(w1, b1, cin_p, cc_p)
        w2m, b2m = _prep_conv(w2, b2, cc_p, cout_p)
        raw.append(((w1, b1), (w2, b2), stride, pad))
        blocks.append(dict(w1=w1m, b1=b1m, w2=w2m, b2=b2m,
                           cin_p=cin_p, cc_p=cc_p, cout_p=cout_p, cout=cout,
                           kh=kh, kw=kw, stride=stride, pad=pad))

    for idx in range(4):                                   # feature2..feature5
        add_block(keys[2 * idx], keys[2 * idx + 1],
                  nf[idx + 1], nc[idx], nf[idx + 2], 3, 3, ns[idx], npad[idx])
    add_block(keys[8], keys[9], 256, 128, 256, 2, 2, 1, 0)  # feature6 (hard-coded)
    return blocks, raw


# -----------------------------------------------------------------------------
# SSDHead forward: NHWC, channel-padded activations between layers; all conv
# compute runs inside the fused Pallas matmul kernel.
# -----------------------------------------------------------------------------
def ssd_head_forward(x_nchw, params):
    n, c, h, w = x_nchw.shape
    cp = _round_up(c, _LANE)
    assert cp == params[0]['cin_p']
    a = jnp.transpose(x_nchw, (0, 2, 3, 1))                 # one-time NCHW->NHWC
    a = jnp.pad(a, ((0, 0), (0, 0), (0, 0), (0, cp - c)))   # one-time channel pad

    det = []
    for blk in params:
        cc_p, cout_p, cout = blk['cc_p'], blk['cout_p'], blk['cout']
        kh, kw, s, p = blk['kh'], blk['kw'], blk['stride'], blk['pad']

        # 1x1 conv + ReLU (fused Pallas matmul, single K step).
        mid = matmul_bias_relu(a.reshape(n * h * w, cp), blk['w1'], blk['b1'])
        mid = mid.reshape(n, h, w, cc_p)

        # kxk (stride s, pad p) conv + ReLU: lane-aligned im2col (layout only)
        # on the channel-padded NHWC tensor, then one fused Pallas matmul.
        ho = (h + 2 * p - kh) // s + 1
        wo = (w + 2 * p - kw) // s + 1
        if p:
            mid = jnp.pad(mid, ((0, 0), (p, p), (p, p), (0, 0)))
        taps = [mid[:, i:i + s * ho:s, j:j + s * wo:s, :]
                for i in range(kh) for j in range(kw)]
        cols = jnp.concatenate(taps, axis=-1).reshape(n * ho * wo, kh * kw * cc_p)
        out = matmul_bias_relu(cols, blk['w2'], blk['b2'])

        a = out.reshape(n, ho, wo, cout_p)                  # stays padded NHWC
        # Only the tiny per-block det outputs go back to NCHW / real channels.
        det.append(jnp.transpose(a[..., :cout], (0, 3, 1, 2)))
        h, w, cp = ho, wo, cout_p
    return det


# -----------------------------------------------------------------------------
# Pure-JAX reference (lax.conv, HIGHEST precision, original f32 weights).
# -----------------------------------------------------------------------------
def _conv2d_relu_ref(x, w, b, stride, padding):
    y = jax.lax.conv_general_dilated(
        x, w, window_strides=(stride, stride),
        padding=((padding, padding), (padding, padding)),
        dimension_numbers=('NCHW', 'OIHW', 'NCHW'),
        precision=jax.lax.Precision.HIGHEST)
    return jnp.maximum(y + b[None, :, None, None], 0.0)


def ssd_head_forward_ref(feature, raw_params):
    det = []
    for (w1, b1), (w2, b2), stride, pad in raw_params:
        feature = _conv2d_relu_ref(feature, w1, b1, 1, 0)
        feature = _conv2d_relu_ref(feature, w2, b2, stride, pad)
        det.append(feature)
    return det


if __name__ == "__main__":
    key = jax.random.PRNGKey(0)
    k_x, k_p = jax.random.split(key)

    # feature5 must output 256 channels (feature6 is hard-coded 256->128->256)
    # and the head input spatial size must be >= 32 so feature6's 2x2 valid
    # conv sees a 2x2 map.
    num_feature_list = [512, 64, 64, 64, 64, 256]
    N, C, H, W = 2, num_feature_list[1], 32, 32

    x = jax.random.normal(k_x, (N, C, H, W), dtype=jnp.float32)
    params, raw_params = init_ssd_head_params(k_p, num_feature_list)

    fwd = jax.jit(functools.partial(ssd_head_forward, params=params))
    det = jax.block_until_ready(fwd(x))

    ref = ssd_head_forward_ref(x, raw_params)

    expected_shapes = [
        (N, num_feature_list[2], 16, 16),
        (N, num_feature_list[3], 8, 8),
        (N, num_feature_list[4], 4, 4),
        (N, num_feature_list[5], 2, 2),
        (N, 256, 1, 1),
    ]
    assert len(det) == 5
    for o, r, s in zip(det, ref, expected_shapes):
        assert o.shape == s, (o.shape, s)
        # Tolerance covers explicit bf16 MXU inputs (weights + activations)
        # across 10 chained matmuls vs the HIGHEST-precision f32 reference.
        max_err = float(jnp.max(jnp.abs(o - r)))
        assert jnp.allclose(o, r, atol=5e-2, rtol=5e-2), max_err
        rel = float(jnp.linalg.norm(o - r) / (jnp.linalg.norm(r) + 1e-6))
        assert rel < 3e-2, rel

    print("KERNEL_OK")
</pallas_src>

<mosaic_0001>
module attributes {stable_mosaic.version = 11 : i64} {
  func.func @_matmul_bias_relu_kernel(%arg0: i32, %arg1: memref<512x128xf32, #tpu.memory_space<vmem>>, %arg2: memref<128x256xbf16, #tpu.memory_space<vmem>>, %arg3: memref<1x256xf32, #tpu.memory_space<vmem>>, %arg4: memref<512x256xf32, #tpu.memory_space<vmem>>) attributes {dimension_semantics = [#tpu.dimension_semantics<parallel>], iteration_bounds = array<i64: 4>, scalar_prefetch = 0 : i64, scratch_operands = 0 : i64, tpu.core_type = #tpu.core_type<tc>, window_params = [{transform_indices = @transform_0, window_bounds = array<i64: 512, 128>}, {pipeline_mode = #tpu.pipeline_mode<synchronous>, transform_indices = @transform_1, window_bounds = array<i64: 128, 256>}, {pipeline_mode = #tpu.pipeline_mode<synchronous>, transform_indices = @transform_2, window_bounds = array<i64: 1, 256>}, {transform_indices = @transform_3, window_bounds = array<i64: 512, 256>}]} {
    %c0 = arith.constant 0 : index
    %c0_0 = arith.constant 0 : index
    %0 = vector.load %arg1[%c0, %c0_0] : memref<512x128xf32, #tpu.memory_space<vmem>>, vector<512x128xf32>
    %1 = arith.truncf %0 : vector<512x128xf32> to vector<512x128xbf16>
    %c0_1 = arith.constant 0 : index
    %c0_2 = arith.constant 0 : index
    %2 = vector.load %arg2[%c0_1, %c0_2] : memref<128x256xbf16, #tpu.memory_space<vmem>>, vector<128x256xbf16>
    %cst = arith.constant dense<0.000000e+00> : vector<512x256xf32>
    %3 = tpu.matmul %1, %2, %cst {dimension_numbers = #tpu.dot_dimension_numbers<[1], [0], [0], [1], [0, 0, 1, 1], [], []>} : vector<512x128xbf16>, vector<128x256xbf16>, vector<512x256xf32> -> vector<512x256xf32>
    %c0_3 = arith.constant 0 : index
    %c0_4 = arith.constant 0 : index
    %4 = vector.load %arg3[%c0_3, %c0_4] : memref<1x256xf32, #tpu.memory_space<vmem>>, vector<1x256xf32>
    %5 = vector.broadcast %4 : vector<1x256xf32> to vector<512x256xf32>
    %6 = arith.addf %3, %5 : vector<512x256xf32>
    %cst_5 = arith.constant 0.000000e+00 : f32
    %7 = vector.broadcast %cst_5 : f32 to vector<512x256xf32>
    %8 = arith.maximumf %6, %7 : vector<512x256xf32>
    %c0_6 = arith.constant 0 : index
    %c0_7 = arith.constant 0 : index
    %9 = vector.load %arg4[%c0_6, %c0_7] : memref<512x256xf32, #tpu.memory_space<vmem>>, vector<512x256xf32>
    tpu.vector_store %arg4[%c0_6, %c0_7], %8 {strides = array<i32>} : memref<512x256xf32, #tpu.memory_space<vmem>>, vector<512x256xf32>,
    return
  }
  func.func @transform_0(%arg0: i32) -> (i32, i32) {
    %c0_i32 = arith.constant 0 : i32
    %c0_i32_0 = arith.constant 0 : i32
    return %arg0, %c0_i32 : i32, i32
  }
  func.func @transform_1(%arg0: i32) -> (i32, i32) {
    %c0_i32 = arith.constant 0 : i32
    %c0_i32_0 = arith.constant 0 : i32
    %c0_i32_1 = arith.constant 0 : i32
    return %c0_i32, %c0_i32_0 : i32, i32
  }
  func.func @transform_2(%arg0: i32) -> (i32, i32) {
    %c0_i32 = arith.constant 0 : i32
    %c0_i32_0 = arith.constant 0 : i32
    %c0_i32_1 = arith.constant 0 : i32
    return %c0_i32, %c0_i32_0 : i32, i32
  }
  func.func @transform_3(%arg0: i32) -> (i32, i32) {
    %c0_i32 = arith.constant 0 : i32
    %c0_i32_0 = arith.constant 0 : i32
    return %arg0, %c0_i32 : i32, i32
  }
}

module attributes {stable_mosaic.version = 11 : i64} {
  func.func @_matmul_bias_relu_kernel(%arg0: i32, %arg1: memref<256x2304xf32, #tpu.memory_space<vmem>>, %arg2: memref<2304x128xbf16, #tpu.memory_space<vmem>>, %arg3: memref<1x128xf32, #tpu.memory_space<vmem>>, %arg4: memref<256x128xf32, #tpu.memory_space<vmem>>) attributes {dimension_semantics = [#tpu.dimension_semantics<parallel>], iteration_bounds = array<i64: 2>, scalar_prefetch = 0 : i64, scratch_operands = 0 : i64, tpu.core_type = #tpu.core_type<tc>, window_params = [{transform_indices = @transform_0, window_bounds = array<i64: 256, 2304>}, {pipeline_mode = #tpu.pipeline_mode<synchronous>, transform_indices = @transform_1, window_bounds = array<i64: 2304, 128>}, {pipeline_mode = #tpu.pipeline_mode<synchronous>, transform_indices = @transform_2, window_bounds = array<i64: 1, 128>}, {transform_indices = @transform_3, window_bounds = array<i64: 256, 128>}]} {
    %c0 = arith.constant 0 : index
    %c0_0 = arith.constant 0 : index
    %0 = vector.load %arg1[%c0, %c0_0] : memref<256x2304xf32, #tpu.memory_space<vmem>>, vector<256x2304xf32>
    %1 = arith.truncf %0 : vector<256x2304xf32> to vector<256x2304xbf16>
    %c0_1 = arith.constant 0 : index
    %c0_2 = arith.constant 0 : index
    %2 = vector.load %arg2[%c0_1, %c0_2] : memref<2304x128xbf16, #tpu.memory_space<vmem>>, vector<2304x128xbf16>
    %cst = arith.constant dense<0.000000e+00> : vector<256x128xf32>
    %3 = tpu.matmul %1, %2, %cst {dimension_numbers = #tpu.dot_dimension_numbers<[1], [0], [0], [1], [0, 0, 1, 1], [], []>} : vector<256x2304xbf16>, vector<2304x128xbf16>, vector<256x128xf32> -> vector<256x128xf32>
    %c0_3 = arith.constant 0 : index
    %c0_4 = arith.constant 0 : index
    %4 = vector.load %arg3[%c0_3, %c0_4] : memref<1x128xf32, #tpu.memory_space<vmem>>, vector<1x128xf32>
    %5 = vector.broadcast %4 : vector<1x128xf32> to vector<256x128xf32>
    %6 = arith.addf %3, %5 : vector<256x128xf32>
    %cst_5 = arith.constant 0.000000e+00 : f32
    %7 = vector.broadcast %cst_5 : f32 to vector<256x128xf32>
    %8 = arith.maximumf %6, %7 : vector<256x128xf32>
    %c0_6 = arith.constant 0 : index
    %c0_7 = arith.constant 0 : index
    %9 = vector.load %arg4[%c0_6, %c0_7] : memref<256x128xf32, #tpu.memory_space<vmem>>, vector<256x128xf32>
    tpu.vector_store %arg4[%c0_6, %c0_7], %8 {strides = array<i32>} : memref<256x128xf32, #tpu.memory_space<vmem>>, vector<256x128xf32>,
    return
  }
  func.func @transform_0(%arg0: i32) -> (i32, i32) {
    %c0_i32 = arith.constant 0 : i32
    %c0_i32_0 = arith.constant 0 : i32
    return %arg0, %c0_i32 : i32, i32
  }
  func.func @transform_1(%arg0: i32) -> (i32, i32) {
    %c0_i32 = arith.constant 0 : i32
    %c0_i32_0 = arith.constant 0 : i32
    %c0_i32_1 = arith.constant 0 : i32
    return %c0_i32, %c0_i32_0 : i32, i32
  }
  func.func @transform_2(%arg0: i32) -> (i32, i32) {
    %c0_i32 = arith.constant 0 : i32
    %c0_i32_0 = arith.constant 0 : i32
    %c0_i32_1 = arith.constant 0 : i32
    return %c0_i32, %c0_i32_0 : i32, i32
  }
  func.func @transform_3(%arg0: i32) -> (i32, i32) {
    %c0_i32 = arith.constant 0 : i32
    %c0_i32_0 = arith.constant 0 : i32
    return %arg0, %c0_i32 : i32, i32
  }
}

module attributes {stable_mosaic.version = 11 : i64} {
  func.func @_matmul_bias_relu_kernel(%arg0: i32, %arg1: memref<256x128xf32, #tpu.memory_space<vmem>>, %arg2: memref<128x128xbf16, #tpu.memory_space<vmem>>, %arg3: memref<1x128xf32, #tpu.memory_space<vmem>>, %arg4: memref<256x128xf32, #tpu.memory_space<vmem>>) attributes {dimension_semantics = [#tpu.dimension_semantics<parallel>], iteration_bounds = array<i64: 2>, scalar_prefetch = 0 : i64, scratch_operands = 0 : i64, tpu.core_type = #tpu.core_type<tc>, window_params = [{transform_indices = @transform_0, window_bounds = array<i64: 256, 128>}, {pipeline_mode = #tpu.pipeline_mode<synchronous>, transform_indices = @transform_1, window_bounds = array<i64: 128, 128>}, {pipeline_mode = #tpu.pipeline_mode<synchronous>, transform_indices = @transform_2, window_bounds = array<i64: 1, 128>}, {transform_indices = @transform_3, window_bounds = array<i64: 256, 128>}]} {
    %c0 = arith.constant 0 : index
    %c0_0 = arith.constant 0 : index
    %0 = vector.load %arg1[%c0, %c0_0] : memref<256x128xf32, #tpu.memory_space<vmem>>, vector<256x128xf32>
    %1 = arith.truncf %0 : vector<256x128xf32> to vector<256x128xbf16>
    %c0_1 = arith.constant 0 : index
    %c0_2 = arith.constant 0 : index
    %2 = vector.load %arg2[%c0_1, %c0_2] : memref<128x128xbf16, #tpu.memory_space<vmem>>, vector<128x128xbf16>
    %cst = arith.constant dense<0.000000e+00> : vector<256x128xf32>
    %3 = tpu.matmul %1, %2, %cst {dimension_numbers = #tpu.dot_dimension_numbers<[1], [0], [0], [1], [0, 0, 1, 1], [], []>} : vector<256x128xbf16>, vector<128x128xbf16>, vector<256x128xf32> -> vector<256x128xf32>
    %c0_3 = arith.constant 0 : index
    %c0_4 = arith.constant 0 : index
    %4 = vector.load %arg3[%c0_3, %c0_4] : memref<1x128xf32, #tpu.memory_space<vmem>>, vector<1x128xf32>
    %5 = vector.broadcast %4 : vector<1x128xf32> to vector<256x128xf32>
    %6 = arith.addf %3, %5 : vector<256x128xf32>
    %cst_5 = arith.constant 0.000000e+00 : f32
    %7 = vector.broadcast %cst_5 : f32 to vector<256x128xf32>
    %8 = arith.maximumf %6, %7 : vector<256x128xf32>
    %c0_6 = arith.constant 0 : index
    %c0_7 = arith.constant 0 : index
    %9 = vector.load %arg4[%c0_6, %c0_7] : memref<256x128xf32, #tpu.memory_space<vmem>>, vector<256x128xf32>
    tpu.vector_store %arg4[%c0_6, %c0_7], %8 {strides = array<i32>} : memref<256x128xf32, #tpu.memory_space<vmem>>, vector<256x128xf32>,
    return
  }
  func.func @transform_0(%arg0: i32) -> (i32, i32) {
    %c0_i32 = arith.constant 0 : i32
    %c0_i32_0 = arith.constant 0 : i32
    return %arg0, %c0_i32 : i32, i32
  }
  func.func @transform_1(%arg0: i32) -> (i32, i32) {
    %c0_i32 = arith.constant 0 : i32
    %c0_i32_0 = arith.constant 0 : i32
    %c0_i32_1 = arith.constant 0 : i32
    return %c0_i32, %c0_i32_0 : i32, i32
  }
  func.func @transform_2(%arg0: i32) -> (i32, i32) {
    %c0_i32 = arith.constant 0 : i32
    %c0_i32_0 = arith.constant 0 : i32
    %c0_i32_1 = arith.constant 0 : i32
    return %c0_i32, %c0_i32_0 : i32, i32
  }
  func.func @transform_3(%arg0: i32) -> (i32, i32) {
    %c0_i32 = arith.constant 0 : i32
    %c0_i32_0 = arith.constant 0 : i32
    return %arg0, %c0_i32 : i32, i32
  }
}

module attributes {stable_mosaic.version = 11 : i64} {
  func.func @_matmul_bias_relu_kernel(%arg0: i32, %arg1: memref<128x128xf32, #tpu.memory_space<vmem>>, %arg2: memref<128x128xbf16, #tpu.memory_space<vmem>>, %arg3: memref<1x128xf32, #tpu.memory_space<vmem>>, %arg4: memref<128x128xf32, #tpu.memory_space<vmem>>) attributes {dimension_semantics = [#tpu.dimension_semantics<parallel>], iteration_bounds = array<i64: 1>, scalar_prefetch = 0 : i64, scratch_operands = 0 : i64, tpu.core_type = #tpu.core_type<tc>, window_params = [{transform_indices = @transform_0, window_bounds = array<i64: 128, 128>}, {pipeline_mode = #tpu.pipeline_mode<synchronous>, transform_indices = @transform_1, window_bounds = array<i64: 128, 128>}, {pipeline_mode = #tpu.pipeline_mode<synchronous>, transform_indices = @transform_2, window_bounds = array<i64: 1, 128>}, {transform_indices = @transform_3, window_bounds = array<i64: 128, 128>}]} {
    %c0 = arith.constant 0 : index
    %c0_0 = arith.constant 0 : index
    %0 = vector.load %arg1[%c0, %c0_0] : memref<128x128xf32, #tpu.memory_space<vmem>>, vector<128x128xf32>
    %1 = arith.truncf %0 : vector<128x128xf32> to vector<128x128xbf16>
    %c0_1 = arith.constant 0 : index
    %c0_2 = arith.constant 0 : index
    %2 = vector.load %arg2[%c0_1, %c0_2] : memref<128x128xbf16, #tpu.memory_space<vmem>>, vector<128x128xbf16>
    %cst = arith.constant dense<0.000000e+00> : vector<128x128xf32>
    %3 = tpu.matmul %1, %2, %cst {dimension_numbers = #tpu.dot_dimension_numbers<[1], [0], [0], [1], [0, 0, 1, 1], [], []>} : vector<128x128xbf16>, vector<128x128xbf16>, vector<128x128xf32> -> vector<128x128xf32>
    %c0_3 = arith.constant 0 : index
    %c0_4 = arith.constant 0 : index
    %4 = vector.load %arg3[%c0_3, %c0_4] : memref<1x128xf32, #tpu.memory_space<vmem>>, vector<1x128xf32>
    %5 = vector.broadcast %4 : vector<1x128xf32> to vector<128x128xf32>
    %6 = arith.addf %3, %5 : vector<128x128xf32>
    %cst_5 = arith.constant 0.000000e+00 : f32
    %7 = vector.broadcast %cst_5 : f32 to vector<128x128xf32>
    %8 = arith.maximumf %6, %7 : vector<128x128xf32>
    %c0_6 = arith.constant 0 : index
    %c0_7 = arith.constant 0 : index
    %9 = vector.load %arg4[%c0_6, %c0_7] : memref<128x128xf32, #tpu.memory_space<vmem>>, vector<128x128xf32>
    tpu.vector_store %arg4[%c0_6, %c0_7], %8 {strides = array<i32>} : memref<128x128xf32, #tpu.memory_space<vmem>>, vector<128x128xf32>,
    return
  }
  func.func @transform_0(%arg0: i32) -> (i32, i32) {
    %c0_i32 = arith.constant 0 : i32
    %c0_i32_0 = arith.constant 0 : i32
    return %arg0, %c0_i32 : i32, i32
  }
  func.func @transform_1(%arg0: i32) -> (i32, i32) {
    %c0_i32 = arith.constant 0 : i32
    %c0_i32_0 = arith.constant 0 : i32
    %c0_i32_1 = arith.constant 0 : i32
    return %c0_i32, %c0_i32_0 : i32, i32
  }
  func.func @transform_2(%arg0: i32) -> (i32, i32) {
    %c0_i32 = arith.constant 0 : i32
    %c0_i32_0 = arith.constant 0 : i32
    %c0_i32_1 = arith.constant 0 : i32
    return %c0_i32, %c0_i32_0 : i32, i32
  }
  func.func @transform_3(%arg0: i32) -> (i32, i32) {
    %c0_i32 = arith.constant 0 : i32
    %c0_i32_0 = arith.constant 0 : i32
    return %arg0, %c0_i32 : i32, i32
  }
}

module attributes {stable_mosaic.version = 11 : i64} {
  func.func @_matmul_bias_relu_kernel(%arg0: i32, %arg1: memref<128x1152xf32, #tpu.memory_space<vmem>>, %arg2: memref<1152x128xbf16, #tpu.memory_space<vmem>>, %arg3: memref<1x128xf32, #tpu.memory_space<vmem>>, %arg4: memref<128x128xf32, #tpu.memory_space<vmem>>) attributes {dimension_semantics = [#tpu.dimension_semantics<parallel>], iteration_bounds = array<i64: 1>, scalar_prefetch = 0 : i64, scratch_operands = 0 : i64, tpu.core_type = #tpu.core_type<tc>, window_params = [{transform_indices = @transform_0, window_bounds = array<i64: 128, 1152>}, {pipeline_mode = #tpu.pipeline_mode<synchronous>, transform_indices = @transform_1, window_bounds = array<i64: 1152, 128>}, {pipeline_mode = #tpu.pipeline_mode<synchronous>, transform_indices = @transform_2, window_bounds = array<i64: 1, 128>}, {transform_indices = @transform_3, window_bounds = array<i64: 128, 128>}]} {
    %c0 = arith.constant 0 : index
    %c0_0 = arith.constant 0 : index
    %0 = vector.load %arg1[%c0, %c0_0] : memref<128x1152xf32, #tpu.memory_space<vmem>>, vector<128x1152xf32>
    %1 = arith.truncf %0 : vector<128x1152xf32> to vector<128x1152xbf16>
    %c0_1 = arith.constant 0 : index
    %c0_2 = arith.constant 0 : index
    %2 = vector.load %arg2[%c0_1, %c0_2] : memref<1152x128xbf16, #tpu.memory_space<vmem>>, vector<1152x128xbf16>
    %cst = arith.constant dense<0.000000e+00> : vector<128x128xf32>
    %3 = tpu.matmul %1, %2, %cst {dimension_numbers = #tpu.dot_dimension_numbers<[1], [0], [0], [1], [0, 0, 1, 1], [], []>} : vector<128x1152xbf16>, vector<1152x128xbf16>, vector<128x128xf32> -> vector<128x128xf32>
    %c0_3 = arith.constant 0 : index
    %c0_4 = arith.constant 0 : index
    %4 = vector.load %arg3[%c0_3, %c0_4] : memref<1x128xf32, #tpu.memory_space<vmem>>, vector<1x128xf32>
    %5 = vector.broadcast %4 : vector<1x128xf32> to vector<128x128xf32>
    %6 = arith.addf %3, %5 : vector<128x128xf32>
    %cst_5 = arith.constant 0.000000e+00 : f32
    %7 = vector.broadcast %cst_5 : f32 to vector<128x128xf32>
    %8 = arith.maximumf %6, %7 : vector<128x128xf32>
    %c0_6 = arith.constant 0 : index
    %c0_7 = arith.constant 0 : index
    %9 = vector.load %arg4[%c0_6, %c0_7] : memref<128x128xf32, #tpu.memory_space<vmem>>, vector<128x128xf32>
    tpu.vector_store %arg4[%c0_6, %c0_7], %8 {strides = array<i32>} : memref<128x128xf32, #tpu.memory_space<vmem>>, vector<128x128xf32>,
    return
  }
  func.func @transform_0(%arg0: i32) -> (i32, i32) {
    %c0_i32 = arith.constant 0 : i32
    %c0_i32_0 = arith.constant 0 : i32
    return %arg0, %c0_i32 : i32, i32
  }
  func.func @transform_1(%arg0: i32) -> (i32, i32) {
    %c0_i32 = arith.constant 0 : i32
    %c0_i32_0 = arith.constant 0 : i32
    %c0_i32_1 = arith.constant 0 : i32
    return %c0_i32, %c0_i32_0 : i32, i32
  }
  func.func @transform_2(%arg0: i32) -> (i32, i32) {
    %c0_i32 = arith.constant 0 : i32
    %c0_i32_0 = arith.constant 0 : i32
    %c0_i32_1 = arith.constant 0 : i32
    return %c0_i32, %c0_i32_0 : i32, i32
  }
  func.func @transform_3(%arg0: i32) -> (i32, i32) {
    %c0_i32 = arith.constant 0 : i32
    %c0_i32_0 = arith.constant 0 : i32
    return %arg0, %c0_i32 : i32, i32
  }
}

module attributes {stable_mosaic.version = 11 : i64} {
  func.func @_matmul_bias_relu_kernel(%arg0: i32, %arg1: memref<32x1152xf32, #tpu.memory_space<vmem>>, %arg2: memref<1152x128xbf16, #tpu.memory_space<vmem>>, %arg3: memref<1x128xf32, #tpu.memory_space<vmem>>, %arg4: memref<32x128xf32, #tpu.memory_space<vmem>>) attributes {dimension_semantics = [#tpu.dimension_semantics<parallel>], iteration_bounds = array<i64: 1>, scalar_prefetch = 0 : i64, scratch_operands = 0 : i64, tpu.core_type = #tpu.core_type<tc>, window_params = [{transform_indices = @transform_0, window_bounds = array<i64: 32, 1152>}, {pipeline_mode = #tpu.pipeline_mode<synchronous>, transform_indices = @transform_1, window_bounds = array<i64: 1152, 128>}, {pipeline_mode = #tpu.pipeline_mode<synchronous>, transform_indices = @transform_2, window_bounds = array<i64: 1, 128>}, {transform_indices = @transform_3, window_bounds = array<i64: 32, 128>}]} {
    %c0 = arith.constant 0 : index
    %c0_0 = arith.constant 0 : index
    %0 = vector.load %arg1[%c0, %c0_0] : memref<32x1152xf32, #tpu.memory_space<vmem>>, vector<32x1152xf32>
    %1 = arith.truncf %0 : vector<32x1152xf32> to vector<32x1152xbf16>
    %c0_1 = arith.constant 0 : index
    %c0_2 = arith.constant 0 : index
    %2 = vector.load %arg2[%c0_1, %c0_2] : memref<1152x128xbf16, #tpu.memory_space<vmem>>, vector<1152x128xbf16>
    %cst = arith.constant dense<0.000000e+00> : vector<32x128xf32>
    %3 = tpu.matmul %1, %2, %cst {dimension_numbers = #tpu.dot_dimension_numbers<[1], [0], [0], [1], [0, 0, 1, 1], [], []>} : vector<32x1152xbf16>, vector<1152x128xbf16>, vector<32x128xf32> -> vector<32x128xf32>
    %c0_3 = arith.constant 0 : index
    %c0_4 = arith.constant 0 : index
    %4 = vector.load %arg3[%c0_3, %c0_4] : memref<1x128xf32, #tpu.memory_space<vmem>>, vector<1x128xf32>
    %5 = vector.broadcast %4 : vector<1x128xf32> to vector<32x128xf32>
    %6 = arith.addf %3, %5 : vector<32x128xf32>
    %cst_5 = arith.constant 0.000000e+00 : f32
    %7 = vector.broadcast %cst_5 : f32 to vector<32x128xf32>
    %8 = arith.maximumf %6, %7 : vector<32x128xf32>
    %c0_6 = arith.constant 0 : index
    %c0_7 = arith.constant 0 : index
    %9 = vector.load %arg4[%c0_6, %c0_7] : memref<32x128xf32, #tpu.memory_space<vmem>>, vector<32x128xf32>
    tpu.vector_store %arg4[%c0_6, %c0_7], %8 {strides = array<i32>} : memref<32x128xf32, #tpu.memory_space<vmem>>, vector<32x128xf32>,
    return
  }
  func.func @transform_0(%arg0: i32) -> (i32, i32) {
    %c0_i32 = arith.constant 0 : i32
    %c0_i32_0 = arith.constant 0 : i32
    return %arg0, %c0_i32 : i32, i32
  }
  func.func @transform_1(%arg0: i32) -> (i32, i32) {
    %c0_i32 = arith.constant 0 : i32
    %c0_i32_0 = arith.constant 0 : i32
    %c0_i32_1 = arith.constant 0 : i32
    return %c0_i32, %c0_i32_0 : i32, i32
  }
  func.func @transform_2(%arg0: i32) -> (i32, i32) {
    %c0_i32 = arith.constant 0 : i32
    %c0_i32_0 = arith.constant 0 : i32
    %c0_i32_1 = arith.constant 0 : i32
    return %c0_i32, %c0_i32_0 : i32, i32
  }
  func.func @transform_3(%arg0: i32) -> (i32, i32) {
    %c0_i32 = arith.constant 0 : i32
    %c0_i32_0 = arith.constant 0 : i32
    return %arg0, %c0_i32 : i32, i32
  }
}

module attributes {stable_mosaic.version = 11 : i64} {
  func.func @_matmul_bias_relu_kernel(%arg0: i32, %arg1: memref<32x128xf32, #tpu.memory_space<vmem>>, %arg2: memref<128x128xbf16, #tpu.memory_space<vmem>>, %arg3: memref<1x128xf32, #tpu.memory_space<vmem>>, %arg4: memref<32x128xf32, #tpu.memory_space<vmem>>) attributes {dimension_semantics = [#tpu.dimension_semantics<parallel>], iteration_bounds = array<i64: 1>, scalar_prefetch = 0 : i64, scratch_operands = 0 : i64, tpu.core_type = #tpu.core_type<tc>, window_params = [{transform_indices = @transform_0, window_bounds = array<i64: 32, 128>}, {pipeline_mode = #tpu.pipeline_mode<synchronous>, transform_indices = @transform_1, window_bounds = array<i64: 128, 128>}, {pipeline_mode = #tpu.pipeline_mode<synchronous>, transform_indices = @transform_2, window_bounds = array<i64: 1, 128>}, {transform_indices = @transform_3, window_bounds = array<i64: 32, 128>}]} {
    %c0 = arith.constant 0 : index
    %c0_0 = arith.constant 0 : index
    %0 = vector.load %arg1[%c0, %c0_0] : memref<32x128xf32, #tpu.memory_space<vmem>>, vector<32x128xf32>
    %1 = arith.truncf %0 : vector<32x128xf32> to vector<32x128xbf16>
    %c0_1 = arith.constant 0 : index
    %c0_2 = arith.constant 0 : index
    %2 = vector.load %arg2[%c0_1, %c0_2] : memref<128x128xbf16, #tpu.memory_space<vmem>>, vector<128x128xbf16>
    %cst = arith.constant dense<0.000000e+00> : vector<32x128xf32>
    %3 = tpu.matmul %1, %2, %cst {dimension_numbers = #tpu.dot_dimension_numbers<[1], [0], [0], [1], [0, 0, 1, 1], [], []>} : vector<32x128xbf16>, vector<128x128xbf16>, vector<32x128xf32> -> vector<32x128xf32>
    %c0_3 = arith.constant 0 : index
    %c0_4 = arith.constant 0 : index
    %4 = vector.load %arg3[%c0_3, %c0_4] : memref<1x128xf32, #tpu.memory_space<vmem>>, vector<1x128xf32>
    %5 = vector.broadcast %4 : vector<1x128xf32> to vector<32x128xf32>
    %6 = arith.addf %3, %5 : vector<32x128xf32>
    %cst_5 = arith.constant 0.000000e+00 : f32
    %7 = vector.broadcast %cst_5 : f32 to vector<32x128xf32>
    %8 = arith.maximumf %6, %7 : vector<32x128xf32>
    %c0_6 = arith.constant 0 : index
    %c0_7 = arith.constant 0 : index
    %9 = vector.load %arg4[%c0_6, %c0_7] : memref<32x128xf32, #tpu.memory_space<vmem>>, vector<32x128xf32>
    tpu.vector_store %arg4[%c0_6, %c0_7], %8 {strides = array<i32>} : memref<32x128xf32, #tpu.memory_space<vmem>>, vector<32x128xf32>,
    return
  }
  func.func @transform_0(%arg0: i32) -> (i32, i32) {
    %c0_i32 = arith.constant 0 : i32
    %c0_i32_0 = arith.constant 0 : i32
    return %arg0, %c0_i32 : i32, i32
  }
  func.func @transform_1(%arg0: i32) -> (i32, i32) {
    %c0_i32 = arith.constant 0 : i32
    %c0_i32_0 = arith.constant 0 : i32
    %c0_i32_1 = arith.constant 0 : i32
    return %c0_i32, %c0_i32_0 : i32, i32
  }
  func.func @transform_2(%arg0: i32) -> (i32, i32) {
    %c0_i32 = arith.constant 0 : i32
    %c0_i32_0 = arith.constant 0 : i32
    %c0_i32_1 = arith.constant 0 : i32
    return %c0_i32, %c0_i32_0 : i32, i32
  }
  func.func @transform_3(%arg0: i32) -> (i32, i32) {
    %c0_i32 = arith.constant 0 : i32
    %c0_i32_0 = arith.constant 0 : i32
    return %arg0, %c0_i32 : i32, i32
  }
}

module attributes {stable_mosaic.version = 11 : i64} {
  func.func @_matmul_bias_relu_kernel(%arg0: i32, %arg1: memref<8x256xf32, #tpu.memory_space<vmem>>, %arg2: memref<256x128xbf16, #tpu.memory_space<vmem>>, %arg3: memref<1x128xf32, #tpu.memory_space<vmem>>, %arg4: memref<8x128xf32, #tpu.memory_space<vmem>>) attributes {dimension_semantics = [#tpu.dimension_semantics<parallel>], iteration_bounds = array<i64: 1>, scalar_prefetch = 0 : i64, scratch_operands = 0 : i64, tpu.core_type = #tpu.core_type<tc>, window_params = [{transform_indices = @transform_0, window_bounds = array<i64: 8, 256>}, {pipeline_mode = #tpu.pipeline_mode<synchronous>, transform_indices = @transform_1, window_bounds = array<i64: 256, 128>}, {pipeline_mode = #tpu.pipeline_mode<synchronous>, transform_indices = @transform_2, window_bounds = array<i64: 1, 128>}, {transform_indices = @transform_3, window_bounds = array<i64: 8, 128>}]} {
    %c0 = arith.constant 0 : index
    %c0_0 = arith.constant 0 : index
    %0 = vector.load %arg1[%c0, %c0_0] : memref<8x256xf32, #tpu.memory_space<vmem>>, vector<8x256xf32>
    %1 = arith.truncf %0 : vector<8x256xf32> to vector<8x256xbf16>
    %c0_1 = arith.constant 0 : index
    %c0_2 = arith.constant 0 : index
    %2 = vector.load %arg2[%c0_1, %c0_2] : memref<256x128xbf16, #tpu.memory_space<vmem>>, vector<256x128xbf16>
    %cst = arith.constant dense<0.000000e+00> : vector<8x128xf32>
    %3 = tpu.matmul %1, %2, %cst {dimension_numbers = #tpu.dot_dimension_numbers<[1], [0], [0], [1], [0, 0, 1, 1], [], []>} : vector<8x256xbf16>, vector<256x128xbf16>, vector<8x128xf32> -> vector<8x128xf32>
    %c0_3 = arith.constant 0 : index
    %c0_4 = arith.constant 0 : index
    %4 = vector.load %arg3[%c0_3, %c0_4] : memref<1x128xf32, #tpu.memory_space<vmem>>, vector<1x128xf32>
    %5 = vector.broadcast %4 : vector<1x128xf32> to vector<8x128xf32>
    %6 = arith.addf %3, %5 : vector<8x128xf32>
    %cst_5 = arith.constant 0.000000e+00 : f32
    %7 = vector.broadcast %cst_5 : f32 to vector<8x128xf32>
    %8 = arith.maximumf %6, %7 : vector<8x128xf32>
    %c0_6 = arith.constant 0 : index
    %c0_7 = arith.constant 0 : index
    %9 = vector.load %arg4[%c0_6, %c0_7] : memref<8x128xf32, #tpu.memory_space<vmem>>, vector<8x128xf32>
    tpu.vector_store %arg4[%c0_6, %c0_7], %8 {strides = array<i32>} : memref<8x128xf32, #tpu.memory_space<vmem>>, vector<8x128xf32>,
    return
  }
  func.func @transform_0(%arg0: i32) -> (i32, i32) {
    %c0_i32 = arith.constant 0 : i32
    %c0_i32_0 = arith.constant 0 : i32
    return %arg0, %c0_i32 : i32, i32
  }
  func.func @transform_1(%arg0: i32) -> (i32, i32) {
    %c0_i32 = arith.constant 0 : i32
    %c0_i32_0 = arith.constant 0 : i32
    %c0_i32_1 = arith.constant 0 : i32
    return %c0_i32, %c0_i32_0 : i32, i32
  }
  func.func @transform_2(%arg0: i32) -> (i32, i32) {
    %c0_i32 = arith.constant 0 : i32
    %c0_i32_0 = arith.constant 0 : i32
    %c0_i32_1 = arith.constant 0 : i32
    return %c0_i32, %c0_i32_0 : i32, i32
  }
  func.func @transform_3(%arg0: i32) -> (i32, i32) {
    %c0_i32 = arith.constant 0 : i32
    %c0_i32_0 = arith.constant 0 : i32
    return %arg0, %c0_i32 : i32, i32
  }
}

module attributes {stable_mosaic.version = 11 : i64} {
  func.func @_matmul_bias_relu_kernel(%arg0: i32, %arg1: memref<8x1152xf32, #tpu.memory_space<vmem>>, %arg2: memref<1152x256xbf16, #tpu.memory_space<vmem>>, %arg3: memref<1x256xf32, #tpu.memory_space<vmem>>, %arg4: memref<8x256xf32, #tpu.memory_space<vmem>>) attributes {dimension_semantics = [#tpu.dimension_semantics<parallel>], iteration_bounds = array<i64: 1>, scalar_prefetch = 0 : i64, scratch_operands = 0 : i64, tpu.core_type = #tpu.core_type<tc>, window_params = [{transform_indices = @transform_0, window_bounds = array<i64: 8, 1152>}, {pipeline_mode = #tpu.pipeline_mode<synchronous>, transform_indices = @transform_1, window_bounds = array<i64: 1152, 256>}, {pipeline_mode = #tpu.pipeline_mode<synchronous>, transform_indices = @transform_2, window_bounds = array<i64: 1, 256>}, {transform_indices = @transform_3, window_bounds = array<i64: 8, 256>}]} {
    %c0 = arith.constant 0 : index
    %c0_0 = arith.constant 0 : index
    %0 = vector.load %arg1[%c0, %c0_0] : memref<8x1152xf32, #tpu.memory_space<vmem>>, vector<8x1152xf32>
    %1 = arith.truncf %0 : vector<8x1152xf32> to vector<8x1152xbf16>
    %c0_1 = arith.constant 0 : index
    %c0_2 = arith.constant 0 : index
    %2 = vector.load %arg2[%c0_1, %c0_2] : memref<1152x256xbf16, #tpu.memory_space<vmem>>, vector<1152x256xbf16>
    %cst = arith.constant dense<0.000000e+00> : vector<8x256xf32>
    %3 = tpu.matmul %1, %2, %cst {dimension_numbers = #tpu.dot_dimension_numbers<[1], [0], [0], [1], [0, 0, 1, 1], [], []>} : vector<8x1152xbf16>, vector<1152x256xbf16>, vector<8x256xf32> -> vector<8x256xf32>
    %c0_3 = arith.constant 0 : index
    %c0_4 = arith.constant 0 : index
    %4 = vector.load %arg3[%c0_3, %c0_4] : memref<1x256xf32, #tpu.memory_space<vmem>>, vector<1x256xf32>
    %5 = vector.broadcast %4 : vector<1x256xf32> to vector<8x256xf32>
    %6 = arith.addf %3, %5 : vector<8x256xf32>
    %cst_5 = arith.constant 0.000000e+00 : f32
    %7 = vector.broadcast %cst_5 : f32 to vector<8x256xf32>
    %8 = arith.maximumf %6, %7 : vector<8x256xf32>
    %c0_6 = arith.constant 0 : index
    %c0_7 = arith.constant 0 : index
    %9 = vector.load %arg4[%c0_6, %c0_7] : memref<8x256xf32, #tpu.memory_space<vmem>>, vector<8x256xf32>
    tpu.vector_store %arg4[%c0_6, %c0_7], %8 {strides = array<i32>} : memref<8x256xf32, #tpu.memory_space<vmem>>, vector<8x256xf32>,
    return
  }
  func.func @transform_0(%arg0: i32) -> (i32, i32) {
    %c0_i32 = arith.constant 0 : i32
    %c0_i32_0 = arith.constant 0 : i32
    return %arg0, %c0_i32 : i32, i32
  }
  func.func @transform_1(%arg0: i32) -> (i32, i32) {
    %c0_i32 = arith.constant 0 : i32
    %c0_i32_0 = arith.constant 0 : i32
    %c0_i32_1 = arith.constant 0 : i32
    return %c0_i32, %c0_i32_0 : i32, i32
  }
  func.func @transform_2(%arg0: i32) -> (i32, i32) {
    %c0_i32 = arith.constant 0 : i32
    %c0_i32_0 = arith.constant 0 : i32
    %c0_i32_1 = arith.constant 0 : i32
    return %c0_i32, %c0_i32_0 : i32, i32
  }
  func.func @transform_3(%arg0: i32) -> (i32, i32) {
    %c0_i32 = arith.constant 0 : i32
    %c0_i32_0 = arith.constant 0 : i32
    return %arg0, %c0_i32 : i32, i32
  }
}

module attributes {stable_mosaic.version = 11 : i64} {
  func.func @_matmul_bias_relu_kernel(%arg0: i32, %arg1: memref<2x512xf32, #tpu.memory_space<vmem>>, %arg2: memref<512x256xbf16, #tpu.memory_space<vmem>>, %arg3: memref<1x256xf32, #tpu.memory_space<vmem>>, %arg4: memref<2x256xf32, #tpu.memory_space<vmem>>) attributes {dimension_semantics = [#tpu.dimension_semantics<parallel>], iteration_bounds = array<i64: 1>, scalar_prefetch = 0 : i64, scratch_operands = 0 : i64, tpu.core_type = #tpu.core_type<tc>, window_params = [{transform_indices = @transform_0, window_bounds = array<i64: 2, 512>}, {pipeline_mode = #tpu.pipeline_mode<synchronous>, transform_indices = @transform_1, window_bounds = array<i64: 512, 256>}, {pipeline_mode = #tpu.pipeline_mode<synchronous>, transform_indices = @transform_2, window_bounds = array<i64: 1, 256>}, {transform_indices = @transform_3, window_bounds = array<i64: 2, 256>}]} {
    %c0 = arith.constant 0 : index
    %c0_0 = arith.constant 0 : index
    %0 = vector.load %arg1[%c0, %c0_0] : memref<2x512xf32, #tpu.memory_space<vmem>>, vector<2x512xf32>
    %1 = arith.truncf %0 : vector<2x512xf32> to vector<2x512xbf16>
    %c0_1 = arith.constant 0 : index
    %c0_2 = arith.constant 0 : index
    %2 = vector.load %arg2[%c0_1, %c0_2] : memref<512x256xbf16, #tpu.memory_space<vmem>>, vector<512x256xbf16>
    %cst = arith.constant dense<0.000000e+00> : vector<2x256xf32>
    %3 = tpu.matmul %1, %2, %cst {dimension_numbers = #tpu.dot_dimension_numbers<[1], [0], [0], [1], [0, 0, 1, 1], [], []>} : vector<2x512xbf16>, vector<512x256xbf16>, vector<2x256xf32> -> vector<2x256xf32>
    %c0_3 = arith.constant 0 : index
    %c0_4 = arith.constant 0 : index
    %4 = vector.load %arg3[%c0_3, %c0_4] : memref<1x256xf32, #tpu.memory_space<vmem>>, vector<1x256xf32>
    %5 = vector.broadcast %4 : vector<1x256xf32> to vector<2x256xf32>
    %6 = arith.addf %3, %5 : vector<2x256xf32>
    %cst_5 = arith.constant 0.000000e+00 : f32
    %7 = vector.broadcast %cst_5 : f32 to vector<2x256xf32>
    %8 = arith.maximumf %6, %7 : vector<2x256xf32>
    %c0_6 = arith.constant 0 : index
    %c0_7 = arith.constant 0 : index
    %9 = vector.load %arg4[%c0_6, %c0_7] : memref<2x256xf32, #tpu.memory_space<vmem>>, vector<2x256xf32>
    tpu.vector_store %arg4[%c0_6, %c0_7], %8 {strides = array<i32>} : memref<2x256xf32, #tpu.memory_space<vmem>>, vector<2x256xf32>,
    return
  }
  func.func @transform_0(%arg0: i32) -> (i32, i32) {
    %c0_i32 = arith.constant 0 : i32
    %c0_i32_0 = arith.constant 0 : i32
    return %arg0, %c0_i32 : i32, i32
  }
  func.func @transform_1(%arg0: i32) -> (i32, i32) {
    %c0_i32 = arith.constant 0 : i32
    %c0_i32_0 = arith.constant 0 : i32
    %c0_i32_1 = arith.constant 0 : i32
    return %c0_i32, %c0_i32_0 : i32, i32
  }
  func.func @transform_2(%arg0: i32) -> (i32, i32) {
    %c0_i32 = arith.constant 0 : i32
    %c0_i32_0 = arith.constant 0 : i32
    %c0_i32_1 = arith.constant 0 : i32
    return %c0_i32, %c0_i32_0 : i32, i32
  }
  func.func @transform_3(%arg0: i32) -> (i32, i32) {
    %c0_i32 = arith.constant 0 : i32
    %c0_i32_0 = arith.constant 0 : i32
    return %arg0, %c0_i32 : i32, i32
  }
}

</mosaic_0001>

<bundles_post_ra>
// kernel: ssd_head_forward.10
= control target key start
LH: loop header
LB: loop body
LE: loop exit
PB: predicated region body
PF: predicated region fallthrough
CT: control target
= control target key end

     0   :  { %8 = vsyncpa [#allocation3], 0  ;;  %s1226_s12 = smov 0   ;;  %s1697_s0 = inlined_call_operand.vmem [shape: f32[2048,128], index: 0, kind: input, shape index: {}]   ;;  %s1698_s1 = inlined_call_operand.vmem [shape: bf16[128,256], index: 1, kind: input, shape index: {}]   ;;  %s1699_s2 = inlined_call_operand.hbm [shape: f32[1,256], index: 2, kind: input, shape index: {}]   ;;  %s1700_s3 = inlined_call_operand.vmem [shape: f32[2048,256], index: 3, kind: output, shape index: {}]  }
   0x1 LB: > { %s1073_s13 = sadd.s32 4294967295, %s1202_s12   ;;  %p1075_p0 = scmp.ge.s32.totalorder %s1202_s12, 1  ;;  %s1202_s12 = sphi %s1226_s12, %s14_s12  }
   0x2   : > { %p113_p1 = scmp.lt.s32.totalorder %s1202_s12, 5  ;;  %p1240_p3 = scmp.eq.s32.totalorder %s1073_s13, 0 }
   0x3   : > { %s1204_s16 = smov [#allocation2]   ;;  %s1164_s21 = scalar_lea.hbm %s1699_s2, 32 }
   0x4   : > { %p1234_p2 = pnand %p1075_p0, %p113_p1  ;;  %s129_s17 = sshll.u32 %s1204_s16, 4  ;;  %s130_s17 = int_to_ptr.vmem [resolvable:$true] %s129_s17 }
   0x5   : > { %s1705_s15 = scalar_select %p1240_p3, 1, 0 }
   0x6   : > { %s1704_s14 = scalar_select %p1234_p2, 1, 0 }
   0x7   : > { %p1124_p4 = pneg %p1234_p2  ;;  %p1165_p6 = scmp.ne.s32.totalorder %s1699_s2, %s1164_s21 }
   0x8   : > { %p1171_p10 = scmp.lt.u32.totalorder %s1164_s21, %s1699_s2 }
   0x9   : > { %p1248_p5 = pnand %p1240_p3, %p1124_p4 }
   0xb   : > { %p1166_p7 = pneg %p1248_p5 }
   0xd   : > { %p1167_p8 = pnand %p1166_p7, %p1165_p6 }
   0xf   : > { %p1168_p9 = pneg %p1167_p8 }
  0x11   : > { %p1173_p11 = pnand %p1171_p10, %p1168_p9 }
  0x13   : > { %1176 = shalt.err (!%p1173_p11)
}
  0x14   : > { %s1177_s26 = scalar_lea.vmem %s130_s17, 32  ;;  %p1185_p1 = scmp.lt.s32.totalorder %s130_s17, %s130_s17 }
  0x15   : > { %p1178_p12 = scmp.ne.s32.totalorder %s130_s17, %s1177_s26  ;;  %p1186_p4 = scmp.lt.s32.totalorder %s1177_s26, %s1177_s26 }
  0x17   : > { %p1180_p13 = pnand %p1178_p12, %p1166_p7  ;;  %p1187_p3 = por %p1186_p4, %p1185_p1 }
  0x19   : > { %p1181_p0 = pneg %p1180_p13 }
  0x1b   : > { %p1188_p2 = pnand %p1187_p3, %p1181_p0 }
  0x1d   : > { %1191 = shalt.err (!%p1188_p2)
}
  0x1e   : > { %1127 = dma.hbm_to_vmem [thread:$0]  (!%p1248_p5), %s1699_s2, 32, %s130_s17, [#allocation3]  }
  0x1f   : > { %p1707_p6 = scmp.ne.s32.totalorder %s1704_s14, 0 }
  0x20   : > { %p1708_p8 = scmp.ne.s32.totalorder (!%p1707_p6), %s1705_s15, 0 }
  0x21   : > { %151 = sbr.rel (%p1707_p6) target bundleno = 415 (0x19f), region = 32 }
  0x28   : > { %1197 = dma.done.wait (%p1708_p8), [#allocation3], 32  }
  0x29   : > { %1199 = vsyncadd (%p1708_p8), [#allocation3], 4294967264  ;;  %v1205_v0 = vmov 0   ;;  %v1140_v1 = vld [vmem:[%s1698_s1 + $0x4] ss:$8 sps:$4 sm:$0xff]   ;;  %s1080_s18 = sshll.u32 %s1073_s13, 6 }
  0x2a   : > { %426 = vmatprep.mubr.bf16.mxu0 %v1205_v0  ;;  %586 = vmatprep.mubr.bf16.mxu1 %v1205_v0  ;;  %v1142_v2 = vld [vmem:[%s1698_s1] ss:$8 sps:$4 sm:$0xff]   ;;  %v1143_v3 = vld [vmem:[%s1698_s1 + $0x14] ss:$8 sps:$4 sm:$0xff]   ;;  %v1145_v4 = vld [vmem:[%s1698_s1 + $0x10] ss:$8 sps:$4 sm:$0xff]  }
  0x2b   : > { %394 = vmatprep.subr.bf16.mxu0 %v1140_v1  ;;  %1104 = vmatprep.subr.bf16.mxu1 %v1140_v1  ;;  %v1146_v5 = vld [vmem:[%s1698_s1 + $0x24] ss:$8 sps:$4 sm:$0xff]   ;;  %v1148_v6 = vld [vmem:[%s1698_s1 + $0x20] ss:$8 sps:$4 sm:$0xff]   ;;  %v1149_v7 = vld [vmem:[%s1698_s1 + $0x34] ss:$8 sps:$4 sm:$0xff]  }
  0x2c   : > { %395 = vmatpush1.bf16.msra.mxu0 %v1142_v2  ;;  %1112 = vmatpush1.bf16.msra.mxu1 %v1142_v2  ;;  %v1151_v8 = vld [vmem:[%s1698_s1 + $0x30] ss:$8 sps:$4 sm:$0xff]   ;;  %v1152_v9 = vld [vmem:[%s1698_s1 + $0x44] ss:$8 sps:$4 sm:$0xff]   ;;  %p177_p2 = scmp.lt.s32.totalorder %s1080_s18, 255 }
  0x2d   : > { %396 = vmatprep.subr.bf16.mxu0 %v1143_v3  ;;  %1105 = vmatprep.subr.bf16.mxu1 %v1143_v3  ;;  %v1154_v10 = vld [vmem:[%s1698_s1 + $0x40] ss:$8 sps:$4 sm:$0xff]   ;;  %v1155_v11 = vld [vmem:[%s1698_s1 + $0x54] ss:$8 sps:$4 sm:$0xff]   ;;  %v1157_v12 = vld [vmem:[%s1698_s1 + $0x50] ss:$8 sps:$4 sm:$0xff]  }
  0x2e   : > { %s1710_s18 = smov (!%p177_p2, %s1080_s18), 255  ;;  %v1158_v13 = vld [vmem:[%s1698_s1 + $0x64] ss:$8 sps:$4 sm:$0xff]   ;;  %v1160_v14 = vld [vmem:[%s1698_s1 + $0x60] ss:$8 sps:$4 sm:$0xff]  }
  0x2f   : > { %s1081_s30 = sshll.u32 %s1710_s18, 3  ;;  %v1161_v15 = vld [vmem:[%s1698_s1 + $0x74] ss:$8 sps:$4 sm:$0xff]   ;;  %v1163_v16 = vld [vmem:[%s1698_s1 + $0x70] ss:$8 sps:$4 sm:$0xff]   ;;  %s1103_s15 = sshll.u32 %s1710_s18, 4 }
  0x30   : > { %397 = vmatpush1.bf16.msra.mxu0 %v1145_v4  ;;  %1113 = vmatpush1.bf16.msra.mxu1 %v1145_v4  ;;  %s1326_s8 = scalar_lea.vmem %s1697_s0, %s1081_s30  ;;  %s1438_s19 = scalar_lea.vmem %s1700_s3, %s1103_s15 }
  0x31   : > { %398 = vmatprep.subr.bf16.mxu0 %v1146_v5  ;;  %1106 = vmatprep.subr.bf16.mxu1 %v1146_v5  ;;  %v190_v17 = vld [vmem:[%s1326_s8] sm:$0xff]  ;;  %v191_v18 = vld [vmem:[%s1326_s8 + $0x8] sm:$0xff]  ;;  %v192_v23 = vld [vmem:[%s1326_s8 + $0x10] sm:$0xff] }
  0x32   : > { %v222_v19 = vld [vmem:[%s1326_s8 + $0x100] sm:$0xff]  ;;  %v223_v20 = vld [vmem:[%s1326_s8 + $0x108] sm:$0xff]  ;;  %v254_v21 = vpack.c.bf16 %v191_v18, %v190_v17  ;;  %v193_v24 = vld [vmem:[%s1326_s8 + $0x18] sm:$0xff] }
  0x33   : > { %v270_v22 = vpack.c.bf16 %v223_v20, %v222_v19  ;;  %v224_v25 = vld [vmem:[%s1326_s8 + $0x110] sm:$0xff]  ;;  %v225_v26 = vld [vmem:[%s1326_s8 + $0x118] sm:$0xff]  ;;  %v255_v27 = vpack.c.bf16 %v193_v24, %v192_v23  ;;  %v194_v29 = vld [vmem:[%s1326_s8 + $0x20] sm:$0xff] }
  0x34   : > { %399 = vmatpush1.bf16.msra.mxu0 %v1148_v6  ;;  %1114 = vmatpush1.bf16.msra.mxu1 %v1148_v6  ;;  %v271_v28 = vpack.c.bf16 %v225_v26, %v224_v25  ;;  %v195_v30 = vld [vmem:[%s1326_s8 + $0x28] sm:$0xff]  ;;  %v226_v31 = vld [vmem:[%s1326_s8 + $0x120] sm:$0xff]  ;;  %v196_v35 = vld [vmem:[%s1326_s8 + $0x30] sm:$0xff] }
  0x35   : > { %400 = vmatprep.subr.bf16.mxu0 %v1149_v7  ;;  %1107 = vmatprep.subr.bf16.mxu1 %v1149_v7  ;;  %v227_v32 = vld [vmem:[%s1326_s8 + $0x128] sm:$0xff]  ;;  %v256_v33 = vpack.c.bf16 %v195_v30, %v194_v29  ;;  %v197_v36 = vld [vmem:[%s1326_s8 + $0x38] sm:$0xff]  ;;  %v228_v37 = vld [vmem:[%s1326_s8 + $0x130] sm:$0xff] }
  0x36   : > { %v272_v34 = vpack.c.bf16 %v227_v32, %v226_v31  ;;  %v229_v38 = vld [vmem:[%s1326_s8 + $0x138] sm:$0xff]  ;;  %v257_v39 = vpack.c.bf16 %v197_v36, %v196_v35  ;;  %v198_v41 = vld [vmem:[%s1326_s8 + $0x40] sm:$0xff]  ;;  %v199_v42 = vld [vmem:[%s1326_s8 + $0x48] sm:$0xff] }
  0x37   : > { %v273_v40 = vpack.c.bf16 %v229_v38, %v228_v37  ;;  %v230_v43 = vld [vmem:[%s1326_s8 + $0x140] sm:$0xff]  ;;  %v231_v44 = vld [vmem:[%s1326_s8 + $0x148] sm:$0xff]  ;;  %v258_v45 = vpack.c.bf16 %v199_v42, %v198_v41  ;;  %v200_v47 = vld [vmem:[%s1326_s8 + $0x50] sm:$0xff] }
  0x38   : > { %401 = vmatpush1.bf16.msra.mxu0 %v1151_v8  ;;  %1115 = vmatpush1.bf16.msra.mxu1 %v1151_v8  ;;  %v274_v46 = vpack.c.bf16 %v231_v44, %v230_v43  ;;  %v201_v48 = vld [vmem:[%s1326_s8 + $0x58] sm:$0xff]  ;;  %v232_v49 = vld [vmem:[%s1326_s8 + $0x150] sm:$0xff]  ;;  %v202_v53 = vld [vmem:[%s1326_s8 + $0x60] sm:$0xff] }
  0x39   : > { %402 = vmatprep.subr.bf16.mxu0 %v1152_v9  ;;  %1108 = vmatprep.subr.bf16.mxu1 %v1152_v9  ;;  %v233_v50 = vld [vmem:[%s1326_s8 + $0x158] sm:$0xff]  ;;  %v259_v51 = vpack.c.bf16 %v201_v48, %v200_v47  ;;  %v203_v54 = vld [vmem:[%s1326_s8 + $0x68] sm:$0xff]  ;;  %v234_v55 = vld [vmem:[%s1326_s8 + $0x160] sm:$0xff] }
  0x3a   : > { %v275_v52 = vpack.c.bf16 %v233_v50, %v232_v49  ;;  %v235_v56 = vld [vmem:[%s1326_s8 + $0x168] sm:$0xff]  ;;  %v260_v57 = vpack.c.bf16 %v203_v54, %v202_v53  ;;  %v204_v59 = vld [vmem:[%s1326_s8 + $0x70] sm:$0xff]  ;;  %v205_v60 = vld [vmem:[%s1326_s8 + $0x78] sm:$0xff]  ;;  %v304_v50 = vlaneseq }
  0x3b   : > { %v276_v58 = vpack.c.bf16 %v235_v56, %v234_v55  ;;  %v236_v61 = vld [vmem:[%s1326_s8 + $0x170] sm:$0xff]  ;;  %v237_v62 = vld [vmem:[%s1326_s8 + $0x178] sm:$0xff]  ;;  %v261_v63 = vpack.c.bf16 %v205_v60, %v204_v59  ;;  %v206_v2 = vld [vmem:[%s1326_s8 + $0x80] sm:$0xff] }
  0x3c   : > { %403 = vmatpush1.bf16.msra.mxu0 %v1154_v10  ;;  %1116 = vmatpush1.bf16.msra.mxu1 %v1154_v10  ;;  %v277_v1 = vpack.c.bf16 %v237_v62, %v236_v61  ;;  %v207_v3 = vld [vmem:[%s1326_s8 + $0x88] sm:$0xff]  ;;  %v238_v4 = vld [vmem:[%s1326_s8 + $0x180] sm:$0xff]  ;;  %v208_v8 = vld [vmem:[%s1326_s8 + $0x90] sm:$0xff] }
  0x3d   : > { %404 = vmatprep.subr.bf16.mxu0 %v1155_v11  ;;  %1109 = vmatprep.subr.bf16.mxu1 %v1155_v11  ;;  %v239_v5 = vld [vmem:[%s1326_s8 + $0x188] sm:$0xff]  ;;  %v262_v6 = vpack.c.bf16 %v207_v3, %v206_v2  ;;  %v209_v9 = vld [vmem:[%s1326_s8 + $0x98] sm:$0xff]  ;;  %v240_v10 = vld [vmem:[%s1326_s8 + $0x190] sm:$0xff] }
  0x3e   : > { %v278_v7 = vpack.c.bf16 %v239_v5, %v238_v4  ;;  %v241_v11 = vld [vmem:[%s1326_s8 + $0x198] sm:$0xff]  ;;  %v243_v17 = vld [vmem:[%s1326_s8 + $0x1a8] sm:$0xff]  ;;  %v212_v20 = vld [vmem:[%s1326_s8 + $0xb0] sm:$0xff] }
  0x3f   : > { %v245_v23 = vld [vmem:[%s1326_s8 + $0x1b8] sm:$0xff]  ;;  %v214_v26 = vld [vmem:[%s1326_s8 + $0xc0] sm:$0xff]  ;;  %v247_v29 = vld [vmem:[%s1326_s8 + $0x1c8] sm:$0xff] }
  0x40   : > { %405 = vmatpush1.bf16.msra.mxu0 %v1157_v12  ;;  %1117 = vmatpush1.bf16.msra.mxu1 %v1157_v12  ;;  %v263_v12 = vpack.c.bf16 %v209_v9, %v208_v8  ;;  %v216_v32 = vld [vmem:[%s1326_s8 + $0xd0] sm:$0xff]  ;;  %v249_v35 = vld [vmem:[%s1326_s8 + $0x1d8] sm:$0xff]  ;;  %v218_v38 = vld [vmem:[%s1326_s8 + $0xe0] sm:$0xff] }
  0x41   : > { %406 = vmatprep.subr.bf16.mxu0 %v1158_v13  ;;  %1110 = vmatprep.subr.bf16.mxu1 %v1158_v13  ;;  %v279_v13 = vpack.c.bf16 %v241_v11, %v240_v10  ;;  %v251_v41 = vld [vmem:[%s1326_s8 + $0x1e8] sm:$0xff]  ;;  %v220_v44 = vld [vmem:[%s1326_s8 + $0xf0] sm:$0xff]  ;;  %v253_v47 = vld [vmem:[%s1326_s8 + $0x1f8] sm:$0xff] }
  0x42   : > { %v302_v53 = vld [vmem:[#allocation2] sm:$0x3] }
  0x44   : > { %407 = vmatpush1.bf16.msra.mxu0 %v1160_v14  ;;  %1118 = vmatpush1.bf16.msra.mxu1 %v1160_v14  ;;  %v210_v14 = vld [vmem:[%s1326_s8 + $0xa0] sm:$0xff] }
  0x45   : > { %408 = vmatprep.subr.bf16.mxu0 %v1161_v15  ;;  %1111 = vmatprep.subr.bf16.mxu1 %v1161_v15  ;;  %v211_v15 = vld [vmem:[%s1326_s8 + $0xa8] sm:$0xff] }
  0x46   : > { %v264_v18 = vpack.c.bf16 %v211_v15, %v210_v14 }
  0x48   : > { %409 = vmatpush1.bf16.msra.mxu0 %v1163_v16  ;;  %1119 = vmatpush1.bf16.msra.mxu1 %v1163_v16  ;;  %v242_v16 = vld [vmem:[%s1326_s8 + $0x1a0] sm:$0xff] }
  0x49   : > { %v280_v19 = vpack.c.bf16 %v243_v17, %v242_v16 }
  0x4b   : > { %427 = vmatmul.mubr.bf16.vlgmr.msra.gmra.mrb[0].mxu0 %v254_v21  ;;  %587 = vmatmul.mubr.bf16.vlgmr.msra.gmra.mrb[0].mxu1 %v270_v22  ;;  %v213_v21 = vld [vmem:[%s1326_s8 + $0xb8] sm:$0xff]  ;;  %v244_v22 = vld [vmem:[%s1326_s8 + $0x1b0] sm:$0xff] }
  0x4c   : > { %436 = vmatprep.mubr.bf16.mxu0 %v1205_v0  ;;  %596 = vmatprep.mubr.bf16.mxu1 %v1205_v0  ;;  %v265_v24 = vpack.c.bf16 %v213_v21, %v212_v20  ;;  %v281_v25 = vpack.c.bf16 %v245_v23, %v244_v22 }
  0x53   : > { %437 = vmatmul.mubr.bf16.gmra.mrb[4].mxu0 %v255_v27  ;;  %597 = vmatmul.mubr.bf16.gmra.mrb[4].mxu1 %v271_v28  ;;  %v215_v27 = vld [vmem:[%s1326_s8 + $0xc8] sm:$0xff]  ;;  %v246_v28 = vld [vmem:[%s1326_s8 + $0x1c0] sm:$0xff] }
  0x54   : > { %446 = vmatprep.mubr.bf16.mxu0 %v1205_v0  ;;  %606 = vmatprep.mubr.bf16.mxu1 %v1205_v0  ;;  %v266_v30 = vpack.c.bf16 %v215_v27, %v214_v26  ;;  %v282_v31 = vpack.c.bf16 %v247_v29, %v246_v28 }
  0x5b   : > { %447 = vmatmul.mubr.bf16.gmra.mrb[8].mxu0 %v256_v33  ;;  %607 = vmatmul.mubr.bf16.gmra.mrb[8].mxu1 %v272_v34  ;;  %v217_v33 = vld [vmem:[%s1326_s8 + $0xd8] sm:$0xff]  ;;  %v248_v34 = vld [vmem:[%s1326_s8 + $0x1d0] sm:$0xff] }
  0x5c   : > { %456 = vmatprep.mubr.bf16.mxu0 %v1205_v0  ;;  %616 = vmatprep.mubr.bf16.mxu1 %v1205_v0  ;;  %v267_v36 = vpack.c.bf16 %v217_v33, %v216_v32  ;;  %v283_v37 = vpack.c.bf16 %v249_v35, %v248_v34 }
  0x63   : > { %457 = vmatmul.mubr.bf16.gmra.mrb[12].mxu0 %v257_v39  ;;  %617 = vmatmul.mubr.bf16.gmra.mrb[12].mxu1 %v273_v40  ;;  %v219_v39 = vld [vmem:[%s1326_s8 + $0xe8] sm:$0xff]  ;;  %v250_v40 = vld [vmem:[%s1326_s8 + $0x1e0] sm:$0xff] }
  0x64   : > { %466 = vmatprep.mubr.bf16.mxu0 %v1205_v0  ;;  %626 = vmatprep.mubr.bf16.mxu1 %v1205_v0  ;;  %v268_v42 = vpack.c.bf16 %v219_v39, %v218_v38  ;;  %v284_v43 = vpack.c.bf16 %v251_v41, %v250_v40 }
  0x6b   : > { %467 = vmatmul.mubr.bf16.gmra.mrb[16].mxu0 %v258_v45  ;;  %627 = vmatmul.mubr.bf16.gmra.mrb[16].mxu1 %v274_v46  ;;  %v221_v45 = vld [vmem:[%s1326_s8 + $0xf8] sm:$0xff]  ;;  %v252_v46 = vld [vmem:[%s1326_s8 + $0x1f0] sm:$0xff] }
  0x6c   : > { %476 = vmatprep.mubr.bf16.mxu0 %v1205_v0  ;;  %636 = vmatprep.mubr.bf16.mxu1 %v1205_v0  ;;  %v269_v48 = vpack.c.bf16 %v221_v45, %v220_v44  ;;  %v285_v49 = vpack.c.bf16 %v253_v47, %v252_v46 }
  0x73   : > { %477 = vmatmul.mubr.bf16.gmra.mrb[20].mxu0 %v259_v51  ;;  %637 = vmatmul.mubr.bf16.gmra.mrb[20].mxu1 %v275_v52  ;;  %v305_v51 = vshrl.u32 %v304_v50, 7 }
  0x74   : > { %486 = vmatprep.mubr.bf16.mxu0 %v1205_v0  ;;  %646 = vmatprep.mubr.bf16.mxu1 %v1205_v0 }
  0x75   : > { %v306_v52 = vsub.s32 0, %v305_v51  ;;  %v310_v54 = vsub.s32 1, %v305_v51 }
  0x77   : > { %v1428_v55 = vrot.slane %v302_v53, %v306_v52  ;;  %v1430_v56 = vrot.slane %v302_v53, %v310_v54 }
  0x7b   : > { %487 = vmatmul.mubr.bf16.gmra.mrb[24].mxu0 %v260_v57  ;;  %647 = vmatmul.mubr.bf16.gmra.mrb[24].mxu1 %v276_v58 }
  0x7c   : > { %496 = vmatprep.mubr.bf16.mxu0 %v1205_v0  ;;  %656 = vmatprep.mubr.bf16.mxu1 %v1205_v0 }
  0x83   : > { %497 = vmatmul.mubr.bf16.gmra.mrb[28].mxu0 %v261_v63  ;;  %657 = vmatmul.mubr.bf16.gmra.mrb[28].mxu1 %v277_v1 }
  0x84   : > { %506 = vmatprep.mubr.bf16.mxu0 %v1205_v0  ;;  %666 = vmatprep.mubr.bf16.mxu1 %v1205_v0 }
  0x8b   : > { %507 = vmatmul.mubr.bf16.gmra.mrb[32].mxu0 %v262_v6  ;;  %667 = vmatmul.mubr.bf16.gmra.mrb[32].mxu1 %v278_v7 }
  0x8c   : > { %516 = vmatprep.mubr.bf16.mxu0 %v1205_v0  ;;  %676 = vmatprep.mubr.bf16.mxu1 %v1205_v0 }
  0x93   : > { %517 = vmatmul.mubr.bf16.gmra.mrb[36].mxu0 %v263_v12  ;;  %677 = vmatmul.mubr.bf16.gmra.mrb[36].mxu1 %v279_v13 }
  0x94   : > { %526 = vmatprep.mubr.bf16.mxu0 %v1205_v0  ;;  %686 = vmatprep.mubr.bf16.mxu1 %v1205_v0 }
  0x9b   : > { %527 = vmatmul.mubr.bf16.gmra.mrb[40].mxu0 %v264_v18  ;;  %687 = vmatmul.mubr.bf16.gmra.mrb[40].mxu1 %v280_v19 }
  0x9c   : > { %536 = vmatprep.mubr.bf16.mxu0 %v1205_v0  ;;  %696 = vmatprep.mubr.bf16.mxu1 %v1205_v0 }
  0xa3   : > { %537 = vmatmul.mubr.bf16.gmra.mrb[44].mxu0 %v265_v24  ;;  %697 = vmatmul.mubr.bf16.gmra.mrb[44].mxu1 %v281_v25 }
  0xa4   : > { %546 = vmatprep.mubr.bf16.mxu0 %v1205_v0  ;;  %706 = vmatprep.mubr.bf16.mxu1 %v1205_v0 }
  0xab   : > { %547 = vmatmul.mubr.bf16.gmra.mrb[48].mxu0 %v266_v30  ;;  %707 = vmatmul.mubr.bf16.gmra.mrb[48].mxu1 %v282_v31 }
  0xac   : > { %556 = vmatprep.mubr.bf16.mxu0 %v1205_v0  ;;  %716 = vmatprep.mubr.bf16.mxu1 %v1205_v0 }
  0xb3   : > { %557 = vmatmul.mubr.bf16.gmra.mrb[52].mxu0 %v267_v36  ;;  %717 = vmatmul.mubr.bf16.gmra.mrb[52].mxu1 %v283_v37 }
  0xb4   : > { %566 = vmatprep.mubr.bf16.mxu0 %v1205_v0  ;;  %726 = vmatprep.mubr.bf16.mxu1 %v1205_v0 }
  0xbb   : > { %567 = vmatmul.mubr.bf16.gmra.mrb[56].mxu0 %v268_v42  ;;  %727 = vmatmul.mubr.bf16.gmra.mrb[56].mxu1 %v284_v43 }
  0xbc   : > { %576 = vmatprep.mubr.bf16.mxu0 %v1205_v0  ;;  %736 = vmatprep.mubr.bf16.mxu1 %v1205_v0 }
  0xc3   : > { %577 = vmatmul.mubr.bf16.gmra.mrb[60].mxu0 %v269_v48  ;;  %737 = vmatmul.mubr.bf16.gmra.mrb[60].mxu1 %v285_v49 }
 0x11e   : > { %v428_v57 = vpop.f32.mrb[0].mxu0  ;;  %v588_v58 = vpop.f32.mrb[0].mxu1 }
 0x11f   : > { %v429_v0 = vadd.f32 %v428_v57, %v1428_v55  ;;  %v589_v59 = vadd.f32 %v588_v58, %v1428_v55  ;;  %v430_v60 = vpop.f32.mrb[1].mxu0  ;;  %v590_v61 = vpop.f32.mrb[1].mxu1 }
 0x120   : > { %v431_v62 = vadd.f32 %v430_v60, %v1430_v56  ;;  %v591_v63 = vadd.f32 %v590_v61, %v1430_v56  ;;  %v432_v1 = vpop.f32.mrb[2].mxu0  ;;  %v592_v2 = vpop.f32.mrb[2].mxu1 }
 0x121   : > { %v747_v3 = vmax.f32 %v429_v0, 0.0  ;;  %v811_v4 = vmax.f32 %v589_v59, 0.0  ;;  %v433_v5 = vadd.f32 %v432_v1, %v1428_v55  ;;  %v593_v6 = vadd.f32 %v592_v2, %v1428_v55  ;;  %v434_v7 = vpop.f32.mrb[3].mxu0  ;;  %v594_v8 = vpop.f32.mrb[3].mxu1 }
 0x122   : > { %v748_v9 = vmax.f32 %v431_v62, 0.0  ;;  %v812_v10 = vmax.f32 %v591_v63, 0.0  ;;  %v435_v11 = vadd.f32 %v434_v7, %v1430_v56  ;;  %v595_v12 = vadd.f32 %v594_v8, %v1430_v56 }
 0x123   : > { %875 = vst [vmem:[%s1438_s19] sm:$0xff] %v747_v3  ;;  %939 = vst [vmem:[%s1438_s19 + $0x200] sm:$0xff] %v811_v4  ;;  %v749_v13 = vmax.f32 %v433_v5, 0.0  ;;  %v813_v14 = vmax.f32 %v593_v6, 0.0 }
 0x124   : > { %876 = vst [vmem:[%s1438_s19 + $0x8] sm:$0xff] %v748_v9  ;;  %940 = vst [vmem:[%s1438_s19 + $0x208] sm:$0xff] %v812_v10  ;;  %v750_v15 = vmax.f32 %v435_v11, 0.0  ;;  %v814_v16 = vmax.f32 %v595_v12, 0.0 }
 0x125   : > { %877 = vst [vmem:[%s1438_s19 + $0x10] sm:$0xff] %v749_v13  ;;  %941 = vst [vmem:[%s1438_s19 + $0x210] sm:$0xff] %v813_v14 }
 0x126   : > { %878 = vst [vmem:[%s1438_s19 + $0x18] sm:$0xff] %v750_v15  ;;  %942 = vst [vmem:[%s1438_s19 + $0x218] sm:$0xff] %v814_v16  ;;  %v438_v17 = vpop.f32.mrb[4].mxu0  ;;  %v598_v18 = vpop.f32.mrb[4].mxu1 }
 0x127   : > { %v439_v19 = vadd.f32 %v438_v17, %v1428_v55  ;;  %v599_v20 = vadd.f32 %v598_v18, %v1428_v55  ;;  %v440_v21 = vpop.f32.mrb[5].mxu0  ;;  %v600_v22 = vpop.f32.mrb[5].mxu1 }
 0x128   : > { %v441_v23 = vadd.f32 %v440_v21, %v1430_v56  ;;  %v601_v24 = vadd.f32 %v600_v22, %v1430_v56  ;;  %v442_v25 = vpop.f32.mrb[6].mxu0  ;;  %v602_v26 = vpop.f32.mrb[6].mxu1 }
 0x129   : > { %v751_v27 = vmax.f32 %v439_v19, 0.0  ;;  %v815_v28 = vmax.f32 %v599_v20, 0.0  ;;  %v443_v29 = vadd.f32 %v442_v25, %v1428_v55  ;;  %v603_v30 = vadd.f32 %v602_v26, %v1428_v55  ;;  %v444_v31 = vpop.f32.mrb[7].mxu0  ;;  %v604_v32 = vpop.f32.mrb[7].mxu1 }
 0x12a   : > { %v752_v33 = vmax.f32 %v441_v23, 0.0  ;;  %v816_v34 = vmax.f32 %v601_v24, 0.0  ;;  %v445_v35 = vadd.f32 %v444_v31, %v1430_v56  ;;  %v605_v36 = vadd.f32 %v604_v32, %v1430_v56 }
 0x12b   : > { %879 = vst [vmem:[%s1438_s19 + $0x20] sm:$0xff] %v751_v27  ;;  %943 = vst [vmem:[%s1438_s19 + $0x220] sm:$0xff] %v815_v28  ;;  %v753_v37 = vmax.f32 %v443_v29, 0.0  ;;  %v817_v38 = vmax.f32 %v603_v30, 0.0 }
 0x12c   : > { %880 = vst [vmem:[%s1438_s19 + $0x28] sm:$0xff] %v752_v33  ;;  %944 = vst [vmem:[%s1438_s19 + $0x228] sm:$0xff] %v816_v34  ;;  %v754_v39 = vmax.f32 %v445_v35, 0.0  ;;  %v818_v40 = vmax.f32 %v605_v36, 0.0 }
 0x12d   : > { %881 = vst [vmem:[%s1438_s19 + $0x30] sm:$0xff] %v753_v37  ;;  %945 = vst [vmem:[%s1438_s19 + $0x230] sm:$0xff] %v817_v38 }
 0x12e   : > { %882 = vst [vmem:[%s1438_s19 + $0x38] sm:$0xff] %v754_v39  ;;  %946 = vst [vmem:[%s1438_s19 + $0x238] sm:$0xff] %v818_v40  ;;  %v448_v41 = vpop.f32.mrb[8].mxu0  ;;  %v608_v42 = vpop.f32.mrb[8].mxu1 }
 0x12f   : > { %v449_v43 = vadd.f32 %v448_v41, %v1428_v55  ;;  %v609_v44 = vadd.f32 %v608_v42, %v1428_v55  ;;  %v450_v45 = vpop.f32.mrb[9].mxu0  ;;  %v610_v46 = vpop.f32.mrb[9].mxu1 }
 0x130   : > { %v451_v47 = vadd.f32 %v450_v45, %v1430_v56  ;;  %v611_v48 = vadd.f32 %v610_v46, %v1430_v56  ;;  %v452_v49 = vpop.f32.mrb[10].mxu0  ;;  %v612_v50 = vpop.f32.mrb[10].mxu1 }
 0x131   : > { %v755_v51 = vmax.f32 %v449_v43, 0.0  ;;  %v819_v52 = vmax.f32 %v609_v44, 0.0  ;;  %v453_v53 = vadd.f32 %v452_v49, %v1428_v55  ;;  %v613_v54 = vadd.f32 %v612_v50, %v1428_v55  ;;  %v454_v57 = vpop.f32.mrb[11].mxu0  ;;  %v614_v58 = vpop.f32.mrb[11].mxu1 }
 0x132   : > { %v756_v0 = vmax.f32 %v451_v47, 0.0  ;;  %v820_v59 = vmax.f32 %v611_v48, 0.0  ;;  %v455_v60 = vadd.f32 %v454_v57, %v1430_v56  ;;  %v615_v61 = vadd.f32 %v614_v58, %v1430_v56 }
 0x133   : > { %883 = vst [vmem:[%s1438_s19 + $0x40] sm:$0xff] %v755_v51  ;;  %947 = vst [vmem:[%s1438_s19 + $0x240] sm:$0xff] %v819_v52  ;;  %v757_v62 = vmax.f32 %v453_v53, 0.0  ;;  %v821_v63 = vmax.f32 %v613_v54, 0.0 }
 0x134   : > { %884 = vst [vmem:[%s1438_s19 + $0x48] sm:$0xff] %v756_v0  ;;  %948 = vst [vmem:[%s1438_s19 + $0x248] sm:$0xff] %v820_v59  ;;  %v758_v1 = vmax.f32 %v455_v60, 0.0  ;;  %v822_v2 = vmax.f32 %v615_v61, 0.0 }
 0x135   : > { %885 = vst [vmem:[%s1438_s19 + $0x50] sm:$0xff] %v757_v62  ;;  %949 = vst [vmem:[%s1438_s19 + $0x250] sm:$0xff] %v821_v63 }
 0x136   : > { %886 = vst [vmem:[%s1438_s19 + $0x58] sm:$0xff] %v758_v1  ;;  %950 = vst [vmem:[%s1438_s19 + $0x258] sm:$0xff] %v822_v2  ;;  %v458_v3 = vpop.f32.mrb[12].mxu0  ;;  %v618_v4 = vpop.f32.mrb[12].mxu1 }
 0x137   : > { %v459_v5 = vadd.f32 %v458_v3, %v1428_v55  ;;  %v619_v6 = vadd.f32 %v618_v4, %v1428_v55  ;;  %v460_v7 = vpop.f32.mrb[13].mxu0  ;;  %v620_v8 = vpop.f32.mrb[13].mxu1 }
 0x138   : > { %v461_v9 = vadd.f32 %v460_v7, %v1430_v56  ;;  %v621_v10 = vadd.f32 %v620_v8, %v1430_v56  ;;  %v462_v11 = vpop.f32.mrb[14].mxu0  ;;  %v622_v12 = vpop.f32.mrb[14].mxu1 }
 0x139   : > { %v759_v13 = vmax.f32 %v459_v5, 0.0  ;;  %v823_v14 = vmax.f32 %v619_v6, 0.0  ;;  %v463_v15 = vadd.f32 %v462_v11, %v1428_v55  ;;  %v623_v16 = vadd.f32 %v622_v12, %v1428_v55  ;;  %v464_v17 = vpop.f32.mrb[15].mxu0  ;;  %v624_v18 = vpop.f32.mrb[15].mxu1 }
 0x13a   : > { %v760_v19 = vmax.f32 %v461_v9, 0.0  ;;  %v824_v20 = vmax.f32 %v621_v10, 0.0  ;;  %v465_v21 = vadd.f32 %v464_v17, %v1430_v56  ;;  %v625_v22 = vadd.f32 %v624_v18, %v1430_v56 }
 0x13b   : > { %887 = vst [vmem:[%s1438_s19 + $0x60] sm:$0xff] %v759_v13  ;;  %951 = vst [vmem:[%s1438_s19 + $0x260] sm:$0xff] %v823_v14  ;;  %v761_v23 = vmax.f32 %v463_v15, 0.0  ;;  %v825_v24 = vmax.f32 %v623_v16, 0.0 }
 0x13c   : > { %888 = vst [vmem:[%s1438_s19 + $0x68] sm:$0xff] %v760_v19  ;;  %952 = vst [vmem:[%s1438_s19 + $0x268] sm:$0xff] %v824_v20  ;;  %v762_v25 = vmax.f32 %v465_v21, 0.0  ;;  %v826_v26 = vmax.f32 %v625_v22, 0.0 }
 0x13d   : > { %889 = vst [vmem:[%s1438_s19 + $0x70] sm:$0xff] %v761_v23  ;;  %953 = vst [vmem:[%s1438_s19 + $0x270] sm:$0xff] %v825_v24 }
 0x13e   : > { %890 = vst [vmem:[%s1438_s19 + $0x78] sm:$0xff] %v762_v25  ;;  %954 = vst [vmem:[%s1438_s19 + $0x278] sm:$0xff] %v826_v26  ;;  %v468_v27 = vpop.f32.mrb[16].mxu0  ;;  %v628_v28 = vpop.f32.mrb[16].mxu1 }
 0x13f   : > { %v469_v29 = vadd.f32 %v468_v27, %v1428_v55  ;;  %v629_v30 = vadd.f32 %v628_v28, %v1428_v55  ;;  %v470_v31 = vpop.f32.mrb[17].mxu0  ;;  %v630_v32 = vpop.f32.mrb[17].mxu1 }
 0x140   : > { %v471_v33 = vadd.f32 %v470_v31, %v1430_v56  ;;  %v631_v34 = vadd.f32 %v630_v32, %v1430_v56  ;;  %v472_v35 = vpop.f32.mrb[18].mxu0  ;;  %v632_v36 = vpop.f32.mrb[18].mxu1 }
 0x141   : > { %v763_v37 = vmax.f32 %v469_v29, 0.0  ;;  %v827_v38 = vmax.f32 %v629_v30, 0.0  ;;  %v473_v39 = vadd.f32 %v472_v35, %v1428_v55  ;;  %v633_v40 = vadd.f32 %v632_v36, %v1428_v55  ;;  %v474_v41 = vpop.f32.mrb[19].mxu0  ;;  %v634_v42 = vpop.f32.mrb[19].mxu1 }
 0x142   : > { %v764_v43 = vmax.f32 %v471_v33, 0.0  ;;  %v828_v44 = vmax.f32 %v631_v34, 0.0  ;;  %v475_v45 = vadd.f32 %v474_v41, %v1430_v56  ;;  %v635_v46 = vadd.f32 %v634_v42, %v1430_v56 }
 0x143   : > { %891 = vst [vmem:[%s1438_s19 + $0x80] sm:$0xff] %v763_v37  ;;  %955 = vst [vmem:[%s1438_s19 + $0x280] sm:$0xff] %v827_v38  ;;  %v765_v47 = vmax.f32 %v473_v39, 0.0  ;;  %v829_v48 = vmax.f32 %v633_v40, 0.0 }
 0x144   : > { %892 = vst [vmem:[%s1438_s19 + $0x88] sm:$0xff] %v764_v43  ;;  %956 = vst [vmem:[%s1438_s19 + $0x288] sm:$0xff] %v828_v44  ;;  %v766_v49 = vmax.f32 %v475_v45, 0.0  ;;  %v830_v50 = vmax.f32 %v635_v46, 0.0 }
 0x145   : > { %893 = vst [vmem:[%s1438_s19 + $0x90] sm:$0xff] %v765_v47  ;;  %957 = vst [vmem:[%s1438_s19 + $0x290] sm:$0xff] %v829_v48 }
 0x146   : > { %894 = vst [vmem:[%s1438_s19 + $0x98] sm:$0xff] %v766_v49  ;;  %958 = vst [vmem:[%s1438_s19 + $0x298] sm:$0xff] %v830_v50  ;;  %v478_v51 = vpop.f32.mrb[20].mxu0  ;;  %v638_v52 = vpop.f32.mrb[20].mxu1 }
 0x147   : > { %v479_v53 = vadd.f32 %v478_v51, %v1428_v55  ;;  %v639_v54 = vadd.f32 %v638_v52, %v1428_v55  ;;  %v480_v57 = vpop.f32.mrb[21].mxu0  ;;  %v640_v58 = vpop.f32.mrb[21].mxu1 }
 0x148   : > { %v481_v0 = vadd.f32 %v480_v57, %v1430_v56  ;;  %v641_v59 = vadd.f32 %v640_v58, %v1430_v56  ;;  %v482_v60 = vpop.f32.mrb[22].mxu0  ;;  %v642_v61 = vpop.f32.mrb[22].mxu1 }
 0x149   : > { %v767_v62 = vmax.f32 %v479_v53, 0.0  ;;  %v831_v63 = vmax.f32 %v639_v54, 0.0  ;;  %v483_v1 = vadd.f32 %v482_v60, %v1428_v55  ;;  %v643_v2 = vadd.f32 %v642_v61, %v1428_v55  ;;  %v484_v3 = vpop.f32.mrb[23].mxu0  ;;  %v644_v4 = vpop.f32.mrb[23].mxu1 }
 0x14a   : > { %v768_v5 = vmax.f32 %v481_v0, 0.0  ;;  %v832_v6 = vmax.f32 %v641_v59, 0.0  ;;  %v485_v7 = vadd.f32 %v484_v3, %v1430_v56  ;;  %v645_v8 = vadd.f32 %v644_v4, %v1430_v56 }
 0x14b   : > { %895 = vst [vmem:[%s1438_s19 + $0xa0] sm:$0xff] %v767_v62  ;;  %959 = vst [vmem:[%s1438_s19 + $0x2a0] sm:$0xff] %v831_v63  ;;  %v769_v9 = vmax.f32 %v483_v1, 0.0  ;;  %v833_v10 = vmax.f32 %v643_v2, 0.0 }
 0x14c   : > { %896 = vst [vmem:[%s1438_s19 + $0xa8] sm:$0xff] %v768_v5  ;;  %960 = vst [vmem:[%s1438_s19 + $0x2a8] sm:$0xff] %v832_v6  ;;  %v770_v11 = vmax.f32 %v485_v7, 0.0  ;;  %v834_v12 = vmax.f32 %v645_v8, 0.0 }
 0x14d   : > { %897 = vst [vmem:[%s1438_s19 + $0xb0] sm:$0xff] %v769_v9  ;;  %961 = vst [vmem:[%s1438_s19 + $0x2b0] sm:$0xff] %v833_v10 }
 0x14e   : > { %898 = vst [vmem:[%s1438_s19 + $0xb8] sm:$0xff] %v770_v11  ;;  %962 = vst [vmem:[%s1438_s19 + $0x2b8] sm:$0xff] %v834_v12  ;;  %v488_v13 = vpop.f32.mrb[24].mxu0  ;;  %v648_v14 = vpop.f32.mrb[24].mxu1 }
 0x14f   : > { %v489_v15 = vadd.f32 %v488_v13, %v1428_v55  ;;  %v649_v16 = vadd.f32 %v648_v14, %v1428_v55  ;;  %v490_v17 = vpop.f32.mrb[25].mxu0  ;;  %v650_v18 = vpop.f32.mrb[25].mxu1 }
 0x150   : > { %v491_v19 = vadd.f32 %v490_v17, %v1430_v56  ;;  %v651_v20 = vadd.f32 %v650_v18, %v1430_v56  ;;  %v492_v21 = vpop.f32.mrb[26].mxu0  ;;  %v652_v22 = vpop.f32.mrb[26].mxu1 }
 0x151   : > { %v771_v23 = vmax.f32 %v489_v15, 0.0  ;;  %v835_v24 = vmax.f32 %v649_v16, 0.0  ;;  %v493_v25 = vadd.f32 %v492_v21, %v1428_v55  ;;  %v653_v26 = vadd.f32 %v652_v22, %v1428_v55  ;;  %v494_v27 = vpop.f32.mrb[27].mxu0  ;;  %v654_v28 = vpop.f32.mrb[27].mxu1 }
 0x152   : > { %v772_v29 = vmax.f32 %v491_v19, 0.0  ;;  %v836_v30 = vmax.f32 %v651_v20, 0.0  ;;  %v495_v31 = vadd.f32 %v494_v27, %v1430_v56  ;;  %v655_v32 = vadd.f32 %v654_v28, %v1430_v56 }
 0x153   : > { %899 = vst [vmem:[%s1438_s19 + $0xc0] sm:$0xff] %v771_v23  ;;  %963 = vst [vmem:[%s1438_s19 + $0x2c0] sm:$0xff] %v835_v24  ;;  %v773_v33 = vmax.f32 %v493_v25, 0.0  ;;  %v837_v34 = vmax.f32 %v653_v26, 0.0 }
 0x154   : > { %900 = vst [vmem:[%s1438_s19 + $0xc8] sm:$0xff] %v772_v29  ;;  %964 = vst [vmem:[%s1438_s19 + $0x2c8] sm:$0xff] %v836_v30  ;;  %v774_v35 = vmax.f32 %v495_v31, 0.0  ;;  %v838_v36 = vmax.f32 %v655_v32, 0.0 }
 0x155   : > { %901 = vst [vmem:[%s1438_s19 + $0xd0] sm:$0xff] %v773_v33  ;;  %965 = vst [vmem:[%s1438_s19 + $0x2d0] sm:$0xff] %v837_v34 }
 0x156   : > { %902 = vst [vmem:[%s1438_s19 + $0xd8] sm:$0xff] %v774_v35  ;;  %966 = vst [vmem:[%s1438_s19 + $0x2d8] sm:$0xff] %v838_v36  ;;  %v498_v37 = vpop.f32.mrb[28].mxu0  ;;  %v658_v38 = vpop.f32.mrb[28].mxu1 }
 0x157   : > { %v499_v39 = vadd.f32 %v498_v37, %v1428_v55  ;;  %v659_v40 = vadd.f32 %v658_v38, %v1428_v55  ;;  %v500_v41 = vpop.f32.mrb[29].mxu0  ;;  %v660_v42 = vpop.f32.mrb[29].mxu1 }
 0x158   : > { %v501_v43 = vadd.f32 %v500_v41, %v1430_v56  ;;  %v661_v44 = vadd.f32 %v660_v42, %v1430_v56  ;;  %v502_v45 = vpop.f32.mrb[30].mxu0  ;;  %v662_v46 = vpop.f32.mrb[30].mxu1 }
 0x159   : > { %v775_v47 = vmax.f32 %v499_v39, 0.0  ;;  %v839_v48 = vmax.f32 %v659_v40, 0.0  ;;  %v503_v49 = vadd.f32 %v502_v45, %v1428_v55  ;;  %v663_v50 = vadd.f32 %v662_v46, %v1428_v55  ;;  %v504_v51 = vpop.f32.mrb[31].mxu0  ;;  %v664_v52 = vpop.f32.mrb[31].mxu1 }
 0x15a   : > { %v776_v53 = vmax.f32 %v501_v43, 0.0  ;;  %v840_v54 = vmax.f32 %v661_v44, 0.0  ;;  %v505_v57 = vadd.f32 %v504_v51, %v1430_v56  ;;  %v665_v58 = vadd.f32 %v664_v52, %v1430_v56 }
 0x15b   : > { %903 = vst [vmem:[%s1438_s19 + $0xe0] sm:$0xff] %v775_v47  ;;  %967 = vst [vmem:[%s1438_s19 + $0x2e0] sm:$0xff] %v839_v48  ;;  %v777_v0 = vmax.f32 %v503_v49, 0.0  ;;  %v841_v59 = vmax.f32 %v663_v50, 0.0 }
 0x15c   : > { %904 = vst [vmem:[%s1438_s19 + $0xe8] sm:$0xff] %v776_v53  ;;  %968 = vst [vmem:[%s1438_s19 + $0x2e8] sm:$0xff] %v840_v54  ;;  %v778_v60 = vmax.f32 %v505_v57, 0.0  ;;  %v842_v61 = vmax.f32 %v665_v58, 0.0 }
 0x15d   : > { %905 = vst [vmem:[%s1438_s19 + $0xf0] sm:$0xff] %v777_v0  ;;  %969 = vst [vmem:[%s1438_s19 + $0x2f0] sm:$0xff] %v841_v59 }
 0x15e   : > { %906 = vst [vmem:[%s1438_s19 + $0xf8] sm:$0xff] %v778_v60  ;;  %970 = vst [vmem:[%s1438_s19 + $0x2f8] sm:$0xff] %v842_v61  ;;  %v508_v62 = vpop.f32.mrb[32].mxu0  ;;  %v668_v63 = vpop.f32.mrb[32].mxu1 }
 0x15f   : > { %v509_v1 = vadd.f32 %v508_v62, %v1428_v55  ;;  %v669_v2 = vadd.f32 %v668_v63, %v1428_v55  ;;  %v510_v3 = vpop.f32.mrb[33].mxu0  ;;  %v670_v4 = vpop.f32.mrb[33].mxu1 }
 0x160   : > { %v511_v5 = vadd.f32 %v510_v3, %v1430_v56  ;;  %v671_v6 = vadd.f32 %v670_v4, %v1430_v56  ;;  %v512_v7 = vpop.f32.mrb[34].mxu0  ;;  %v672_v8 = vpop.f32.mrb[34].mxu1 }
 0x161   : > { %v779_v9 = vmax.f32 %v509_v1, 0.0  ;;  %v843_v10 = vmax.f32 %v669_v2, 0.0  ;;  %v513_v11 = vadd.f32 %v512_v7, %v1428_v55  ;;  %v673_v12 = vadd.f32 %v672_v8, %v1428_v55  ;;  %v514_v13 = vpop.f32.mrb[35].mxu0  ;;  %v674_v14 = vpop.f32.mrb[35].mxu1 }
 0x162   : > { %v780_v15 = vmax.f32 %v511_v5, 0.0  ;;  %v844_v16 = vmax.f32 %v671_v6, 0.0  ;;  %v515_v17 = vadd.f32 %v514_v13, %v1430_v56  ;;  %v675_v18 = vadd.f32 %v674_v14, %v1430_v56 }
 0x163   : > { %907 = vst [vmem:[%s1438_s19 + $0x100] sm:$0xff] %v779_v9  ;;  %971 = vst [vmem:[%s1438_s19 + $0x300] sm:$0xff] %v843_v10  ;;  %v781_v19 = vmax.f32 %v513_v11, 0.0  ;;  %v845_v20 = vmax.f32 %v673_v12, 0.0 }
 0x164   : > { %908 = vst [vmem:[%s1438_s19 + $0x108] sm:$0xff] %v780_v15  ;;  %972 = vst [vmem:[%s1438_s19 + $0x308] sm:$0xff] %v844_v16  ;;  %v782_v21 = vmax.f32 %v515_v17, 0.0  ;;  %v846_v22 = vmax.f32 %v675_v18, 0.0 }
 0x165   : > { %909 = vst [vmem:[%s1438_s19 + $0x110] sm:$0xff] %v781_v19  ;;  %973 = vst [vmem:[%s1438_s19 + $0x310] sm:$0xff] %v845_v20 }
 0x166   : > { %910 = vst [vmem:[%s1438_s19 + $0x118] sm:$0xff] %v782_v21  ;;  %974 = vst [vmem:[%s1438_s19 + $0x318] sm:$0xff] %v846_v22  ;;  %v518_v23 = vpop.f32.mrb[36].mxu0  ;;  %v678_v24 = vpop.f32.mrb[36].mxu1 }
 0x167   : > { %v519_v25 = vadd.f32 %v518_v23, %v1428_v55  ;;  %v679_v26 = vadd.f32 %v678_v24, %v1428_v55  ;;  %v520_v27 = vpop.f32.mrb[37].mxu0  ;;  %v680_v28 = vpop.f32.mrb[37].mxu1 }
 0x168   : > { %v521_v29 = vadd.f32 %v520_v27, %v1430_v56  ;;  %v681_v30 = vadd.f32 %v680_v28, %v1430_v56  ;;  %v522_v31 = vpop.f32.mrb[38].mxu0  ;;  %v682_v32 = vpop.f32.mrb[38].mxu1 }
 0x169   : > { %v783_v33 = vmax.f32 %v519_v25, 0.0  ;;  %v847_v34 = vmax.f32 %v679_v26, 0.0  ;;  %v523_v35 = vadd.f32 %v522_v31, %v1428_v55  ;;  %v683_v36 = vadd.f32 %v682_v32, %v1428_v55  ;;  %v524_v37 = vpop.f32.mrb[39].mxu0  ;;  %v684_v38 = vpop.f32.mrb[39].mxu1 }
 0x16a   : > { %v784_v39 = vmax.f32 %v521_v29, 0.0  ;;  %v848_v40 = vmax.f32 %v681_v30, 0.0  ;;  %v525_v41 = vadd.f32 %v524_v37, %v1430_v56  ;;  %v685_v42 = vadd.f32 %v684_v38, %v1430_v56 }
 0x16b   : > { %911 = vst [vmem:[%s1438_s19 + $0x120] sm:$0xff] %v783_v33  ;;  %975 = vst [vmem:[%s1438_s19 + $0x320] sm:$0xff] %v847_v34  ;;  %v785_v43 = vmax.f32 %v523_v35, 0.0  ;;  %v849_v44 = vmax.f32 %v683_v36, 0.0 }
 0x16c   : > { %912 = vst [vmem:[%s1438_s19 + $0x128] sm:$0xff] %v784_v39  ;;  %976 = vst [vmem:[%s1438_s19 + $0x328] sm:$0xff] %v848_v40  ;;  %v786_v45 = vmax.f32 %v525_v41, 0.0  ;;  %v850_v46 = vmax.f32 %v685_v42, 0.0 }
 0x16d   : > { %913 = vst [vmem:[%s1438_s19 + $0x130] sm:$0xff] %v785_v43  ;;  %977 = vst [vmem:[%s1438_s19 + $0x330] sm:$0xff] %v849_v44 }
 0x16e   : > { %914 = vst [vmem:[%s1438_s19 + $0x138] sm:$0xff] %v786_v45  ;;  %978 = vst [vmem:[%s1438_s19 + $0x338] sm:$0xff] %v850_v46  ;;  %v528_v47 = vpop.f32.mrb[40].mxu0  ;;  %v688_v48 = vpop.f32.mrb[40].mxu1 }
 0x16f   : > { %v529_v49 = vadd.f32 %v528_v47, %v1428_v55  ;;  %v689_v50 = vadd.f32 %v688_v48, %v1428_v55  ;;  %v530_v51 = vpop.f32.mrb[41].mxu0  ;;  %v690_v52 = vpop.f32.mrb[41].mxu1 }
 0x170   : > { %v531_v53 = vadd.f32 %v530_v51, %v1430_v56  ;;  %v691_v54 = vadd.f32 %v690_v52, %v1430_v56  ;;  %v532_v57 = vpop.f32.mrb[42].mxu0  ;;  %v692_v58 = vpop.f32.mrb[42].mxu1 }
 0x171   : > { %v787_v0 = vmax.f32 %v529_v49, 0.0  ;;  %v851_v59 = vmax.f32 %v689_v50, 0.0  ;;  %v533_v60 = vadd.f32 %v532_v57, %v1428_v55  ;;  %v693_v61 = vadd.f32 %v692_v58, %v1428_v55  ;;  %v534_v62 = vpop.f32.mrb[43].mxu0  ;;  %v694_v63 = vpop.f32.mrb[43].mxu1 }
 0x172   : > { %v788_v1 = vmax.f32 %v531_v53, 0.0  ;;  %v852_v2 = vmax.f32 %v691_v54, 0.0  ;;  %v535_v3 = vadd.f32 %v534_v62, %v1430_v56  ;;  %v695_v4 = vadd.f32 %v694_v63, %v1430_v56 }
 0x173   : > { %915 = vst [vmem:[%s1438_s19 + $0x140] sm:$0xff] %v787_v0  ;;  %979 = vst [vmem:[%s1438_s19 + $0x340] sm:$0xff] %v851_v59  ;;  %v789_v5 = vmax.f32 %v533_v60, 0.0  ;;  %v853_v6 = vmax.f32 %v693_v61, 0.0 }
 0x174   : > { %916 = vst [vmem:[%s1438_s19 + $0x148] sm:$0xff] %v788_v1  ;;  %980 = vst [vmem:[%s1438_s19 + $0x348] sm:$0xff] %v852_v2  ;;  %v790_v7 = vmax.f32 %v535_v3, 0.0  ;;  %v854_v8 = vmax.f32 %v695_v4, 0.0 }
 0x175   : > { %917 = vst [vmem:[%s1438_s19 + $0x150] sm:$0xff] %v789_v5  ;;  %981 = vst [vmem:[%s1438_s19 + $0x350] sm:$0xff] %v853_v6 }
 0x176   : > { %918 = vst [vmem:[%s1438_s19 + $0x158] sm:$0xff] %v790_v7  ;;  %982 = vst [vmem:[%s1438_s19 + $0x358] sm:$0xff] %v854_v8  ;;  %v538_v9 = vpop.f32.mrb[44].mxu0  ;;  %v698_v10 = vpop.f32.mrb[44].mxu1 }
 0x177   : > { %v539_v11 = vadd.f32 %v538_v9, %v1428_v55  ;;  %v699_v12 = vadd.f32 %v698_v10, %v1428_v55  ;;  %v540_v13 = vpop.f32.mrb[45].mxu0  ;;  %v700_v14 = vpop.f32.mrb[45].mxu1 }
 0x178   : > { %v541_v15 = vadd.f32 %v540_v13, %v1430_v56  ;;  %v701_v16 = vadd.f32 %v700_v14, %v1430_v56  ;;  %v542_v17 = vpop.f32.mrb[46].mxu0  ;;  %v702_v18 = vpop.f32.mrb[46].mxu1 }
 0x179   : > { %v791_v19 = vmax.f32 %v539_v11, 0.0  ;;  %v855_v20 = vmax.f32 %v699_v12, 0.0  ;;  %v543_v21 = vadd.f32 %v542_v17, %v1428_v55  ;;  %v703_v22 = vadd.f32 %v702_v18, %v1428_v55  ;;  %v544_v23 = vpop.f32.mrb[47].mxu0  ;;  %v704_v24 = vpop.f32.mrb[47].mxu1 }
 0x17a   : > { %v792_v25 = vmax.f32 %v541_v15, 0.0  ;;  %v856_v26 = vmax.f32 %v701_v16, 0.0  ;;  %v545_v27 = vadd.f32 %v544_v23, %v1430_v56  ;;  %v705_v28 = vadd.f32 %v704_v24, %v1430_v56 }
 0x17b   : > { %919 = vst [vmem:[%s1438_s19 + $0x160] sm:$0xff] %v791_v19  ;;  %983 = vst [vmem:[%s1438_s19 + $0x360] sm:$0xff] %v855_v20  ;;  %v793_v29 = vmax.f32 %v543_v21, 0.0  ;;  %v857_v30 = vmax.f32 %v703_v22, 0.0 }
 0x17c   : > { %920 = vst [vmem:[%s1438_s19 + $0x168] sm:$0xff] %v792_v25  ;;  %984 = vst [vmem:[%s1438_s19 + $0x368] sm:$0xff] %v856_v26  ;;  %v794_v31 = vmax.f32 %v545_v27, 0.0  ;;  %v858_v32 = vmax.f32 %v705_v28, 0.0 }
 0x17d   : > { %921 = vst [vmem:[%s1438_s19 + $0x170] sm:$0xff] %v793_v29  ;;  %985 = vst [vmem:[%s1438_s19 + $0x370] sm:$0xff] %v857_v30 }
 0x17e   : > { %922 = vst [vmem:[%s1438_s19 + $0x178] sm:$0xff] %v794_v31  ;;  %986 = vst [vmem:[%s1438_s19 + $0x378] sm:$0xff] %v858_v32  ;;  %v548_v33 = vpop.f32.mrb[48].mxu0  ;;  %v708_v34 = vpop.f32.mrb[48].mxu1 }
 0x17f   : > { %v549_v35 = vadd.f32 %v548_v33, %v1428_v55  ;;  %v709_v36 = vadd.f32 %v708_v34, %v1428_v55  ;;  %v550_v37 = vpop.f32.mrb[49].mxu0  ;;  %v710_v38 = vpop.f32.mrb[49].mxu1 }
 0x180   : > { %v551_v39 = vadd.f32 %v550_v37, %v1430_v56  ;;  %v711_v40 = vadd.f32 %v710_v38, %v1430_v56  ;;  %v552_v41 = vpop.f32.mrb[50].mxu0  ;;  %v712_v42 = vpop.f32.mrb[50].mxu1 }
 0x181   : > { %v795_v43 = vmax.f32 %v549_v35, 0.0  ;;  %v859_v44 = vmax.f32 %v709_v36, 0.0  ;;  %v553_v45 = vadd.f32 %v552_v41, %v1428_v55  ;;  %v713_v46 = vadd.f32 %v712_v42, %v1428_v55  ;;  %v554_v47 = vpop.f32.mrb[51].mxu0  ;;  %v714_v48 = vpop.f32.mrb[51].mxu1 }
 0x182   : > { %v796_v49 = vmax.f32 %v551_v39, 0.0  ;;  %v860_v50 = vmax.f32 %v711_v40, 0.0  ;;  %v555_v51 = vadd.f32 %v554_v47, %v1430_v56  ;;  %v715_v52 = vadd.f32 %v714_v48, %v1430_v56 }
 0x183   : > { %923 = vst [vmem:[%s1438_s19 + $0x180] sm:$0xff] %v795_v43  ;;  %987 = vst [vmem:[%s1438_s19 + $0x380] sm:$0xff] %v859_v44  ;;  %v797_v53 = vmax.f32 %v553_v45, 0.0  ;;  %v861_v54 = vmax.f32 %v713_v46, 0.0 }
 0x184   : > { %924 = vst [vmem:[%s1438_s19 + $0x188] sm:$0xff] %v796_v49  ;;  %988 = vst [vmem:[%s1438_s19 + $0x388] sm:$0xff] %v860_v50  ;;  %v798_v57 = vmax.f32 %v555_v51, 0.0  ;;  %v862_v58 = vmax.f32 %v715_v52, 0.0 }
 0x185   : > { %925 = vst [vmem:[%s1438_s19 + $0x190] sm:$0xff] %v797_v53  ;;  %989 = vst [vmem:[%s1438_s19 + $0x390] sm:$0xff] %v861_v54 }
 0x186   : > { %926 = vst [vmem:[%s1438_s19 + $0x198] sm:$0xff] %v798_v57  ;;  %990 = vst [vmem:[%s1438_s19 + $0x398] sm:$0xff] %v862_v58  ;;  %v558_v0 = vpop.f32.mrb[52].mxu0  ;;  %v718_v59 = vpop.f32.mrb[52].mxu1 }
 0x187   : > { %v559_v60 = vadd.f32 %v558_v0, %v1428_v55  ;;  %v719_v61 = vadd.f32 %v718_v59, %v1428_v55  ;;  %v560_v62 = vpop.f32.mrb[53].mxu0  ;;  %v720_v63 = vpop.f32.mrb[53].mxu1 }
 0x188   : > { %v561_v1 = vadd.f32 %v560_v62, %v1430_v56  ;;  %v721_v2 = vadd.f32 %v720_v63, %v1430_v56  ;;  %v562_v3 = vpop.f32.mrb[54].mxu0  ;;  %v722_v4 = vpop.f32.mrb[54].mxu1 }
 0x189   : > { %v799_v5 = vmax.f32 %v559_v60, 0.0  ;;  %v863_v6 = vmax.f32 %v719_v61, 0.0  ;;  %v563_v7 = vadd.f32 %v562_v3, %v1428_v55  ;;  %v723_v8 = vadd.f32 %v722_v4, %v1428_v55  ;;  %v564_v9 = vpop.f32.mrb[55].mxu0  ;;  %v724_v10 = vpop.f32.mrb[55].mxu1 }
 0x18a   : > { %v800_v11 = vmax.f32 %v561_v1, 0.0  ;;  %v864_v12 = vmax.f32 %v721_v2, 0.0  ;;  %v565_v13 = vadd.f32 %v564_v9, %v1430_v56  ;;  %v725_v14 = vadd.f32 %v724_v10, %v1430_v56 }
 0x18b   : > { %927 = vst [vmem:[%s1438_s19 + $0x1a0] sm:$0xff] %v799_v5  ;;  %991 = vst [vmem:[%s1438_s19 + $0x3a0] sm:$0xff] %v863_v6  ;;  %v801_v15 = vmax.f32 %v563_v7, 0.0  ;;  %v865_v16 = vmax.f32 %v723_v8, 0.0 }
 0x18c   : > { %928 = vst [vmem:[%s1438_s19 + $0x1a8] sm:$0xff] %v800_v11  ;;  %992 = vst [vmem:[%s1438_s19 + $0x3a8] sm:$0xff] %v864_v12  ;;  %v802_v17 = vmax.f32 %v565_v13, 0.0  ;;  %v866_v18 = vmax.f32 %v725_v14, 0.0 }
 0x18d   : > { %929 = vst [vmem:[%s1438_s19 + $0x1b0] sm:$0xff] %v801_v15  ;;  %993 = vst [vmem:[%s1438_s19 + $0x3b0] sm:$0xff] %v865_v16 }
 0x18e   : > { %930 = vst [vmem:[%s1438_s19 + $0x1b8] sm:$0xff] %v802_v17  ;;  %994 = vst [vmem:[%s1438_s19 + $0x3b8] sm:$0xff] %v866_v18  ;;  %v568_v19 = vpop.f32.mrb[56].mxu0  ;;  %v728_v20 = vpop.f32.mrb[56].mxu1 }
 0x18f   : > { %v569_v21 = vadd.f32 %v568_v19, %v1428_v55  ;;  %v729_v22 = vadd.f32 %v728_v20, %v1428_v55  ;;  %v570_v23 = vpop.f32.mrb[57].mxu0  ;;  %v730_v24 = vpop.f32.mrb[57].mxu1 }
 0x190   : > { %v571_v25 = vadd.f32 %v570_v23, %v1430_v56  ;;  %v731_v26 = vadd.f32 %v730_v24, %v1430_v56  ;;  %v572_v27 = vpop.f32.mrb[58].mxu0  ;;  %v732_v28 = vpop.f32.mrb[58].mxu1 }
 0x191   : > { %v803_v29 = vmax.f32 %v569_v21, 0.0  ;;  %v867_v30 = vmax.f32 %v729_v22, 0.0  ;;  %v573_v31 = vadd.f32 %v572_v27, %v1428_v55  ;;  %v733_v32 = vadd.f32 %v732_v28, %v1428_v55  ;;  %v574_v33 = vpop.f32.mrb[59].mxu0  ;;  %v734_v34 = vpop.f32.mrb[59].mxu1 }
 0x192   : > { %v804_v35 = vmax.f32 %v571_v25, 0.0  ;;  %v868_v36 = vmax.f32 %v731_v26, 0.0  ;;  %v575_v37 = vadd.f32 %v574_v33, %v1430_v56  ;;  %v735_v38 = vadd.f32 %v734_v34, %v1430_v56 }
 0x193   : > { %931 = vst [vmem:[%s1438_s19 + $0x1c0] sm:$0xff] %v803_v29  ;;  %995 = vst [vmem:[%s1438_s19 + $0x3c0] sm:$0xff] %v867_v30  ;;  %v805_v39 = vmax.f32 %v573_v31, 0.0  ;;  %v869_v40 = vmax.f32 %v733_v32, 0.0 }
 0x194   : > { %932 = vst [vmem:[%s1438_s19 + $0x1c8] sm:$0xff] %v804_v35  ;;  %996 = vst [vmem:[%s1438_s19 + $0x3c8] sm:$0xff] %v868_v36  ;;  %v806_v41 = vmax.f32 %v575_v37, 0.0  ;;  %v870_v42 = vmax.f32 %v735_v38, 0.0 }
 0x195   : > { %933 = vst [vmem:[%s1438_s19 + $0x1d0] sm:$0xff] %v805_v39  ;;  %997 = vst [vmem:[%s1438_s19 + $0x3d0] sm:$0xff] %v869_v40 }
 0x196   : > { %934 = vst [vmem:[%s1438_s19 + $0x1d8] sm:$0xff] %v806_v41  ;;  %998 = vst [vmem:[%s1438_s19 + $0x3d8] sm:$0xff] %v870_v42  ;;  %v578_v43 = vpop.f32.mrb[60].mxu0  ;;  %v738_v44 = vpop.f32.mrb[60].mxu1 }
 0x197   : > { %v579_v45 = vadd.f32 %v578_v43, %v1428_v55  ;;  %v739_v46 = vadd.f32 %v738_v44, %v1428_v55  ;;  %v580_v47 = vpop.f32.mrb[61].mxu0  ;;  %v740_v48 = vpop.f32.mrb[61].mxu1 }
 0x198   : > { %v581_v49 = vadd.f32 %v580_v47, %v1430_v56  ;;  %v741_v50 = vadd.f32 %v740_v48, %v1430_v56  ;;  %v582_v51 = vpop.f32.mrb[62].mxu0  ;;  %v742_v52 = vpop.f32.mrb[62].mxu1 }
 0x199   : > { %v807_v53 = vmax.f32 %v579_v45, 0.0  ;;  %v871_v54 = vmax.f32 %v739_v46, 0.0  ;;  %v583_v57 = vadd.f32 %v582_v51, %v1428_v55  ;;  %v743_v58 = vadd.f32 %v742_v52, %v1428_v55  ;;  %v584_v0 = vpop.f32.mrb[63].mxu0  ;;  %v744_v59 = vpop.f32.mrb[63].mxu1 }
 0x19a   : > { %v808_v60 = vmax.f32 %v581_v49, 0.0  ;;  %v872_v61 = vmax.f32 %v741_v50, 0.0  ;;  %v585_v62 = vadd.f32 %v584_v0, %v1430_v56  ;;  %v745_v63 = vadd.f32 %v744_v59, %v1430_v56 }
 0x19b   : > { %935 = vst [vmem:[%s1438_s19 + $0x1e0] sm:$0xff] %v807_v53  ;;  %999 = vst [vmem:[%s1438_s19 + $0x3e0] sm:$0xff] %v871_v54  ;;  %v809_v1 = vmax.f32 %v583_v57, 0.0  ;;  %v873_v2 = vmax.f32 %v743_v58, 0.0 }
 0x19c   : > { %936 = vst [vmem:[%s1438_s19 + $0x1e8] sm:$0xff] %v808_v60  ;;  %1000 = vst [vmem:[%s1438_s19 + $0x3e8] sm:$0xff] %v872_v61  ;;  %v810_v3 = vmax.f32 %v585_v62, 0.0  ;;  %v874_v4 = vmax.f32 %v745_v63, 0.0 }
 0x19d   : > { %937 = vst [vmem:[%s1438_s19 + $0x1f0] sm:$0xff] %v809_v1  ;;  %1001 = vst [vmem:[%s1438_s19 + $0x3f0] sm:$0xff] %v873_v2 }
 0x19e   : > { %938 = vst [vmem:[%s1438_s19 + $0x1f8] sm:$0xff] %v810_v3  ;;  %1002 = vst [vmem:[%s1438_s19 + $0x3f8] sm:$0xff] %v874_v4 }
 0x19f PF: > { %s14_s12 = sadd.s32 1, %s1202_s12  }
 0x1a0   : > { %p11_p3 = scmp.ge.s32.totalorder %s14_s12, 6  }
 0x1a2   :  { %13 = sbr.rel (!%p11_p3) target bundleno = 1 (0x1), region = 67 }
 0x1a9   :  { %1027 = vsyncpa [#allocation3], 1 }
 0x1aa   :  { %1029 = vsyncpa [#allocation3 + $0x1], 1 }

// kernel: ssd_head_forward.12
= control target key start
LH: loop header
LB: loop body
LE: loop exit
PB: predicated region body
PF: predicated region fallthrough
CT: control target
= control target key end

     0   :  { %s727_s12 = smov 0   ;;  %s880_s0 = inlined_call_operand.vmem [shape: f32[512,128], index: 0, kind: input, shape index: {}]   ;;  %s881_s1 = inlined_call_operand.vmem [shape: bf16[128,128], index: 1, kind: input, shape index: {}]   ;;  %s882_s2 = inlined_call_operand.vmem [shape: f32[1,128], index: 2, kind: input, shape index: {}]   ;;  %s883_s3 = inlined_call_operand.vmem [shape: f32[512,128], index: 3, kind: output, shape index: {}]  }
   0x1 LB: > { %s575_s13 = sadd.s32 4294967295, %s705_s12   ;;  %p579_p0 = scmp.ge.s32.totalorder %s705_s12, 1  ;;  %s705_s12 = sphi %s727_s12, %s13_s12  }
   0x2   : > { %p138_p1 = scmp.lt.s32.totalorder %s705_s12, 3 }
   0x4   : > { %p139_p2 = pnand %p579_p0, %p138_p1 }
   0x5   : > { %v691_v0 = vld [vmem:[%s881_s1] sm:$0xff] (!%p139_p2)   ;;  %s580_s16 = sshll.u32 (!%p139_p2), %s575_s13, 5  ;;  %v692_v1 = vld [vmem:[%s881_s1 + $0x8] sm:$0xff] (!%p139_p2)   ;;  %v693_v2 = vld [vmem:[%s881_s1 + $0x10] sm:$0xff] (!%p139_p2)  }
   0x6   : > { %142 = sbr.rel (%p139_p2) target bundleno = 283 (0x11b), region = 32  ;;  %p163_p3 = scmp.lt.s32.totalorder (!%p139_p2), %s580_s16, 63  ;;  %619 = vmatprep.subr.bf16.mxu0 (!%p139_p2), %v691_v0  ;;  %667 = vmatprep.subr.bf16.mxu1 (!%p139_p2), %v691_v0  ;;  %v694_v3 = vld [vmem:[%s881_s1 + $0x18] sm:$0xff] (!%p139_p2)   ;;  %v695_v10 = vld [vmem:[%s881_s1 + $0x20] sm:$0xff] (!%p139_p2)   ;;  %v696_v11 = vld [vmem:[%s881_s1 + $0x28] sm:$0xff] (!%p139_p2)  }
   0x7   : > { %620 = vmatpush3.bf16.msra.mxu0 (!%p139_p2), %v691_v0  ;;  %675 = vmatpush3.bf16.msra.mxu1 (!%p139_p2), %v691_v0  ;;  %v697_v12 = vld [vmem:[%s881_s1 + $0x30] sm:$0xff] (!%p139_p2)   ;;  %v698_v13 = vld [vmem:[%s881_s1 + $0x38] sm:$0xff] (!%p139_p2)   ;;  %v804_v56 = vld [vmem:[%s882_s2] ss:$0 sm:$0xff] (!%p139_p2) }
   0x8   : > { %621 = vmatprep.subr.bf16.mxu0 (!%p139_p2), %v692_v1  ;;  %668 = vmatprep.subr.bf16.mxu1 (!%p139_p2), %v692_v1 }
   0xb   : > { %622 = vmatpush3.bf16.msra.mxu0 (!%p139_p2), %v692_v1  ;;  %676 = vmatpush3.bf16.msra.mxu1 (!%p139_p2), %v692_v1 }
   0xc   : > { %623 = vmatprep.subr.bf16.mxu0 (!%p139_p2), %v693_v2  ;;  %669 = vmatprep.subr.bf16.mxu1 (!%p139_p2), %v693_v2 }
   0xd   : > { %s885_s16 = smov (!%p163_p3, %s580_s16), 63 }
   0xe   : > { %s581_s21 = sshll.u32 %s885_s16, 3 }
   0xf   : > { %s752_s24 = scalar_lea.vmem %s880_s0, %s581_s21  ;;  %624 = vmatpush3.bf16.msra.mxu0 %v693_v2  ;;  %677 = vmatpush3.bf16.msra.mxu1 %v693_v2  ;;  %s813_s13 = scalar_lea.vmem %s883_s3, %s581_s21 }
  0x10   : > { %v175_v4 = vld [vmem:[%s752_s24] sm:$0xff]  ;;  %v176_v5 = vld [vmem:[%s752_s24 + $0x8] sm:$0xff]  ;;  %625 = vmatprep.subr.bf16.mxu0 %v694_v3  ;;  %670 = vmatprep.subr.bf16.mxu1 %v694_v3  ;;  %v177_v14 = vld [vmem:[%s752_s24 + $0x10] sm:$0xff] }
  0x11   : > { %v191_v6 = vld [vmem:[%s752_s24 + $0x80] sm:$0xff]  ;;  %v207_v7 = vpack.c.bf16 %v176_v5, %v175_v4  ;;  %v192_v8 = vld [vmem:[%s752_s24 + $0x88] sm:$0xff]  ;;  %v178_v15 = vld [vmem:[%s752_s24 + $0x18] sm:$0xff] }
  0x12   : > { %v215_v9 = vpack.c.bf16 %v192_v8, %v191_v6  ;;  %v193_v16 = vld [vmem:[%s752_s24 + $0x90] sm:$0xff]  ;;  %v194_v17 = vld [vmem:[%s752_s24 + $0x98] sm:$0xff]  ;;  %v179_v18 = vld [vmem:[%s752_s24 + $0x20] sm:$0xff]  ;;  %v208_v22 = vpack.c.bf16 %v178_v15, %v177_v14 }
  0x13   : > { %635 = vmatprep.mubr.bf16.mxu0 %v207_v7  ;;  %626 = vmatpush3.bf16.msra.mxu0 %v694_v3  ;;  %v180_v19 = vld [vmem:[%s752_s24 + $0x28] sm:$0xff]  ;;  %v195_v20 = vld [vmem:[%s752_s24 + $0xa0] sm:$0xff]  ;;  %v216_v23 = vpack.c.bf16 %v194_v17, %v193_v16  ;;  %v181_v26 = vld [vmem:[%s752_s24 + $0x30] sm:$0xff] }
  0x14   : > { %651 = vmatprep.mubr.bf16.mxu1 %v215_v9  ;;  %678 = vmatpush3.bf16.msra.mxu1 %v694_v3  ;;  %v196_v21 = vld [vmem:[%s752_s24 + $0xa8] sm:$0xff]  ;;  %v209_v24 = vpack.c.bf16 %v180_v19, %v179_v18  ;;  %v182_v27 = vld [vmem:[%s752_s24 + $0x38] sm:$0xff]  ;;  %v197_v28 = vld [vmem:[%s752_s24 + $0xb0] sm:$0xff] }
  0x15   : > { %627 = vmatprep.subr.bf16.mxu0 %v695_v10  ;;  %671 = vmatprep.subr.bf16.mxu1 %v695_v10  ;;  %v217_v25 = vpack.c.bf16 %v196_v21, %v195_v20  ;;  %v198_v29 = vld [vmem:[%s752_s24 + $0xb8] sm:$0xff]  ;;  %v183_v30 = vld [vmem:[%s752_s24 + $0x40] sm:$0xff]  ;;  %v184_v31 = vld [vmem:[%s752_s24 + $0x48] sm:$0xff]  ;;  %v210_v34 = vpack.c.bf16 %v182_v27, %v181_v26 }
  0x16   : > { %v199_v32 = vld [vmem:[%s752_s24 + $0xc0] sm:$0xff]  ;;  %v200_v33 = vld [vmem:[%s752_s24 + $0xc8] sm:$0xff]  ;;  %v218_v35 = vpack.c.bf16 %v198_v29, %v197_v28  ;;  %v211_v36 = vpack.c.bf16 %v184_v31, %v183_v30  ;;  %v185_v38 = vld [vmem:[%s752_s24 + $0x50] sm:$0xff] }
  0x17   : > { %628 = vmatpush3.bf16.msra.mxu0 %v695_v10  ;;  %v219_v37 = vpack.c.bf16 %v200_v33, %v199_v32  ;;  %v186_v39 = vld [vmem:[%s752_s24 + $0x58] sm:$0xff]  ;;  %v201_v40 = vld [vmem:[%s752_s24 + $0xd0] sm:$0xff]  ;;  %v187_v42 = vld [vmem:[%s752_s24 + $0x60] sm:$0xff] }
  0x18   : > { %679 = vmatpush3.bf16.msra.mxu1 %v695_v10  ;;  %629 = vmatprep.subr.bf16.mxu0 %v696_v11  ;;  %v202_v41 = vld [vmem:[%s752_s24 + $0xd8] sm:$0xff]  ;;  %v188_v43 = vld [vmem:[%s752_s24 + $0x68] sm:$0xff]  ;;  %v203_v44 = vld [vmem:[%s752_s24 + $0xe0] sm:$0xff]  ;;  %v212_v46 = vpack.c.bf16 %v186_v39, %v185_v38 }
  0x19   : > { %672 = vmatprep.subr.bf16.mxu1 %v696_v11  ;;  %v204_v45 = vld [vmem:[%s752_s24 + $0xe8] sm:$0xff]  ;;  %v220_v47 = vpack.c.bf16 %v202_v41, %v201_v40  ;;  %v213_v48 = vpack.c.bf16 %v188_v43, %v187_v42  ;;  %v189_v50 = vld [vmem:[%s752_s24 + $0x70] sm:$0xff]  ;;  %v190_v51 = vld [vmem:[%s752_s24 + $0x78] sm:$0xff] }
  0x1a   : > { %v221_v49 = vpack.c.bf16 %v204_v45, %v203_v44  ;;  %v205_v52 = vld [vmem:[%s752_s24 + $0xf0] sm:$0xff]  ;;  %v206_v53 = vld [vmem:[%s752_s24 + $0xf8] sm:$0xff]  ;;  %v214_v54 = vpack.c.bf16 %v190_v51, %v189_v50 }
  0x1b   : > { %630 = vmatpush3.bf16.msra.mxu0 %v696_v11  ;;  %v222_v55 = vpack.c.bf16 %v206_v53, %v205_v52 }
  0x1c   : > { %680 = vmatpush3.bf16.msra.mxu1 %v696_v11  ;;  %631 = vmatprep.subr.bf16.mxu0 %v697_v12 }
  0x1d   : > { %673 = vmatprep.subr.bf16.mxu1 %v697_v12 }
  0x1f   : > { %632 = vmatpush3.bf16.msra.mxu0 %v697_v12 }
  0x20   : > { %681 = vmatpush3.bf16.msra.mxu1 %v697_v12  ;;  %633 = vmatprep.subr.bf16.mxu0 %v698_v13 }
  0x21   : > { %674 = vmatprep.subr.bf16.mxu1 %v698_v13 }
  0x23   : > { %634 = vmatpush3.bf16.msra.mxu0 %v698_v13 }
  0x24   : > { %682 = vmatpush3.bf16.msra.mxu1 %v698_v13 }
  0x26   : > { %636 = vmatmul.mubr.bf16.vlgmr.msra.gmra.mrb[0].mxu0 %v208_v22 }
  0x27   : > { %652 = vmatmul.mubr.bf16.vlgmr.msra.gmra.mrb[0].mxu1 %v216_v23  ;;  %639 = vmatprep.mubr.bf16.mxu0 %v209_v24 }
  0x28   : > { %655 = vmatprep.mubr.bf16.mxu1 %v217_v25 }
  0x2e   : > { %640 = vmatmul.mubr.bf16.gmra.mrb[4].mxu0 %v210_v34 }
  0x2f   : > { %656 = vmatmul.mubr.bf16.gmra.mrb[4].mxu1 %v218_v35  ;;  %643 = vmatprep.mubr.bf16.mxu0 %v211_v36 }
  0x30   : > { %659 = vmatprep.mubr.bf16.mxu1 %v219_v37 }
  0x36   : > { %644 = vmatmul.mubr.bf16.gmra.mrb[8].mxu0 %v212_v46 }
  0x37   : > { %660 = vmatmul.mubr.bf16.gmra.mrb[8].mxu1 %v220_v47  ;;  %647 = vmatprep.mubr.bf16.mxu0 %v213_v48 }
  0x38   : > { %663 = vmatprep.mubr.bf16.mxu1 %v221_v49 }
  0x3e   : > { %648 = vmatmul.mubr.bf16.gmra.mrb[12].mxu0 %v214_v54 }
  0x3f   : > { %664 = vmatmul.mubr.bf16.gmra.mrb[12].mxu1 %v222_v55 }
  0xf9   : > { %v637_v57 = vpop.f32.mrb[0].mxu0 }
  0xfa   : > { %v653_v58 = vpop.f32.mrb[0].mxu1  ;;  %v337_v59 = vadd.f32 %v637_v57, %v804_v56  ;;  %v328_v61 = vpop.f32.mrb[1].mxu0 }
  0xfb   : > { %v401_v60 = vadd.f32 %v653_v58, %v804_v56  ;;  %v392_v62 = vpop.f32.mrb[1].mxu1  ;;  %v329_v63 = vadd.f32 %v804_v56, %v328_v61  ;;  %v638_v1 = vpop.f32.mrb[2].mxu0 }
  0xfc   : > { %v393_v0 = vadd.f32 %v804_v56, %v392_v62  ;;  %v654_v2 = vpop.f32.mrb[2].mxu1  ;;  %v457_v3 = vmax.f32 %v337_v59, 0.0  ;;  %v340_v5 = vadd.f32 %v638_v1, %v804_v56  ;;  %v331_v7 = vpop.f32.mrb[3].mxu0 }
  0xfd   : > { %v473_v4 = vmax.f32 %v401_v60, 0.0  ;;  %v404_v6 = vadd.f32 %v654_v2, %v804_v56  ;;  %v395_v8 = vpop.f32.mrb[3].mxu1  ;;  %v455_v9 = vmax.f32 %v329_v63, 0.0  ;;  %v332_v11 = vadd.f32 %v804_v56, %v331_v7 }
  0xfe   : > { %v471_v10 = vmax.f32 %v393_v0, 0.0  ;;  %v396_v12 = vadd.f32 %v804_v56, %v395_v8  ;;  %489 = vst [vmem:[%s813_s13 + $0x10] sm:$0xff] %v457_v3  ;;  %v458_v13 = vmax.f32 %v340_v5, 0.0 }
  0xff   : > { %505 = vst [vmem:[%s813_s13 + $0x90] sm:$0xff] %v473_v4  ;;  %v474_v14 = vmax.f32 %v404_v6, 0.0  ;;  %487 = vst [vmem:[%s813_s13] sm:$0xff] %v455_v9  ;;  %v456_v15 = vmax.f32 %v332_v11, 0.0 }
 0x100   : > { %503 = vst [vmem:[%s813_s13 + $0x80] sm:$0xff] %v471_v10  ;;  %v472_v16 = vmax.f32 %v396_v12, 0.0  ;;  %490 = vst [vmem:[%s813_s13 + $0x18] sm:$0xff] %v458_v13 }
 0x101   : > { %506 = vst [vmem:[%s813_s13 + $0x98] sm:$0xff] %v474_v14  ;;  %488 = vst [vmem:[%s813_s13 + $0x8] sm:$0xff] %v456_v15  ;;  %v641_v17 = vpop.f32.mrb[4].mxu0 }
 0x102   : > { %504 = vst [vmem:[%s813_s13 + $0x88] sm:$0xff] %v472_v16  ;;  %v657_v18 = vpop.f32.mrb[4].mxu1  ;;  %v353_v19 = vadd.f32 %v641_v17, %v804_v56  ;;  %v344_v21 = vpop.f32.mrb[5].mxu0 }
 0x103   : > { %v417_v20 = vadd.f32 %v657_v18, %v804_v56  ;;  %v408_v22 = vpop.f32.mrb[5].mxu1  ;;  %v345_v23 = vadd.f32 %v804_v56, %v344_v21  ;;  %v642_v25 = vpop.f32.mrb[6].mxu0 }
 0x104   : > { %v409_v24 = vadd.f32 %v804_v56, %v408_v22  ;;  %v658_v26 = vpop.f32.mrb[6].mxu1  ;;  %v461_v27 = vmax.f32 %v353_v19, 0.0  ;;  %v356_v29 = vadd.f32 %v642_v25, %v804_v56  ;;  %v347_v31 = vpop.f32.mrb[7].mxu0 }
 0x105   : > { %v477_v28 = vmax.f32 %v417_v20, 0.0  ;;  %v420_v30 = vadd.f32 %v658_v26, %v804_v56  ;;  %v411_v32 = vpop.f32.mrb[7].mxu1  ;;  %v459_v33 = vmax.f32 %v345_v23, 0.0  ;;  %v348_v35 = vadd.f32 %v804_v56, %v347_v31 }
 0x106   : > { %v475_v34 = vmax.f32 %v409_v24, 0.0  ;;  %v412_v36 = vadd.f32 %v804_v56, %v411_v32  ;;  %493 = vst [vmem:[%s813_s13 + $0x30] sm:$0xff] %v461_v27  ;;  %v462_v37 = vmax.f32 %v356_v29, 0.0 }
 0x107   : > { %509 = vst [vmem:[%s813_s13 + $0xb0] sm:$0xff] %v477_v28  ;;  %v478_v38 = vmax.f32 %v420_v30, 0.0  ;;  %491 = vst [vmem:[%s813_s13 + $0x20] sm:$0xff] %v459_v33  ;;  %v460_v39 = vmax.f32 %v348_v35, 0.0 }
 0x108   : > { %507 = vst [vmem:[%s813_s13 + $0xa0] sm:$0xff] %v475_v34  ;;  %v476_v40 = vmax.f32 %v412_v36, 0.0  ;;  %494 = vst [vmem:[%s813_s13 + $0x38] sm:$0xff] %v462_v37 }
 0x109   : > { %510 = vst [vmem:[%s813_s13 + $0xb8] sm:$0xff] %v478_v38  ;;  %492 = vst [vmem:[%s813_s13 + $0x28] sm:$0xff] %v460_v39  ;;  %v645_v41 = vpop.f32.mrb[8].mxu0 }
 0x10a   : > { %508 = vst [vmem:[%s813_s13 + $0xa8] sm:$0xff] %v476_v40  ;;  %v661_v42 = vpop.f32.mrb[8].mxu1  ;;  %v369_v43 = vadd.f32 %v645_v41, %v804_v56  ;;  %v360_v45 = vpop.f32.mrb[9].mxu0 }
 0x10b   : > { %v433_v44 = vadd.f32 %v661_v42, %v804_v56  ;;  %v424_v46 = vpop.f32.mrb[9].mxu1  ;;  %v361_v47 = vadd.f32 %v804_v56, %v360_v45  ;;  %v646_v49 = vpop.f32.mrb[10].mxu0 }
 0x10c   : > { %v425_v48 = vadd.f32 %v804_v56, %v424_v46  ;;  %v662_v50 = vpop.f32.mrb[10].mxu1  ;;  %v465_v51 = vmax.f32 %v369_v43, 0.0  ;;  %v372_v53 = vadd.f32 %v646_v49, %v804_v56  ;;  %v363_v55 = vpop.f32.mrb[11].mxu0 }
 0x10d   : > { %v481_v52 = vmax.f32 %v433_v44, 0.0  ;;  %v436_v54 = vadd.f32 %v662_v50, %v804_v56  ;;  %v427_v57 = vpop.f32.mrb[11].mxu1  ;;  %v463_v58 = vmax.f32 %v361_v47, 0.0  ;;  %v364_v60 = vadd.f32 %v804_v56, %v363_v55 }
 0x10e   : > { %v479_v59 = vmax.f32 %v425_v48, 0.0  ;;  %v428_v61 = vadd.f32 %v804_v56, %v427_v57  ;;  %497 = vst [vmem:[%s813_s13 + $0x50] sm:$0xff] %v465_v51  ;;  %v466_v62 = vmax.f32 %v372_v53, 0.0 }
 0x10f   : > { %513 = vst [vmem:[%s813_s13 + $0xd0] sm:$0xff] %v481_v52  ;;  %v482_v63 = vmax.f32 %v436_v54, 0.0  ;;  %495 = vst [vmem:[%s813_s13 + $0x40] sm:$0xff] %v463_v58  ;;  %v464_v0 = vmax.f32 %v364_v60, 0.0 }
 0x110   : > { %511 = vst [vmem:[%s813_s13 + $0xc0] sm:$0xff] %v479_v59  ;;  %v480_v1 = vmax.f32 %v428_v61, 0.0  ;;  %498 = vst [vmem:[%s813_s13 + $0x58] sm:$0xff] %v466_v62 }
 0x111   : > { %514 = vst [vmem:[%s813_s13 + $0xd8] sm:$0xff] %v482_v63  ;;  %496 = vst [vmem:[%s813_s13 + $0x48] sm:$0xff] %v464_v0  ;;  %v649_v2 = vpop.f32.mrb[12].mxu0 }
 0x112   : > { %512 = vst [vmem:[%s813_s13 + $0xc8] sm:$0xff] %v480_v1  ;;  %v665_v3 = vpop.f32.mrb[12].mxu1  ;;  %v385_v4 = vadd.f32 %v649_v2, %v804_v56  ;;  %v376_v6 = vpop.f32.mrb[13].mxu0 }
 0x113   : > { %v449_v5 = vadd.f32 %v665_v3, %v804_v56  ;;  %v440_v7 = vpop.f32.mrb[13].mxu1  ;;  %v377_v8 = vadd.f32 %v804_v56, %v376_v6  ;;  %v650_v10 = vpop.f32.mrb[14].mxu0 }
 0x114   : > { %v441_v9 = vadd.f32 %v804_v56, %v440_v7  ;;  %v666_v11 = vpop.f32.mrb[14].mxu1  ;;  %v469_v12 = vmax.f32 %v385_v4, 0.0  ;;  %v388_v14 = vadd.f32 %v650_v10, %v804_v56  ;;  %v379_v16 = vpop.f32.mrb[15].mxu0 }
 0x115   : > { %v485_v13 = vmax.f32 %v449_v5, 0.0  ;;  %v452_v15 = vadd.f32 %v666_v11, %v804_v56  ;;  %v443_v17 = vpop.f32.mrb[15].mxu1  ;;  %v467_v18 = vmax.f32 %v377_v8, 0.0  ;;  %v380_v20 = vadd.f32 %v804_v56, %v379_v16 }
 0x116   : > { %v483_v19 = vmax.f32 %v441_v9, 0.0  ;;  %v444_v21 = vadd.f32 %v804_v56, %v443_v17  ;;  %501 = vst [vmem:[%s813_s13 + $0x70] sm:$0xff] %v469_v12  ;;  %v470_v22 = vmax.f32 %v388_v14, 0.0 }
 0x117   : > { %517 = vst [vmem:[%s813_s13 + $0xf0] sm:$0xff] %v485_v13  ;;  %v486_v23 = vmax.f32 %v452_v15, 0.0  ;;  %499 = vst [vmem:[%s813_s13 + $0x60] sm:$0xff] %v467_v18  ;;  %v468_v24 = vmax.f32 %v380_v20, 0.0 }
 0x118   : > { %515 = vst [vmem:[%s813_s13 + $0xe0] sm:$0xff] %v483_v19  ;;  %v484_v25 = vmax.f32 %v444_v21, 0.0  ;;  %502 = vst [vmem:[%s813_s13 + $0x78] sm:$0xff] %v470_v22 }
 0x119   : > { %518 = vst [vmem:[%s813_s13 + $0xf8] sm:$0xff] %v486_v23  ;;  %500 = vst [vmem:[%s813_s13 + $0x68] sm:$0xff] %v468_v24 }
 0x11a   : > { %516 = vst [vmem:[%s813_s13 + $0xe8] sm:$0xff] %v484_v25 }
 0x11b PF: > { %s13_s12 = sadd.s32 1, %s705_s12  }
 0x11c   : > { %p10_p4 = scmp.ge.s32.totalorder %s13_s12, 4  }
 0x11e   :  { %12 = sbr.rel (!%p10_p4) target bundleno = 1 (0x1), region = 62 }

// kernel: ssd_head_forward.14
= control target key start
LH: loop header
LB: loop body
LE: loop exit
PB: predicated region body
PF: predicated region fallthrough
CT: control target
= control target key end

     0   :  { %s467_s1 = inlined_call_operand.vmem [shape: bf16[128,128], index: 1, kind: input, shape index: {}]   ;;  %s468_s0 = inlined_call_operand.vmem [shape: f32[128,128], index: 0, kind: input, shape index: {}]   ;;  %s469_s2 = inlined_call_operand.vmem [shape: f32[1,128], index: 2, kind: input, shape index: {}]   ;;  %s470_s3 = inlined_call_operand.vmem [shape: f32[128,128], index: 3, kind: output, shape index: {}]  }
   0x1   :  { %v316_v0 = vld [vmem:[%s467_s1] sm:$0xff]   ;;  %v317_v1 = vld [vmem:[%s467_s1 + $0x8] sm:$0xff]   ;;  %v318_v2 = vld [vmem:[%s467_s1 + $0x10] sm:$0xff]  }
   0x2   :  { %268 = vmatprep.subr.bf16.mxu0 %v316_v0  ;;  %300 = vmatprep.subr.bf16.mxu1 %v316_v0  ;;  %v319_v3 = vld [vmem:[%s467_s1 + $0x18] sm:$0xff]   ;;  %v15_v4 = vld [vmem:[%s468_s0] sm:$0xff]  ;;  %v16_v5 = vld [vmem:[%s468_s0 + $0x8] sm:$0xff] }
   0x3   :  { %269 = vmatpush3.bf16.msra.mxu0 %v316_v0  ;;  %308 = vmatpush3.bf16.msra.mxu1 %v316_v0  ;;  %v23_v6 = vld [vmem:[%s468_s0 + $0x40] sm:$0xff]  ;;  %v31_v7 = vpack.c.bf16 %v16_v5, %v15_v4  ;;  %v24_v8 = vld [vmem:[%s468_s0 + $0x48] sm:$0xff]  ;;  %v322_v12 = vld [vmem:[%s467_s1 + $0x30] sm:$0xff]  }
   0x4   :  { %270 = vmatprep.subr.bf16.mxu0 %v317_v1  ;;  %301 = vmatprep.subr.bf16.mxu1 %v317_v1  ;;  %v35_v9 = vpack.c.bf16 %v24_v8, %v23_v6  ;;  %v320_v10 = vld [vmem:[%s467_s1 + $0x20] sm:$0xff]   ;;  %v321_v11 = vld [vmem:[%s467_s1 + $0x28] sm:$0xff]   ;;  %v323_v13 = vld [vmem:[%s467_s1 + $0x38] sm:$0xff]  }
   0x5   :  { %284 = vmatprep.mubr.bf16.mxu0 %v31_v7  ;;  %v17_v14 = vld [vmem:[%s468_s0 + $0x10] sm:$0xff]  ;;  %v18_v15 = vld [vmem:[%s468_s0 + $0x18] sm:$0xff]  ;;  %v19_v18 = vld [vmem:[%s468_s0 + $0x20] sm:$0xff] }
   0x6   :  { %292 = vmatprep.mubr.bf16.mxu1 %v35_v9  ;;  %v25_v16 = vld [vmem:[%s468_s0 + $0x50] sm:$0xff]  ;;  %v26_v17 = vld [vmem:[%s468_s0 + $0x58] sm:$0xff]  ;;  %v20_v19 = vld [vmem:[%s468_s0 + $0x28] sm:$0xff]  ;;  %v32_v22 = vpack.c.bf16 %v18_v15, %v17_v14 }
   0x7   :  { %271 = vmatpush3.bf16.msra.mxu0 %v317_v1  ;;  %309 = vmatpush3.bf16.msra.mxu1 %v317_v1  ;;  %v27_v20 = vld [vmem:[%s468_s0 + $0x60] sm:$0xff]  ;;  %v28_v21 = vld [vmem:[%s468_s0 + $0x68] sm:$0xff]  ;;  %v36_v23 = vpack.c.bf16 %v26_v17, %v25_v16  ;;  %v33_v24 = vpack.c.bf16 %v20_v19, %v19_v18  ;;  %v21_v26 = vld [vmem:[%s468_s0 + $0x30] sm:$0xff] }
   0x8   :  { %272 = vmatprep.subr.bf16.mxu0 %v318_v2  ;;  %302 = vmatprep.subr.bf16.mxu1 %v318_v2  ;;  %v37_v25 = vpack.c.bf16 %v28_v21, %v27_v20  ;;  %v22_v27 = vld [vmem:[%s468_s0 + $0x38] sm:$0xff]  ;;  %v29_v28 = vld [vmem:[%s468_s0 + $0x70] sm:$0xff]  ;;  %v243_v32 = vld [vmem:[%s469_s2] ss:$0 sm:$0xff] }
   0x9   :  { %v30_v29 = vld [vmem:[%s468_s0 + $0x78] sm:$0xff]  ;;  %v34_v30 = vpack.c.bf16 %v22_v27, %v21_v26 }
   0xa   :  { %v38_v31 = vpack.c.bf16 %v30_v29, %v29_v28 }
   0xb   :  { %273 = vmatpush3.bf16.msra.mxu0 %v318_v2  ;;  %310 = vmatpush3.bf16.msra.mxu1 %v318_v2 }
   0xc   :  { %274 = vmatprep.subr.bf16.mxu0 %v319_v3  ;;  %303 = vmatprep.subr.bf16.mxu1 %v319_v3 }
   0xf   :  { %275 = vmatpush3.bf16.msra.mxu0 %v319_v3  ;;  %311 = vmatpush3.bf16.msra.mxu1 %v319_v3 }
  0x10   :  { %276 = vmatprep.subr.bf16.mxu0 %v320_v10  ;;  %304 = vmatprep.subr.bf16.mxu1 %v320_v10 }
  0x13   :  { %277 = vmatpush3.bf16.msra.mxu0 %v320_v10  ;;  %312 = vmatpush3.bf16.msra.mxu1 %v320_v10 }
  0x14   :  { %278 = vmatprep.subr.bf16.mxu0 %v321_v11  ;;  %305 = vmatprep.subr.bf16.mxu1 %v321_v11 }
  0x17   :  { %279 = vmatpush3.bf16.msra.mxu0 %v321_v11  ;;  %313 = vmatpush3.bf16.msra.mxu1 %v321_v11 }
  0x18   :  { %280 = vmatprep.subr.bf16.mxu0 %v322_v12  ;;  %306 = vmatprep.subr.bf16.mxu1 %v322_v12 }
  0x1b   :  { %281 = vmatpush3.bf16.msra.mxu0 %v322_v12  ;;  %314 = vmatpush3.bf16.msra.mxu1 %v322_v12 }
  0x1c   :  { %282 = vmatprep.subr.bf16.mxu0 %v323_v13  ;;  %307 = vmatprep.subr.bf16.mxu1 %v323_v13 }
  0x1f   :  { %283 = vmatpush3.bf16.msra.mxu0 %v323_v13  ;;  %315 = vmatpush3.bf16.msra.mxu1 %v323_v13 }
  0x22   :  { %285 = vmatmul.mubr.bf16.vlgmr.msra.gmra.mrb[0].mxu0 %v32_v22  ;;  %293 = vmatmul.mubr.bf16.vlgmr.msra.gmra.mrb[0].mxu1 %v36_v23 }
  0x23   :  { %288 = vmatprep.mubr.bf16.mxu0 %v33_v24  ;;  %296 = vmatprep.mubr.bf16.mxu1 %v37_v25 }
  0x2a   :  { %289 = vmatmul.mubr.bf16.gmra.mrb[4].mxu0 %v34_v30  ;;  %297 = vmatmul.mubr.bf16.gmra.mrb[4].mxu1 %v38_v31 }
  0xf5   :  { %v286_v33 = vpop.f32.mrb[0].mxu0  ;;  %v294_v34 = vpop.f32.mrb[0].mxu1 }
  0xf6   :  { %v153_v35 = vadd.f32 %v286_v33, %v243_v32  ;;  %v185_v36 = vadd.f32 %v294_v34, %v243_v32  ;;  %v144_v37 = vpop.f32.mrb[1].mxu0  ;;  %v176_v38 = vpop.f32.mrb[1].mxu1 }
  0xf7   :  { %v145_v39 = vadd.f32 %v243_v32, %v144_v37  ;;  %v177_v40 = vadd.f32 %v243_v32, %v176_v38  ;;  %v287_v41 = vpop.f32.mrb[2].mxu0  ;;  %v295_v42 = vpop.f32.mrb[2].mxu1 }
  0xf8   :  { %v209_v43 = vmax.f32 %v153_v35, 0.0  ;;  %v217_v44 = vmax.f32 %v185_v36, 0.0  ;;  %v156_v45 = vadd.f32 %v287_v41, %v243_v32  ;;  %v188_v46 = vadd.f32 %v295_v42, %v243_v32  ;;  %v147_v47 = vpop.f32.mrb[3].mxu0  ;;  %v179_v48 = vpop.f32.mrb[3].mxu1 }
  0xf9   :  { %v207_v49 = vmax.f32 %v145_v39, 0.0  ;;  %v215_v50 = vmax.f32 %v177_v40, 0.0  ;;  %v148_v51 = vadd.f32 %v243_v32, %v147_v47  ;;  %v180_v52 = vadd.f32 %v243_v32, %v179_v48 }
  0xfa   :  { %225 = vst [vmem:[%s470_s3 + $0x10] sm:$0xff] %v209_v43  ;;  %233 = vst [vmem:[%s470_s3 + $0x50] sm:$0xff] %v217_v44  ;;  %v210_v53 = vmax.f32 %v156_v45, 0.0  ;;  %v218_v54 = vmax.f32 %v188_v46, 0.0 }
  0xfb   :  { %223 = vst [vmem:[%s470_s3] sm:$0xff] %v207_v49  ;;  %231 = vst [vmem:[%s470_s3 + $0x40] sm:$0xff] %v215_v50  ;;  %v208_v55 = vmax.f32 %v148_v51, 0.0  ;;  %v216_v56 = vmax.f32 %v180_v52, 0.0 }
  0xfc   :  { %226 = vst [vmem:[%s470_s3 + $0x18] sm:$0xff] %v210_v53  ;;  %234 = vst [vmem:[%s470_s3 + $0x58] sm:$0xff] %v218_v54 }
  0xfd   :  { %224 = vst [vmem:[%s470_s3 + $0x8] sm:$0xff] %v208_v55  ;;  %232 = vst [vmem:[%s470_s3 + $0x48] sm:$0xff] %v216_v56  ;;  %v290_v57 = vpop.f32.mrb[4].mxu0  ;;  %v298_v58 = vpop.f32.mrb[4].mxu1 }
  0xfe   :  { %v169_v59 = vadd.f32 %v290_v57, %v243_v32  ;;  %v201_v60 = vadd.f32 %v298_v58, %v243_v32  ;;  %v160_v61 = vpop.f32.mrb[5].mxu0  ;;  %v192_v62 = vpop.f32.mrb[5].mxu1 }
  0xff   :  { %v161_v63 = vadd.f32 %v243_v32, %v160_v61  ;;  %v193_v0 = vadd.f32 %v243_v32, %v192_v62  ;;  %v291_v1 = vpop.f32.mrb[6].mxu0  ;;  %v299_v2 = vpop.f32.mrb[6].mxu1 }
 0x100   :  { %v213_v3 = vmax.f32 %v169_v59, 0.0  ;;  %v221_v4 = vmax.f32 %v201_v60, 0.0  ;;  %v172_v5 = vadd.f32 %v291_v1, %v243_v32  ;;  %v204_v6 = vadd.f32 %v299_v2, %v243_v32  ;;  %v163_v7 = vpop.f32.mrb[7].mxu0  ;;  %v195_v8 = vpop.f32.mrb[7].mxu1 }
 0x101   :  { %v211_v9 = vmax.f32 %v161_v63, 0.0  ;;  %v219_v10 = vmax.f32 %v193_v0, 0.0  ;;  %v164_v11 = vadd.f32 %v243_v32, %v163_v7  ;;  %v196_v12 = vadd.f32 %v243_v32, %v195_v8 }
 0x102   :  { %229 = vst [vmem:[%s470_s3 + $0x30] sm:$0xff] %v213_v3  ;;  %237 = vst [vmem:[%s470_s3 + $0x70] sm:$0xff] %v221_v4  ;;  %v214_v13 = vmax.f32 %v172_v5, 0.0  ;;  %v222_v14 = vmax.f32 %v204_v6, 0.0 }
 0x103   :  { %227 = vst [vmem:[%s470_s3 + $0x20] sm:$0xff] %v211_v9  ;;  %235 = vst [vmem:[%s470_s3 + $0x60] sm:$0xff] %v219_v10  ;;  %v212_v15 = vmax.f32 %v164_v11, 0.0  ;;  %v220_v16 = vmax.f32 %v196_v12, 0.0 }
 0x104   :  { %230 = vst [vmem:[%s470_s3 + $0x38] sm:$0xff] %v214_v13  ;;  %238 = vst [vmem:[%s470_s3 + $0x78] sm:$0xff] %v222_v14 }
 0x105   :  { %228 = vst [vmem:[%s470_s3 + $0x28] sm:$0xff] %v212_v15  ;;  %236 = vst [vmem:[%s470_s3 + $0x68] sm:$0xff] %v220_v16 }

// kernel: ssd_head_forward.13
= control target key start
LH: loop header
LB: loop body
LE: loop exit
PB: predicated region body
PF: predicated region fallthrough
CT: control target
= control target key end

     0   :  { %s2615_s1 = inlined_call_operand.vmem [shape: bf16[1152,128], index: 1, kind: input, shape index: {}]   ;;  %s2616_s0 = inlined_call_operand.vmem [shape: f32[128,1152], index: 0, kind: input, shape index: {}]   ;;  %s2617_s2 = inlined_call_operand.vmem [shape: f32[1,128], index: 2, kind: input, shape index: {}]   ;;  %s2618_s3 = inlined_call_operand.vmem [shape: f32[128,128], index: 3, kind: output, shape index: {}]  }
   0x1   :  { %v1728_v0 = vld [vmem:[%s2615_s1 + $0x40] sm:$0xff]   ;;  %v1732_v4 = vld [vmem:[%s2615_s1 + $0x48] sm:$0xff]   ;;  %v1736_v8 = vld [vmem:[%s2615_s1 + $0x50] sm:$0xff]  }
   0x2   :  { %v1729_v1 = vld [vmem:[%s2615_s1 + $0xc0] sm:$0xff]   ;;  %1408 = vmatprep.subr.bf16.mxu0 %v1728_v0  ;;  %v1733_v5 = vld [vmem:[%s2615_s1 + $0xc8] sm:$0xff]   ;;  %v1737_v9 = vld [vmem:[%s2615_s1 + $0xd0] sm:$0xff]  }
   0x3   :  { %v1730_v2 = vld [vmem:[%s2615_s1] sm:$0xff]   ;;  %1472 = vmatprep.subr.bf16.mxu1 %v1729_v1  ;;  %v1734_v6 = vld [vmem:[%s2615_s1 + $0x8] sm:$0xff]   ;;  %v1738_v10 = vld [vmem:[%s2615_s1 + $0x10] sm:$0xff]  }
   0x4   :  { %v1731_v3 = vld [vmem:[%s2615_s1 + $0x80] sm:$0xff]   ;;  %1409 = vmatpush3.bf16.msra.mxu0 %v1730_v2  ;;  %v1735_v7 = vld [vmem:[%s2615_s1 + $0x88] sm:$0xff]   ;;  %v1739_v11 = vld [vmem:[%s2615_s1 + $0x90] sm:$0xff]  }
   0x5   :  { %1473 = vmatpush3.bf16.msra.mxu1 %v1731_v3  ;;  %1410 = vmatprep.subr.bf16.mxu0 %v1732_v4  ;;  %v1740_v12 = vld [vmem:[%s2615_s1 + $0x58] sm:$0xff]   ;;  %v1744_v16 = vld [vmem:[%s2615_s1 + $0x60] sm:$0xff]   ;;  %v1748_v20 = vld [vmem:[%s2615_s1 + $0x68] sm:$0xff]  }
   0x6   :  { %1474 = vmatprep.subr.bf16.mxu1 %v1733_v5  ;;  %v1741_v13 = vld [vmem:[%s2615_s1 + $0xd8] sm:$0xff]   ;;  %v1745_v17 = vld [vmem:[%s2615_s1 + $0xe0] sm:$0xff]   ;;  %v1749_v21 = vld [vmem:[%s2615_s1 + $0xe8] sm:$0xff]  }
   0x7   :  { %v1742_v14 = vld [vmem:[%s2615_s1 + $0x18] sm:$0xff]   ;;  %v1746_v18 = vld [vmem:[%s2615_s1 + $0x20] sm:$0xff]   ;;  %v1750_v22 = vld [vmem:[%s2615_s1 + $0x28] sm:$0xff]  }
   0x8   :  { %1411 = vmatpush3.bf16.msra.mxu0 %v1734_v6  ;;  %v1743_v15 = vld [vmem:[%s2615_s1 + $0x98] sm:$0xff]   ;;  %v1747_v19 = vld [vmem:[%s2615_s1 + $0xa0] sm:$0xff]   ;;  %v1751_v23 = vld [vmem:[%s2615_s1 + $0xa8] sm:$0xff]  }
   0x9   :  { %1475 = vmatpush3.bf16.msra.mxu1 %v1735_v7  ;;  %1412 = vmatprep.subr.bf16.mxu0 %v1736_v8  ;;  %v1752_v24 = vld [vmem:[%s2615_s1 + $0x70] sm:$0xff]   ;;  %v1756_v28 = vld [vmem:[%s2615_s1 + $0x78] sm:$0xff]   ;;  %v16_v32 = vld [vmem:[%s2616_s0 + $0x8] sm:$0xff] }
   0xa   :  { %1476 = vmatprep.subr.bf16.mxu1 %v1737_v9  ;;  %v1753_v25 = vld [vmem:[%s2615_s1 + $0xf0] sm:$0xff]   ;;  %v1757_v29 = vld [vmem:[%s2615_s1 + $0xf8] sm:$0xff]   ;;  %v27_v36 = vld [vmem:[%s2616_s0 + $0x60] sm:$0xff] }
   0xb   :  { %v1754_v26 = vld [vmem:[%s2615_s1 + $0x30] sm:$0xff]   ;;  %v1758_v30 = vld [vmem:[%s2615_s1 + $0x38] sm:$0xff]   ;;  %v15_v37 = vld [vmem:[%s2616_s0] sm:$0xff] }
   0xc   :  { %1413 = vmatpush3.bf16.msra.mxu0 %v1738_v10  ;;  %v1755_v27 = vld [vmem:[%s2615_s1 + $0xb0] sm:$0xff]   ;;  %v1759_v31 = vld [vmem:[%s2615_s1 + $0xb8] sm:$0xff]   ;;  %v24_v38 = vld [vmem:[%s2616_s0 + $0x48] sm:$0xff] }
   0xd   :  { %1477 = vmatpush3.bf16.msra.mxu1 %v1739_v11  ;;  %1414 = vmatprep.subr.bf16.mxu0 %v1740_v12  ;;  %v25_v33 = vld [vmem:[%s2616_s0 + $0x50] sm:$0xff]  ;;  %v18_v34 = vld [vmem:[%s2616_s0 + $0x18] sm:$0xff]  ;;  %v159_v40 = vpack.c.bf16 %v24_v38, %v15_v37  ;;  %v1760_v44 = vld [vmem:[%s2615_s1 + $0x140] sm:$0xff]  }
   0xe   :  { %1478 = vmatprep.subr.bf16.mxu1 %v1741_v13  ;;  %v160_v35 = vpack.c.bf16 %v25_v33, %v16_v32  ;;  %v162_v39 = vpack.c.bf16 %v27_v36, %v18_v34  ;;  %v17_v41 = vld [vmem:[%s2616_s0 + $0x10] sm:$0xff]  ;;  %v26_v42 = vld [vmem:[%s2616_s0 + $0x58] sm:$0xff]  ;;  %v1761_v45 = vld [vmem:[%s2615_s1 + $0x1c0] sm:$0xff]  }
   0xf   :  { %v161_v43 = vpack.c.bf16 %v26_v42, %v17_v41  ;;  %v1762_v46 = vld [vmem:[%s2615_s1 + $0x100] sm:$0xff]   ;;  %v34_v48 = vld [vmem:[%s2616_s0 + $0x98] sm:$0xff]  ;;  %v36_v50 = vld [vmem:[%s2616_s0 + $0xa8] sm:$0xff] }
  0x10   :  { %1415 = vmatpush3.bf16.msra.mxu0 %v1742_v14  ;;  %846 = vmatprep.mubr.bf16.mxu0 %v160_v35  ;;  %v1763_v47 = vld [vmem:[%s2615_s1 + $0x180] sm:$0xff]   ;;  %v45_v51 = vld [vmem:[%s2616_s0 + $0xf0] sm:$0xff]  ;;  %v42_v55 = vld [vmem:[%s2616_s0 + $0xd8] sm:$0xff] }
  0x11   :  { %1479 = vmatpush3.bf16.msra.mxu1 %v1743_v15  ;;  %1416 = vmatprep.subr.bf16.mxu0 %v1744_v16  ;;  %v43_v49 = vld [vmem:[%s2616_s0 + $0xe0] sm:$0xff]  ;;  %v171_v53 = vpack.c.bf16 %v45_v51, %v36_v50  ;;  %v33_v54 = vld [vmem:[%s2616_s0 + $0x90] sm:$0xff]  ;;  %v44_v58 = vld [vmem:[%s2616_s0 + $0xe8] sm:$0xff] }
  0x12   :  { %1480 = vmatprep.subr.bf16.mxu1 %v1745_v17  ;;  %943 = vmatprep.mubr.bf16.mxu1 %v162_v39  ;;  %v169_v52 = vpack.c.bf16 %v43_v49, %v34_v48  ;;  %v35_v56 = vld [vmem:[%s2616_s0 + $0xa0] sm:$0xff]  ;;  %v168_v57 = vpack.c.bf16 %v42_v55, %v33_v54  ;;  %v1764_v60 = vld [vmem:[%s2615_s1 + $0x148] sm:$0xff]   ;;  %v61_v1 = vld [vmem:[%s2616_s0 + $0x170] sm:$0xff] }
  0x13   :  { %v170_v59 = vpack.c.bf16 %v44_v58, %v35_v56  ;;  %v1765_v61 = vld [vmem:[%s2615_s1 + $0x1c8] sm:$0xff]   ;;  %v54_v3 = vld [vmem:[%s2616_s0 + $0x138] sm:$0xff]  ;;  %v63_v4 = vld [vmem:[%s2616_s0 + $0x180] sm:$0xff] }
  0x14   :  { %1417 = vmatpush3.bf16.msra.mxu0 %v1746_v18  ;;  %v1766_v62 = vld [vmem:[%s2615_s1 + $0x108] sm:$0xff]   ;;  %v51_v5 = vld [vmem:[%s2616_s0 + $0x120] sm:$0xff]  ;;  %v180_v6 = vpack.c.bf16 %v63_v4, %v54_v3  ;;  %v53_v8 = vld [vmem:[%s2616_s0 + $0x130] sm:$0xff] }
  0x15   :  { %1481 = vmatpush3.bf16.msra.mxu1 %v1747_v19  ;;  %1418 = vmatprep.subr.bf16.mxu0 %v1748_v20  ;;  %v1767_v63 = vld [vmem:[%s2615_s1 + $0x188] sm:$0xff]   ;;  %v62_v9 = vld [vmem:[%s2616_s0 + $0x178] sm:$0xff]  ;;  %v1768_v11 = vld [vmem:[%s2615_s1 + $0x150] sm:$0xff]  }
  0x16   :  { %1482 = vmatprep.subr.bf16.mxu1 %v1749_v21  ;;  %v52_v0 = vld [vmem:[%s2616_s0 + $0x128] sm:$0xff]  ;;  %v179_v12 = vpack.c.bf16 %v62_v9, %v53_v8  ;;  %v1769_v13 = vld [vmem:[%s2615_s1 + $0x1d0] sm:$0xff]   ;;  %v70_v16 = vld [vmem:[%s2616_s0 + $0x1b8] sm:$0xff] }
  0x17   :  { %v178_v2 = vpack.c.bf16 %v61_v1, %v52_v0  ;;  %v60_v7 = vld [vmem:[%s2616_s0 + $0x168] sm:$0xff]  ;;  %v1770_v14 = vld [vmem:[%s2615_s1 + $0x110] sm:$0xff]   ;;  %v79_v17 = vld [vmem:[%s2616_s0 + $0x200] sm:$0xff] }
  0x18   :  { %1419 = vmatpush3.bf16.msra.mxu0 %v1750_v22  ;;  %v177_v10 = vpack.c.bf16 %v60_v7, %v51_v5  ;;  %v1771_v15 = vld [vmem:[%s2615_s1 + $0x190] sm:$0xff]   ;;  %v72_v18 = vld [vmem:[%s2616_s0 + $0x1c8] sm:$0xff]  ;;  %v187_v19 = vpack.c.bf16 %v79_v17, %v70_v16  ;;  %v78_v22 = vld [vmem:[%s2616_s0 + $0x1f8] sm:$0xff] }
  0x19   :  { %1483 = vmatpush3.bf16.msra.mxu1 %v1751_v23  ;;  %1420 = vmatprep.subr.bf16.mxu0 %v1752_v24  ;;  %v81_v20 = vld [vmem:[%s2616_s0 + $0x210] sm:$0xff]  ;;  %v71_v24 = vld [vmem:[%s2616_s0 + $0x1c0] sm:$0xff]  ;;  %v88_v32 = vld [vmem:[%s2616_s0 + $0x248] sm:$0xff] }
  0x1a   :  { %1484 = vmatprep.subr.bf16.mxu1 %v1753_v25  ;;  %v69_v21 = vld [vmem:[%s2616_s0 + $0x1b0] sm:$0xff]  ;;  %v189_v23 = vpack.c.bf16 %v81_v20, %v72_v18  ;;  %v80_v25 = vld [vmem:[%s2616_s0 + $0x208] sm:$0xff]  ;;  %v90_v34 = vld [vmem:[%s2616_s0 + $0x258] sm:$0xff] }
  0x1b   :  { %v97_v33 = vld [vmem:[%s2616_s0 + $0x290] sm:$0xff]  ;;  %v99_v35 = vld [vmem:[%s2616_s0 + $0x2a0] sm:$0xff]  ;;  %v96_v39 = vld [vmem:[%s2616_s0 + $0x288] sm:$0xff] }
  0x1c   :  { %1421 = vmatpush3.bf16.msra.mxu0 %v1754_v26  ;;  %v1772_v26 = vld [vmem:[%s2615_s1 + $0x158] sm:$0xff]   ;;  %v196_v36 = vpack.c.bf16 %v97_v33, %v88_v32  ;;  %v198_v37 = vpack.c.bf16 %v99_v35, %v90_v34  ;;  %v87_v38 = vld [vmem:[%s2616_s0 + $0x240] sm:$0xff]  ;;  %v108_v51 = vld [vmem:[%s2616_s0 + $0x2e8] sm:$0xff] }
  0x1d   :  { %1485 = vmatpush3.bf16.msra.mxu1 %v1755_v27  ;;  %1422 = vmatprep.subr.bf16.mxu0 %v1756_v28  ;;  %v186_v27 = vpack.c.bf16 %v78_v22, %v69_v21  ;;  %v1773_v28 = vld [vmem:[%s2615_s1 + $0x1d8] sm:$0xff]   ;;  %v1776_v42 = vld [vmem:[%s2615_s1 + $0x160] sm:$0xff]   ;;  %v105_v54 = vld [vmem:[%s2616_s0 + $0x2d0] sm:$0xff] }
  0x1e   :  { %1486 = vmatprep.subr.bf16.mxu1 %v1757_v29  ;;  %v188_v29 = vpack.c.bf16 %v80_v25, %v71_v24  ;;  %v98_v41 = vld [vmem:[%s2616_s0 + $0x298] sm:$0xff]  ;;  %v115_v49 = vld [vmem:[%s2616_s0 + $0x320] sm:$0xff]  ;;  %v1780_v58 = vld [vmem:[%s2615_s1 + $0x168] sm:$0xff]  }
  0x1f   :  { %v106_v48 = vld [vmem:[%s2616_s0 + $0x2d8] sm:$0xff]  ;;  %v107_v56 = vld [vmem:[%s2616_s0 + $0x2e0] sm:$0xff]  ;;  %v133_v0 = vld [vmem:[%s2616_s0 + $0x3b0] sm:$0xff] }
  0x20   :  { %1423 = vmatpush3.bf16.msra.mxu0 %v1758_v30  ;;  %v1774_v30 = vld [vmem:[%s2615_s1 + $0x118] sm:$0xff]   ;;  %v205_v50 = vpack.c.bf16 %v115_v49, %v106_v48  ;;  %v135_v4 = vld [vmem:[%s2616_s0 + $0x3c0] sm:$0xff]  ;;  %v132_v7 = vld [vmem:[%s2616_s0 + $0x3a8] sm:$0xff] }
  0x21   :  { %1487 = vmatpush3.bf16.msra.mxu1 %v1759_v31  ;;  %1536 = vmatprep.subr.bf16.mxu0 %v1760_v44  ;;  %v1775_v31 = vld [vmem:[%s2615_s1 + $0x198] sm:$0xff]   ;;  %v195_v44 = vpack.c.bf16 %v96_v39, %v87_v38  ;;  %v1784_v8 = vld [vmem:[%s2615_s1 + $0x170] sm:$0xff]   ;;  %v144_v16 = vld [vmem:[%s2616_s0 + $0x408] sm:$0xff] }
  0x22   :  { %1600 = vmatprep.subr.bf16.mxu1 %v1761_v45  ;;  %v1778_v45 = vld [vmem:[%s2615_s1 + $0x120] sm:$0xff]   ;;  %v114_v55 = vld [vmem:[%s2616_s0 + $0x318] sm:$0xff]  ;;  %v125_v9 = vld [vmem:[%s2616_s0 + $0x370] sm:$0xff] }
  0x23   :  { %847 = vmatmul.mubr.bf16.vlgmr.msra.gmra.mrb[0].mxu0 %v159_v40  ;;  %v89_v40 = vld [vmem:[%s2616_s0 + $0x250] sm:$0xff]  ;;  %v126_v1 = vld [vmem:[%s2616_s0 + $0x378] sm:$0xff]  ;;  %v31_v33 = vld [vmem:[%s2616_s0 + $0x80] sm:$0xff] }
  0x24   :  { %944 = vmatmul.mubr.bf16.vlgmr.msra.gmra.mrb[0].mxu1 %v161_v43  ;;  %1537 = vmatpush3.bf16.msra.mxu0 %v1762_v46  ;;  %v1777_v43 = vld [vmem:[%s2615_s1 + $0x1e0] sm:$0xff]   ;;  %v197_v46 = vpack.c.bf16 %v98_v41, %v89_v40  ;;  %v216_v5 = vpack.c.bf16 %v135_v4, %v126_v1  ;;  %v153_v17 = vld [vmem:[%s2616_s0 + $0x450] sm:$0xff]  ;;  %v1788_v22 = vld [vmem:[%s2615_s1 + $0x178] sm:$0xff]  }
  0x25   :  { %1601 = vmatpush3.bf16.msra.mxu1 %v1763_v47  ;;  %854 = vmatprep.mubr.bf16.mxu0 %v169_v52  ;;  %v1779_v47 = vld [vmem:[%s2615_s1 + $0x1a0] sm:$0xff]   ;;  %v117_v52 = vld [vmem:[%s2616_s0 + $0x330] sm:$0xff]  ;;  %v225_v21 = vpack.c.bf16 %v153_v17, %v144_v16  ;;  %v1789_v24 = vld [vmem:[%s2615_s1 + $0x1f8] sm:$0xff]  }
  0x26   :  { %951 = vmatprep.mubr.bf16.mxu1 %v171_v53  ;;  %1538 = vmatprep.subr.bf16.mxu0 %v1764_v60  ;;  %v207_v53 = vpack.c.bf16 %v117_v52, %v108_v51  ;;  %v1782_v60 = vld [vmem:[%s2615_s1 + $0x128] sm:$0xff]   ;;  %v1790_v25 = vld [vmem:[%s2615_s1 + $0x138] sm:$0xff]   ;;  %v1792_v35 = vld [vmem:[%s2615_s1 + $0x200] sm:$0xff]  }
  0x27   :  { %1602 = vmatprep.subr.bf16.mxu1 %v1765_v61  ;;  %v1783_v61 = vld [vmem:[%s2615_s1 + $0x1a8] sm:$0xff]   ;;  %v22_v32 = vld [vmem:[%s2616_s0 + $0x38] sm:$0xff]  ;;  %v19_v39 = vld [vmem:[%s2616_s0 + $0x20] sm:$0xff] }
  0x28   :  { %1539 = vmatpush3.bf16.msra.mxu0 %v1766_v62  ;;  %v204_v62 = vpack.c.bf16 %v114_v55, %v105_v54  ;;  %v166_v38 = vpack.c.bf16 %v31_v33, %v22_v32  ;;  %v28_v40 = vld [vmem:[%s2616_s0 + $0x68] sm:$0xff]  ;;  %v21_v41 = vld [vmem:[%s2616_s0 + $0x30] sm:$0xff]  ;;  %v39_v54 = vld [vmem:[%s2616_s0 + $0xc0] sm:$0xff] }
  0x29   :  { %1603 = vmatpush3.bf16.msra.mxu1 %v1767_v63  ;;  %1540 = vmatprep.subr.bf16.mxu0 %v1768_v11  ;;  %v124_v63 = vld [vmem:[%s2616_s0 + $0x368] sm:$0xff]  ;;  %v1785_v11 = vld [vmem:[%s2615_s1 + $0x1f0] sm:$0xff]   ;;  %v1795_v1 = vld [vmem:[%s2615_s1 + $0x218] sm:$0xff]  }
  0x2a   :  { %1604 = vmatprep.subr.bf16.mxu1 %v1769_v13  ;;  %v214_v3 = vpack.c.bf16 %v133_v0, %v124_v63  ;;  %v1787_v13 = vld [vmem:[%s2615_s1 + $0x1b0] sm:$0xff]   ;;  %v1793_v51 = vld [vmem:[%s2615_s1 + $0x208] sm:$0xff]   ;;  %v82_v17 = vld [vmem:[%s2616_s0 + $0x218] sm:$0xff] }
  0x2b   :  { %855 = vmatmul.mubr.bf16.gmra.mrb[4].mxu0 %v168_v57  ;;  %v116_v57 = vld [vmem:[%s2616_s0 + $0x328] sm:$0xff]  ;;  %v37_v52 = vld [vmem:[%s2616_s0 + $0xb0] sm:$0xff]  ;;  %v102_v33 = vld [vmem:[%s2616_s0 + $0x2b8] sm:$0xff] }
  0x2c   :  { %952 = vmatmul.mubr.bf16.gmra.mrb[4].mxu1 %v170_v59  ;;  %862 = vmatprep.mubr.bf16.mxu0 %v178_v2  ;;  %v1781_v59 = vld [vmem:[%s2615_s1 + $0x1e8] sm:$0xff]   ;;  %v206_v2 = vpack.c.bf16 %v116_v57, %v107_v56  ;;  %v65_v57 = vld [vmem:[%s2616_s0 + $0x190] sm:$0xff] }
  0x2d   :  { %959 = vmatprep.mubr.bf16.mxu1 %v180_v6  ;;  %1541 = vmatpush3.bf16.msra.mxu0 %v1770_v14  ;;  %v123_v6 = vld [vmem:[%s2616_s0 + $0x360] sm:$0xff]  ;;  %v142_v14 = vld [vmem:[%s2616_s0 + $0x3f8] sm:$0xff]  ;;  %v48_v55 = vld [vmem:[%s2616_s0 + $0x108] sm:$0xff] }
  0x2e   :  { %1605 = vmatpush3.bf16.msra.mxu1 %v1771_v15  ;;  %1542 = vmatprep.subr.bf16.mxu0 %v1772_v26  ;;  %v151_v15 = vld [vmem:[%s2616_s0 + $0x440] sm:$0xff]  ;;  %v213_v18 = vpack.c.bf16 %v132_v7, %v123_v6  ;;  %v150_v26 = vld [vmem:[%s2616_s0 + $0x438] sm:$0xff]  ;;  %v56_v56 = vld [vmem:[%s2616_s0 + $0x148] sm:$0xff] }
  0x2f   :  { %1606 = vmatprep.subr.bf16.mxu1 %v1773_v28  ;;  %v223_v20 = vpack.c.bf16 %v151_v15, %v142_v14  ;;  %v1791_v28 = vld [vmem:[%s2615_s1 + $0x1b8] sm:$0xff]   ;;  %v182_v63 = vpack.c.bf16 %v65_v57, %v56_v56  ;;  %v57_v4 = vld [vmem:[%s2616_s0 + $0x150] sm:$0xff]  ;;  %v83_v7 = vld [vmem:[%s2616_s0 + $0x220] sm:$0xff] }
  0x30   :  { %v74_v6 = vld [vmem:[%s2616_s0 + $0x1d8] sm:$0xff]  ;;  %v1797_v15 = vld [vmem:[%s2615_s1 + $0x228] sm:$0xff]   ;;  %v73_v16 = vld [vmem:[%s2616_s0 + $0x1d0] sm:$0xff] }
  0x31   :  { %1543 = vmatpush3.bf16.msra.mxu0 %v1774_v30  ;;  %v20_v30 = vld [vmem:[%s2616_s0 + $0x28] sm:$0xff]  ;;  %v93_v32 = vld [vmem:[%s2616_s0 + $0x270] sm:$0xff]  ;;  %v138_v57 = vld [vmem:[%s2616_s0 + $0x3d8] sm:$0xff] }
  0x32   :  { %1607 = vmatpush3.bf16.msra.mxu1 %v1775_v31  ;;  %1544 = vmatprep.subr.bf16.mxu0 %v1776_v42  ;;  %v29_v31 = vld [vmem:[%s2616_s0 + $0x70] sm:$0xff]  ;;  %v30_v42 = vld [vmem:[%s2616_s0 + $0x78] sm:$0xff] }
  0x33   :  { %863 = vmatmul.mubr.bf16.gmra.mrb[8].mxu0 %v177_v10  ;;  %1608 = vmatprep.subr.bf16.mxu1 %v1777_v43  ;;  %v134_v10 = vld [vmem:[%s2616_s0 + $0x3b8] sm:$0xff]  ;;  %v165_v48 = vpack.c.bf16 %v30_v42, %v21_v41  ;;  %v109_v42 = vld [vmem:[%s2616_s0 + $0x2f0] sm:$0xff] }
  0x34   :  { %960 = vmatmul.mubr.bf16.gmra.mrb[8].mxu1 %v179_v12  ;;  %870 = vmatprep.mubr.bf16.mxu0 %v187_v19  ;;  %v1786_v12 = vld [vmem:[%s2615_s1 + $0x130] sm:$0xff]   ;;  %v215_v19 = vpack.c.bf16 %v134_v10, %v125_v9  ;;  %v38_v43 = vld [vmem:[%s2616_s0 + $0xb8] sm:$0xff]  ;;  %v1796_v10 = vld [vmem:[%s2615_s1 + $0x220] sm:$0xff]  }
  0x35   :  { %967 = vmatprep.mubr.bf16.mxu1 %v189_v23  ;;  %1545 = vmatpush3.bf16.msra.mxu0 %v1778_v45  ;;  %v141_v23 = vld [vmem:[%s2616_s0 + $0x3f0] sm:$0xff]  ;;  %v163_v45 = vpack.c.bf16 %v28_v40, %v19_v39  ;;  %v201_v39 = vpack.c.bf16 %v102_v33, %v93_v32 }
  0x36   :  { %1609 = vmatpush3.bf16.msra.mxu1 %v1779_v47  ;;  %1546 = vmatprep.subr.bf16.mxu0 %v1780_v58  ;;  %v222_v34 = vpack.c.bf16 %v150_v26, %v141_v23  ;;  %v49_v47 = vld [vmem:[%s2616_s0 + $0x110] sm:$0xff]  ;;  %v103_v23 = vld [vmem:[%s2616_s0 + $0x2c0] sm:$0xff] }
  0x37   :  { %1610 = vmatprep.subr.bf16.mxu1 %v1781_v59  ;;  %v1794_v58 = vld [vmem:[%s2615_s1 + $0x210] sm:$0xff]   ;;  %v58_v59 = vld [vmem:[%s2616_s0 + $0x158] sm:$0xff] }
  0x38   :  { %v85_v9 = vld [vmem:[%s2616_s0 + $0x230] sm:$0xff] }
  0x39   :  { %1547 = vmatpush3.bf16.msra.mxu0 %v1782_v60  ;;  %v67_v60 = vld [vmem:[%s2616_s0 + $0x1a0] sm:$0xff]  ;;  %v129_v56 = vld [vmem:[%s2616_s0 + $0x390] sm:$0xff] }
  0x3a   :  { %1611 = vmatpush3.bf16.msra.mxu1 %v1783_v61  ;;  %1548 = vmatprep.subr.bf16.mxu0 %v1784_v8  ;;  %v184_v0 = vpack.c.bf16 %v67_v60, %v58_v59  ;;  %v76_v8 = vld [vmem:[%s2616_s0 + $0x1e8] sm:$0xff]  ;;  %v155_v59 = vld [vmem:[%s2616_s0 + $0x460] sm:$0xff] }
  0x3b   :  { %871 = vmatmul.mubr.bf16.gmra.mrb[12].mxu0 %v186_v27  ;;  %1612 = vmatprep.subr.bf16.mxu1 %v1785_v11  ;;  %v143_v27 = vld [vmem:[%s2616_s0 + $0x400] sm:$0xff]  ;;  %v193_v14 = vpack.c.bf16 %v85_v9, %v76_v8  ;;  %v148_v60 = vld [vmem:[%s2616_s0 + $0x428] sm:$0xff] }
  0x3c   :  { %968 = vmatmul.mubr.bf16.gmra.mrb[12].mxu1 %v188_v29  ;;  %878 = vmatprep.mubr.bf16.mxu0 %v196_v36  ;;  %v152_v29 = vld [vmem:[%s2616_s0 + $0x448] sm:$0xff]  ;;  %v95_v8 = vld [vmem:[%s2616_s0 + $0x280] sm:$0xff] }
  0x3d   :  { %975 = vmatprep.mubr.bf16.mxu1 %v198_v37  ;;  %1549 = vmatpush3.bf16.msra.mxu0 %v1786_v12  ;;  %v224_v36 = vpack.c.bf16 %v152_v29, %v143_v27  ;;  %v164_v37 = vpack.c.bf16 %v29_v31, %v20_v30  ;;  %v1799_v29 = vld [vmem:[%s2615_s1 + $0x238] sm:$0xff]   ;;  %v91_v30 = vld [vmem:[%s2616_s0 + $0x260] sm:$0xff]  ;;  %v100_v31 = vld [vmem:[%s2616_s0 + $0x2a8] sm:$0xff] }
  0x3e   :  { %1613 = vmatpush3.bf16.msra.mxu1 %v1787_v13  ;;  %1550 = vmatprep.subr.bf16.mxu0 %v1788_v22  ;;  %v191_v13 = vpack.c.bf16 %v83_v7, %v74_v6  ;;  %v94_v22 = vld [vmem:[%s2616_s0 + $0x278] sm:$0xff]  ;;  %v23_v6 = vld [vmem:[%s2616_s0 + $0x40] sm:$0xff]  ;;  %v32_v7 = vld [vmem:[%s2616_s0 + $0x88] sm:$0xff] }
  0x3f   :  { %1614 = vmatprep.subr.bf16.mxu1 %v1789_v24  ;;  %v1798_v24 = vld [vmem:[%s2615_s1 + $0x230] sm:$0xff]   ;;  %v104_v9 = vld [vmem:[%s2616_s0 + $0x2c8] sm:$0xff] }
  0x41   :  { %1551 = vmatpush3.bf16.msra.mxu0 %v1790_v25  ;;  %v190_v25 = vpack.c.bf16 %v82_v17, %v73_v16  ;;  %v113_v16 = vld [vmem:[%s2616_s0 + $0x310] sm:$0xff]  ;;  %v122_v17 = vld [vmem:[%s2616_s0 + $0x358] sm:$0xff] }
  0x42   :  { %1615 = vmatpush3.bf16.msra.mxu1 %v1791_v28  ;;  %1680 = vmatprep.subr.bf16.mxu0 %v1792_v35  ;;  %v202_v28 = vpack.c.bf16 %v103_v23, %v94_v22  ;;  %v212_v23 = vpack.c.bf16 %v122_v17, %v113_v16 }
  0x43   :  { %879 = vmatmul.mubr.bf16.gmra.mrb[16].mxu0 %v195_v44  ;;  %1712 = vmatprep.subr.bf16.mxu1 %v1792_v35  ;;  %v47_v44 = vld [vmem:[%s2616_s0 + $0x100] sm:$0xff] }
  0x44   :  { %976 = vmatmul.mubr.bf16.gmra.mrb[16].mxu1 %v197_v46  ;;  %886 = vmatprep.mubr.bf16.mxu0 %v205_v50  ;;  %v40_v46 = vld [vmem:[%s2616_s0 + $0xc8] sm:$0xff]  ;;  %v173_v49 = vpack.c.bf16 %v47_v44, %v38_v43  ;;  %v118_v43 = vld [vmem:[%s2616_s0 + $0x338] sm:$0xff]  ;;  %v111_v44 = vld [vmem:[%s2616_s0 + $0x300] sm:$0xff] }
  0x45   :  { %983 = vmatprep.mubr.bf16.mxu1 %v207_v53  ;;  %v175_v50 = vpack.c.bf16 %v49_v47, %v40_v46  ;;  %v46_v53 = vld [vmem:[%s2616_s0 + $0xf8] sm:$0xff]  ;;  %v128_v46 = vld [vmem:[%s2616_s0 + $0x388] sm:$0xff]  ;;  %v137_v47 = vld [vmem:[%s2616_s0 + $0x3d0] sm:$0xff] }
  0x46   :  { %v172_v61 = vpack.c.bf16 %v46_v53, %v37_v52  ;;  %v218_v52 = vpack.c.bf16 %v137_v47, %v128_v46 }
  0x4b   :  { %887 = vmatmul.mubr.bf16.gmra.mrb[20].mxu0 %v204_v62  ;;  %v174_v62 = vpack.c.bf16 %v48_v55, %v39_v54  ;;  %v127_v54 = vld [vmem:[%s2616_s0 + $0x380] sm:$0xff]  ;;  %v136_v55 = vld [vmem:[%s2616_s0 + $0x3c8] sm:$0xff] }
  0x4c   :  { %984 = vmatmul.mubr.bf16.gmra.mrb[20].mxu1 %v206_v2  ;;  %894 = vmatprep.mubr.bf16.mxu0 %v214_v3  ;;  %v55_v2 = vld [vmem:[%s2616_s0 + $0x140] sm:$0xff]  ;;  %v64_v3 = vld [vmem:[%s2616_s0 + $0x188] sm:$0xff] }
  0x4d   :  { %991 = vmatprep.mubr.bf16.mxu1 %v216_v5  ;;  %v66_v5 = vld [vmem:[%s2616_s0 + $0x198] sm:$0xff]  ;;  %v181_v11 = vpack.c.bf16 %v64_v3, %v55_v2  ;;  %v145_v2 = vld [vmem:[%s2616_s0 + $0x410] sm:$0xff] }
  0x4e   :  { %v183_v12 = vpack.c.bf16 %v66_v5, %v57_v4  ;;  %v154_v3 = vld [vmem:[%s2616_s0 + $0x458] sm:$0xff]  ;;  %v147_v4 = vld [vmem:[%s2616_s0 + $0x420] sm:$0xff]  ;;  %v156_v5 = vld [vmem:[%s2616_s0 + $0x468] sm:$0xff] }
  0x53   :  { %895 = vmatmul.mubr.bf16.gmra.mrb[24].mxu0 %v213_v18  ;;  %v75_v18 = vld [vmem:[%s2616_s0 + $0x1e0] sm:$0xff] }
  0x54   :  { %992 = vmatmul.mubr.bf16.gmra.mrb[24].mxu1 %v215_v19  ;;  %902 = vmatprep.mubr.bf16.mxu0 %v223_v20  ;;  %v84_v19 = vld [vmem:[%s2616_s0 + $0x228] sm:$0xff] }
  0x55   :  { %999 = vmatprep.mubr.bf16.mxu1 %v225_v21  ;;  %v92_v20 = vld [vmem:[%s2616_s0 + $0x268] sm:$0xff]  ;;  %v101_v21 = vld [vmem:[%s2616_s0 + $0x2b0] sm:$0xff]  ;;  %v192_v26 = vpack.c.bf16 %v84_v19, %v75_v18  ;;  %v59_v18 = vld [vmem:[%s2616_s0 + $0x160] sm:$0xff] }
  0x56   :  { %v200_v27 = vpack.c.bf16 %v101_v21, %v92_v20  ;;  %v68_v19 = vld [vmem:[%s2616_s0 + $0x1a8] sm:$0xff]  ;;  %v131_v20 = vld [vmem:[%s2616_s0 + $0x3a0] sm:$0xff] }
  0x57   :  { %v140_v21 = vld [vmem:[%s2616_s0 + $0x3e8] sm:$0xff] }
  0x5b   :  { %903 = vmatmul.mubr.bf16.gmra.mrb[28].mxu0 %v222_v34  ;;  %v110_v34 = vld [vmem:[%s2616_s0 + $0x2f8] sm:$0xff] }
  0x5c   :  { %1000 = vmatmul.mubr.bf16.gmra.mrb[28].mxu1 %v224_v36  ;;  %1040 = vmatprep.mubr.bf16.mxu0 %v164_v37  ;;  %v112_v36 = vld [vmem:[%s2616_s0 + $0x308] sm:$0xff]  ;;  %v121_v37 = vld [vmem:[%s2616_s0 + $0x350] sm:$0xff] }
  0x5d   :  { %1137 = vmatprep.mubr.bf16.mxu1 %v166_v38  ;;  %v199_v38 = vpack.c.bf16 %v100_v31, %v91_v30  ;;  %v211_v41 = vpack.c.bf16 %v121_v37, %v112_v36 }
  0x63   :  { %1041 = vmatmul.mubr.bf16.vlgmr.msra.gmra.mrb[32].mxu0 %v163_v45  ;;  %v120_v45 = vld [vmem:[%s2616_s0 + $0x348] sm:$0xff] }
  0x64   :  { %1138 = vmatmul.mubr.bf16.vlgmr.msra.gmra.mrb[32].mxu1 %v165_v48  ;;  %1681 = vmatpush3.bf16.msra.mxu0 %v1792_v35  ;;  %v130_v48 = vld [vmem:[%s2616_s0 + $0x398] sm:$0xff] }
  0x65   :  { %1720 = vmatpush3.bf16.msra.mxu1 %v1792_v35  ;;  %1048 = vmatprep.mubr.bf16.mxu0 %v173_v49  ;;  %v119_v35 = vld [vmem:[%s2616_s0 + $0x340] sm:$0xff] }
  0x66   :  { %1145 = vmatprep.mubr.bf16.mxu1 %v175_v50  ;;  %1682 = vmatprep.subr.bf16.mxu0 %v1793_v51  ;;  %v209_v40 = vpack.c.bf16 %v119_v35, %v110_v34  ;;  %v139_v49 = vld [vmem:[%s2616_s0 + $0x3e0] sm:$0xff]  ;;  %v208_v50 = vpack.c.bf16 %v118_v43, %v109_v42 }
  0x67   :  { %1713 = vmatprep.subr.bf16.mxu1 %v1793_v51  ;;  %v220_v53 = vpack.c.bf16 %v139_v49, %v130_v48  ;;  %v2471_v34 = vld [vmem:[%s2617_s2] ss:$0 sm:$0xff] }
  0x68   :  { %1683 = vmatpush3.bf16.msra.mxu0 %v1793_v51 }
  0x69   :  { %1721 = vmatpush3.bf16.msra.mxu1 %v1793_v51  ;;  %1684 = vmatprep.subr.bf16.mxu0 %v1794_v58  ;;  %v210_v51 = vpack.c.bf16 %v120_v45, %v111_v44 }
  0x6a   :  { %1714 = vmatprep.subr.bf16.mxu1 %v1794_v58 }
  0x6b   :  { %1049 = vmatmul.mubr.bf16.gmra.mrb[36].mxu0 %v172_v61  ;;  %v157_v61 = vld [vmem:[%s2616_s0 + $0x470] sm:$0xff] }
  0x6c   :  { %1146 = vmatmul.mubr.bf16.gmra.mrb[36].mxu1 %v174_v62  ;;  %1056 = vmatprep.mubr.bf16.mxu0 %v182_v63  ;;  %v217_v62 = vpack.c.bf16 %v136_v55, %v127_v54  ;;  %v219_v63 = vpack.c.bf16 %v138_v57, %v129_v56 }
  0x6d   :  { %1153 = vmatprep.mubr.bf16.mxu1 %v184_v0  ;;  %1685 = vmatpush3.bf16.msra.mxu0 %v1794_v58 }
  0x6e   :  { %1722 = vmatpush3.bf16.msra.mxu1 %v1794_v58  ;;  %1686 = vmatprep.subr.bf16.mxu0 %v1795_v1  ;;  %v146_v58 = vld [vmem:[%s2616_s0 + $0x418] sm:$0xff] }
  0x6f   :  { %1715 = vmatprep.subr.bf16.mxu1 %v1795_v1  ;;  %v227_v0 = vpack.c.bf16 %v155_v59, %v146_v58 }
  0x71   :  { %1687 = vmatpush3.bf16.msra.mxu0 %v1795_v1 }
  0x72   :  { %1723 = vmatpush3.bf16.msra.mxu1 %v1795_v1  ;;  %1688 = vmatprep.subr.bf16.mxu0 %v1796_v10  ;;  %v229_v1 = vpack.c.bf16 %v157_v61, %v148_v60 }
  0x73   :  { %1057 = vmatmul.mubr.bf16.gmra.mrb[40].mxu0 %v181_v11  ;;  %1716 = vmatprep.subr.bf16.mxu1 %v1796_v10  ;;  %v228_v11 = vpack.c.bf16 %v156_v5, %v147_v4 }
  0x74   :  { %1154 = vmatmul.mubr.bf16.gmra.mrb[40].mxu1 %v183_v12  ;;  %1064 = vmatprep.mubr.bf16.mxu0 %v191_v13  ;;  %v167_v12 = vpack.c.bf16 %v32_v7, %v23_v6  ;;  %v203_v13 = vpack.c.bf16 %v104_v9, %v95_v8 }
  0x75   :  { %1161 = vmatprep.mubr.bf16.mxu1 %v193_v14  ;;  %1689 = vmatpush3.bf16.msra.mxu0 %v1796_v10  ;;  %v41_v14 = vld [vmem:[%s2616_s0 + $0xd0] sm:$0xff] }
  0x76   :  { %1724 = vmatpush3.bf16.msra.mxu1 %v1796_v10  ;;  %1690 = vmatprep.subr.bf16.mxu0 %v1797_v15  ;;  %v226_v10 = vpack.c.bf16 %v154_v3, %v145_v2 }
  0x77   :  { %1717 = vmatprep.subr.bf16.mxu1 %v1797_v15 }
  0x79   :  { %1691 = vmatpush3.bf16.msra.mxu0 %v1797_v15 }
  0x7a   :  { %1725 = vmatpush3.bf16.msra.mxu1 %v1797_v15  ;;  %1692 = vmatprep.subr.bf16.mxu0 %v1798_v24  ;;  %v50_v15 = vld [vmem:[%s2616_s0 + $0x118] sm:$0xff] }
  0x7b   :  { %1065 = vmatmul.mubr.bf16.gmra.mrb[44].mxu0 %v190_v25  ;;  %1718 = vmatprep.subr.bf16.mxu1 %v1798_v24  ;;  %v176_v22 = vpack.c.bf16 %v50_v15, %v41_v14  ;;  %v221_v25 = vpack.c.bf16 %v140_v21, %v131_v20 }
  0x7c   :  { %1162 = vmatmul.mubr.bf16.gmra.mrb[44].mxu1 %v192_v26  ;;  %1072 = vmatprep.mubr.bf16.mxu0 %v200_v27  ;;  %v77_v26 = vld [vmem:[%s2616_s0 + $0x1f0] sm:$0xff]  ;;  %v86_v27 = vld [vmem:[%s2616_s0 + $0x238] sm:$0xff] }
  0x7d   :  { %1169 = vmatprep.mubr.bf16.mxu1 %v202_v28  ;;  %1693 = vmatpush3.bf16.msra.mxu0 %v1798_v24  ;;  %v149_v28 = vld [vmem:[%s2616_s0 + $0x430] sm:$0xff]  ;;  %v194_v30 = vpack.c.bf16 %v86_v27, %v77_v26 }
  0x7e   :  { %1726 = vmatpush3.bf16.msra.mxu1 %v1798_v24  ;;  %1694 = vmatprep.subr.bf16.mxu0 %v1799_v29  ;;  %v185_v24 = vpack.c.bf16 %v68_v19, %v59_v18 }
  0x7f   :  { %1719 = vmatprep.subr.bf16.mxu1 %v1799_v29 }
  0x81   :  { %1695 = vmatpush3.bf16.msra.mxu0 %v1799_v29 }
  0x82   :  { %1727 = vmatpush3.bf16.msra.mxu1 %v1799_v29  ;;  %v158_v29 = vld [vmem:[%s2616_s0 + $0x478] sm:$0xff] }
  0x83   :  { %1073 = vmatmul.mubr.bf16.gmra.mrb[48].mxu0 %v199_v38  ;;  %v230_v31 = vpack.c.bf16 %v158_v29, %v149_v28 }
  0x84   :  { %1170 = vmatmul.mubr.bf16.gmra.mrb[48].mxu1 %v201_v39  ;;  %1080 = vmatprep.mubr.bf16.mxu0 %v209_v40 }
  0x85   :  { %1177 = vmatprep.mubr.bf16.mxu1 %v211_v41 }
  0x8b   :  { %1081 = vmatmul.mubr.bf16.gmra.mrb[52].mxu0 %v208_v50 }
  0x8c   :  { %1178 = vmatmul.mubr.bf16.gmra.mrb[52].mxu1 %v210_v51  ;;  %1088 = vmatprep.mubr.bf16.mxu0 %v218_v52 }
  0x8d   :  { %1185 = vmatprep.mubr.bf16.mxu1 %v220_v53 }
  0x93   :  { %1089 = vmatmul.mubr.bf16.gmra.mrb[56].mxu0 %v217_v62 }
  0x94   :  { %1186 = vmatmul.mubr.bf16.gmra.mrb[56].mxu1 %v219_v63  ;;  %1096 = vmatprep.mubr.bf16.mxu0 %v227_v0 }
  0x95   :  { %1193 = vmatprep.mubr.bf16.mxu1 %v229_v1 }
  0x9b   :  { %1097 = vmatmul.mubr.bf16.gmra.mrb[60].mxu0 %v226_v10 }
  0x9c   :  { %1194 = vmatmul.mubr.bf16.gmra.mrb[60].mxu1 %v228_v11  ;;  %1696 = vmatprep.mubr.bf16.mxu0 %v167_v12 }
  0x9d   :  { %1704 = vmatprep.mubr.bf16.mxu1 %v203_v13 }
  0xa3   :  { %1697 = vmatmul.mubr.bf16.vlgmr.msra.gmra.mrb[64].mxu0 %v176_v22 }
  0xa4   :  { %1705 = vmatmul.mubr.bf16.vlgmr.msra.gmra.mrb[64].mxu1 %v212_v23  ;;  %1700 = vmatprep.mubr.bf16.mxu0 %v185_v24 }
  0xa5   :  { %1708 = vmatprep.mubr.bf16.mxu1 %v221_v25 }
  0xab   :  { %1701 = vmatmul.mubr.bf16.gmra.mrb[68].mxu0 %v194_v30 }
  0xac   :  { %1709 = vmatmul.mubr.bf16.gmra.mrb[68].mxu1 %v230_v31 }
  0xf6   :  { %v1424_v32 = vpop.f32.mrb[0].mxu0 }
  0xf7   :  { %v1488_v33 = vpop.f32.mrb[0].mxu1  ;;  %v1425_v35 = vpop.f32.mrb[1].mxu0 }
  0xf8   :  { %v1426_v36 = vadd.f32 %v1425_v35, %v1424_v32  ;;  %v1489_v37 = vpop.f32.mrb[1].mxu1  ;;  %v1427_v38 = vpop.f32.mrb[2].mxu0 }
  0xf9   :  { %v1490_v39 = vadd.f32 %v1489_v37, %v1488_v33  ;;  %v1491_v40 = vpop.f32.mrb[2].mxu1  ;;  %v1428_v41 = vpop.f32.mrb[3].mxu0 }
  0xfa   :  { %v849_v42 = vadd.f32 %v1426_v36, %v2471_v34  ;;  %v1429_v43 = vadd.f32 %v1428_v41, %v1427_v38  ;;  %v1492_v44 = vpop.f32.mrb[3].mxu1 }
  0xfb   :  { %v1493_v45 = vadd.f32 %v1492_v44, %v1491_v40 }
  0xfc   :  { %v2474_v46 = vadd.f32 %v1490_v39, %v849_v42  ;;  %v852_v47 = vadd.f32 %v1429_v43, %v2471_v34 }
  0xfe   :  { %v2477_v48 = vadd.f32 %v1493_v45, %v852_v47  ;;  %v1430_v49 = vpop.f32.mrb[4].mxu0 }
  0xff   :  { %v1494_v50 = vpop.f32.mrb[4].mxu1  ;;  %v1431_v51 = vpop.f32.mrb[5].mxu0 }
 0x100   :  { %v1432_v52 = vadd.f32 %v1431_v51, %v1430_v49  ;;  %v1495_v53 = vpop.f32.mrb[5].mxu1  ;;  %v1433_v54 = vpop.f32.mrb[6].mxu0 }
 0x101   :  { %v1496_v55 = vadd.f32 %v1495_v53, %v1494_v50  ;;  %v1497_v56 = vpop.f32.mrb[6].mxu1  ;;  %v1434_v57 = vpop.f32.mrb[7].mxu0 }
 0x102   :  { %v857_v58 = vadd.f32 %v1432_v52, %v2471_v34  ;;  %v1435_v59 = vadd.f32 %v1434_v57, %v1433_v54  ;;  %v1498_v60 = vpop.f32.mrb[7].mxu1 }
 0x103   :  { %v1499_v61 = vadd.f32 %v1498_v60, %v1497_v56 }
 0x104   :  { %v2480_v62 = vadd.f32 %v1496_v55, %v857_v58  ;;  %v860_v63 = vadd.f32 %v1435_v59, %v2471_v34 }
 0x106   :  { %v2483_v0 = vadd.f32 %v1499_v61, %v860_v63  ;;  %v1436_v1 = vpop.f32.mrb[8].mxu0 }
 0x107   :  { %v1500_v2 = vpop.f32.mrb[8].mxu1  ;;  %v1437_v3 = vpop.f32.mrb[9].mxu0 }
 0x108   :  { %v1438_v4 = vadd.f32 %v1437_v3, %v1436_v1  ;;  %v1501_v5 = vpop.f32.mrb[9].mxu1  ;;  %v1439_v6 = vpop.f32.mrb[10].mxu0 }
 0x109   :  { %v1502_v7 = vadd.f32 %v1501_v5, %v1500_v2  ;;  %v1503_v8 = vpop.f32.mrb[10].mxu1  ;;  %v1440_v9 = vpop.f32.mrb[11].mxu0 }
 0x10a   :  { %v865_v10 = vadd.f32 %v1438_v4, %v2471_v34  ;;  %v1441_v11 = vadd.f32 %v1440_v9, %v1439_v6  ;;  %v1504_v12 = vpop.f32.mrb[11].mxu1 }
 0x10b   :  { %v1505_v13 = vadd.f32 %v1504_v12, %v1503_v8 }
 0x10c   :  { %v2486_v14 = vadd.f32 %v1502_v7, %v865_v10  ;;  %v868_v15 = vadd.f32 %v1441_v11, %v2471_v34 }
 0x10e   :  { %v2489_v16 = vadd.f32 %v1505_v13, %v868_v15  ;;  %v1442_v17 = vpop.f32.mrb[12].mxu0 }
 0x10f   :  { %v1506_v18 = vpop.f32.mrb[12].mxu1  ;;  %v1443_v19 = vpop.f32.mrb[13].mxu0 }
 0x110   :  { %v1444_v20 = vadd.f32 %v1443_v19, %v1442_v17  ;;  %v1507_v21 = vpop.f32.mrb[13].mxu1  ;;  %v1445_v22 = vpop.f32.mrb[14].mxu0 }
 0x111   :  { %v1508_v23 = vadd.f32 %v1507_v21, %v1506_v18  ;;  %v1509_v24 = vpop.f32.mrb[14].mxu1  ;;  %v1446_v25 = vpop.f32.mrb[15].mxu0 }
 0x112   :  { %v873_v26 = vadd.f32 %v1444_v20, %v2471_v34  ;;  %v1447_v27 = vadd.f32 %v1446_v25, %v1445_v22  ;;  %v1510_v28 = vpop.f32.mrb[15].mxu1 }
 0x113   :  { %v1511_v29 = vadd.f32 %v1510_v28, %v1509_v24 }
 0x114   :  { %v2492_v30 = vadd.f32 %v1508_v23, %v873_v26  ;;  %v876_v31 = vadd.f32 %v1447_v27, %v2471_v34 }
 0x116   :  { %v2495_v32 = vadd.f32 %v1511_v29, %v876_v31  ;;  %v1448_v33 = vpop.f32.mrb[16].mxu0 }
 0x117   :  { %v1512_v35 = vpop.f32.mrb[16].mxu1  ;;  %v1449_v36 = vpop.f32.mrb[17].mxu0 }
 0x118   :  { %v1450_v37 = vadd.f32 %v1449_v36, %v1448_v33  ;;  %v1513_v38 = vpop.f32.mrb[17].mxu1  ;;  %v1451_v39 = vpop.f32.mrb[18].mxu0 }
 0x119   :  { %v1514_v40 = vadd.f32 %v1513_v38, %v1512_v35  ;;  %v1515_v41 = vpop.f32.mrb[18].mxu1  ;;  %v1452_v42 = vpop.f32.mrb[19].mxu0 }
 0x11a   :  { %v881_v43 = vadd.f32 %v1450_v37, %v2471_v34  ;;  %v1453_v44 = vadd.f32 %v1452_v42, %v1451_v39  ;;  %v1516_v45 = vpop.f32.mrb[19].mxu1 }
 0x11b   :  { %v1517_v47 = vadd.f32 %v1516_v45, %v1515_v41 }
 0x11c   :  { %v2498_v49 = vadd.f32 %v1514_v40, %v881_v43  ;;  %v884_v50 = vadd.f32 %v1453_v44, %v2471_v34 }
 0x11e   :  { %v2501_v51 = vadd.f32 %v1517_v47, %v884_v50  ;;  %v1454_v52 = vpop.f32.mrb[20].mxu0 }
 0x11f   :  { %v1518_v53 = vpop.f32.mrb[20].mxu1  ;;  %v1455_v54 = vpop.f32.mrb[21].mxu0 }
 0x120   :  { %v1456_v55 = vadd.f32 %v1455_v54, %v1454_v52  ;;  %v1519_v56 = vpop.f32.mrb[21].mxu1  ;;  %v1457_v57 = vpop.f32.mrb[22].mxu0 }
 0x121   :  { %v1520_v58 = vadd.f32 %v1519_v56, %v1518_v53  ;;  %v1521_v59 = vpop.f32.mrb[22].mxu1  ;;  %v1458_v60 = vpop.f32.mrb[23].mxu0 }
 0x122   :  { %v889_v61 = vadd.f32 %v1456_v55, %v2471_v34  ;;  %v1459_v63 = vadd.f32 %v1458_v60, %v1457_v57  ;;  %v1522_v1 = vpop.f32.mrb[23].mxu1 }
 0x123   :  { %v1523_v2 = vadd.f32 %v1522_v1, %v1521_v59 }
 0x124   :  { %v2504_v3 = vadd.f32 %v1520_v58, %v889_v61  ;;  %v892_v4 = vadd.f32 %v1459_v63, %v2471_v34 }
 0x126   :  { %v2507_v5 = vadd.f32 %v1523_v2, %v892_v4  ;;  %v1460_v6 = vpop.f32.mrb[24].mxu0 }
 0x127   :  { %v1524_v7 = vpop.f32.mrb[24].mxu1  ;;  %v1461_v8 = vpop.f32.mrb[25].mxu0 }
 0x128   :  { %v1462_v9 = vadd.f32 %v1461_v8, %v1460_v6  ;;  %v1525_v10 = vpop.f32.mrb[25].mxu1  ;;  %v1463_v11 = vpop.f32.mrb[26].mxu0 }
 0x129   :  { %v1526_v12 = vadd.f32 %v1525_v10, %v1524_v7  ;;  %v1527_v13 = vpop.f32.mrb[26].mxu1  ;;  %v1464_v15 = vpop.f32.mrb[27].mxu0 }
 0x12a   :  { %v897_v17 = vadd.f32 %v1462_v9, %v2471_v34  ;;  %v1465_v18 = vadd.f32 %v1464_v15, %v1463_v11  ;;  %v1528_v19 = vpop.f32.mrb[27].mxu1 }
 0x12b   :  { %v1529_v20 = vadd.f32 %v1528_v19, %v1527_v13 }
 0x12c   :  { %v2510_v21 = vadd.f32 %v1526_v12, %v897_v17  ;;  %v900_v22 = vadd.f32 %v1465_v18, %v2471_v34 }
 0x12e   :  { %v2513_v23 = vadd.f32 %v1529_v20, %v900_v22  ;;  %v1466_v24 = vpop.f32.mrb[28].mxu0 }
 0x12f   :  { %v1530_v25 = vpop.f32.mrb[28].mxu1  ;;  %v1467_v26 = vpop.f32.mrb[29].mxu0 }
 0x130   :  { %v1468_v27 = vadd.f32 %v1467_v26, %v1466_v24  ;;  %v1531_v28 = vpop.f32.mrb[29].mxu1  ;;  %v1469_v29 = vpop.f32.mrb[30].mxu0 }
 0x131   :  { %v1532_v31 = vadd.f32 %v1531_v28, %v1530_v25  ;;  %v1533_v33 = vpop.f32.mrb[30].mxu1  ;;  %v1470_v35 = vpop.f32.mrb[31].mxu0 }
 0x132   :  { %v905_v36 = vadd.f32 %v1468_v27, %v2471_v34  ;;  %v1471_v37 = vadd.f32 %v1470_v35, %v1469_v29  ;;  %v1534_v38 = vpop.f32.mrb[31].mxu1 }
 0x133   :  { %v1535_v39 = vadd.f32 %v1534_v38, %v1533_v33 }
 0x134   :  { %v2516_v40 = vadd.f32 %v1532_v31, %v905_v36  ;;  %v908_v41 = vadd.f32 %v1471_v37, %v2471_v34 }
 0x136   :  { %v2519_v42 = vadd.f32 %v1535_v39, %v908_v41  ;;  %v1552_v43 = vpop.f32.mrb[32].mxu0 }
 0x137   :  { %v1616_v44 = vpop.f32.mrb[32].mxu1  ;;  %v1553_v45 = vpop.f32.mrb[33].mxu0 }
 0x138   :  { %v1554_v47 = vadd.f32 %v1553_v45, %v1552_v43  ;;  %v1617_v50 = vpop.f32.mrb[33].mxu1  ;;  %v1555_v52 = vpop.f32.mrb[34].mxu0 }
 0x139   :  { %v1618_v53 = vadd.f32 %v1617_v50, %v1616_v44  ;;  %v1619_v54 = vpop.f32.mrb[34].mxu1  ;;  %v1556_v55 = vpop.f32.mrb[35].mxu0 }
 0x13a   :  { %v1043_v56 = vadd.f32 %v1554_v47, %v2474_v46  ;;  %v1557_v57 = vadd.f32 %v1556_v55, %v1555_v52  ;;  %v1620_v58 = vpop.f32.mrb[35].mxu1 }
 0x13b   :  { %v1621_v59 = vadd.f32 %v1620_v58, %v1619_v54 }
 0x13c   :  { %v1046_v60 = vadd.f32 %v1557_v57, %v2477_v48  ;;  %v2523_v61 = vadd.f32 %v1618_v53, %v1043_v56 }
 0x13e   :  { %v1558_v34 = vpop.f32.mrb[36].mxu0  ;;  %v2525_v63 = vadd.f32 %v1621_v59, %v1046_v60 }
 0x13f   :  { %v1622_v1 = vpop.f32.mrb[36].mxu1  ;;  %v1559_v2 = vpop.f32.mrb[37].mxu0 }
 0x140   :  { %v1560_v4 = vadd.f32 %v1559_v2, %v1558_v34  ;;  %v1623_v6 = vpop.f32.mrb[37].mxu1  ;;  %v1561_v7 = vpop.f32.mrb[38].mxu0 }
 0x141   :  { %v1624_v8 = vadd.f32 %v1623_v6, %v1622_v1  ;;  %v1625_v9 = vpop.f32.mrb[38].mxu1  ;;  %v1562_v10 = vpop.f32.mrb[39].mxu0 }
 0x142   :  { %v1051_v46 = vadd.f32 %v1560_v4, %v2480_v62  ;;  %v1563_v11 = vadd.f32 %v1562_v10, %v1561_v7  ;;  %v1626_v12 = vpop.f32.mrb[39].mxu1 }
 0x143   :  { %v1627_v13 = vadd.f32 %v1626_v12, %v1625_v9 }
 0x144   :  { %v1054_v48 = vadd.f32 %v1563_v11, %v2483_v0  ;;  %v2529_v15 = vadd.f32 %v1624_v8, %v1051_v46 }
 0x146   :  { %v1564_v17 = vpop.f32.mrb[40].mxu0  ;;  %v2531_v18 = vadd.f32 %v1627_v13, %v1054_v48 }
 0x147   :  { %v1628_v19 = vpop.f32.mrb[40].mxu1  ;;  %v1565_v20 = vpop.f32.mrb[41].mxu0 }
 0x148   :  { %v1566_v22 = vadd.f32 %v1565_v20, %v1564_v17  ;;  %v1629_v24 = vpop.f32.mrb[41].mxu1  ;;  %v1567_v25 = vpop.f32.mrb[42].mxu0 }
 0x149   :  { %v1630_v26 = vadd.f32 %v1629_v24, %v1628_v19  ;;  %v1631_v27 = vpop.f32.mrb[42].mxu1  ;;  %v1568_v28 = vpop.f32.mrb[43].mxu0 }
 0x14a   :  { %v1059_v62 = vadd.f32 %v1566_v22, %v2486_v14  ;;  %v1569_v29 = vadd.f32 %v1568_v28, %v1567_v25  ;;  %v1632_v31 = vpop.f32.mrb[43].mxu1 }
 0x14b   :  { %v1633_v33 = vadd.f32 %v1632_v31, %v1631_v27 }
 0x14c   :  { %v1062_v0 = vadd.f32 %v1569_v29, %v2489_v16  ;;  %v2535_v35 = vadd.f32 %v1630_v26, %v1059_v62 }
 0x14e   :  { %v1570_v36 = vpop.f32.mrb[44].mxu0  ;;  %v2537_v37 = vadd.f32 %v1633_v33, %v1062_v0 }
 0x14f   :  { %v1634_v38 = vpop.f32.mrb[44].mxu1  ;;  %v1571_v39 = vpop.f32.mrb[45].mxu0 }
 0x150   :  { %v1572_v41 = vadd.f32 %v1571_v39, %v1570_v36  ;;  %v1635_v43 = vpop.f32.mrb[45].mxu1  ;;  %v1573_v44 = vpop.f32.mrb[46].mxu0 }
 0x151   :  { %v1636_v45 = vadd.f32 %v1635_v43, %v1634_v38  ;;  %v1637_v47 = vpop.f32.mrb[46].mxu1  ;;  %v1574_v50 = vpop.f32.mrb[47].mxu0 }
 0x152   :  { %v1067_v14 = vadd.f32 %v1572_v41, %v2492_v30  ;;  %v1575_v52 = vadd.f32 %v1574_v50, %v1573_v44  ;;  %v1638_v53 = vpop.f32.mrb[47].mxu1 }
 0x153   :  { %v1639_v54 = vadd.f32 %v1638_v53, %v1637_v47 }
 0x154   :  { %v1070_v16 = vadd.f32 %v1575_v52, %v2495_v32  ;;  %v2541_v55 = vadd.f32 %v1636_v45, %v1067_v14 }
 0x156   :  { %v1576_v56 = vpop.f32.mrb[48].mxu0  ;;  %v2543_v57 = vadd.f32 %v1639_v54, %v1070_v16 }
 0x157   :  { %v1640_v58 = vpop.f32.mrb[48].mxu1  ;;  %v1577_v59 = vpop.f32.mrb[49].mxu0 }
 0x158   :  { %v1578_v60 = vadd.f32 %v1577_v59, %v1576_v56  ;;  %v1641_v34 = vpop.f32.mrb[49].mxu1  ;;  %v1579_v1 = vpop.f32.mrb[50].mxu0 }
 0x159   :  { %v1642_v2 = vadd.f32 %v1641_v34, %v1640_v58  ;;  %v1643_v4 = vpop.f32.mrb[50].mxu1  ;;  %v1580_v6 = vpop.f32.mrb[51].mxu0 }
 0x15a   :  { %v1075_v30 = vadd.f32 %v1578_v60, %v2498_v49  ;;  %v1581_v7 = vadd.f32 %v1580_v6, %v1579_v1  ;;  %v1644_v8 = vpop.f32.mrb[51].mxu1 }
 0x15b   :  { %v1645_v9 = vadd.f32 %v1644_v8, %v1643_v4 }
 0x15c   :  { %v1078_v32 = vadd.f32 %v1581_v7, %v2501_v51  ;;  %v1172_v10 = vadd.f32 %v1642_v2, %v1075_v30 }
 0x15e   :  { %v1582_v46 = vpop.f32.mrb[52].mxu0  ;;  %v2547_v11 = vadd.f32 %v1645_v9, %v1078_v32 }
 0x15f   :  { %v1646_v12 = vpop.f32.mrb[52].mxu1  ;;  %v1583_v13 = vpop.f32.mrb[53].mxu0 }
 0x160   :  { %v1584_v48 = vadd.f32 %v1583_v13, %v1582_v46  ;;  %v1647_v17 = vpop.f32.mrb[53].mxu1  ;;  %v1585_v19 = vpop.f32.mrb[54].mxu0 }
 0x161   :  { %v1648_v20 = vadd.f32 %v1647_v17, %v1646_v12  ;;  %v1649_v22 = vpop.f32.mrb[54].mxu1  ;;  %v1586_v24 = vpop.f32.mrb[55].mxu0 }
 0x162   :  { %v1083_v25 = vadd.f32 %v1584_v48, %v2504_v3  ;;  %v1587_v49 = vadd.f32 %v1586_v24, %v1585_v19  ;;  %v1650_v26 = vpop.f32.mrb[55].mxu1 }
 0x163   :  { %v1651_v27 = vadd.f32 %v1650_v26, %v1649_v22 }
 0x164   :  { %v1086_v28 = vadd.f32 %v1587_v49, %v2507_v5  ;;  %v1180_v51 = vadd.f32 %v1648_v20, %v1083_v25 }
 0x166   :  { %v1588_v62 = vpop.f32.mrb[56].mxu0  ;;  %v1183_v29 = vadd.f32 %v1651_v27, %v1086_v28 }
 0x167   :  { %v1652_v31 = vpop.f32.mrb[56].mxu1  ;;  %v1589_v33 = vpop.f32.mrb[57].mxu0 }
 0x168   :  { %v1590_v0 = vadd.f32 %v1589_v33, %v1588_v62  ;;  %v1653_v36 = vpop.f32.mrb[57].mxu1  ;;  %v1591_v38 = vpop.f32.mrb[58].mxu0 }
 0x169   :  { %v1654_v39 = vadd.f32 %v1653_v36, %v1652_v31  ;;  %v1655_v41 = vpop.f32.mrb[58].mxu1  ;;  %v1592_v43 = vpop.f32.mrb[59].mxu0 }
 0x16a   :  { %v1091_v44 = vadd.f32 %v1590_v0, %v2510_v21  ;;  %v1593_v45 = vadd.f32 %v1592_v43, %v1591_v38  ;;  %v1656_v3 = vpop.f32.mrb[59].mxu1 }
 0x16b   :  { %v1657_v47 = vadd.f32 %v1656_v3, %v1655_v41 }
 0x16c   :  { %v1094_v50 = vadd.f32 %v1593_v45, %v2513_v23  ;;  %v1188_v14 = vadd.f32 %v1654_v39, %v1091_v44 }
 0x16e   :  { %v1594_v5 = vpop.f32.mrb[60].mxu0  ;;  %v2553_v52 = vadd.f32 %v1657_v47, %v1094_v50 }
 0x16f   :  { %v1658_v53 = vpop.f32.mrb[60].mxu1  ;;  %v1595_v54 = vpop.f32.mrb[61].mxu0 }
 0x170   :  { %v1596_v16 = vadd.f32 %v1595_v54, %v1594_v5  ;;  %v1659_v56 = vpop.f32.mrb[61].mxu1  ;;  %v1597_v58 = vpop.f32.mrb[62].mxu0 }
 0x171   :  { %v1660_v59 = vadd.f32 %v1659_v56, %v1658_v53  ;;  %v1661_v60 = vpop.f32.mrb[62].mxu1  ;;  %v1598_v34 = vpop.f32.mrb[63].mxu0 }
 0x172   :  { %v1099_v1 = vadd.f32 %v1596_v16, %v2516_v40  ;;  %v1599_v21 = vadd.f32 %v1598_v34, %v1597_v58  ;;  %v1662_v2 = vpop.f32.mrb[63].mxu1 }
 0x173   :  { %v1663_v4 = vadd.f32 %v1662_v2, %v1661_v60 }
 0x174   :  { %v1102_v6 = vadd.f32 %v1599_v21, %v2519_v42  ;;  %v1196_v23 = vadd.f32 %v1660_v59, %v1099_v1 }
 0x176   :  { %v1698_v30 = vpop.f32.mrb[64].mxu0  ;;  %v1199_v7 = vadd.f32 %v1663_v4, %v1102_v6 }
 0x177   :  { %v1245_v8 = vadd.f32 %v1698_v30, %v2529_v15  ;;  %v1706_v9 = vpop.f32.mrb[64].mxu1  ;;  %v1236_v32 = vpop.f32.mrb[65].mxu0 }
 0x178   :  { %v1277_v46 = vadd.f32 %v1706_v9, %v1180_v51  ;;  %v1237_v12 = vadd.f32 %v1236_v32, %v2523_v61  ;;  %v1268_v13 = vpop.f32.mrb[65].mxu1  ;;  %v1699_v48 = vpop.f32.mrb[66].mxu0 }
 0x179   :  { %v1301_v17 = vmax.f32 %v1245_v8, 0.0  ;;  %v1269_v19 = vadd.f32 %v1268_v13, %v1172_v10  ;;  %v1248_v40 = vadd.f32 %v1699_v48, %v2531_v18  ;;  %v1707_v20 = vpop.f32.mrb[66].mxu1  ;;  %v1239_v22 = vpop.f32.mrb[67].mxu0 }
 0x17a   :  { %v1309_v24 = vmax.f32 %v1277_v46, 0.0  ;;  %v1299_v42 = vmax.f32 %v1237_v12, 0.0  ;;  %v1280_v25 = vadd.f32 %v1707_v20, %v1183_v29  ;;  %v1240_v49 = vadd.f32 %v1239_v22, %v2525_v63  ;;  %v1271_v26 = vpop.f32.mrb[67].mxu1 }
 0x17b   :  { %1317 = vst [vmem:[%s2618_s3 + $0x10] sm:$0xff] %v1301_v17  ;;  %v1307_v15 = vmax.f32 %v1269_v19, 0.0  ;;  %v1302_v61 = vmax.f32 %v1248_v40, 0.0  ;;  %v1272_v27 = vadd.f32 %v1271_v26, %v2547_v11 }
 0x17c   :  { %1325 = vst [vmem:[%s2618_s3 + $0x50] sm:$0xff] %v1309_v24  ;;  %1315 = vst [vmem:[%s2618_s3] sm:$0xff] %v1299_v42  ;;  %v1310_v18 = vmax.f32 %v1280_v25, 0.0  ;;  %v1300_v10 = vmax.f32 %v1240_v49, 0.0 }
 0x17d   :  { %1323 = vst [vmem:[%s2618_s3 + $0x40] sm:$0xff] %v1307_v15  ;;  %1318 = vst [vmem:[%s2618_s3 + $0x18] sm:$0xff] %v1302_v61  ;;  %v1308_v63 = vmax.f32 %v1272_v27, 0.0 }
 0x17e   :  { %1326 = vst [vmem:[%s2618_s3 + $0x58] sm:$0xff] %v1310_v18  ;;  %1316 = vst [vmem:[%s2618_s3 + $0x8] sm:$0xff] %v1300_v10  ;;  %v1702_v11 = vpop.f32.mrb[68].mxu0 }
 0x17f   :  { %1324 = vst [vmem:[%s2618_s3 + $0x48] sm:$0xff] %v1308_v63  ;;  %v1261_v28 = vadd.f32 %v1702_v11, %v2541_v55  ;;  %v1710_v51 = vpop.f32.mrb[68].mxu1  ;;  %v1252_v62 = vpop.f32.mrb[69].mxu0 }
 0x180   :  { %v1293_v29 = vadd.f32 %v1710_v51, %v1196_v23  ;;  %v1253_v31 = vadd.f32 %v1252_v62, %v2535_v35  ;;  %v1284_v33 = vpop.f32.mrb[69].mxu1  ;;  %v1703_v0 = vpop.f32.mrb[70].mxu0 }
 0x181   :  { %v1305_v36 = vmax.f32 %v1261_v28, 0.0  ;;  %v1285_v38 = vadd.f32 %v1284_v33, %v1188_v14  ;;  %v1264_v39 = vadd.f32 %v1703_v0, %v2543_v57  ;;  %v1711_v41 = vpop.f32.mrb[70].mxu1  ;;  %v1255_v43 = vpop.f32.mrb[71].mxu0 }
 0x182   :  { %v1313_v44 = vmax.f32 %v1293_v29, 0.0  ;;  %v1303_v45 = vmax.f32 %v1253_v31, 0.0  ;;  %v1296_v3 = vadd.f32 %v1711_v41, %v1199_v7  ;;  %v1256_v47 = vadd.f32 %v1255_v43, %v2537_v37  ;;  %v1287_v50 = vpop.f32.mrb[71].mxu1 }
 0x183   :  { %1321 = vst [vmem:[%s2618_s3 + $0x30] sm:$0xff] %v1305_v36  ;;  %v1311_v55 = vmax.f32 %v1285_v38, 0.0  ;;  %v1306_v35 = vmax.f32 %v1264_v39, 0.0  ;;  %v1288_v5 = vadd.f32 %v1287_v50, %v2553_v52 }
 0x184   :  { %1329 = vst [vmem:[%s2618_s3 + $0x70] sm:$0xff] %v1313_v44  ;;  %1319 = vst [vmem:[%s2618_s3 + $0x20] sm:$0xff] %v1303_v45  ;;  %v1314_v57 = vmax.f32 %v1296_v3, 0.0  ;;  %v1304_v14 = vmax.f32 %v1256_v47, 0.0 }
 0x185   :  { %1327 = vst [vmem:[%s2618_s3 + $0x60] sm:$0xff] %v1311_v55  ;;  %1322 = vst [vmem:[%s2618_s3 + $0x38] sm:$0xff] %v1306_v35  ;;  %v1312_v37 = vmax.f32 %v1288_v5, 0.0 }
 0x186   :  { %1330 = vst [vmem:[%s2618_s3 + $0x78] sm:$0xff] %v1314_v57  ;;  %1320 = vst [vmem:[%s2618_s3 + $0x28] sm:$0xff] %v1304_v14 }
 0x187   :  { %1328 = vst [vmem:[%s2618_s3 + $0x68] sm:$0xff] %v1312_v37 }

// kernel: ssd_head_forward.11
= control target key start
LH: loop header
LB: loop body
LE: loop exit
PB: predicated region body
PF: predicated region fallthrough
CT: control target
= control target key end

     0   :  { %s5132_s12 = smov 0   ;;  %s6619_s0 = inlined_call_operand.vmem [shape: f32[512,2304], index: 0, kind: input, shape index: {}]   ;;  %s6620_s1 = inlined_call_operand.vmem [shape: bf16[2304,128], index: 1, kind: input, shape index: {}]   ;;  %s6621_s2 = inlined_call_operand.vmem [shape: f32[1,128], index: 2, kind: input, shape index: {}]   ;;  %s6622_s3 = inlined_call_operand.vmem [shape: f32[512,128], index: 3, kind: output, shape index: {}]  }
   0x1 LB: > { %s3770_s13 = sadd.s32 4294967295, %s5110_s12   ;;  %p3774_p0 = scmp.ge.s32.totalorder %s5110_s12, 1  ;;  %s5110_s12 = sphi %s5132_s12, %s13_s12  }
   0x2   : > { %p139_p1 = scmp.lt.s32.totalorder %s5110_s12, 3 }
   0x4   : > { %p140_p2 = pnand %p3774_p0, %p139_p1 }
   0x5   : > { %v4959_v0 = vld [vmem:[%s6620_s1 + $0x40] sm:$0xff] (!%p140_p2)   ;;  %s3775_s16 = sshll.u32 (!%p140_p2), %s3770_s13, 5  ;;  %v4961_v2 = vld [vmem:[%s6620_s1 + $0x48] sm:$0xff] (!%p140_p2)   ;;  %v4963_v4 = vld [vmem:[%s6620_s1 + $0x50] sm:$0xff] (!%p140_p2)  }
   0x6   : > { %143 = sbr.rel (%p140_p2) target bundleno = 830 (0x33e), region = 32  ;;  %v4960_v1 = vld [vmem:[%s6620_s1] sm:$0xff] (!%p140_p2)   ;;  %p165_p3 = scmp.lt.s32.totalorder (!%p140_p2), %s3775_s16, 63  ;;  %3926 = vmatprep.subr.bf16.mxu0 (!%p140_p2), %v4959_v0  ;;  %4934 = vmatprep.subr.bf16.mxu1 (!%p140_p2), %v4959_v0  ;;  %v4962_v3 = vld [vmem:[%s6620_s1 + $0x8] sm:$0xff] (!%p140_p2)   ;;  %v4964_v5 = vld [vmem:[%s6620_s1 + $0x10] sm:$0xff] (!%p140_p2)  }
   0x7   : > { %3927 = vmatpush3.bf16.msra.mxu0 (!%p140_p2), %v4960_v1  ;;  %4942 = vmatpush3.bf16.msra.mxu1 (!%p140_p2), %v4960_v1  ;;  %v4965_v6 = vld [vmem:[%s6620_s1 + $0x58] sm:$0xff] (!%p140_p2)   ;;  %v4967_v8 = vld [vmem:[%s6620_s1 + $0x60] sm:$0xff] (!%p140_p2)   ;;  %v4969_v10 = vld [vmem:[%s6620_s1 + $0x68] sm:$0xff] (!%p140_p2)  }
   0x8   : > { %3928 = vmatprep.subr.bf16.mxu0 (!%p140_p2), %v4961_v2  ;;  %4935 = vmatprep.subr.bf16.mxu1 (!%p140_p2), %v4961_v2  ;;  %v4966_v7 = vld [vmem:[%s6620_s1 + $0x18] sm:$0xff] (!%p140_p2)   ;;  %v4968_v9 = vld [vmem:[%s6620_s1 + $0x20] sm:$0xff] (!%p140_p2)   ;;  %v4970_v17 = vld [vmem:[%s6620_s1 + $0x28] sm:$0xff] (!%p140_p2)  }
   0x9   : > { %v4971_v18 = vld [vmem:[%s6620_s1 + $0x70] sm:$0xff] (!%p140_p2)   ;;  %v4973_v20 = vld [vmem:[%s6620_s1 + $0x78] sm:$0xff] (!%p140_p2)   ;;  %v4975_v26 = vld [vmem:[%s6620_s1 + $0xc0] sm:$0xff] (!%p140_p2)  }
   0xa   : > { %v4972_v19 = vld [vmem:[%s6620_s1 + $0x30] sm:$0xff] (!%p140_p2)   ;;  %v4974_v21 = vld [vmem:[%s6620_s1 + $0x38] sm:$0xff] (!%p140_p2)   ;;  %v4977_v27 = vld [vmem:[%s6620_s1 + $0x140] sm:$0xff] (!%p140_p2)  }
   0xb   : > { %3929 = vmatpush3.bf16.msra.mxu0 (!%p140_p2), %v4962_v3  ;;  %4943 = vmatpush3.bf16.msra.mxu1 (!%p140_p2), %v4962_v3  ;;  %v4976_v34 = vld [vmem:[%s6620_s1 + $0x80] sm:$0xff] (!%p140_p2)   ;;  %v4979_v36 = vld [vmem:[%s6620_s1 + $0xc8] sm:$0xff] (!%p140_p2)   ;;  %v4983_v50 = vld [vmem:[%s6620_s1 + $0xd0] sm:$0xff] (!%p140_p2)  }
   0xc   : > { %3930 = vmatprep.subr.bf16.mxu0 (!%p140_p2), %v4963_v4  ;;  %4936 = vmatprep.subr.bf16.mxu1 (!%p140_p2), %v4963_v4  ;;  %v4978_v35 = vld [vmem:[%s6620_s1 + $0x100] sm:$0xff] (!%p140_p2)   ;;  %v4981_v39 = vld [vmem:[%s6620_s1 + $0x148] sm:$0xff] (!%p140_p2)   ;;  %v4985_v51 = vld [vmem:[%s6620_s1 + $0x150] sm:$0xff] (!%p140_p2)  }
   0xd   : > { %s6624_s16 = smov (!%p165_p3, %s3775_s16), 63  ;;  %v4980_v44 = vld [vmem:[%s6620_s1 + $0x88] sm:$0xff]   ;;  %v4984_v54 = vld [vmem:[%s6620_s1 + $0x90] sm:$0xff]   ;;  %v4987_v58 = vld [vmem:[%s6620_s1 + $0xd8] sm:$0xff]  }
   0xe   : > { %s4950_s29 = smul.u32 144, %s6624_s16  ;;  %v4982_v45 = vld [vmem:[%s6620_s1 + $0x108] sm:$0xff]   ;;  %v4986_v57 = vld [vmem:[%s6620_s1 + $0x110] sm:$0xff]   ;;  %v4989_v61 = vld [vmem:[%s6620_s1 + $0x158] sm:$0xff]  }
   0xf   : > { %3931 = vmatpush3.bf16.msra.mxu0 %v4964_v5  ;;  %4944 = vmatpush3.bf16.msra.mxu1 %v4964_v5  ;;  %v4988_v4 = vld [vmem:[%s6620_s1 + $0x98] sm:$0xff]  }
  0x10   : > { %3932 = vmatprep.subr.bf16.mxu0 %v4965_v6  ;;  %4937 = vmatprep.subr.bf16.mxu1 %v4965_v6  ;;  %s5173_s9 = scalar_lea.vmem %s6619_s0, %s4950_s29  ;;  %v4990_v5 = vld [vmem:[%s6620_s1 + $0x118] sm:$0xff]  }
  0x11   : > { %v179_v11 = vld [vmem:[%s5173_s9 + $0x8] sm:$0xff]  ;;  %v197_v12 = vld [vmem:[%s5173_s9 + $0x98] sm:$0xff]  ;;  %v178_v22 = vld [vmem:[%s5173_s9] sm:$0xff] }
  0x12   : > { %v467_v13 = vld [vmem:[%s5173_s9 + $0x908] sm:$0xff]  ;;  %v755_v14 = vpack.c.bf16 %v197_v12, %v179_v11  ;;  %v485_v15 = vld [vmem:[%s5173_s9 + $0x998] sm:$0xff]  ;;  %v196_v23 = vld [vmem:[%s5173_s9 + $0x90] sm:$0xff] }
  0x13   : > { %3933 = vmatpush3.bf16.msra.mxu0 %v4966_v7  ;;  %4945 = vmatpush3.bf16.msra.mxu1 %v4966_v7  ;;  %v899_v16 = vpack.c.bf16 %v485_v15, %v467_v13  ;;  %v466_v24 = vld [vmem:[%s5173_s9 + $0x900] sm:$0xff]  ;;  %v484_v25 = vld [vmem:[%s5173_s9 + $0x990] sm:$0xff]  ;;  %v215_v28 = vld [vmem:[%s5173_s9 + $0x128] sm:$0xff]  ;;  %v754_v32 = vpack.c.bf16 %v196_v23, %v178_v22 }
  0x14   : > { %3934 = vmatprep.subr.bf16.mxu0 %v4967_v8  ;;  %4938 = vmatprep.subr.bf16.mxu1 %v4967_v8  ;;  %v233_v29 = vld [vmem:[%s5173_s9 + $0x1b8] sm:$0xff]  ;;  %v503_v30 = vld [vmem:[%s5173_s9 + $0xa28] sm:$0xff]  ;;  %v898_v33 = vpack.c.bf16 %v484_v25, %v466_v24  ;;  %v214_v40 = vld [vmem:[%s5173_s9 + $0x120] sm:$0xff] }
  0x15   : > { %2233 = vmatprep.mubr.bf16.mxu0 %v755_v14  ;;  %2297 = vmatprep.mubr.bf16.mxu1 %v899_v16  ;;  %v521_v31 = vld [vmem:[%s5173_s9 + $0xab8] sm:$0xff]  ;;  %v773_v37 = vpack.c.bf16 %v233_v29, %v215_v28  ;;  %v232_v41 = vld [vmem:[%s5173_s9 + $0x1b0] sm:$0xff]  ;;  %v502_v42 = vld [vmem:[%s5173_s9 + $0xa20] sm:$0xff] }
  0x16   : > { %v917_v38 = vpack.c.bf16 %v521_v31, %v503_v30  ;;  %v520_v43 = vld [vmem:[%s5173_s9 + $0xab0] sm:$0xff]  ;;  %v251_v46 = vld [vmem:[%s5173_s9 + $0x248] sm:$0xff]  ;;  %v269_v47 = vld [vmem:[%s5173_s9 + $0x2d8] sm:$0xff]  ;;  %v772_v52 = vpack.c.bf16 %v232_v41, %v214_v40 }
  0x17   : > { %3935 = vmatpush3.bf16.msra.mxu0 %v4968_v9  ;;  %4946 = vmatpush3.bf16.msra.mxu1 %v4968_v9  ;;  %v539_v48 = vld [vmem:[%s5173_s9 + $0xb48] sm:$0xff]  ;;  %v557_v49 = vld [vmem:[%s5173_s9 + $0xbd8] sm:$0xff]  ;;  %v916_v53 = vpack.c.bf16 %v520_v43, %v502_v42  ;;  %v791_v55 = vpack.c.bf16 %v269_v47, %v251_v46  ;;  %v250_v59 = vld [vmem:[%s5173_s9 + $0x240] sm:$0xff] }
  0x18   : > { %3936 = vmatprep.subr.bf16.mxu0 %v4969_v10  ;;  %4939 = vmatprep.subr.bf16.mxu1 %v4969_v10  ;;  %v935_v56 = vpack.c.bf16 %v557_v49, %v539_v48  ;;  %v268_v60 = vld [vmem:[%s5173_s9 + $0x2d0] sm:$0xff]  ;;  %v538_v62 = vld [vmem:[%s5173_s9 + $0xb40] sm:$0xff]  ;;  %v287_v0 = vld [vmem:[%s5173_s9 + $0x368] sm:$0xff] }
  0x19   : > { %v556_v63 = vld [vmem:[%s5173_s9 + $0xbd0] sm:$0xff]  ;;  %v305_v1 = vld [vmem:[%s5173_s9 + $0x3f8] sm:$0xff]  ;;  %v575_v2 = vld [vmem:[%s5173_s9 + $0xc68] sm:$0xff]  ;;  %v790_v6 = vpack.c.bf16 %v268_v60, %v250_v59 }
  0x1a   : > { %v593_v3 = vld [vmem:[%s5173_s9 + $0xcf8] sm:$0xff]  ;;  %v934_v7 = vpack.c.bf16 %v556_v63, %v538_v62  ;;  %v4991_v8 = vld [vmem:[%s6620_s1 + $0xe0] sm:$0xff]   ;;  %v809_v9 = vpack.c.bf16 %v305_v1, %v287_v0  ;;  %v304_v14 = vld [vmem:[%s5173_s9 + $0x3f0] sm:$0xff] }
  0x1b   : > { %3937 = vmatpush3.bf16.msra.mxu0 %v4970_v17  ;;  %4947 = vmatpush3.bf16.msra.mxu1 %v4970_v17  ;;  %v953_v10 = vpack.c.bf16 %v593_v3, %v575_v2  ;;  %v4992_v11 = vld [vmem:[%s6620_s1 + $0xa0] sm:$0xff]   ;;  %v592_v17 = vld [vmem:[%s5173_s9 + $0xcf0] sm:$0xff]  ;;  %v4995_v22 = vld [vmem:[%s6620_s1 + $0xe8] sm:$0xff]  }
  0x1c   : > { %3938 = vmatprep.subr.bf16.mxu0 %v4971_v18  ;;  %4940 = vmatprep.subr.bf16.mxu1 %v4971_v18  ;;  %v4993_v12 = vld [vmem:[%s6620_s1 + $0x160] sm:$0xff]   ;;  %v323_v18 = vld [vmem:[%s5173_s9 + $0x488] sm:$0xff]  ;;  %v340_v31 = vld [vmem:[%s5173_s9 + $0x510] sm:$0xff] }
  0x1d   : > { %v286_v13 = vld [vmem:[%s5173_s9 + $0x360] sm:$0xff]  ;;  %v4996_v23 = vld [vmem:[%s6620_s1 + $0xa8] sm:$0xff]   ;;  %v5001_v40 = vld [vmem:[%s6620_s1 + $0x170] sm:$0xff]  }
  0x1e   : > { %v4994_v15 = vld [vmem:[%s6620_s1 + $0x120] sm:$0xff]   ;;  %v808_v24 = vpack.c.bf16 %v304_v14, %v286_v13  ;;  %v4998_v29 = vld [vmem:[%s6620_s1 + $0x128] sm:$0xff]   ;;  %v5002_v43 = vld [vmem:[%s6620_s1 + $0x130] sm:$0xff]  }
  0x1f   : > { %3939 = vmatpush3.bf16.msra.mxu0 %v4972_v19  ;;  %4948 = vmatpush3.bf16.msra.mxu1 %v4972_v19  ;;  %v574_v16 = vld [vmem:[%s5173_s9 + $0xc60] sm:$0xff]  ;;  %v341_v19 = vld [vmem:[%s5173_s9 + $0x518] sm:$0xff]  ;;  %v376_v47 = vld [vmem:[%s5173_s9 + $0x630] sm:$0xff] }
  0x20   : > { %3940 = vmatprep.subr.bf16.mxu0 %v4973_v20  ;;  %4941 = vmatprep.subr.bf16.mxu1 %v4973_v20  ;;  %v611_v20 = vld [vmem:[%s5173_s9 + $0xd88] sm:$0xff]  ;;  %v952_v25 = vpack.c.bf16 %v592_v17, %v574_v16  ;;  %v322_v30 = vld [vmem:[%s5173_s9 + $0x480] sm:$0xff]  ;;  %v664_v49 = vld [vmem:[%s5173_s9 + $0xf30] sm:$0xff] }
  0x21   : > { %v826_v41 = vpack.c.bf16 %v340_v31, %v322_v30  ;;  %v358_v46 = vld [vmem:[%s5173_s9 + $0x5a0] sm:$0xff]  ;;  %v412_v0 = vld [vmem:[%s5173_s9 + $0x750] sm:$0xff]  ;;  %v181_v16 = vld [vmem:[%s5173_s9 + $0x18] sm:$0xff] }
  0x22   : > { %v646_v48 = vld [vmem:[%s5173_s9 + $0xea0] sm:$0xff]  ;;  %v700_v2 = vld [vmem:[%s5173_s9 + $0x1050] sm:$0xff]  ;;  %v199_v17 = vld [vmem:[%s5173_s9 + $0xa8] sm:$0xff] }
  0x23   : > { %3941 = vmatpush3.bf16.msra.mxu0 %v4974_v21  ;;  %4949 = vmatpush3.bf16.msra.mxu1 %v4974_v21  ;;  %v629_v21 = vld [vmem:[%s5173_s9 + $0xe18] sm:$0xff]  ;;  %v988_v59 = vpack.c.bf16 %v664_v49, %v646_v48  ;;  %v5007_v62 = vld [vmem:[%s6620_s1 + $0x1c0] sm:$0xff]   ;;  %v448_v13 = vld [vmem:[%s5173_s9 + $0x870] sm:$0xff] }
  0x24   : > { %4038 = vmatprep.subr.bf16.mxu1 %v4975_v26  ;;  %4150 = vmatprep.subr.bf16.mxu0 %v4977_v27  ;;  %v4997_v26 = vld [vmem:[%s6620_s1 + $0x168] sm:$0xff]   ;;  %v827_v27 = vpack.c.bf16 %v341_v19, %v323_v18  ;;  %v971_v28 = vpack.c.bf16 %v629_v21, %v611_v20  ;;  %v394_v63 = vld [vmem:[%s5173_s9 + $0x6c0] sm:$0xff]  ;;  %v201_v19 = vld [vmem:[%s5173_s9 + $0xb8] sm:$0xff] }
  0x25   : > { %v682_v1 = vld [vmem:[%s5173_s9 + $0xfc0] sm:$0xff]  ;;  %v183_v18 = vld [vmem:[%s5173_s9 + $0x28] sm:$0xff]  ;;  %v237_v31 = vld [vmem:[%s5173_s9 + $0x1d8] sm:$0xff] }
  0x26   : > { %2234 = vmatmul.mubr.bf16.vlgmr.msra.gmra.mrb[0].mxu0 %v754_v32  ;;  %2298 = vmatmul.mubr.bf16.vlgmr.msra.gmra.mrb[0].mxu1 %v898_v33  ;;  %v610_v32 = vld [vmem:[%s5173_s9 + $0xd80] sm:$0xff]  ;;  %v628_v33 = vld [vmem:[%s5173_s9 + $0xe10] sm:$0xff]  ;;  %v219_v30 = vld [vmem:[%s5173_s9 + $0x148] sm:$0xff] }
  0x27   : > { %4039 = vmatpush3.bf16.msra.mxu1 %v4976_v34  ;;  %4151 = vmatpush3.bf16.msra.mxu0 %v4978_v35  ;;  %v359_v34 = vld [vmem:[%s5173_s9 + $0x5a8] sm:$0xff]  ;;  %v377_v35 = vld [vmem:[%s5173_s9 + $0x638] sm:$0xff]  ;;  %v970_v42 = vpack.c.bf16 %v628_v33, %v610_v32  ;;  %v5009_v3 = vld [vmem:[%s6620_s1 + $0x240] sm:$0xff]  }
  0x28   : > { %2241 = vmatprep.mubr.bf16.mxu0 %v773_v37  ;;  %2305 = vmatprep.mubr.bf16.mxu1 %v917_v38  ;;  %v665_v37 = vld [vmem:[%s5173_s9 + $0xf38] sm:$0xff]  ;;  %v4999_v38 = vld [vmem:[%s6620_s1 + $0xf0] sm:$0xff]   ;;  %v718_v14 = vld [vmem:[%s5173_s9 + $0x10e0] sm:$0xff] }
  0x29   : > { %4040 = vmatprep.subr.bf16.mxu1 %v4979_v36  ;;  %4152 = vmatprep.subr.bf16.mxu0 %v4981_v39  ;;  %v647_v36 = vld [vmem:[%s5173_s9 + $0xea8] sm:$0xff]  ;;  %v5000_v39 = vld [vmem:[%s6620_s1 + $0xb0] sm:$0xff]  }
  0x2a   : > { %v5012_v48 = vld [vmem:[%s6620_s1 + $0x188] sm:$0xff]  }
  0x2b   : > { %4041 = vmatpush3.bf16.msra.mxu1 %v4980_v44  ;;  %4153 = vmatpush3.bf16.msra.mxu0 %v4982_v45  ;;  %v845_v44 = vpack.c.bf16 %v377_v35, %v359_v34  ;;  %v989_v45 = vpack.c.bf16 %v665_v37, %v647_v36  ;;  %v5008_v34 = vld [vmem:[%s6620_s1 + $0x180] sm:$0xff]   ;;  %v777_v37 = vpack.c.bf16 %v237_v31, %v219_v30  ;;  %v5014_v49 = vld [vmem:[%s6620_s1 + $0x208] sm:$0xff]  }
  0x2c   : > { %4042 = vmatprep.subr.bf16.mxu1 %v4983_v50  ;;  %4154 = vmatprep.subr.bf16.mxu0 %v4985_v51  ;;  %v395_v50 = vld [vmem:[%s5173_s9 + $0x6c8] sm:$0xff]  ;;  %v413_v51 = vld [vmem:[%s5173_s9 + $0x758] sm:$0xff]  ;;  %v5010_v35 = vld [vmem:[%s6620_s1 + $0x200] sm:$0xff]  }
  0x2d   : > { %v863_v60 = vpack.c.bf16 %v413_v51, %v395_v50  ;;  %v5015_v50 = vld [vmem:[%s6620_s1 + $0x1d0] sm:$0xff]   ;;  %v342_v30 = vld [vmem:[%s5173_s9 + $0x520] sm:$0xff]  ;;  %v5030_v31 = vld [vmem:[%s6620_s1 + $0x228] sm:$0xff]  }
  0x2e   : > { %2242 = vmatmul.mubr.bf16.gmra.mrb[4].mxu0 %v772_v52  ;;  %2306 = vmatmul.mubr.bf16.gmra.mrb[4].mxu1 %v916_v53  ;;  %v683_v52 = vld [vmem:[%s5173_s9 + $0xfc8] sm:$0xff]  ;;  %v701_v53 = vld [vmem:[%s5173_s9 + $0x1058] sm:$0xff]  ;;  %v5017_v51 = vld [vmem:[%s6620_s1 + $0x250] sm:$0xff]  }
  0x2f   : > { %2249 = vmatprep.mubr.bf16.mxu0 %v791_v55  ;;  %2313 = vmatprep.mubr.bf16.mxu1 %v935_v56  ;;  %v5004_v55 = vld [vmem:[%s6620_s1 + $0xb8] sm:$0xff]  }
  0x30   : > { %4043 = vmatpush3.bf16.msra.mxu1 %v4984_v54  ;;  %4155 = vmatpush3.bf16.msra.mxu0 %v4986_v57  ;;  %v5003_v54 = vld [vmem:[%s6620_s1 + $0xf8] sm:$0xff]  }
  0x31   : > { %4044 = vmatprep.subr.bf16.mxu1 %v4987_v58  ;;  %4156 = vmatprep.subr.bf16.mxu0 %v4989_v61  ;;  %v5005_v56 = vld [vmem:[%s6620_s1 + $0x178] sm:$0xff]   ;;  %v844_v58 = vpack.c.bf16 %v376_v47, %v358_v46  ;;  %v1007_v61 = vpack.c.bf16 %v701_v53, %v683_v52  ;;  %v255_v46 = vld [vmem:[%s5173_s9 + $0x268] sm:$0xff] }
  0x32   : > { %v5006_v57 = vld [vmem:[%s6620_s1 + $0x138] sm:$0xff]  }
  0x33   : > { %v273_v47 = vld [vmem:[%s5173_s9 + $0x2f8] sm:$0xff] }
  0x34   : > { %4045 = vmatpush3.bf16.msra.mxu1 %v4988_v4  ;;  %4157 = vmatpush3.bf16.msra.mxu0 %v4990_v5  ;;  %v431_v4 = vld [vmem:[%s5173_s9 + $0x7e8] sm:$0xff]  ;;  %v449_v5 = vld [vmem:[%s5173_s9 + $0x878] sm:$0xff] }
  0x35   : > { %4046 = vmatprep.subr.bf16.mxu1 %v4991_v8  ;;  %4158 = vmatprep.subr.bf16.mxu0 %v4993_v12  ;;  %v862_v8 = vpack.c.bf16 %v412_v0, %v394_v63  ;;  %v430_v12 = vld [vmem:[%s5173_s9 + $0x7e0] sm:$0xff]  ;;  %v272_v63 = vld [vmem:[%s5173_s9 + $0x2f0] sm:$0xff]  ;;  %v289_v0 = vld [vmem:[%s5173_s9 + $0x378] sm:$0xff] }
  0x36   : > { %2250 = vmatmul.mubr.bf16.gmra.mrb[8].mxu0 %v790_v6  ;;  %2314 = vmatmul.mubr.bf16.gmra.mrb[8].mxu1 %v934_v7  ;;  %v719_v6 = vld [vmem:[%s5173_s9 + $0x10e8] sm:$0xff]  ;;  %v737_v7 = vld [vmem:[%s5173_s9 + $0x1178] sm:$0xff]  ;;  %v880_v20 = vpack.c.bf16 %v448_v13, %v430_v12  ;;  %v5025_v12 = vld [vmem:[%s6620_s1 + $0x260] sm:$0xff]  }
  0x37   : > { %2257 = vmatprep.mubr.bf16.mxu0 %v809_v9  ;;  %2321 = vmatprep.mubr.bf16.mxu1 %v953_v10  ;;  %v1006_v9 = vpack.c.bf16 %v700_v2, %v682_v1  ;;  %v881_v10 = vpack.c.bf16 %v449_v5, %v431_v4  ;;  %v307_v1 = vld [vmem:[%s5173_s9 + $0x408] sm:$0xff]  ;;  %v5020_v4 = vld [vmem:[%s6620_s1 + $0x198] sm:$0xff]   ;;  %v5026_v13 = vld [vmem:[%s6620_s1 + $0x220] sm:$0xff]  }
  0x38   : > { %4047 = vmatpush3.bf16.msra.mxu1 %v4992_v11  ;;  %4159 = vmatpush3.bf16.msra.mxu0 %v4994_v15  ;;  %v1025_v11 = vpack.c.bf16 %v737_v7, %v719_v6  ;;  %v736_v15 = vld [vmem:[%s5173_s9 + $0x1170] sm:$0xff]  ;;  %v291_v2 = vld [vmem:[%s5173_s9 + $0x388] sm:$0xff]  ;;  %v5022_v5 = vld [vmem:[%s6620_s1 + $0x218] sm:$0xff]  }
  0x39   : > { %4048 = vmatprep.subr.bf16.mxu1 %v4995_v22  ;;  %4160 = vmatprep.subr.bf16.mxu0 %v4997_v26  ;;  %v1024_v21 = vpack.c.bf16 %v736_v15, %v718_v14  ;;  %v757_v22 = vpack.c.bf16 %v199_v17, %v181_v16  ;;  %v182_v26 = vld [vmem:[%s5173_s9 + $0x20] sm:$0xff]  ;;  %v288_v14 = vld [vmem:[%s5173_s9 + $0x370] sm:$0xff] }
  0x3a   : > { %v306_v15 = vld [vmem:[%s5173_s9 + $0x400] sm:$0xff]  ;;  %v308_v17 = vld [vmem:[%s5173_s9 + $0x410] sm:$0xff] }
  0x3b   : > { %v290_v16 = vld [vmem:[%s5173_s9 + $0x380] sm:$0xff] }
  0x3c   : > { %4049 = vmatpush3.bf16.msra.mxu1 %v4996_v23  ;;  %4161 = vmatpush3.bf16.msra.mxu0 %v4998_v29  ;;  %v759_v23 = vpack.c.bf16 %v201_v19, %v183_v18  ;;  %v235_v29 = vld [vmem:[%s5173_s9 + $0x1c8] sm:$0xff]  ;;  %v325_v18 = vld [vmem:[%s5173_s9 + $0x498] sm:$0xff] }
  0x3d   : > { %4050 = vmatprep.subr.bf16.mxu1 %v4999_v38  ;;  %4162 = vmatprep.subr.bf16.mxu0 %v5001_v40  ;;  %v216_v38 = vld [vmem:[%s5173_s9 + $0x130] sm:$0xff]  ;;  %v218_v40 = vld [vmem:[%s5173_s9 + $0x140] sm:$0xff]  ;;  %v343_v19 = vld [vmem:[%s5173_s9 + $0x528] sm:$0xff] }
  0x3e   : > { %2258 = vmatmul.mubr.bf16.gmra.mrb[12].mxu0 %v808_v24  ;;  %2322 = vmatmul.mubr.bf16.gmra.mrb[12].mxu1 %v952_v25  ;;  %v180_v24 = vld [vmem:[%s5173_s9 + $0x10] sm:$0xff]  ;;  %v198_v25 = vld [vmem:[%s5173_s9 + $0xa0] sm:$0xff] }
  0x3f   : > { %2265 = vmatprep.mubr.bf16.mxu0 %v827_v27  ;;  %2329 = vmatprep.mubr.bf16.mxu1 %v971_v28  ;;  %v200_v27 = vld [vmem:[%s5173_s9 + $0xb0] sm:$0xff]  ;;  %v217_v28 = vld [vmem:[%s5173_s9 + $0x138] sm:$0xff]  ;;  %v756_v32 = vpack.c.bf16 %v198_v25, %v180_v24  ;;  %v829_v24 = vpack.c.bf16 %v343_v19, %v325_v18  ;;  %v5041_v19 = vld [vmem:[%s6620_s1 + $0x340] sm:$0xff]  }
  0x40   : > { %4051 = vmatpush3.bf16.msra.mxu1 %v5000_v39  ;;  %4163 = vmatpush3.bf16.msra.mxu0 %v5002_v43  ;;  %v758_v33 = vpack.c.bf16 %v200_v27, %v182_v26  ;;  %v775_v36 = vpack.c.bf16 %v235_v29, %v217_v28  ;;  %v234_v39 = vld [vmem:[%s5173_s9 + $0x1c0] sm:$0xff]  ;;  %v5013_v43 = vld [vmem:[%s6620_s1 + $0x248] sm:$0xff]   ;;  %v324_v28 = vld [vmem:[%s5173_s9 + $0x490] sm:$0xff] }
  0x41   : > { %4052 = vmatprep.subr.bf16.mxu1 %v5003_v54  ;;  %4164 = vmatprep.subr.bf16.mxu0 %v5005_v56  ;;  %v774_v52 = vpack.c.bf16 %v234_v39, %v216_v38  ;;  %v5016_v56 = vld [vmem:[%s6620_s1 + $0x190] sm:$0xff]   ;;  %v5027_v26 = vld [vmem:[%s6620_s1 + $0x1e8] sm:$0xff]   ;;  %v828_v38 = vpack.c.bf16 %v342_v30, %v324_v28  ;;  %v489_v18 = vld [vmem:[%s5173_s9 + $0x9b8] sm:$0xff] }
  0x42   : > { %v5028_v27 = vld [vmem:[%s6620_s1 + $0x1a8] sm:$0xff]   ;;  %v505_v28 = vld [vmem:[%s5173_s9 + $0xa38] sm:$0xff] }
  0x43   : > { %v5029_v29 = vld [vmem:[%s6620_s1 + $0x268] sm:$0xff]  }
  0x44   : > { %4053 = vmatpush3.bf16.msra.mxu1 %v5004_v55  ;;  %4165 = vmatpush3.bf16.msra.mxu0 %v5006_v57  ;;  %v795_v55 = vpack.c.bf16 %v273_v47, %v255_v46  ;;  %v5018_v57 = vld [vmem:[%s6620_s1 + $0x210] sm:$0xff]   ;;  %v507_v30 = vld [vmem:[%s5173_s9 + $0xa48] sm:$0xff] }
  0x45   : > { %4262 = vmatprep.subr.bf16.mxu1 %v5007_v62  ;;  %4374 = vmatprep.subr.bf16.mxu0 %v5009_v3  ;;  %v254_v62 = vld [vmem:[%s5173_s9 + $0x260] sm:$0xff]  ;;  %v309_v3 = vld [vmem:[%s5173_s9 + $0x418] sm:$0xff]  ;;  %v380_v46 = vld [vmem:[%s5173_s9 + $0x650] sm:$0xff] }
  0x46   : > { %2266 = vmatmul.mubr.bf16.gmra.mrb[16].mxu0 %v826_v41  ;;  %2330 = vmatmul.mubr.bf16.gmra.mrb[16].mxu1 %v970_v42  ;;  %v236_v41 = vld [vmem:[%s5173_s9 + $0x1d0] sm:$0xff]  ;;  %v5011_v42 = vld [vmem:[%s6620_s1 + $0x1c8] sm:$0xff]   ;;  %v794_v7 = vpack.c.bf16 %v272_v63, %v254_v62  ;;  %v433_v62 = vld [vmem:[%s5173_s9 + $0x7f8] sm:$0xff] }
  0x47   : > { %2273 = vmatprep.mubr.bf16.mxu0 %v845_v44  ;;  %2337 = vmatprep.mubr.bf16.mxu1 %v989_v45  ;;  %v253_v44 = vld [vmem:[%s5173_s9 + $0x258] sm:$0xff]  ;;  %v271_v45 = vld [vmem:[%s5173_s9 + $0x2e8] sm:$0xff]  ;;  %v776_v53 = vpack.c.bf16 %v236_v41, %v218_v40  ;;  %v5032_v47 = vld [vmem:[%s6620_s1 + $0x1b0] sm:$0xff]  }
  0x48   : > { %v793_v54 = vpack.c.bf16 %v271_v45, %v253_v44  ;;  %v378_v44 = vld [vmem:[%s5173_s9 + $0x640] sm:$0xff]  ;;  %v451_v63 = vld [vmem:[%s5173_s9 + $0x888] sm:$0xff] }
  0x49   : > { %v362_v45 = vld [vmem:[%s5173_s9 + $0x5c0] sm:$0xff] }
  0x4e   : > { %2274 = vmatmul.mubr.bf16.gmra.mrb[20].mxu0 %v844_v58  ;;  %2338 = vmatmul.mubr.bf16.gmra.mrb[20].mxu1 %v988_v59  ;;  %v252_v58 = vld [vmem:[%s5173_s9 + $0x250] sm:$0xff]  ;;  %v5019_v59 = vld [vmem:[%s6620_s1 + $0x1d8] sm:$0xff]  }
  0x4f   : > { %2281 = vmatprep.mubr.bf16.mxu0 %v863_v60  ;;  %2345 = vmatprep.mubr.bf16.mxu1 %v1007_v61  ;;  %v5021_v60 = vld [vmem:[%s6620_s1 + $0x258] sm:$0xff]   ;;  %v270_v61 = vld [vmem:[%s5173_s9 + $0x2e0] sm:$0xff] }
  0x50   : > { %v792_v6 = vpack.c.bf16 %v270_v61, %v252_v58  ;;  %v396_v58 = vld [vmem:[%s5173_s9 + $0x6d0] sm:$0xff] }
  0x51   : > { %v416_v61 = vld [vmem:[%s5173_s9 + $0x770] sm:$0xff] }
  0x56   : > { %2282 = vmatmul.mubr.bf16.gmra.mrb[24].mxu0 %v862_v8  ;;  %2346 = vmatmul.mubr.bf16.gmra.mrb[24].mxu1 %v1006_v9  ;;  %v5023_v8 = vld [vmem:[%s6620_s1 + $0x1e0] sm:$0xff]   ;;  %v811_v9 = vpack.c.bf16 %v307_v1, %v289_v0  ;;  %v435_v0 = vld [vmem:[%s5173_s9 + $0x808] sm:$0xff]  ;;  %v453_v1 = vld [vmem:[%s5173_s9 + $0x898] sm:$0xff] }
  0x57   : > { %2289 = vmatprep.mubr.bf16.mxu0 %v881_v10  ;;  %2353 = vmatprep.mubr.bf16.mxu1 %v1025_v11  ;;  %v813_v10 = vpack.c.bf16 %v309_v3, %v291_v2  ;;  %v5024_v11 = vld [vmem:[%s6620_s1 + $0x1a0] sm:$0xff]   ;;  %v5035_v2 = vld [vmem:[%s6620_s1 + $0x1f8] sm:$0xff]  }
  0x58   : > { %v5036_v3 = vld [vmem:[%s6620_s1 + $0x1b8] sm:$0xff]  }
  0x5e   : > { %2290 = vmatmul.mubr.bf16.gmra.mrb[28].mxu0 %v880_v20  ;;  %2354 = vmatmul.mubr.bf16.gmra.mrb[28].mxu1 %v1024_v21  ;;  %v327_v20 = vld [vmem:[%s5173_s9 + $0x4a8] sm:$0xff]  ;;  %v345_v21 = vld [vmem:[%s5173_s9 + $0x538] sm:$0xff] }
  0x5f   : > { %2394 = vmatprep.mubr.bf16.mxu1 %v757_v22  ;;  %2555 = vmatprep.mubr.bf16.mxu0 %v759_v23  ;;  %v810_v22 = vpack.c.bf16 %v306_v15, %v288_v14  ;;  %v812_v23 = vpack.c.bf16 %v308_v17, %v290_v16  ;;  %v831_v25 = vpack.c.bf16 %v345_v21, %v327_v20  ;;  %v469_v14 = vld [vmem:[%s5173_s9 + $0x918] sm:$0xff]  ;;  %v487_v15 = vld [vmem:[%s5173_s9 + $0x9a8] sm:$0xff]  ;;  %v5039_v17 = vld [vmem:[%s6620_s1 + $0x2c0] sm:$0xff]  }
  0x60   : > { %v471_v16 = vld [vmem:[%s5173_s9 + $0x928] sm:$0xff] }
  0x66   : > { %2395 = vmatmul.mubr.bf16.vlgmr.msra.gmra.mrb[32].mxu1 %v756_v32  ;;  %2556 = vmatmul.mubr.bf16.vlgmr.msra.gmra.mrb[32].mxu0 %v758_v33  ;;  %v326_v32 = vld [vmem:[%s5173_s9 + $0x4a0] sm:$0xff]  ;;  %v344_v33 = vld [vmem:[%s5173_s9 + $0x530] sm:$0xff] }
  0x67   : > { %4263 = vmatpush3.bf16.msra.mxu1 %v5008_v34  ;;  %4375 = vmatpush3.bf16.msra.mxu0 %v5010_v35  ;;  %v361_v34 = vld [vmem:[%s5173_s9 + $0x5b8] sm:$0xff]  ;;  %v379_v35 = vld [vmem:[%s5173_s9 + $0x648] sm:$0xff]  ;;  %v830_v39 = vpack.c.bf16 %v344_v33, %v326_v32 }
  0x68   : > { %2402 = vmatprep.mubr.bf16.mxu1 %v775_v36  ;;  %2563 = vmatprep.mubr.bf16.mxu0 %v777_v37  ;;  %v363_v36 = vld [vmem:[%s5173_s9 + $0x5c8] sm:$0xff]  ;;  %v381_v37 = vld [vmem:[%s5173_s9 + $0x658] sm:$0xff]  ;;  %v847_v40 = vpack.c.bf16 %v379_v35, %v361_v34 }
  0x69   : > { %4264 = vmatprep.subr.bf16.mxu1 %v5011_v42  ;;  %4376 = vmatprep.subr.bf16.mxu0 %v5013_v43  ;;  %v849_v41 = vpack.c.bf16 %v381_v37, %v363_v36  ;;  %v5031_v42 = vld [vmem:[%s6620_s1 + $0x1f0] sm:$0xff]   ;;  %v522_v37 = vld [vmem:[%s5173_s9 + $0xac0] sm:$0xff] }
  0x6a   : > { %v360_v43 = vld [vmem:[%s5173_s9 + $0x5b0] sm:$0xff] }
  0x6b   : > { %4265 = vmatpush3.bf16.msra.mxu1 %v5012_v48  ;;  %4377 = vmatpush3.bf16.msra.mxu0 %v5014_v49  ;;  %v397_v48 = vld [vmem:[%s5173_s9 + $0x6d8] sm:$0xff]  ;;  %v5033_v49 = vld [vmem:[%s6620_s1 + $0x270] sm:$0xff]  }
  0x6c   : > { %4266 = vmatprep.subr.bf16.mxu1 %v5015_v50  ;;  %4378 = vmatprep.subr.bf16.mxu0 %v5017_v51  ;;  %v5034_v50 = vld [vmem:[%s6620_s1 + $0x230] sm:$0xff]   ;;  %v415_v51 = vld [vmem:[%s5173_s9 + $0x768] sm:$0xff] }
  0x6d   : > { %v504_v36 = vld [vmem:[%s5173_s9 + $0xa30] sm:$0xff] }
  0x6e   : > { %2403 = vmatmul.mubr.bf16.gmra.mrb[36].mxu1 %v774_v52  ;;  %2564 = vmatmul.mubr.bf16.gmra.mrb[36].mxu0 %v776_v53  ;;  %v399_v52 = vld [vmem:[%s5173_s9 + $0x6e8] sm:$0xff]  ;;  %v417_v53 = vld [vmem:[%s5173_s9 + $0x778] sm:$0xff] }
  0x6f   : > { %2410 = vmatprep.mubr.bf16.mxu1 %v793_v54  ;;  %2571 = vmatprep.mubr.bf16.mxu0 %v795_v55  ;;  %v846_v54 = vpack.c.bf16 %v378_v44, %v360_v43  ;;  %v848_v55 = vpack.c.bf16 %v380_v46, %v362_v45  ;;  %v561_v43 = vld [vmem:[%s5173_s9 + $0xbf8] sm:$0xff]  ;;  %v918_v44 = vpack.c.bf16 %v522_v37, %v504_v36  ;;  %v739_v37 = vld [vmem:[%s5173_s9 + $0x1188] sm:$0xff] }
  0x70   : > { %4267 = vmatpush3.bf16.msra.mxu1 %v5016_v56  ;;  %4379 = vmatpush3.bf16.msra.mxu0 %v5018_v57  ;;  %v865_v56 = vpack.c.bf16 %v415_v51, %v397_v48  ;;  %v867_v57 = vpack.c.bf16 %v417_v53, %v399_v52  ;;  %v540_v48 = vld [vmem:[%s5173_s9 + $0xb50] sm:$0xff]  ;;  %v577_v52 = vld [vmem:[%s5173_s9 + $0xc78] sm:$0xff]  ;;  %v595_v53 = vld [vmem:[%s5173_s9 + $0xd08] sm:$0xff] }
  0x71   : > { %4268 = vmatprep.subr.bf16.mxu1 %v5019_v59  ;;  %4380 = vmatprep.subr.bf16.mxu0 %v5021_v60  ;;  %v414_v59 = vld [vmem:[%s5173_s9 + $0x760] sm:$0xff]  ;;  %v560_v51 = vld [vmem:[%s5173_s9 + $0xbf0] sm:$0xff]  ;;  %v721_v36 = vld [vmem:[%s5173_s9 + $0x10f8] sm:$0xff] }
  0x72   : > { %v398_v60 = vld [vmem:[%s5173_s9 + $0x6e0] sm:$0xff] }
  0x74   : > { %4269 = vmatpush3.bf16.msra.mxu1 %v5020_v4  ;;  %4381 = vmatpush3.bf16.msra.mxu0 %v5022_v5  ;;  %v5037_v4 = vld [vmem:[%s6620_s1 + $0x278] sm:$0xff]  }
  0x75   : > { %4270 = vmatprep.subr.bf16.mxu1 %v5023_v8  ;;  %4382 = vmatprep.subr.bf16.mxu0 %v5025_v12  ;;  %v5038_v5 = vld [vmem:[%s6620_s1 + $0x238] sm:$0xff]   ;;  %v883_v8 = vpack.c.bf16 %v451_v63, %v433_v62  ;;  %v434_v12 = vld [vmem:[%s5173_s9 + $0x800] sm:$0xff]  ;;  %v596_v63 = vld [vmem:[%s5173_s9 + $0xd10] sm:$0xff] }
  0x76   : > { %2411 = vmatmul.mubr.bf16.gmra.mrb[40].mxu1 %v792_v6  ;;  %2572 = vmatmul.mubr.bf16.gmra.mrb[40].mxu0 %v794_v7  ;;  %v864_v6 = vpack.c.bf16 %v414_v59, %v396_v58  ;;  %v866_v7 = vpack.c.bf16 %v416_v61, %v398_v60  ;;  %v955_v58 = vpack.c.bf16 %v595_v53, %v577_v52  ;;  %v576_v60 = vld [vmem:[%s5173_s9 + $0xc70] sm:$0xff]  ;;  %v594_v61 = vld [vmem:[%s5173_s9 + $0xd00] sm:$0xff] }
  0x77   : > { %2418 = vmatprep.mubr.bf16.mxu1 %v811_v9  ;;  %2579 = vmatprep.mubr.bf16.mxu0 %v813_v10  ;;  %v885_v9 = vpack.c.bf16 %v453_v1, %v435_v0  ;;  %v432_v10 = vld [vmem:[%s5173_s9 + $0x7f0] sm:$0xff]  ;;  %v578_v62 = vld [vmem:[%s5173_s9 + $0xc80] sm:$0xff]  ;;  %v613_v0 = vld [vmem:[%s5173_s9 + $0xd98] sm:$0xff] }
  0x78   : > { %4271 = vmatpush3.bf16.msra.mxu1 %v5024_v11  ;;  %4383 = vmatpush3.bf16.msra.mxu0 %v5026_v13  ;;  %v450_v11 = vld [vmem:[%s5173_s9 + $0x880] sm:$0xff]  ;;  %v452_v13 = vld [vmem:[%s5173_s9 + $0x890] sm:$0xff]  ;;  %v631_v1 = vld [vmem:[%s5173_s9 + $0xe28] sm:$0xff] }
  0x79   : > { %4272 = vmatprep.subr.bf16.mxu1 %v5027_v26  ;;  %4384 = vmatprep.subr.bf16.mxu0 %v5029_v29  ;;  %v882_v20 = vpack.c.bf16 %v450_v11, %v432_v10  ;;  %v884_v21 = vpack.c.bf16 %v452_v13, %v434_v12  ;;  %v470_v26 = vld [vmem:[%s5173_s9 + $0x920] sm:$0xff]  ;;  %v523_v29 = vld [vmem:[%s5173_s9 + $0xac8] sm:$0xff]  ;;  %v632_v11 = vld [vmem:[%s5173_s9 + $0xe30] sm:$0xff] }
  0x7a   : > { %v919_v34 = vpack.c.bf16 %v523_v29, %v505_v28  ;;  %v614_v10 = vld [vmem:[%s5173_s9 + $0xda0] sm:$0xff]  ;;  %v649_v12 = vld [vmem:[%s5173_s9 + $0xeb8] sm:$0xff]  ;;  %v667_v13 = vld [vmem:[%s5173_s9 + $0xf48] sm:$0xff] }
  0x7c   : > { %4273 = vmatpush3.bf16.msra.mxu1 %v5028_v27  ;;  %4385 = vmatpush3.bf16.msra.mxu0 %v5030_v31  ;;  %v488_v27 = vld [vmem:[%s5173_s9 + $0x9b0] sm:$0xff]  ;;  %v525_v31 = vld [vmem:[%s5173_s9 + $0xad8] sm:$0xff] }
  0x7d   : > { %4274 = vmatprep.subr.bf16.mxu1 %v5031_v42  ;;  %4386 = vmatprep.subr.bf16.mxu0 %v5033_v49  ;;  %v902_v33 = vpack.c.bf16 %v488_v27, %v470_v26  ;;  %v921_v35 = vpack.c.bf16 %v525_v31, %v507_v30  ;;  %v543_v42 = vld [vmem:[%s5173_s9 + $0xb68] sm:$0xff]  ;;  %v558_v49 = vld [vmem:[%s5173_s9 + $0xbe0] sm:$0xff]  ;;  %v705_v27 = vld [vmem:[%s5173_s9 + $0x1078] sm:$0xff] }
  0x7e   : > { %2419 = vmatmul.mubr.bf16.gmra.mrb[44].mxu1 %v810_v22  ;;  %2580 = vmatmul.mubr.bf16.gmra.mrb[44].mxu0 %v812_v23  ;;  %v901_v22 = vpack.c.bf16 %v487_v15, %v469_v14  ;;  %v903_v23 = vpack.c.bf16 %v489_v18, %v471_v16  ;;  %v651_v14 = vld [vmem:[%s5173_s9 + $0xec8] sm:$0xff]  ;;  %v669_v15 = vld [vmem:[%s5173_s9 + $0xf58] sm:$0xff]  ;;  %v991_v18 = vpack.c.bf16 %v667_v13, %v649_v12 }
  0x7f   : > { %2426 = vmatprep.mubr.bf16.mxu1 %v829_v24  ;;  %2587 = vmatprep.mubr.bf16.mxu0 %v831_v25  ;;  %v468_v24 = vld [vmem:[%s5173_s9 + $0x910] sm:$0xff]  ;;  %v486_v25 = vld [vmem:[%s5173_s9 + $0x9a0] sm:$0xff]  ;;  %v687_v26 = vld [vmem:[%s5173_s9 + $0xfe8] sm:$0xff] }
  0x80   : > { %4275 = vmatpush3.bf16.msra.mxu1 %v5032_v47  ;;  %4387 = vmatpush3.bf16.msra.mxu0 %v5034_v50  ;;  %v900_v32 = vpack.c.bf16 %v486_v25, %v468_v24  ;;  %v939_v47 = vpack.c.bf16 %v561_v43, %v543_v42  ;;  %v542_v50 = vld [vmem:[%s5173_s9 + $0xb60] sm:$0xff]  ;;  %v685_v24 = vld [vmem:[%s5173_s9 + $0xfd8] sm:$0xff]  ;;  %v703_v25 = vld [vmem:[%s5173_s9 + $0x1068] sm:$0xff]  ;;  %v1011_v31 = vpack.c.bf16 %v705_v27, %v687_v26 }
  0x81   : > { %4276 = vmatprep.subr.bf16.mxu1 %v5035_v2  ;;  %4388 = vmatprep.subr.bf16.mxu0 %v5037_v4  ;;  %v615_v2 = vld [vmem:[%s5173_s9 + $0xda8] sm:$0xff]  ;;  %v954_v4 = vpack.c.bf16 %v594_v61, %v576_v60  ;;  %v1009_v30 = vpack.c.bf16 %v703_v25, %v685_v24  ;;  %v1027_v42 = vpack.c.bf16 %v739_v37, %v721_v36  ;;  %v221_v60 = vld [vmem:[%s5173_s9 + $0x158] sm:$0xff]  ;;  %v5048_v24 = vld [vmem:[%s6620_s1 + $0x290] sm:$0xff]  }
  0x82   : > { %v239_v61 = vld [vmem:[%s5173_s9 + $0x1e8] sm:$0xff]  ;;  %v5050_v25 = vld [vmem:[%s6620_s1 + $0x310] sm:$0xff]   ;;  %v5051_v26 = vld [vmem:[%s6620_s1 + $0x2d8] sm:$0xff]  }
  0x83   : > { %v5044_v12 = vld [vmem:[%s6620_s1 + $0x288] sm:$0xff]   ;;  %v5053_v27 = vld [vmem:[%s6620_s1 + $0x358] sm:$0xff]  }
  0x84   : > { %4277 = vmatpush3.bf16.msra.mxu1 %v5036_v3  ;;  %4389 = vmatpush3.bf16.msra.mxu0 %v5038_v5  ;;  %v633_v3 = vld [vmem:[%s5173_s9 + $0xe38] sm:$0xff]  ;;  %v956_v5 = vpack.c.bf16 %v596_v63, %v578_v62  ;;  %v223_v62 = vld [vmem:[%s5173_s9 + $0x168] sm:$0xff] }
  0x85   : > { %4486 = vmatprep.subr.bf16.mxu1 %v5039_v17  ;;  %4598 = vmatprep.subr.bf16.mxu0 %v5041_v19  ;;  %v974_v17 = vpack.c.bf16 %v632_v11, %v614_v10  ;;  %v993_v19 = vpack.c.bf16 %v669_v15, %v651_v14  ;;  %v241_v63 = vld [vmem:[%s5173_s9 + $0x1f8] sm:$0xff]  ;;  %v222_v10 = vld [vmem:[%s5173_s9 + $0x160] sm:$0xff]  ;;  %v240_v11 = vld [vmem:[%s5173_s9 + $0x1f0] sm:$0xff] }
  0x86   : > { %2427 = vmatmul.mubr.bf16.gmra.mrb[48].mxu1 %v828_v38  ;;  %2588 = vmatmul.mubr.bf16.gmra.mrb[48].mxu0 %v830_v39  ;;  %v506_v38 = vld [vmem:[%s5173_s9 + $0xa40] sm:$0xff]  ;;  %v524_v39 = vld [vmem:[%s5173_s9 + $0xad0] sm:$0xff]  ;;  %v5046_v13 = vld [vmem:[%s6620_s1 + $0x308] sm:$0xff]  }
  0x87   : > { %2434 = vmatprep.mubr.bf16.mxu1 %v847_v40  ;;  %2595 = vmatprep.mubr.bf16.mxu0 %v849_v41  ;;  %v541_v40 = vld [vmem:[%s5173_s9 + $0xb58] sm:$0xff]  ;;  %v559_v41 = vld [vmem:[%s5173_s9 + $0xbe8] sm:$0xff]  ;;  %v920_v45 = vpack.c.bf16 %v524_v39, %v506_v38 }
  0x88   : > { %v937_v46 = vpack.c.bf16 %v559_v41, %v541_v40  ;;  %v723_v38 = vld [vmem:[%s5173_s9 + $0x1108] sm:$0xff]  ;;  %v741_v39 = vld [vmem:[%s5173_s9 + $0x1198] sm:$0xff] }
  0x89   : > { %v1029_v43 = vpack.c.bf16 %v741_v39, %v723_v38  ;;  %v257_v14 = vld [vmem:[%s5173_s9 + $0x278] sm:$0xff]  ;;  %v275_v15 = vld [vmem:[%s5173_s9 + $0x308] sm:$0xff]  ;;  %v5055_v38 = vld [vmem:[%s6620_s1 + $0x2e0] sm:$0xff]  }
  0x8a   : > { %v5052_v36 = vld [vmem:[%s6620_s1 + $0x298] sm:$0xff]   ;;  %v5057_v39 = vld [vmem:[%s6620_s1 + $0x360] sm:$0xff]  }
  0x8b   : > { %v5054_v37 = vld [vmem:[%s6620_s1 + $0x318] sm:$0xff]  }
  0x8e   : > { %2435 = vmatmul.mubr.bf16.gmra.mrb[52].mxu1 %v846_v54  ;;  %2596 = vmatmul.mubr.bf16.gmra.mrb[52].mxu0 %v848_v55  ;;  %v579_v54 = vld [vmem:[%s5173_s9 + $0xc88] sm:$0xff]  ;;  %v597_v55 = vld [vmem:[%s5173_s9 + $0xd18] sm:$0xff] }
  0x8f   : > { %2442 = vmatprep.mubr.bf16.mxu1 %v865_v56  ;;  %2603 = vmatprep.mubr.bf16.mxu0 %v867_v57  ;;  %v936_v56 = vpack.c.bf16 %v558_v49, %v540_v48  ;;  %v938_v57 = vpack.c.bf16 %v560_v51, %v542_v50  ;;  %v957_v59 = vpack.c.bf16 %v597_v55, %v579_v54  ;;  %v185_v48 = vld [vmem:[%s5173_s9 + $0x38] sm:$0xff]  ;;  %v203_v49 = vld [vmem:[%s5173_s9 + $0xc8] sm:$0xff] }
  0x90   : > { %v187_v50 = vld [vmem:[%s5173_s9 + $0x48] sm:$0xff]  ;;  %v205_v51 = vld [vmem:[%s5173_s9 + $0xd8] sm:$0xff]  ;;  %v761_v54 = vpack.c.bf16 %v203_v49, %v185_v48  ;;  %v292_v48 = vld [vmem:[%s5173_s9 + $0x390] sm:$0xff] }
  0x91   : > { %v763_v55 = vpack.c.bf16 %v205_v51, %v187_v50  ;;  %v310_v49 = vld [vmem:[%s5173_s9 + $0x420] sm:$0xff]  ;;  %v312_v51 = vld [vmem:[%s5173_s9 + $0x430] sm:$0xff] }
  0x92   : > { %v294_v50 = vld [vmem:[%s5173_s9 + $0x3a0] sm:$0xff] }
  0x96   : > { %2443 = vmatmul.mubr.bf16.gmra.mrb[56].mxu1 %v864_v6  ;;  %2604 = vmatmul.mubr.bf16.gmra.mrb[56].mxu0 %v866_v7  ;;  %v973_v6 = vpack.c.bf16 %v631_v1, %v613_v0  ;;  %v975_v7 = vpack.c.bf16 %v633_v3, %v615_v2  ;;  %v5040_v2 = vld [vmem:[%s6620_s1 + $0x280] sm:$0xff]  }
  0x97   : > { %2450 = vmatprep.mubr.bf16.mxu1 %v883_v8  ;;  %2611 = vmatprep.mubr.bf16.mxu0 %v885_v9  ;;  %v612_v8 = vld [vmem:[%s5173_s9 + $0xd90] sm:$0xff]  ;;  %v630_v9 = vld [vmem:[%s5173_s9 + $0xe20] sm:$0xff] }
  0x98   : > { %v972_v16 = vpack.c.bf16 %v630_v9, %v612_v8  ;;  %v5042_v3 = vld [vmem:[%s6620_s1 + $0x300] sm:$0xff]   ;;  %v220_v8 = vld [vmem:[%s5173_s9 + $0x150] sm:$0xff] }
  0x99   : > { %v238_v9 = vld [vmem:[%s5173_s9 + $0x1e0] sm:$0xff] }
  0x9e   : > { %2451 = vmatmul.mubr.bf16.gmra.mrb[60].mxu1 %v882_v20  ;;  %2612 = vmatmul.mubr.bf16.gmra.mrb[60].mxu0 %v884_v21  ;;  %v648_v20 = vld [vmem:[%s5173_s9 + $0xeb0] sm:$0xff]  ;;  %v666_v21 = vld [vmem:[%s5173_s9 + $0xf40] sm:$0xff] }
  0x9f   : > { %2458 = vmatprep.mubr.bf16.mxu1 %v901_v22  ;;  %2619 = vmatprep.mubr.bf16.mxu0 %v903_v23  ;;  %v650_v22 = vld [vmem:[%s5173_s9 + $0xec0] sm:$0xff]  ;;  %v668_v23 = vld [vmem:[%s5173_s9 + $0xf50] sm:$0xff]  ;;  %v990_v28 = vpack.c.bf16 %v666_v21, %v648_v20  ;;  %v778_v20 = vpack.c.bf16 %v238_v9, %v220_v8  ;;  %v780_v21 = vpack.c.bf16 %v240_v11, %v222_v10 }
  0xa0   : > { %v992_v29 = vpack.c.bf16 %v668_v23, %v650_v22  ;;  %v797_v22 = vpack.c.bf16 %v275_v15, %v257_v14  ;;  %v5699_v8 = vld [vmem:[%s6621_s2] ss:$0 sm:$0xff]  ;;  %v5064_v11 = vld [vmem:[%s6620_s1 + $0x2b0] sm:$0xff]  }
  0xa1   : > { %v328_v15 = vld [vmem:[%s5173_s9 + $0x4b0] sm:$0xff] }
  0xa6   : > { %2459 = vmatmul.mubr.bf16.gmra.mrb[64].mxu1 %v900_v32  ;;  %2620 = vmatmul.mubr.bf16.gmra.mrb[64].mxu0 %v902_v33  ;;  %v684_v32 = vld [vmem:[%s5173_s9 + $0xfd0] sm:$0xff]  ;;  %v702_v33 = vld [vmem:[%s5173_s9 + $0x1060] sm:$0xff] }
  0xa7   : > { %2466 = vmatprep.mubr.bf16.mxu1 %v919_v34  ;;  %2627 = vmatprep.mubr.bf16.mxu0 %v921_v35  ;;  %v686_v34 = vld [vmem:[%s5173_s9 + $0xfe0] sm:$0xff]  ;;  %v704_v35 = vld [vmem:[%s5173_s9 + $0x1070] sm:$0xff]  ;;  %v1008_v40 = vpack.c.bf16 %v702_v33, %v684_v32  ;;  %v293_v32 = vld [vmem:[%s5173_s9 + $0x398] sm:$0xff] }
  0xa8   : > { %v1010_v41 = vpack.c.bf16 %v704_v35, %v686_v34  ;;  %v311_v33 = vld [vmem:[%s5173_s9 + $0x428] sm:$0xff]  ;;  %v313_v35 = vld [vmem:[%s5173_s9 + $0x438] sm:$0xff] }
  0xa9   : > { %v295_v34 = vld [vmem:[%s5173_s9 + $0x3a8] sm:$0xff] }
  0xae   : > { %2467 = vmatmul.mubr.bf16.gmra.mrb[68].mxu1 %v918_v44  ;;  %2628 = vmatmul.mubr.bf16.gmra.mrb[68].mxu0 %v920_v45  ;;  %v720_v44 = vld [vmem:[%s5173_s9 + $0x10f0] sm:$0xff]  ;;  %v738_v45 = vld [vmem:[%s5173_s9 + $0x1180] sm:$0xff] }
  0xaf   : > { %2474 = vmatprep.mubr.bf16.mxu1 %v937_v46  ;;  %2635 = vmatprep.mubr.bf16.mxu0 %v939_v47  ;;  %v722_v46 = vld [vmem:[%s5173_s9 + $0x1100] sm:$0xff]  ;;  %v740_v47 = vld [vmem:[%s5173_s9 + $0x1190] sm:$0xff]  ;;  %v1026_v52 = vpack.c.bf16 %v738_v45, %v720_v44 }
  0xb0   : > { %v1028_v53 = vpack.c.bf16 %v740_v47, %v722_v46  ;;  %v5056_v44 = vld [vmem:[%s6620_s1 + $0x2a0] sm:$0xff]   ;;  %v5059_v46 = vld [vmem:[%s6620_s1 + $0x2e8] sm:$0xff]  }
  0xb1   : > { %v5058_v45 = vld [vmem:[%s6620_s1 + $0x320] sm:$0xff]   ;;  %v5061_v47 = vld [vmem:[%s6620_s1 + $0x368] sm:$0xff]  }
  0xb6   : > { %2475 = vmatmul.mubr.bf16.gmra.mrb[72].mxu1 %v936_v56  ;;  %2636 = vmatmul.mubr.bf16.gmra.mrb[72].mxu0 %v938_v57  ;;  %v184_v56 = vld [vmem:[%s5173_s9 + $0x30] sm:$0xff]  ;;  %v202_v57 = vld [vmem:[%s5173_s9 + $0xc0] sm:$0xff] }
  0xb7   : > { %2482 = vmatprep.mubr.bf16.mxu1 %v955_v58  ;;  %2643 = vmatprep.mubr.bf16.mxu0 %v957_v59  ;;  %v186_v58 = vld [vmem:[%s5173_s9 + $0x40] sm:$0xff]  ;;  %v204_v59 = vld [vmem:[%s5173_s9 + $0xd0] sm:$0xff]  ;;  %v760_v0 = vpack.c.bf16 %v202_v57, %v184_v56  ;;  %v5060_v56 = vld [vmem:[%s6620_s1 + $0x2a8] sm:$0xff]  }
  0xb8   : > { %v762_v1 = vpack.c.bf16 %v204_v59, %v186_v58  ;;  %v5062_v57 = vld [vmem:[%s6620_s1 + $0x328] sm:$0xff]  }
  0xbe   : > { %2483 = vmatmul.mubr.bf16.gmra.mrb[76].mxu1 %v954_v4  ;;  %2644 = vmatmul.mubr.bf16.gmra.mrb[76].mxu0 %v956_v5  ;;  %v779_v4 = vpack.c.bf16 %v239_v61, %v221_v60  ;;  %v781_v5 = vpack.c.bf16 %v241_v63, %v223_v62  ;;  %v5063_v60 = vld [vmem:[%s6620_s1 + $0x2f0] sm:$0xff]  }
  0xbf   : > { %2490 = vmatprep.mubr.bf16.mxu1 %v973_v6  ;;  %2651 = vmatprep.mubr.bf16.mxu0 %v975_v7  ;;  %v5043_v6 = vld [vmem:[%s6620_s1 + $0x2c8] sm:$0xff]   ;;  %v5065_v61 = vld [vmem:[%s6620_s1 + $0x370] sm:$0xff]  }
  0xc0   : > { %v5045_v7 = vld [vmem:[%s6620_s1 + $0x348] sm:$0xff]  }
  0xc6   : > { %2491 = vmatmul.mubr.bf16.gmra.mrb[80].mxu1 %v972_v16  ;;  %2652 = vmatmul.mubr.bf16.gmra.mrb[80].mxu0 %v974_v17  ;;  %v259_v16 = vld [vmem:[%s5173_s9 + $0x288] sm:$0xff]  ;;  %v277_v17 = vld [vmem:[%s5173_s9 + $0x318] sm:$0xff] }
  0xc7   : > { %2498 = vmatprep.mubr.bf16.mxu1 %v991_v18  ;;  %2659 = vmatprep.mubr.bf16.mxu0 %v993_v19  ;;  %v5047_v18 = vld [vmem:[%s6620_s1 + $0x2d0] sm:$0xff]   ;;  %v799_v23 = vpack.c.bf16 %v277_v17, %v259_v16  ;;  %v346_v16 = vld [vmem:[%s5173_s9 + $0x540] sm:$0xff] }
  0xc8   : > { %v5049_v19 = vld [vmem:[%s6620_s1 + $0x350] sm:$0xff]   ;;  %v330_v17 = vld [vmem:[%s5173_s9 + $0x4c0] sm:$0xff] }
  0xce   : > { %2499 = vmatmul.mubr.bf16.gmra.mrb[84].mxu1 %v990_v28  ;;  %2660 = vmatmul.mubr.bf16.gmra.mrb[84].mxu0 %v992_v29  ;;  %v256_v28 = vld [vmem:[%s5173_s9 + $0x270] sm:$0xff]  ;;  %v274_v29 = vld [vmem:[%s5173_s9 + $0x300] sm:$0xff] }
  0xcf   : > { %2506 = vmatprep.mubr.bf16.mxu1 %v1009_v30  ;;  %2667 = vmatprep.mubr.bf16.mxu0 %v1011_v31  ;;  %v258_v30 = vld [vmem:[%s5173_s9 + $0x280] sm:$0xff]  ;;  %v276_v31 = vld [vmem:[%s5173_s9 + $0x310] sm:$0xff] }
  0xd6   : > { %2507 = vmatmul.mubr.bf16.gmra.mrb[88].mxu1 %v1008_v40  ;;  %2668 = vmatmul.mubr.bf16.gmra.mrb[88].mxu0 %v1010_v41  ;;  %v796_v40 = vpack.c.bf16 %v274_v29, %v256_v28  ;;  %v798_v41 = vpack.c.bf16 %v276_v31, %v258_v30  ;;  %v5071_v28 = vld [vmem:[%s6620_s1 + $0x3c0] sm:$0xff]  }
  0xd7   : > { %2514 = vmatprep.mubr.bf16.mxu1 %v1027_v42  ;;  %2675 = vmatprep.mubr.bf16.mxu0 %v1029_v43  ;;  %v815_v42 = vpack.c.bf16 %v311_v33, %v293_v32  ;;  %v817_v43 = vpack.c.bf16 %v313_v35, %v295_v34  ;;  %v5073_v29 = vld [vmem:[%s6620_s1 + $0x440] sm:$0xff]   ;;  %v832_v35 = vpack.c.bf16 %v346_v16, %v328_v15  ;;  %v420_v16 = vld [vmem:[%s5173_s9 + $0x790] sm:$0xff] }
  0xd8   : > { %v402_v15 = vld [vmem:[%s5173_s9 + $0x700] sm:$0xff] }
  0xde   : > { %2515 = vmatmul.mubr.bf16.gmra.mrb[92].mxu1 %v1026_v52  ;;  %2676 = vmatmul.mubr.bf16.gmra.mrb[92].mxu0 %v1028_v53  ;;  %v329_v52 = vld [vmem:[%s5173_s9 + $0x4b8] sm:$0xff]  ;;  %v347_v53 = vld [vmem:[%s5173_s9 + $0x548] sm:$0xff] }
  0xdf   : > { %2716 = vmatprep.mubr.bf16.mxu1 %v761_v54  ;;  %2877 = vmatprep.mubr.bf16.mxu0 %v763_v55  ;;  %v331_v54 = vld [vmem:[%s5173_s9 + $0x4c8] sm:$0xff]  ;;  %v349_v55 = vld [vmem:[%s5173_s9 + $0x558] sm:$0xff] }
  0xe6   : > { %2717 = vmatmul.mubr.bf16.vlgmr.msra.gmra.mrb[96].mxu1 %v760_v0  ;;  %2878 = vmatmul.mubr.bf16.vlgmr.msra.gmra.mrb[96].mxu0 %v762_v1  ;;  %v814_v0 = vpack.c.bf16 %v310_v49, %v292_v48  ;;  %v816_v1 = vpack.c.bf16 %v312_v51, %v294_v50  ;;  %v382_v48 = vld [vmem:[%s5173_s9 + $0x660] sm:$0xff]  ;;  %v384_v51 = vld [vmem:[%s5173_s9 + $0x670] sm:$0xff] }
  0xe7   : > { %4487 = vmatpush3.bf16.msra.mxu1 %v5040_v2  ;;  %4599 = vmatpush3.bf16.msra.mxu0 %v5042_v3  ;;  %v366_v50 = vld [vmem:[%s5173_s9 + $0x5e0] sm:$0xff] }
  0xe8   : > { %2724 = vmatprep.mubr.bf16.mxu1 %v779_v4  ;;  %2885 = vmatprep.mubr.bf16.mxu0 %v781_v5 }
  0xe9   : > { %4488 = vmatprep.subr.bf16.mxu1 %v5043_v6  ;;  %4600 = vmatprep.subr.bf16.mxu0 %v5045_v7  ;;  %v833_v6 = vpack.c.bf16 %v347_v53, %v329_v52  ;;  %v835_v7 = vpack.c.bf16 %v349_v55, %v331_v54  ;;  %v401_v52 = vld [vmem:[%s5173_s9 + $0x6f8] sm:$0xff]  ;;  %v419_v54 = vld [vmem:[%s5173_s9 + $0x788] sm:$0xff] }
  0xea   : > { %v403_v55 = vld [vmem:[%s5173_s9 + $0x708] sm:$0xff] }
  0xeb   : > { %4489 = vmatpush3.bf16.msra.mxu1 %v5044_v12  ;;  %4601 = vmatpush3.bf16.msra.mxu0 %v5046_v13  ;;  %v5066_v12 = vld [vmem:[%s6620_s1 + $0x330] sm:$0xff]  }
  0xec   : > { %4490 = vmatprep.subr.bf16.mxu1 %v5047_v18  ;;  %4602 = vmatprep.subr.bf16.mxu0 %v5049_v19  ;;  %v348_v18 = vld [vmem:[%s5173_s9 + $0x550] sm:$0xff]  ;;  %v5067_v19 = vld [vmem:[%s6620_s1 + $0x2f8] sm:$0xff]  }
  0xee   : > { %2725 = vmatmul.mubr.bf16.gmra.mrb[100].mxu1 %v778_v20  ;;  %2886 = vmatmul.mubr.bf16.gmra.mrb[100].mxu0 %v780_v21  ;;  %v5069_v20 = vld [vmem:[%s6620_s1 + $0x378] sm:$0xff]  }
  0xef   : > { %2732 = vmatprep.mubr.bf16.mxu1 %v797_v22  ;;  %2893 = vmatprep.mubr.bf16.mxu0 %v799_v23  ;;  %v365_v21 = vld [vmem:[%s5173_s9 + $0x5d8] sm:$0xff]  ;;  %v383_v22 = vld [vmem:[%s5173_s9 + $0x668] sm:$0xff] }
  0xf0   : > { %4491 = vmatpush3.bf16.msra.mxu1 %v5048_v24  ;;  %4603 = vmatpush3.bf16.msra.mxu0 %v5050_v25  ;;  %v367_v23 = vld [vmem:[%s5173_s9 + $0x5e8] sm:$0xff]  ;;  %v385_v24 = vld [vmem:[%s5173_s9 + $0x678] sm:$0xff] }
  0xf1   : > { %4492 = vmatprep.subr.bf16.mxu1 %v5051_v26  ;;  %4604 = vmatprep.subr.bf16.mxu0 %v5053_v27  ;;  %v5068_v25 = vld [vmem:[%s6620_s1 + $0x2b8] sm:$0xff]  }
  0xf2   : > { %v5070_v26 = vld [vmem:[%s6620_s1 + $0x338] sm:$0xff]  }
  0xf4   : > { %4493 = vmatpush3.bf16.msra.mxu1 %v5052_v36  ;;  %4605 = vmatpush3.bf16.msra.mxu0 %v5054_v37  ;;  %v834_v36 = vpack.c.bf16 %v348_v18, %v330_v17  ;;  %v437_v17 = vld [vmem:[%s5173_s9 + $0x818] sm:$0xff] }
  0xf5   : > { %4494 = vmatprep.subr.bf16.mxu1 %v5055_v38  ;;  %4606 = vmatprep.subr.bf16.mxu0 %v5057_v39 }
  0xf6   : > { %2733 = vmatmul.mubr.bf16.gmra.mrb[104].mxu1 %v796_v40  ;;  %2894 = vmatmul.mubr.bf16.gmra.mrb[104].mxu0 %v798_v41  ;;  %v851_v41 = vpack.c.bf16 %v383_v22, %v365_v21  ;;  %v457_v21 = vld [vmem:[%s5173_s9 + $0x8b8] sm:$0xff] }
  0xf7   : > { %2740 = vmatprep.mubr.bf16.mxu1 %v815_v42  ;;  %2901 = vmatprep.mubr.bf16.mxu0 %v817_v43  ;;  %v853_v42 = vpack.c.bf16 %v385_v24, %v367_v23 }
  0xf8   : > { %4495 = vmatpush3.bf16.msra.mxu1 %v5056_v44  ;;  %4607 = vmatpush3.bf16.msra.mxu0 %v5058_v45 }
  0xf9   : > { %v3942_v58 = vpop.f32.mrb[0].mxu0  ;;  %v3990_v59 = vpop.f32.mrb[0].mxu1  ;;  %4496 = vmatprep.subr.bf16.mxu1 %v5059_v46  ;;  %4608 = vmatprep.subr.bf16.mxu0 %v5061_v47  ;;  %v364_v47 = vld [vmem:[%s5173_s9 + $0x5d0] sm:$0xff] }
  0xfa   : > { %v3943_v62 = vpop.f32.mrb[1].mxu0  ;;  %v3991_v63 = vpop.f32.mrb[1].mxu1 }
  0xfb   : > { %v5694_v2 = vadd.f32 %v3943_v62, %v3942_v58  ;;  %v3992_v3 = vadd.f32 %v3991_v63, %v3990_v59  ;;  %v3945_v4 = vpop.f32.mrb[2].mxu0  ;;  %v3993_v5 = vpop.f32.mrb[2].mxu1  ;;  %v852_v62 = vpack.c.bf16 %v384_v51, %v366_v50  ;;  %v491_v50 = vld [vmem:[%s5173_s9 + $0x9c8] sm:$0xff] }
  0xfc   : > { %v3946_v9 = vpop.f32.mrb[3].mxu0  ;;  %v3994_v10 = vpop.f32.mrb[3].mxu1  ;;  %4497 = vmatpush3.bf16.msra.mxu1 %v5060_v56  ;;  %4609 = vmatpush3.bf16.msra.mxu0 %v5062_v57  ;;  %v421_v56 = vld [vmem:[%s5173_s9 + $0x798] sm:$0xff]  ;;  %v475_v51 = vld [vmem:[%s5173_s9 + $0x948] sm:$0xff] }
  0xfd   : > { %v5707_v13 = vadd.f32 %v3946_v9, %v3945_v4  ;;  %v3995_v14 = vadd.f32 %v3994_v10, %v3993_v5  ;;  %4498 = vmatprep.subr.bf16.mxu1 %v5063_v60  ;;  %4610 = vmatprep.subr.bf16.mxu0 %v5065_v61  ;;  %v5730_v27 = vadd.f32 %v3992_v3, %v5699_v8 }
  0xfe   : > { %2741 = vmatmul.mubr.bf16.gmra.mrb[108].mxu1 %v814_v0  ;;  %2902 = vmatmul.mubr.bf16.gmra.mrb[108].mxu0 %v816_v1  ;;  %v850_v61 = vpack.c.bf16 %v382_v48, %v364_v47  ;;  %v869_v4 = vpack.c.bf16 %v419_v54, %v401_v52  ;;  %v871_v5 = vpack.c.bf16 %v421_v56, %v403_v55  ;;  %v473_v47 = vld [vmem:[%s5173_s9 + $0x938] sm:$0xff] }
  0xff   : > { %2748 = vmatprep.mubr.bf16.mxu1 %v833_v6  ;;  %2909 = vmatprep.mubr.bf16.mxu0 %v835_v7  ;;  %v5739_v30 = vadd.f32 %v3995_v14, %v5699_v8  ;;  %v418_v14 = vld [vmem:[%s5173_s9 + $0x780] sm:$0xff]  ;;  %v493_v52 = vld [vmem:[%s5173_s9 + $0x9d8] sm:$0xff] }
 0x100   : > { %4499 = vmatpush3.bf16.msra.mxu1 %v5064_v11  ;;  %4611 = vmatpush3.bf16.msra.mxu0 %v5066_v12  ;;  %v400_v12 = vld [vmem:[%s5173_s9 + $0x6f0] sm:$0xff] }
 0x101   : > { %v3948_v31 = vpop.f32.mrb[4].mxu0  ;;  %v3996_v32 = vpop.f32.mrb[4].mxu1  ;;  %4500 = vmatprep.subr.bf16.mxu1 %v5067_v19  ;;  %4612 = vmatprep.subr.bf16.mxu0 %v5069_v20  ;;  %v455_v19 = vld [vmem:[%s5173_s9 + $0x8a8] sm:$0xff] }
 0x102   : > { %v3949_v33 = vpop.f32.mrb[5].mxu0  ;;  %v3997_v34 = vpop.f32.mrb[5].mxu1  ;;  %v439_v20 = vld [vmem:[%s5173_s9 + $0x828] sm:$0xff] }
 0x103   : > { %v5741_v37 = vadd.f32 %v3949_v33, %v3948_v31  ;;  %v3998_v38 = vadd.f32 %v3997_v34, %v3996_v32  ;;  %v3951_v39 = vpop.f32.mrb[6].mxu0  ;;  %v3999_v40 = vpop.f32.mrb[6].mxu1  ;;  %v887_v34 = vpack.c.bf16 %v455_v19, %v437_v17  ;;  %v509_v17 = vld [vmem:[%s5173_s9 + $0xa58] sm:$0xff] }
 0x104   : > { %v3952_v43 = vpop.f32.mrb[7].mxu0  ;;  %v4000_v44 = vpop.f32.mrb[7].mxu1  ;;  %4501 = vmatpush3.bf16.msra.mxu1 %v5068_v25  ;;  %4613 = vmatpush3.bf16.msra.mxu0 %v5070_v26  ;;  %v868_v26 = vpack.c.bf16 %v418_v14, %v400_v12  ;;  %v472_v12 = vld [vmem:[%s5173_s9 + $0x930] sm:$0xff]  ;;  %v490_v14 = vld [vmem:[%s5173_s9 + $0x9c0] sm:$0xff] }
 0x105   : > { %v5743_v45 = vadd.f32 %v3952_v43, %v3951_v39  ;;  %v4001_v46 = vadd.f32 %v4000_v44, %v3999_v40  ;;  %4710 = vmatprep.subr.bf16.mxu1 %v5071_v28  ;;  %4822 = vmatprep.subr.bf16.mxu0 %v5073_v29  ;;  %v5748_v49 = vadd.f32 %v3998_v38, %v5699_v8  ;;  %v454_v43 = vld [vmem:[%s5173_s9 + $0x8a0] sm:$0xff] }
 0x106   : > { %2749 = vmatmul.mubr.bf16.gmra.mrb[112].mxu1 %v832_v35  ;;  %2910 = vmatmul.mubr.bf16.gmra.mrb[112].mxu0 %v834_v36  ;;  %v870_v28 = vpack.c.bf16 %v420_v16, %v402_v15  ;;  %v889_v35 = vpack.c.bf16 %v457_v21, %v439_v20  ;;  %v438_v44 = vld [vmem:[%s5173_s9 + $0x820] sm:$0xff]  ;;  %v492_v16 = vld [vmem:[%s5173_s9 + $0x9d0] sm:$0xff]  ;;  %v527_v20 = vld [vmem:[%s5173_s9 + $0xae8] sm:$0xff] }
 0x107   : > { %2756 = vmatprep.mubr.bf16.mxu1 %v851_v41  ;;  %2917 = vmatprep.mubr.bf16.mxu0 %v853_v42  ;;  %v5754_v53 = vadd.f32 %v4001_v46, %v5699_v8  ;;  %v436_v42 = vld [vmem:[%s5173_s9 + $0x810] sm:$0xff]  ;;  %v474_v15 = vld [vmem:[%s5173_s9 + $0x940] sm:$0xff]  ;;  %v511_v21 = vld [vmem:[%s5173_s9 + $0xa68] sm:$0xff] }
 0x108   : > { %v456_v46 = vld [vmem:[%s5173_s9 + $0x8b0] sm:$0xff] }
 0x109   : > { %v3954_v57 = vpop.f32.mrb[8].mxu0  ;;  %v4002_v58 = vpop.f32.mrb[8].mxu1 }
 0x10a   : > { %v3955_v59 = vpop.f32.mrb[9].mxu0  ;;  %v4003_v60 = vpop.f32.mrb[9].mxu1 }
 0x10b   : > { %v5759_v63 = vadd.f32 %v3955_v59, %v3954_v57  ;;  %v4004_v0 = vadd.f32 %v4003_v60, %v4002_v58  ;;  %v3957_v1 = vpop.f32.mrb[10].mxu0  ;;  %v4005_v3 = vpop.f32.mrb[10].mxu1  ;;  %v886_v58 = vpack.c.bf16 %v454_v43, %v436_v42  ;;  %v888_v59 = vpack.c.bf16 %v456_v46, %v438_v44 }
 0x10c   : > { %v3958_v6 = vpop.f32.mrb[11].mxu0  ;;  %v4006_v7 = vpop.f32.mrb[11].mxu1 }
 0x10d   : > { %v5761_v9 = vadd.f32 %v3958_v6, %v3957_v1  ;;  %v4007_v10 = vadd.f32 %v4006_v7, %v4005_v3  ;;  %v5764_v11 = vadd.f32 %v4004_v0, %v5699_v8  ;;  %v905_v1 = vpack.c.bf16 %v491_v50, %v473_v47  ;;  %v508_v47 = vld [vmem:[%s5173_s9 + $0xa50] sm:$0xff]  ;;  %v526_v50 = vld [vmem:[%s5173_s9 + $0xae0] sm:$0xff] }
 0x10e   : > { %2757 = vmatmul.mubr.bf16.gmra.mrb[116].mxu1 %v850_v61  ;;  %2918 = vmatmul.mubr.bf16.gmra.mrb[116].mxu0 %v852_v62  ;;  %v907_v3 = vpack.c.bf16 %v493_v52, %v475_v51  ;;  %v510_v51 = vld [vmem:[%s5173_s9 + $0xa60] sm:$0xff]  ;;  %v528_v52 = vld [vmem:[%s5173_s9 + $0xaf0] sm:$0xff] }
 0x10f   : > { %2764 = vmatprep.mubr.bf16.mxu1 %v869_v4  ;;  %2925 = vmatprep.mubr.bf16.mxu0 %v871_v5  ;;  %v5772_v18 = vadd.f32 %v4007_v10, %v5699_v8 }
 0x111   : > { %v3960_v22 = vpop.f32.mrb[12].mxu0  ;;  %v4008_v23 = vpop.f32.mrb[12].mxu1 }
 0x112   : > { %v3961_v24 = vpop.f32.mrb[13].mxu0  ;;  %v4009_v25 = vpop.f32.mrb[13].mxu1 }
 0x113   : > { %v5777_v29 = vadd.f32 %v3961_v24, %v3960_v22  ;;  %v4010_v31 = vadd.f32 %v4009_v25, %v4008_v23  ;;  %v3963_v32 = vpop.f32.mrb[14].mxu0  ;;  %v4011_v33 = vpop.f32.mrb[14].mxu1  ;;  %v529_v22 = vld [vmem:[%s5173_s9 + $0xaf8] sm:$0xff] }
 0x114   : > { %v3964_v36 = vpop.f32.mrb[15].mxu0  ;;  %v4012_v38 = vpop.f32.mrb[15].mxu1 }
 0x115   : > { %v5779_v39 = vadd.f32 %v3964_v36, %v3963_v32  ;;  %v4013_v40 = vadd.f32 %v4012_v38, %v4011_v33  ;;  %v5782_v41 = vadd.f32 %v4010_v31, %v5699_v8  ;;  %v906_v31 = vpack.c.bf16 %v492_v16, %v474_v15 }
 0x116   : > { %2765 = vmatmul.mubr.bf16.gmra.mrb[120].mxu1 %v868_v26  ;;  %2926 = vmatmul.mubr.bf16.gmra.mrb[120].mxu0 %v870_v28  ;;  %v904_v28 = vpack.c.bf16 %v490_v14, %v472_v12  ;;  %v923_v36 = vpack.c.bf16 %v527_v20, %v509_v17  ;;  %v925_v38 = vpack.c.bf16 %v529_v22, %v511_v21 }
 0x117   : > { %2772 = vmatprep.mubr.bf16.mxu1 %v887_v34  ;;  %2933 = vmatprep.mubr.bf16.mxu0 %v889_v35  ;;  %v5790_v48 = vadd.f32 %v4013_v40, %v5699_v8 }
 0x119   : > { %v3966_v54 = vpop.f32.mrb[16].mxu0  ;;  %v4014_v55 = vpop.f32.mrb[16].mxu1 }
 0x11a   : > { %v3967_v56 = vpop.f32.mrb[17].mxu0  ;;  %v4015_v57 = vpop.f32.mrb[17].mxu1 }
 0x11b   : > { %v5795_v60 = vadd.f32 %v3967_v56, %v3966_v54  ;;  %v4016_v61 = vadd.f32 %v4015_v57, %v4014_v55  ;;  %v3969_v62 = vpop.f32.mrb[18].mxu0  ;;  %v4017_v0 = vpop.f32.mrb[18].mxu1  ;;  %v545_v54 = vld [vmem:[%s5173_s9 + $0xb78] sm:$0xff]  ;;  %v563_v56 = vld [vmem:[%s5173_s9 + $0xc08] sm:$0xff] }
 0x11c   : > { %v3970_v4 = vpop.f32.mrb[19].mxu0  ;;  %v4018_v5 = vpop.f32.mrb[19].mxu1  ;;  %v547_v57 = vld [vmem:[%s5173_s9 + $0xb88] sm:$0xff]  ;;  %v941_v14 = vpack.c.bf16 %v563_v56, %v545_v54 }
 0x11d   : > { %v5797_v6 = vadd.f32 %v3970_v4, %v3969_v62  ;;  %v4019_v7 = vadd.f32 %v4018_v5, %v4017_v0  ;;  %v5800_v10 = vadd.f32 %v4016_v61, %v5699_v8 }
 0x11e   : > { %2773 = vmatmul.mubr.bf16.gmra.mrb[124].mxu1 %v886_v58  ;;  %2934 = vmatmul.mubr.bf16.gmra.mrb[124].mxu0 %v888_v59  ;;  %v565_v58 = vld [vmem:[%s5173_s9 + $0xc18] sm:$0xff] }
 0x11f   : > { %2780 = vmatprep.mubr.bf16.mxu1 %v905_v1  ;;  %2941 = vmatprep.mubr.bf16.mxu0 %v907_v3  ;;  %v5808_v19 = vadd.f32 %v4019_v7, %v5699_v8  ;;  %v922_v1 = vpack.c.bf16 %v526_v50, %v508_v47  ;;  %v924_v3 = vpack.c.bf16 %v528_v52, %v510_v51 }
 0x120   : > { %v943_v15 = vpack.c.bf16 %v565_v58, %v547_v57 }
 0x121   : > { %v3972_v23 = vpop.f32.mrb[20].mxu0  ;;  %v4020_v24 = vpop.f32.mrb[20].mxu1 }
 0x122   : > { %v3973_v25 = vpop.f32.mrb[21].mxu0  ;;  %v4021_v26 = vpop.f32.mrb[21].mxu1 }
 0x123   : > { %v5813_v32 = vadd.f32 %v3973_v25, %v3972_v23  ;;  %v4022_v33 = vadd.f32 %v4021_v26, %v4020_v24  ;;  %v3975_v34 = vpop.f32.mrb[22].mxu0  ;;  %v4023_v35 = vpop.f32.mrb[22].mxu1  ;;  %v544_v23 = vld [vmem:[%s5173_s9 + $0xb70] sm:$0xff]  ;;  %v562_v24 = vld [vmem:[%s5173_s9 + $0xc00] sm:$0xff] }
 0x124   : > { %v3976_v40 = vpop.f32.mrb[23].mxu0  ;;  %v4024_v42 = vpop.f32.mrb[23].mxu1  ;;  %v546_v25 = vld [vmem:[%s5173_s9 + $0xb80] sm:$0xff]  ;;  %v564_v26 = vld [vmem:[%s5173_s9 + $0xc10] sm:$0xff] }
 0x125   : > { %v5815_v43 = vadd.f32 %v3976_v40, %v3975_v34  ;;  %v4025_v44 = vadd.f32 %v4024_v42, %v4023_v35  ;;  %v5818_v46 = vadd.f32 %v4022_v33, %v5699_v8  ;;  %v599_v33 = vld [vmem:[%s5173_s9 + $0xd28] sm:$0xff]  ;;  %v601_v35 = vld [vmem:[%s5173_s9 + $0xd38] sm:$0xff]  ;;  %v942_v47 = vpack.c.bf16 %v564_v26, %v546_v25 }
 0x126   : > { %2781 = vmatmul.mubr.bf16.gmra.mrb[128].mxu1 %v904_v28  ;;  %2942 = vmatmul.mubr.bf16.gmra.mrb[128].mxu0 %v906_v31  ;;  %v581_v28 = vld [vmem:[%s5173_s9 + $0xc98] sm:$0xff]  ;;  %v583_v34 = vld [vmem:[%s5173_s9 + $0xca8] sm:$0xff] }
 0x127   : > { %2788 = vmatprep.mubr.bf16.mxu1 %v923_v36  ;;  %2949 = vmatprep.mubr.bf16.mxu0 %v925_v38  ;;  %v5826_v55 = vadd.f32 %v4025_v44, %v5699_v8  ;;  %v940_v44 = vpack.c.bf16 %v562_v24, %v544_v23  ;;  %v959_v56 = vpack.c.bf16 %v599_v33, %v581_v28 }
 0x128   : > { %v961_v57 = vpack.c.bf16 %v601_v35, %v583_v34  ;;  %v2236_v34 = vadd.f32 %v5694_v2, %v5699_v8  ;;  %v616_v2 = vld [vmem:[%s5173_s9 + $0xdb0] sm:$0xff] }
 0x129   : > { %v3978_v59 = vpop.f32.mrb[24].mxu0  ;;  %v4026_v61 = vpop.f32.mrb[24].mxu1 }
 0x12a   : > { %v3979_v62 = vpop.f32.mrb[25].mxu0  ;;  %v4027_v0 = vpop.f32.mrb[25].mxu1 }
 0x12b   : > { %v5831_v4 = vadd.f32 %v3979_v62, %v3978_v59  ;;  %v4028_v5 = vadd.f32 %v4027_v0, %v4026_v61  ;;  %v3981_v7 = vpop.f32.mrb[26].mxu0  ;;  %v4029_v12 = vpop.f32.mrb[26].mxu1 }
 0x12c   : > { %v3982_v16 = vpop.f32.mrb[27].mxu0  ;;  %v4030_v17 = vpop.f32.mrb[27].mxu1 }
 0x12d   : > { %v5833_v20 = vadd.f32 %v3982_v16, %v3981_v7  ;;  %v4031_v21 = vadd.f32 %v4030_v17, %v4029_v12  ;;  %v5836_v22 = vadd.f32 %v4028_v5, %v5699_v8  ;;  %v582_v5 = vld [vmem:[%s5173_s9 + $0xca0] sm:$0xff]  ;;  %v600_v7 = vld [vmem:[%s5173_s9 + $0xd30] sm:$0xff]  ;;  %v617_v12 = vld [vmem:[%s5173_s9 + $0xdb8] sm:$0xff] }
 0x12e   : > { %2789 = vmatmul.mubr.bf16.gmra.mrb[132].mxu1 %v922_v1  ;;  %2950 = vmatmul.mubr.bf16.gmra.mrb[132].mxu0 %v924_v3  ;;  %v580_v1 = vld [vmem:[%s5173_s9 + $0xc90] sm:$0xff]  ;;  %v598_v3 = vld [vmem:[%s5173_s9 + $0xd20] sm:$0xff]  ;;  %v619_v16 = vld [vmem:[%s5173_s9 + $0xdc8] sm:$0xff]  ;;  %v960_v28 = vpack.c.bf16 %v600_v7, %v582_v5 }
 0x12f   : > { %2796 = vmatprep.mubr.bf16.mxu1 %v941_v14  ;;  %2957 = vmatprep.mubr.bf16.mxu0 %v943_v15  ;;  %v5844_v31 = vadd.f32 %v4031_v21, %v5699_v8  ;;  %v635_v14 = vld [vmem:[%s5173_s9 + $0xe48] sm:$0xff]  ;;  %v637_v17 = vld [vmem:[%s5173_s9 + $0xe58] sm:$0xff]  ;;  %v958_v26 = vpack.c.bf16 %v598_v3, %v580_v1  ;;  %v636_v1 = vld [vmem:[%s5173_s9 + $0xe50] sm:$0xff] }
 0x130   : > { %v977_v33 = vpack.c.bf16 %v635_v14, %v617_v12  ;;  %v653_v3 = vld [vmem:[%s5173_s9 + $0xed8] sm:$0xff]  ;;  %v671_v5 = vld [vmem:[%s5173_s9 + $0xf68] sm:$0xff] }
 0x131   : > { %v3984_v36 = vpop.f32.mrb[28].mxu0  ;;  %v4032_v38 = vpop.f32.mrb[28].mxu1  ;;  %v655_v7 = vld [vmem:[%s5173_s9 + $0xee8] sm:$0xff]  ;;  %v673_v12 = vld [vmem:[%s5173_s9 + $0xf78] sm:$0xff] }
 0x132   : > { %v3985_v40 = vpop.f32.mrb[29].mxu0  ;;  %v4033_v42 = vpop.f32.mrb[29].mxu1 }
 0x133   : > { %v5849_v50 = vadd.f32 %v3985_v40, %v3984_v36  ;;  %v4034_v51 = vadd.f32 %v4033_v42, %v4032_v38  ;;  %v3987_v52 = vpop.f32.mrb[30].mxu0  ;;  %v4035_v54 = vpop.f32.mrb[30].mxu1  ;;  %v979_v42 = vpack.c.bf16 %v637_v17, %v619_v16 }
 0x134   : > { %v3988_v58 = vpop.f32.mrb[31].mxu0  ;;  %v4036_v59 = vpop.f32.mrb[31].mxu1 }
 0x135   : > { %v5851_v61 = vadd.f32 %v3988_v58, %v3987_v52  ;;  %v4037_v62 = vadd.f32 %v4036_v59, %v4035_v54  ;;  %v5854_v0 = vadd.f32 %v4034_v51, %v5699_v8  ;;  %v2239_v52 = vadd.f32 %v5707_v13, %v5699_v8  ;;  %v618_v58 = vld [vmem:[%s5173_s9 + $0xdc0] sm:$0xff] }
 0x136   : > { %2797 = vmatmul.mubr.bf16.gmra.mrb[136].mxu1 %v940_v44  ;;  %2958 = vmatmul.mubr.bf16.gmra.mrb[136].mxu0 %v942_v47 }
 0x137   : > { %2804 = vmatprep.mubr.bf16.mxu1 %v959_v56  ;;  %2965 = vmatprep.mubr.bf16.mxu0 %v961_v57  ;;  %v5863_v15 = vadd.f32 %v4037_v62, %v5699_v8  ;;  %v634_v57 = vld [vmem:[%s5173_s9 + $0xe40] sm:$0xff] }
 0x139   : > { %v4054_v21 = vpop.f32.mrb[32].mxu1  ;;  %v4166_v23 = vpop.f32.mrb[32].mxu0 }
 0x13a   : > { %v4055_v24 = vpop.f32.mrb[33].mxu1  ;;  %v4167_v25 = vpop.f32.mrb[33].mxu0 }
 0x13b   : > { %v4056_v35 = vadd.f32 %v4055_v24, %v4054_v21  ;;  %v4168_v36 = vadd.f32 %v4167_v25, %v4166_v23  ;;  %v4057_v38 = vpop.f32.mrb[34].mxu1  ;;  %v4169_v40 = vpop.f32.mrb[34].mxu0  ;;  %v976_v23 = vpack.c.bf16 %v634_v57, %v616_v2  ;;  %v978_v24 = vpack.c.bf16 %v636_v1, %v618_v58  ;;  %v672_v57 = vld [vmem:[%s5173_s9 + $0xf70] sm:$0xff]  ;;  %v689_v58 = vld [vmem:[%s5173_s9 + $0xff8] sm:$0xff]  ;;  %v691_v1 = vld [vmem:[%s5173_s9 + $0x1008] sm:$0xff] }
 0x13c   : > { %v4058_v44 = vpop.f32.mrb[35].mxu1  ;;  %v4170_v47 = vpop.f32.mrb[35].mxu0  ;;  %v995_v25 = vpack.c.bf16 %v671_v5, %v653_v3  ;;  %v709_v3 = vld [vmem:[%s5173_s9 + $0x1098] sm:$0xff] }
 0x13d   : > { %v2397_v51 = vadd.f32 %v4056_v35, %v2236_v34  ;;  %v4059_v54 = vadd.f32 %v4058_v44, %v4057_v38  ;;  %v4171_v56 = vadd.f32 %v4170_v47, %v4169_v40  ;;  %v2247_v44 = vadd.f32 %v5743_v45, %v5699_v8 }
 0x13e   : > { %2805 = vmatmul.mubr.bf16.gmra.mrb[140].mxu1 %v958_v26  ;;  %2966 = vmatmul.mubr.bf16.gmra.mrb[140].mxu0 %v960_v28  ;;  %v2244_v26 = vadd.f32 %v5741_v37, %v5699_v8  ;;  %v652_v37 = vld [vmem:[%s5173_s9 + $0xed0] sm:$0xff] }
 0x13f   : > { %v5874_v59 = vadd.f32 %v4168_v36, %v2397_v51  ;;  %v2400_v62 = vadd.f32 %v4059_v54, %v2239_v52  ;;  %2812 = vmatprep.mubr.bf16.mxu1 %v977_v33  ;;  %2973 = vmatprep.mubr.bf16.mxu0 %v979_v42  ;;  %v997_v36 = vpack.c.bf16 %v673_v12, %v655_v7  ;;  %v670_v52 = vld [vmem:[%s5173_s9 + $0xf60] sm:$0xff] }
 0x140   : > { %v654_v54 = vld [vmem:[%s5173_s9 + $0xee0] sm:$0xff] }
 0x141   : > { %v5881_v14 = vadd.f32 %v4171_v56, %v2400_v62  ;;  %v4060_v13 = vpop.f32.mrb[36].mxu1  ;;  %v4172_v16 = vpop.f32.mrb[36].mxu0  ;;  %v707_v62 = vld [vmem:[%s5173_s9 + $0x1088] sm:$0xff] }
 0x142   : > { %v4061_v17 = vpop.f32.mrb[37].mxu1  ;;  %v4173_v21 = vpop.f32.mrb[37].mxu0 }
 0x143   : > { %v4062_v28 = vadd.f32 %v4061_v17, %v4060_v13  ;;  %v4174_v33 = vadd.f32 %v4173_v21, %v4172_v16  ;;  %v4063_v34 = vpop.f32.mrb[38].mxu1  ;;  %v4175_v35 = vpop.f32.mrb[38].mxu0  ;;  %v994_v16 = vpack.c.bf16 %v670_v52, %v652_v37  ;;  %v996_v17 = vpack.c.bf16 %v672_v57, %v654_v54  ;;  %v708_v52 = vld [vmem:[%s5173_s9 + $0x1090] sm:$0xff]  ;;  %v725_v54 = vld [vmem:[%s5173_s9 + $0x1118] sm:$0xff]  ;;  %v727_v57 = vld [vmem:[%s5173_s9 + $0x1128] sm:$0xff] }
 0x144   : > { %v4064_v38 = vpop.f32.mrb[39].mxu1  ;;  %v4176_v40 = vpop.f32.mrb[39].mxu0  ;;  %v1013_v21 = vpack.c.bf16 %v707_v62, %v689_v58  ;;  %v745_v58 = vld [vmem:[%s5173_s9 + $0x11b8] sm:$0xff] }
 0x145   : > { %v2405_v42 = vadd.f32 %v4062_v28, %v2244_v26  ;;  %v4065_v47 = vadd.f32 %v4064_v38, %v4063_v34  ;;  %v4177_v51 = vadd.f32 %v4176_v40, %v4175_v35  ;;  %v2255_v38 = vadd.f32 %v5761_v9, %v5699_v8 }
 0x146   : > { %2813 = vmatmul.mubr.bf16.gmra.mrb[144].mxu1 %v976_v23  ;;  %2974 = vmatmul.mubr.bf16.gmra.mrb[144].mxu0 %v978_v24  ;;  %v2252_v23 = vadd.f32 %v5759_v63, %v5699_v8  ;;  %v688_v63 = vld [vmem:[%s5173_s9 + $0xff0] sm:$0xff] }
 0x147   : > { %v5890_v56 = vadd.f32 %v4174_v33, %v2405_v42  ;;  %v2408_v2 = vadd.f32 %v4065_v47, %v2247_v44  ;;  %2820 = vmatprep.mubr.bf16.mxu1 %v995_v25  ;;  %2981 = vmatprep.mubr.bf16.mxu0 %v997_v36  ;;  %v1015_v33 = vpack.c.bf16 %v709_v3, %v691_v1  ;;  %v706_v44 = vld [vmem:[%s5173_s9 + $0x1080] sm:$0xff] }
 0x148   : > { %v690_v47 = vld [vmem:[%s5173_s9 + $0x1000] sm:$0xff] }
 0x149   : > { %v5897_v5 = vadd.f32 %v4177_v51, %v2408_v2  ;;  %v4066_v45 = vpop.f32.mrb[40].mxu1  ;;  %v4178_v7 = vpop.f32.mrb[40].mxu0  ;;  %v743_v2 = vld [vmem:[%s5173_s9 + $0x11a8] sm:$0xff] }
 0x14a   : > { %v4067_v12 = vpop.f32.mrb[41].mxu1  ;;  %v4179_v13 = vpop.f32.mrb[41].mxu0 }
 0x14b   : > { %v4068_v24 = vadd.f32 %v4067_v12, %v4066_v45  ;;  %v4180_v25 = vadd.f32 %v4179_v13, %v4178_v7  ;;  %v4069_v26 = vpop.f32.mrb[42].mxu1  ;;  %v4181_v28 = vpop.f32.mrb[42].mxu0  ;;  %v1012_v7 = vpack.c.bf16 %v706_v44, %v688_v63  ;;  %v1014_v12 = vpack.c.bf16 %v708_v52, %v690_v47  ;;  %v744_v44 = vld [vmem:[%s5173_s9 + $0x11b0] sm:$0xff]  ;;  %v189_v47 = vld [vmem:[%s5173_s9 + $0x58] sm:$0xff]  ;;  %v191_v52 = vld [vmem:[%s5173_s9 + $0x68] sm:$0xff] }
 0x14c   : > { %v4070_v34 = vpop.f32.mrb[43].mxu1  ;;  %v4182_v35 = vpop.f32.mrb[43].mxu0  ;;  %v1031_v13 = vpack.c.bf16 %v743_v2, %v725_v54  ;;  %v209_v54 = vld [vmem:[%s5173_s9 + $0xf8] sm:$0xff] }
 0x14d   : > { %v2413_v36 = vadd.f32 %v4068_v24, %v2252_v23  ;;  %v4071_v40 = vadd.f32 %v4070_v34, %v4069_v26  ;;  %v4183_v42 = vadd.f32 %v4182_v35, %v4181_v28  ;;  %v2263_v34 = vadd.f32 %v5779_v39, %v5699_v8 }
 0x14e   : > { %2821 = vmatmul.mubr.bf16.gmra.mrb[148].mxu1 %v994_v16  ;;  %2982 = vmatmul.mubr.bf16.gmra.mrb[148].mxu0 %v996_v17  ;;  %v2260_v16 = vadd.f32 %v5777_v29, %v5699_v8  ;;  %v724_v29 = vld [vmem:[%s5173_s9 + $0x1110] sm:$0xff] }
 0x14f   : > { %v5906_v51 = vadd.f32 %v4180_v25, %v2413_v36  ;;  %v2416_v37 = vadd.f32 %v4071_v40, %v2255_v38  ;;  %2828 = vmatprep.mubr.bf16.mxu1 %v1013_v21  ;;  %2989 = vmatprep.mubr.bf16.mxu0 %v1015_v33  ;;  %v1033_v25 = vpack.c.bf16 %v745_v58, %v727_v57  ;;  %v742_v38 = vld [vmem:[%s5173_s9 + $0x11a0] sm:$0xff] }
 0x150   : > { %v726_v40 = vld [vmem:[%s5173_s9 + $0x1120] sm:$0xff] }
 0x151   : > { %v5913_v62 = vadd.f32 %v4183_v42, %v2416_v37  ;;  %v4072_v9 = vpop.f32.mrb[44].mxu1  ;;  %v4184_v1 = vpop.f32.mrb[44].mxu0  ;;  %v207_v37 = vld [vmem:[%s5173_s9 + $0xe8] sm:$0xff] }
 0x152   : > { %v4073_v3 = vpop.f32.mrb[45].mxu1  ;;  %v4185_v45 = vpop.f32.mrb[45].mxu0 }
 0x153   : > { %v4074_v17 = vadd.f32 %v4073_v3, %v4072_v9  ;;  %v4186_v21 = vadd.f32 %v4185_v45, %v4184_v1  ;;  %v4075_v23 = vpop.f32.mrb[46].mxu1  ;;  %v4187_v24 = vpop.f32.mrb[46].mxu0  ;;  %v1030_v1 = vpack.c.bf16 %v742_v38, %v724_v29  ;;  %v1032_v3 = vpack.c.bf16 %v744_v44, %v726_v40  ;;  %v190_v29 = vld [vmem:[%s5173_s9 + $0x60] sm:$0xff]  ;;  %v208_v38 = vld [vmem:[%s5173_s9 + $0xf0] sm:$0xff]  ;;  %v225_v40 = vld [vmem:[%s5173_s9 + $0x178] sm:$0xff] }
 0x154   : > { %v4076_v26 = vpop.f32.mrb[47].mxu1  ;;  %v4188_v28 = vpop.f32.mrb[47].mxu0  ;;  %v765_v45 = vpack.c.bf16 %v207_v37, %v189_v47  ;;  %v243_v47 = vld [vmem:[%s5173_s9 + $0x208] sm:$0xff] }
 0x155   : > { %v2421_v33 = vadd.f32 %v4074_v17, %v2260_v16  ;;  %v4077_v35 = vadd.f32 %v4076_v26, %v4075_v23  ;;  %v4189_v36 = vadd.f32 %v4188_v28, %v4187_v24  ;;  %v2271_v26 = vadd.f32 %v5797_v6, %v5699_v8  ;;  %v227_v37 = vld [vmem:[%s5173_s9 + $0x188] sm:$0xff] }
 0x156   : > { %2829 = vmatmul.mubr.bf16.gmra.mrb[152].mxu1 %v1012_v7  ;;  %2990 = vmatmul.mubr.bf16.gmra.mrb[152].mxu0 %v1014_v12  ;;  %v2268_v7 = vadd.f32 %v5795_v60, %v5699_v8  ;;  %v188_v60 = vld [vmem:[%s5173_s9 + $0x50] sm:$0xff] }
 0x157   : > { %v5922_v42 = vadd.f32 %v4186_v21, %v2421_v33  ;;  %v2424_v63 = vadd.f32 %v4077_v35, %v2263_v34  ;;  %2836 = vmatprep.mubr.bf16.mxu1 %v1031_v13  ;;  %2997 = vmatprep.mubr.bf16.mxu0 %v1033_v25  ;;  %v767_v21 = vpack.c.bf16 %v209_v54, %v191_v52  ;;  %v245_v52 = vld [vmem:[%s5173_s9 + $0x218] sm:$0xff] }
 0x159   : > { %v5929_v2 = vadd.f32 %v4189_v36, %v2424_v63  ;;  %v4078_v39 = vpop.f32.mrb[48].mxu1  ;;  %v4190_v57 = vpop.f32.mrb[48].mxu0  ;;  %v206_v36 = vld [vmem:[%s5173_s9 + $0xe0] sm:$0xff] }
 0x15a   : > { %v4079_v58 = vpop.f32.mrb[49].mxu1  ;;  %v4191_v9 = vpop.f32.mrb[49].mxu0 }
 0x15b   : > { %v4080_v12 = vadd.f32 %v4079_v58, %v4078_v39  ;;  %v4192_v13 = vadd.f32 %v4191_v9, %v4190_v57  ;;  %v4081_v16 = vpop.f32.mrb[50].mxu1  ;;  %v4193_v17 = vpop.f32.mrb[50].mxu0  ;;  %v764_v57 = vpack.c.bf16 %v206_v36, %v188_v60  ;;  %v766_v58 = vpack.c.bf16 %v208_v38, %v190_v29  ;;  %v226_v60 = vld [vmem:[%s5173_s9 + $0x180] sm:$0xff]  ;;  %v5075_v36 = vld [vmem:[%s6620_s1 + $0x3c8] sm:$0xff]   ;;  %v261_v38 = vld [vmem:[%s5173_s9 + $0x298] sm:$0xff] }
 0x15c   : > { %v4082_v23 = vpop.f32.mrb[51].mxu1  ;;  %v4194_v24 = vpop.f32.mrb[51].mxu0  ;;  %v2276_v9 = vadd.f32 %v5813_v32, %v5699_v8  ;;  %v783_v32 = vpack.c.bf16 %v243_v47, %v225_v40  ;;  %v5077_v29 = vld [vmem:[%s6620_s1 + $0x448] sm:$0xff]   ;;  %v281_v47 = vld [vmem:[%s5173_s9 + $0x338] sm:$0xff] }
 0x15d   : > { %v2429_v25 = vadd.f32 %v4080_v12, %v2268_v7  ;;  %v4083_v28 = vadd.f32 %v4082_v23, %v4081_v16  ;;  %v4195_v33 = vadd.f32 %v4194_v24, %v4193_v17  ;;  %v5072_v12 = vld [vmem:[%s6620_s1 + $0x380] sm:$0xff]   ;;  %v2279_v24 = vadd.f32 %v5815_v43, %v5699_v8  ;;  %v279_v40 = vld [vmem:[%s5173_s9 + $0x328] sm:$0xff] }
 0x15e   : > { %2837 = vmatmul.mubr.bf16.gmra.mrb[156].mxu1 %v1030_v1  ;;  %2998 = vmatmul.mubr.bf16.gmra.mrb[156].mxu0 %v1032_v3  ;;  %v263_v43 = vld [vmem:[%s5173_s9 + $0x2a8] sm:$0xff] }
 0x15f   : > { %v5936_v34 = vadd.f32 %v4192_v13, %v2429_v25  ;;  %v2432_v35 = vadd.f32 %v4083_v28, %v2271_v26  ;;  %3038 = vmatprep.mubr.bf16.mxu1 %v765_v45  ;;  %3199 = vmatprep.mubr.bf16.mxu0 %v767_v21  ;;  %v5074_v13 = vld [vmem:[%s6620_s1 + $0x400] sm:$0xff]   ;;  %v785_v21 = vpack.c.bf16 %v245_v52, %v227_v37  ;;  %v224_v28 = vld [vmem:[%s5173_s9 + $0x170] sm:$0xff]  ;;  %v5076_v37 = vld [vmem:[%s6620_s1 + $0x388] sm:$0xff]  }
 0x160   : > { %v5078_v52 = vld [vmem:[%s6620_s1 + $0x408] sm:$0xff]  }
 0x161   : > { %v5942_v63 = vadd.f32 %v4195_v33, %v2432_v35  ;;  %v4084_v6 = vpop.f32.mrb[52].mxu1  ;;  %v4196_v44 = vpop.f32.mrb[52].mxu0  ;;  %v242_v33 = vld [vmem:[%s5173_s9 + $0x200] sm:$0xff]  ;;  %v244_v35 = vld [vmem:[%s5173_s9 + $0x210] sm:$0xff] }
 0x162   : > { %v4085_v54 = vpop.f32.mrb[53].mxu1  ;;  %v4197_v39 = vpop.f32.mrb[53].mxu0 }
 0x163   : > { %v4086_v1 = vadd.f32 %v4085_v54, %v4084_v6  ;;  %v4198_v3 = vadd.f32 %v4197_v39, %v4196_v44  ;;  %v4087_v45 = vpop.f32.mrb[54].mxu1  ;;  %v4199_v7 = vpop.f32.mrb[54].mxu0  ;;  %v5079_v54 = vld [vmem:[%s6620_s1 + $0x3d0] sm:$0xff]  }
 0x164   : > { %v4088_v16 = vpop.f32.mrb[55].mxu1  ;;  %v4200_v17 = vpop.f32.mrb[55].mxu0  ;;  %v5081_v39 = vld [vmem:[%s6620_s1 + $0x450] sm:$0xff]  }
 0x165   : > { %v2437_v23 = vadd.f32 %v4086_v1, %v2276_v9  ;;  %v4089_v25 = vadd.f32 %v4088_v16, %v4087_v45  ;;  %v4201_v26 = vadd.f32 %v4200_v17, %v4199_v7  ;;  %v782_v45 = vpack.c.bf16 %v242_v33, %v224_v28 }
 0x166   : > { %3039 = vmatmul.mubr.bf16.vlgmr.msra.gmra.mrb[160].mxu1 %v764_v57  ;;  %3200 = vmatmul.mubr.bf16.vlgmr.msra.gmra.mrb[160].mxu0 %v766_v58  ;;  %v784_v7 = vpack.c.bf16 %v244_v35, %v226_v60  ;;  %v2284_v16 = vadd.f32 %v5831_v4, %v5699_v8  ;;  %v5082_v4 = vld [vmem:[%s6620_s1 + $0x410] sm:$0xff]   ;;  %v2287_v33 = vadd.f32 %v5833_v20, %v5699_v8 }
 0x167   : > { %v5970_v6 = vadd.f32 %v4198_v3, %v2437_v23  ;;  %v2440_v44 = vadd.f32 %v4089_v25, %v2279_v24  ;;  %4711 = vmatpush3.bf16.msra.mxu1 %v5072_v12  ;;  %4823 = vmatpush3.bf16.msra.mxu0 %v5074_v13  ;;  %v801_v12 = vpack.c.bf16 %v279_v40, %v261_v38  ;;  %v5085_v38 = vld [vmem:[%s6620_s1 + $0x458] sm:$0xff]   ;;  %v278_v40 = vld [vmem:[%s5173_s9 + $0x320] sm:$0xff] }
 0x168   : > { %3046 = vmatprep.mubr.bf16.mxu1 %v783_v32  ;;  %3207 = vmatprep.mubr.bf16.mxu0 %v785_v21  ;;  %v803_v13 = vpack.c.bf16 %v281_v47, %v263_v43  ;;  %v262_v43 = vld [vmem:[%s5173_s9 + $0x2a0] sm:$0xff]  ;;  %v297_v47 = vld [vmem:[%s5173_s9 + $0x3b8] sm:$0xff] }
 0x169   : > { %v5985_v57 = vadd.f32 %v4201_v26, %v2440_v44  ;;  %v4090_v58 = vpop.f32.mrb[56].mxu1  ;;  %v4202_v9 = vpop.f32.mrb[56].mxu0  ;;  %4712 = vmatprep.subr.bf16.mxu1 %v5075_v36  ;;  %4824 = vmatprep.subr.bf16.mxu0 %v5077_v29  ;;  %v5080_v26 = vld [vmem:[%s6620_s1 + $0x390] sm:$0xff]   ;;  %v5083_v29 = vld [vmem:[%s6620_s1 + $0x3d8] sm:$0xff]  }
 0x16a   : > { %v4091_v1 = vpop.f32.mrb[57].mxu1  ;;  %v4203_v3 = vpop.f32.mrb[57].mxu0  ;;  %v260_v36 = vld [vmem:[%s5173_s9 + $0x290] sm:$0xff] }
 0x16b   : > { %v4092_v17 = vadd.f32 %v4091_v1, %v4090_v58  ;;  %v4204_v32 = vadd.f32 %v4203_v3, %v4202_v9  ;;  %v4093_v21 = vpop.f32.mrb[58].mxu1  ;;  %v4205_v23 = vpop.f32.mrb[58].mxu0  ;;  %4713 = vmatpush3.bf16.msra.mxu1 %v5076_v37  ;;  %4825 = vmatpush3.bf16.msra.mxu0 %v5078_v52  ;;  %v280_v44 = vld [vmem:[%s5173_s9 + $0x330] sm:$0xff]  ;;  %v315_v37 = vld [vmem:[%s5173_s9 + $0x448] sm:$0xff]  ;;  %v5086_v58 = vld [vmem:[%s6620_s1 + $0x418] sm:$0xff]  }
 0x16c   : > { %v4094_v24 = vpop.f32.mrb[59].mxu1  ;;  %v4206_v25 = vpop.f32.mrb[59].mxu0  ;;  %4714 = vmatprep.subr.bf16.mxu1 %v5079_v54  ;;  %4826 = vmatprep.subr.bf16.mxu0 %v5081_v39  ;;  %v299_v52 = vld [vmem:[%s5173_s9 + $0x3c8] sm:$0xff]  ;;  %v317_v54 = vld [vmem:[%s5173_s9 + $0x458] sm:$0xff] }
 0x16d   : > { %v2445_v28 = vadd.f32 %v4092_v17, %v2284_v16  ;;  %v4095_v60 = vadd.f32 %v4094_v24, %v4093_v21  ;;  %v4207_v35 = vadd.f32 %v4206_v25, %v4205_v23  ;;  %v5084_v39 = vld [vmem:[%s6620_s1 + $0x398] sm:$0xff]   ;;  %v800_v16 = vpack.c.bf16 %v278_v40, %v260_v36  ;;  %v5103_v21 = vld [vmem:[%s6621_s2] ss:$0 sm:$0xff] }
 0x16e   : > { %3047 = vmatmul.mubr.bf16.gmra.mrb[164].mxu1 %v782_v45  ;;  %3208 = vmatmul.mubr.bf16.gmra.mrb[164].mxu0 %v784_v7  ;;  %v5087_v45 = vld [vmem:[%s6620_s1 + $0x3e0] sm:$0xff]   ;;  %v802_v17 = vpack.c.bf16 %v280_v44, %v262_v43  ;;  %v2292_v23 = vadd.f32 %v5103_v21, %v5849_v50  ;;  %v5091_v43 = vld [vmem:[%s6620_s1 + $0x3e8] sm:$0xff]  }
 0x16f   : > { %v6007_v8 = vadd.f32 %v4204_v32, %v2445_v28  ;;  %v2448_v20 = vadd.f32 %v4095_v60, %v2287_v33  ;;  %3054 = vmatprep.mubr.bf16.mxu1 %v801_v12  ;;  %3215 = vmatprep.mubr.bf16.mxu0 %v803_v13  ;;  %v5089_v7 = vld [vmem:[%s6620_s1 + $0x460] sm:$0xff]   ;;  %v819_v32 = vpack.c.bf16 %v315_v37, %v297_v47  ;;  %v5093_v44 = vld [vmem:[%s6620_s1 + $0x468] sm:$0xff]   ;;  %v316_v37 = vld [vmem:[%s5173_s9 + $0x450] sm:$0xff] }
 0x170   : > { %4715 = vmatpush3.bf16.msra.mxu1 %v5080_v26  ;;  %4827 = vmatpush3.bf16.msra.mxu0 %v5082_v4  ;;  %v821_v28 = vpack.c.bf16 %v317_v54, %v299_v52  ;;  %v2295_v33 = vadd.f32 %v5103_v21, %v5851_v61  ;;  %v5088_v36 = vld [vmem:[%s6620_s1 + $0x3a0] sm:$0xff]   ;;  %v296_v61 = vld [vmem:[%s5173_s9 + $0x3b0] sm:$0xff] }
 0x171   : > { %v6019_v9 = vadd.f32 %v4207_v35, %v2448_v20  ;;  %v4096_v1 = vpop.f32.mrb[60].mxu1  ;;  %v4208_v3 = vpop.f32.mrb[60].mxu0  ;;  %4716 = vmatprep.subr.bf16.mxu1 %v5083_v29  ;;  %4828 = vmatprep.subr.bf16.mxu0 %v5085_v38  ;;  %v5090_v50 = vld [vmem:[%s6620_s1 + $0x420] sm:$0xff]  }
 0x172   : > { %v4097_v12 = vpop.f32.mrb[61].mxu1  ;;  %v4209_v13 = vpop.f32.mrb[61].mxu0  ;;  %v314_v20 = vld [vmem:[%s5173_s9 + $0x440] sm:$0xff] }
 0x173   : > { %v4098_v24 = vadd.f32 %v4097_v12, %v4096_v1  ;;  %v4210_v25 = vadd.f32 %v4209_v13, %v4208_v3  ;;  %v4099_v26 = vpop.f32.mrb[62].mxu1  ;;  %v4211_v4 = vpop.f32.mrb[62].mxu0  ;;  %v298_v47 = vld [vmem:[%s5173_s9 + $0x3c0] sm:$0xff]  ;;  %v335_v1 = vld [vmem:[%s5173_s9 + $0x4e8] sm:$0xff]  ;;  %v353_v3 = vld [vmem:[%s5173_s9 + $0x578] sm:$0xff] }
 0x174   : > { %v4100_v60 = vpop.f32.mrb[63].mxu1  ;;  %v4212_v35 = vpop.f32.mrb[63].mxu0  ;;  %4717 = vmatpush3.bf16.msra.mxu1 %v5084_v39  ;;  %4829 = vmatpush3.bf16.msra.mxu0 %v5086_v58  ;;  %v333_v39 = vld [vmem:[%s5173_s9 + $0x4d8] sm:$0xff]  ;;  %v351_v58 = vld [vmem:[%s5173_s9 + $0x568] sm:$0xff] }
 0x175   : > { %v2453_v29 = vadd.f32 %v4098_v24, %v2292_v23  ;;  %v4101_v38 = vadd.f32 %v4100_v60, %v4099_v26  ;;  %v4213_v40 = vadd.f32 %v4212_v35, %v4211_v4  ;;  %4718 = vmatprep.subr.bf16.mxu1 %v5087_v45  ;;  %4830 = vmatprep.subr.bf16.mxu0 %v5089_v7  ;;  %v5092_v45 = vld [vmem:[%s6620_s1 + $0x3a8] sm:$0xff]  }
 0x176   : > { %3055 = vmatmul.mubr.bf16.gmra.mrb[168].mxu1 %v800_v16  ;;  %3216 = vmatmul.mubr.bf16.gmra.mrb[168].mxu0 %v802_v17  ;;  %v5094_v7 = vld [vmem:[%s6620_s1 + $0x428] sm:$0xff]   ;;  %v5095_v17 = vld [vmem:[%s6620_s1 + $0x3f0] sm:$0xff]   ;;  %v818_v24 = vpack.c.bf16 %v314_v20, %v296_v61  ;;  %v837_v60 = vpack.c.bf16 %v351_v58, %v333_v39  ;;  %v839_v35 = vpack.c.bf16 %v353_v3, %v335_v1  ;;  %v5099_v20 = vld [vmem:[%s6620_s1 + $0x3f8] sm:$0xff]  }
 0x177   : > { %v6048_v52 = vadd.f32 %v4210_v25, %v2453_v29  ;;  %v2456_v54 = vadd.f32 %v4101_v38, %v2295_v33  ;;  %3062 = vmatprep.mubr.bf16.mxu1 %v819_v32  ;;  %3223 = vmatprep.mubr.bf16.mxu0 %v821_v28  ;;  %v5097_v32 = vld [vmem:[%s6620_s1 + $0x470] sm:$0xff]   ;;  %v820_v25 = vpack.c.bf16 %v316_v37, %v298_v47  ;;  %v5101_v47 = vld [vmem:[%s6620_s1 + $0x478] sm:$0xff]   ;;  %v334_v37 = vld [vmem:[%s5173_s9 + $0x4e0] sm:$0xff] }
 0x178   : > { %4719 = vmatpush3.bf16.msra.mxu1 %v5088_v36  ;;  %4831 = vmatpush3.bf16.msra.mxu0 %v5090_v50  ;;  %v5096_v29 = vld [vmem:[%s6620_s1 + $0x3b0] sm:$0xff]   ;;  %v369_v1 = vld [vmem:[%s5173_s9 + $0x5f8] sm:$0xff]  ;;  %v387_v3 = vld [vmem:[%s5173_s9 + $0x688] sm:$0xff] }
 0x179   : > { %v6060_v12 = vadd.f32 %v4213_v40, %v2456_v54  ;;  %v4102_v13 = vpop.f32.mrb[64].mxu1  ;;  %v4214_v16 = vpop.f32.mrb[64].mxu0  ;;  %4720 = vmatprep.subr.bf16.mxu1 %v5091_v43  ;;  %4832 = vmatprep.subr.bf16.mxu0 %v5093_v44  ;;  %v5098_v38 = vld [vmem:[%s6620_s1 + $0x430] sm:$0xff]  }
 0x17a   : > { %v4103_v21 = vpop.f32.mrb[65].mxu1  ;;  %v4215_v23 = vpop.f32.mrb[65].mxu0  ;;  %v332_v44 = vld [vmem:[%s5173_s9 + $0x4d0] sm:$0xff] }
 0x17b   : > { %v4104_v26 = vadd.f32 %v4103_v21, %v4102_v13  ;;  %v4216_v4 = vadd.f32 %v4215_v23, %v4214_v16  ;;  %v4105_v28 = vpop.f32.mrb[66].mxu1  ;;  %v4217_v33 = vpop.f32.mrb[66].mxu0  ;;  %v352_v54 = vld [vmem:[%s5173_s9 + $0x570] sm:$0xff]  ;;  %v5100_v13 = vld [vmem:[%s6620_s1 + $0x3b8] sm:$0xff]  }
 0x17c   : > { %v4106_v36 = vpop.f32.mrb[67].mxu1  ;;  %v4218_v50 = vpop.f32.mrb[67].mxu0  ;;  %4721 = vmatpush3.bf16.msra.mxu1 %v5092_v45  ;;  %4833 = vmatpush3.bf16.msra.mxu0 %v5094_v7  ;;  %v371_v45 = vld [vmem:[%s5173_s9 + $0x608] sm:$0xff]  ;;  %v389_v7 = vld [vmem:[%s5173_s9 + $0x698] sm:$0xff] }
 0x17d   : > { %v2461_v40 = vadd.f32 %v4104_v26, %v5730_v27  ;;  %v4107_v61 = vadd.f32 %v4106_v36, %v4105_v28  ;;  %v4219_v43 = vadd.f32 %v4218_v50, %v4217_v33  ;;  %4722 = vmatprep.subr.bf16.mxu1 %v5095_v17  ;;  %4834 = vmatprep.subr.bf16.mxu0 %v5097_v32  ;;  %v350_v27 = vld [vmem:[%s5173_s9 + $0x560] sm:$0xff]  ;;  %v5102_v16 = vld [vmem:[%s6620_s1 + $0x438] sm:$0xff]  }
 0x17e   : > { %3063 = vmatmul.mubr.bf16.gmra.mrb[172].mxu1 %v818_v24  ;;  %3224 = vmatmul.mubr.bf16.gmra.mrb[172].mxu0 %v820_v25  ;;  %v836_v24 = vpack.c.bf16 %v350_v27, %v332_v44  ;;  %v838_v25 = vpack.c.bf16 %v352_v54, %v334_v37  ;;  %v388_v27 = vld [vmem:[%s5173_s9 + $0x690] sm:$0xff]  ;;  %v405_v37 = vld [vmem:[%s5173_s9 + $0x718] sm:$0xff]  ;;  %v423_v54 = vld [vmem:[%s5173_s9 + $0x7a8] sm:$0xff] }
 0x17f   : > { %v6085_v39 = vadd.f32 %v4216_v4, %v2461_v40  ;;  %v2464_v58 = vadd.f32 %v4107_v61, %v5739_v30  ;;  %3070 = vmatprep.mubr.bf16.mxu1 %v837_v60  ;;  %3231 = vmatprep.mubr.bf16.mxu0 %v839_v35  ;;  %v855_v60 = vpack.c.bf16 %v387_v3, %v369_v1  ;;  %v368_v61 = vld [vmem:[%s5173_s9 + $0x5f0] sm:$0xff]  ;;  %v425_v1 = vld [vmem:[%s5173_s9 + $0x7b8] sm:$0xff] }
 0x180   : > { %4723 = vmatpush3.bf16.msra.mxu1 %v5096_v29  ;;  %4835 = vmatpush3.bf16.msra.mxu0 %v5098_v38  ;;  %v857_v35 = vpack.c.bf16 %v389_v7, %v371_v45 }
 0x181   : > { %v6098_v17 = vadd.f32 %v4219_v43, %v2464_v58  ;;  %v4108_v32 = vpop.f32.mrb[68].mxu1  ;;  %v4220_v30 = vpop.f32.mrb[68].mxu0  ;;  %4724 = vmatprep.subr.bf16.mxu1 %v5099_v20  ;;  %4836 = vmatprep.subr.bf16.mxu0 %v5101_v47  ;;  %v386_v43 = vld [vmem:[%s5173_s9 + $0x680] sm:$0xff]  ;;  %v407_v58 = vld [vmem:[%s5173_s9 + $0x728] sm:$0xff] }
 0x182   : > { %v4109_v21 = vpop.f32.mrb[69].mxu1  ;;  %v4221_v23 = vpop.f32.mrb[69].mxu0  ;;  %v370_v47 = vld [vmem:[%s5173_s9 + $0x600] sm:$0xff] }
 0x183   : > { %v4110_v26 = vadd.f32 %v4109_v21, %v4108_v32  ;;  %v4222_v4 = vadd.f32 %v4221_v23, %v4220_v30  ;;  %v4111_v28 = vpop.f32.mrb[70].mxu1  ;;  %v4223_v33 = vpop.f32.mrb[70].mxu0  ;;  %v856_v32 = vpack.c.bf16 %v388_v27, %v370_v47  ;;  %v461_v47 = vld [vmem:[%s5173_s9 + $0x8d8] sm:$0xff] }
 0x184   : > { %v4112_v36 = vpop.f32.mrb[71].mxu1  ;;  %v4224_v50 = vpop.f32.mrb[71].mxu0  ;;  %4725 = vmatpush3.bf16.msra.mxu1 %v5100_v13  ;;  %4837 = vmatpush3.bf16.msra.mxu0 %v5102_v16  ;;  %v854_v16 = vpack.c.bf16 %v386_v43, %v368_v61  ;;  %v441_v61 = vld [vmem:[%s5173_s9 + $0x838] sm:$0xff]  ;;  %v459_v43 = vld [vmem:[%s5173_s9 + $0x8c8] sm:$0xff] }
 0x185   : > { %v2469_v29 = vadd.f32 %v4110_v26, %v5748_v49  ;;  %v4113_v38 = vadd.f32 %v4112_v36, %v4111_v28  ;;  %v4225_v40 = vadd.f32 %v4224_v50, %v4223_v33  ;;  %v422_v36 = vld [vmem:[%s5173_s9 + $0x7a0] sm:$0xff] }
 0x186   : > { %3071 = vmatmul.mubr.bf16.gmra.mrb[176].mxu1 %v836_v24  ;;  %3232 = vmatmul.mubr.bf16.gmra.mrb[176].mxu0 %v838_v25  ;;  %v873_v24 = vpack.c.bf16 %v423_v54, %v405_v37  ;;  %v875_v25 = vpack.c.bf16 %v425_v1, %v407_v58 }
 0x187   : > { %v6103_v44 = vadd.f32 %v4222_v4, %v2469_v29  ;;  %v2472_v20 = vadd.f32 %v4113_v38, %v5754_v53  ;;  %3078 = vmatprep.mubr.bf16.mxu1 %v855_v60  ;;  %3239 = vmatprep.mubr.bf16.mxu0 %v857_v35  ;;  %v404_v35 = vld [vmem:[%s5173_s9 + $0x710] sm:$0xff]  ;;  %v406_v38 = vld [vmem:[%s5173_s9 + $0x720] sm:$0xff] }
 0x188   : > { %v872_v1 = vpack.c.bf16 %v422_v36, %v404_v35  ;;  %v477_v35 = vld [vmem:[%s5173_s9 + $0x958] sm:$0xff]  ;;  %v495_v36 = vld [vmem:[%s5173_s9 + $0x9e8] sm:$0xff] }
 0x189   : > { %v6112_v49 = vadd.f32 %v4225_v40, %v2472_v20  ;;  %v4114_v3 = vpop.f32.mrb[72].mxu1  ;;  %v4226_v45 = vpop.f32.mrb[72].mxu0  ;;  %v424_v40 = vld [vmem:[%s5173_s9 + $0x7b0] sm:$0xff]  ;;  %v443_v20 = vld [vmem:[%s5173_s9 + $0x848] sm:$0xff] }
 0x18a   : > { %v4115_v7 = vpop.f32.mrb[73].mxu1  ;;  %v4227_v13 = vpop.f32.mrb[73].mxu0 }
 0x18b   : > { %v4116_v30 = vadd.f32 %v4115_v7, %v4114_v3  ;;  %v4228_v53 = vadd.f32 %v4227_v13, %v4226_v45  ;;  %v4117_v21 = vpop.f32.mrb[74].mxu1  ;;  %v4229_v23 = vpop.f32.mrb[74].mxu0  ;;  %v874_v3 = vpack.c.bf16 %v424_v40, %v406_v38  ;;  %v497_v38 = vld [vmem:[%s5173_s9 + $0x9f8] sm:$0xff] }
 0x18c   : > { %v4118_v26 = vpop.f32.mrb[75].mxu1  ;;  %v4230_v4 = vpop.f32.mrb[75].mxu0 }
 0x18d   : > { %v2477_v28 = vadd.f32 %v4116_v30, %v5764_v11  ;;  %v4119_v33 = vadd.f32 %v4118_v26, %v4117_v21  ;;  %v4231_v60 = vadd.f32 %v4230_v4, %v4229_v23  ;;  %v458_v26 = vld [vmem:[%s5173_s9 + $0x8c0] sm:$0xff] }
 0x18e   : > { %3079 = vmatmul.mubr.bf16.gmra.mrb[180].mxu1 %v854_v16  ;;  %3240 = vmatmul.mubr.bf16.gmra.mrb[180].mxu0 %v856_v32  ;;  %v891_v16 = vpack.c.bf16 %v459_v43, %v441_v61  ;;  %v893_v32 = vpack.c.bf16 %v461_v47, %v443_v20 }
 0x18f   : > { %v6117_v50 = vadd.f32 %v4228_v53, %v2477_v28  ;;  %v2480_v29 = vadd.f32 %v4119_v33, %v5772_v18  ;;  %3086 = vmatprep.mubr.bf16.mxu1 %v873_v24  ;;  %3247 = vmatprep.mubr.bf16.mxu0 %v875_v25  ;;  %v440_v25 = vld [vmem:[%s5173_s9 + $0x830] sm:$0xff]  ;;  %v442_v33 = vld [vmem:[%s5173_s9 + $0x840] sm:$0xff] }
 0x190   : > { %v890_v47 = vpack.c.bf16 %v458_v26, %v440_v25  ;;  %v513_v25 = vld [vmem:[%s5173_s9 + $0xa78] sm:$0xff]  ;;  %v531_v26 = vld [vmem:[%s5173_s9 + $0xb08] sm:$0xff] }
 0x191   : > { %v6126_v11 = vadd.f32 %v4231_v60, %v2480_v29  ;;  %v4120_v27 = vpop.f32.mrb[76].mxu1  ;;  %v4232_v37 = vpop.f32.mrb[76].mxu0  ;;  %v460_v60 = vld [vmem:[%s5173_s9 + $0x8d0] sm:$0xff]  ;;  %v479_v29 = vld [vmem:[%s5173_s9 + $0x968] sm:$0xff] }
 0x192   : > { %v4121_v54 = vpop.f32.mrb[77].mxu1  ;;  %v4233_v58 = vpop.f32.mrb[77].mxu0 }
 0x193   : > { %v4122_v45 = vadd.f32 %v4121_v54, %v4120_v27  ;;  %v4234_v18 = vadd.f32 %v4233_v58, %v4232_v37  ;;  %v4123_v7 = vpop.f32.mrb[78].mxu1  ;;  %v4235_v13 = vpop.f32.mrb[78].mxu0  ;;  %v892_v27 = vpack.c.bf16 %v460_v60, %v442_v33  ;;  %v533_v33 = vld [vmem:[%s5173_s9 + $0xb18] sm:$0xff] }
 0x194   : > { %v4124_v30 = vpop.f32.mrb[79].mxu1  ;;  %v4236_v53 = vpop.f32.mrb[79].mxu0 }
 0x195   : > { %v2485_v21 = vadd.f32 %v4122_v45, %v5782_v41  ;;  %v4125_v23 = vadd.f32 %v4124_v30, %v4123_v7  ;;  %v4237_v24 = vadd.f32 %v4236_v53, %v4235_v13  ;;  %v494_v30 = vld [vmem:[%s5173_s9 + $0x9e0] sm:$0xff] }
 0x196   : > { %3087 = vmatmul.mubr.bf16.gmra.mrb[184].mxu1 %v872_v1  ;;  %3248 = vmatmul.mubr.bf16.gmra.mrb[184].mxu0 %v874_v3  ;;  %v909_v1 = vpack.c.bf16 %v495_v36, %v477_v35  ;;  %v911_v3 = vpack.c.bf16 %v497_v38, %v479_v29 }
 0x197   : > { %v6131_v4 = vadd.f32 %v4234_v18, %v2485_v21  ;;  %v2488_v28 = vadd.f32 %v4125_v23, %v5790_v48  ;;  %3094 = vmatprep.mubr.bf16.mxu1 %v891_v16  ;;  %3255 = vmatprep.mubr.bf16.mxu0 %v893_v32  ;;  %v476_v32 = vld [vmem:[%s5173_s9 + $0x950] sm:$0xff]  ;;  %v478_v23 = vld [vmem:[%s5173_s9 + $0x960] sm:$0xff] }
 0x198   : > { %v908_v38 = vpack.c.bf16 %v494_v30, %v476_v32  ;;  %v549_v32 = vld [vmem:[%s5173_s9 + $0xb98] sm:$0xff]  ;;  %v567_v30 = vld [vmem:[%s5173_s9 + $0xc28] sm:$0xff] }
 0x199   : > { %v6140_v41 = vadd.f32 %v4237_v24, %v2488_v28  ;;  %v4126_v40 = vpop.f32.mrb[80].mxu1  ;;  %v4238_v61 = vpop.f32.mrb[80].mxu0  ;;  %v496_v24 = vld [vmem:[%s5173_s9 + $0x9f0] sm:$0xff]  ;;  %v515_v28 = vld [vmem:[%s5173_s9 + $0xa88] sm:$0xff] }
 0x19a   : > { %v4127_v43 = vpop.f32.mrb[81].mxu1  ;;  %v4239_v20 = vpop.f32.mrb[81].mxu0 }
 0x19b   : > { %v4128_v37 = vadd.f32 %v4127_v43, %v4126_v40  ;;  %v4240_v48 = vadd.f32 %v4239_v20, %v4238_v61  ;;  %v4129_v54 = vpop.f32.mrb[82].mxu1  ;;  %v4241_v58 = vpop.f32.mrb[82].mxu0  ;;  %v910_v40 = vpack.c.bf16 %v496_v24, %v478_v23  ;;  %v569_v23 = vld [vmem:[%s5173_s9 + $0xc38] sm:$0xff] }
 0x19c   : > { %v4130_v45 = vpop.f32.mrb[83].mxu1  ;;  %v4242_v18 = vpop.f32.mrb[83].mxu0 }
 0x19d   : > { %v2493_v7 = vadd.f32 %v4128_v37, %v5800_v10  ;;  %v4131_v13 = vadd.f32 %v4130_v45, %v4129_v54  ;;  %v4243_v16 = vadd.f32 %v4242_v18, %v4241_v58  ;;  %v530_v45 = vld [vmem:[%s5173_s9 + $0xb00] sm:$0xff] }
 0x19e   : > { %3095 = vmatmul.mubr.bf16.gmra.mrb[188].mxu1 %v890_v47  ;;  %3256 = vmatmul.mubr.bf16.gmra.mrb[188].mxu0 %v892_v27  ;;  %v927_v47 = vpack.c.bf16 %v531_v26, %v513_v25  ;;  %v929_v27 = vpack.c.bf16 %v533_v33, %v515_v28 }
 0x19f   : > { %v6145_v53 = vadd.f32 %v4240_v48, %v2493_v7  ;;  %v2496_v21 = vadd.f32 %v4131_v13, %v5808_v19  ;;  %3102 = vmatprep.mubr.bf16.mxu1 %v909_v1  ;;  %3263 = vmatprep.mubr.bf16.mxu0 %v911_v3  ;;  %v512_v3 = vld [vmem:[%s5173_s9 + $0xa70] sm:$0xff]  ;;  %v514_v13 = vld [vmem:[%s5173_s9 + $0xa80] sm:$0xff] }
 0x1a0   : > { %v926_v33 = vpack.c.bf16 %v530_v45, %v512_v3  ;;  %v585_v3 = vld [vmem:[%s5173_s9 + $0xcb8] sm:$0xff]  ;;  %v603_v45 = vld [vmem:[%s5173_s9 + $0xd48] sm:$0xff] }
 0x1a1   : > { %v6154_v10 = vadd.f32 %v4243_v16, %v2496_v21  ;;  %v4132_v60 = vpop.f32.mrb[84].mxu1  ;;  %v4244_v35 = vpop.f32.mrb[84].mxu0  ;;  %v532_v16 = vld [vmem:[%s5173_s9 + $0xb10] sm:$0xff]  ;;  %v551_v21 = vld [vmem:[%s5173_s9 + $0xba8] sm:$0xff] }
 0x1a2   : > { %v4133_v36 = vpop.f32.mrb[85].mxu1  ;;  %v4245_v29 = vpop.f32.mrb[85].mxu0 }
 0x1a3   : > { %v4134_v61 = vadd.f32 %v4133_v36, %v4132_v60  ;;  %v4246_v19 = vadd.f32 %v4245_v29, %v4244_v35  ;;  %v4135_v43 = vpop.f32.mrb[86].mxu1  ;;  %v4247_v20 = vpop.f32.mrb[86].mxu0  ;;  %v928_v60 = vpack.c.bf16 %v532_v16, %v514_v13  ;;  %v605_v13 = vld [vmem:[%s5173_s9 + $0xd58] sm:$0xff] }
 0x1a4   : > { %v4136_v37 = vpop.f32.mrb[87].mxu1  ;;  %v4248_v48 = vpop.f32.mrb[87].mxu0 }
 0x1a5   : > { %v2501_v54 = vadd.f32 %v4134_v61, %v5818_v46  ;;  %v4137_v58 = vadd.f32 %v4136_v37, %v4135_v43  ;;  %v4249_v1 = vadd.f32 %v4248_v48, %v4247_v20  ;;  %v566_v37 = vld [vmem:[%s5173_s9 + $0xc20] sm:$0xff] }
 0x1a6   : > { %3103 = vmatmul.mubr.bf16.gmra.mrb[192].mxu1 %v908_v38  ;;  %3264 = vmatmul.mubr.bf16.gmra.mrb[192].mxu0 %v910_v40  ;;  %v945_v38 = vpack.c.bf16 %v567_v30, %v549_v32  ;;  %v947_v40 = vpack.c.bf16 %v569_v23, %v551_v21 }
 0x1a7   : > { %v6159_v18 = vadd.f32 %v4246_v19, %v2501_v54  ;;  %v2504_v7 = vadd.f32 %v4137_v58, %v5826_v55  ;;  %3110 = vmatprep.mubr.bf16.mxu1 %v927_v47  ;;  %3271 = vmatprep.mubr.bf16.mxu0 %v929_v27  ;;  %v548_v27 = vld [vmem:[%s5173_s9 + $0xb90] sm:$0xff]  ;;  %v550_v58 = vld [vmem:[%s5173_s9 + $0xba0] sm:$0xff] }
 0x1a8   : > { %v944_v23 = vpack.c.bf16 %v566_v37, %v548_v27  ;;  %v621_v27 = vld [vmem:[%s5173_s9 + $0xdd8] sm:$0xff]  ;;  %v639_v37 = vld [vmem:[%s5173_s9 + $0xe68] sm:$0xff] }
 0x1a9   : > { %v6168_v46 = vadd.f32 %v4249_v1, %v2504_v7  ;;  %v4138_v24 = vpop.f32.mrb[88].mxu1  ;;  %v4250_v25 = vpop.f32.mrb[88].mxu0  ;;  %v568_v1 = vld [vmem:[%s5173_s9 + $0xc30] sm:$0xff]  ;;  %v587_v7 = vld [vmem:[%s5173_s9 + $0xcc8] sm:$0xff] }
 0x1aa   : > { %v4139_v26 = vpop.f32.mrb[89].mxu1  ;;  %v4251_v28 = vpop.f32.mrb[89].mxu0 }
 0x1ab   : > { %v4140_v35 = vadd.f32 %v4139_v26, %v4138_v24  ;;  %v4252_v55 = vadd.f32 %v4251_v28, %v4250_v25  ;;  %v4141_v36 = vpop.f32.mrb[90].mxu1  ;;  %v4253_v29 = vpop.f32.mrb[90].mxu0  ;;  %v946_v24 = vpack.c.bf16 %v568_v1, %v550_v58  ;;  %v641_v58 = vld [vmem:[%s5173_s9 + $0xe78] sm:$0xff] }
 0x1ac   : > { %v4142_v61 = vpop.f32.mrb[91].mxu1  ;;  %v4254_v19 = vpop.f32.mrb[91].mxu0 }
 0x1ad   : > { %v2509_v43 = vadd.f32 %v4140_v35, %v5836_v22  ;;  %v4143_v20 = vadd.f32 %v4142_v61, %v4141_v36  ;;  %v4255_v47 = vadd.f32 %v4254_v19, %v4253_v29  ;;  %v602_v61 = vld [vmem:[%s5173_s9 + $0xd40] sm:$0xff] }
 0x1ae   : > { %3111 = vmatmul.mubr.bf16.gmra.mrb[196].mxu1 %v926_v33  ;;  %3272 = vmatmul.mubr.bf16.gmra.mrb[196].mxu0 %v928_v60  ;;  %v963_v33 = vpack.c.bf16 %v603_v45, %v585_v3  ;;  %v965_v60 = vpack.c.bf16 %v605_v13, %v587_v7 }
 0x1af   : > { %v6173_v48 = vadd.f32 %v4252_v55, %v2509_v43  ;;  %v2512_v54 = vadd.f32 %v4143_v20, %v5844_v31  ;;  %3118 = vmatprep.mubr.bf16.mxu1 %v945_v38  ;;  %3279 = vmatprep.mubr.bf16.mxu0 %v947_v40  ;;  %v584_v40 = vld [vmem:[%s5173_s9 + $0xcb0] sm:$0xff]  ;;  %v586_v20 = vld [vmem:[%s5173_s9 + $0xcc0] sm:$0xff] }
 0x1b0   : > { %v962_v13 = vpack.c.bf16 %v602_v61, %v584_v40  ;;  %v657_v40 = vld [vmem:[%s5173_s9 + $0xef8] sm:$0xff]  ;;  %v675_v61 = vld [vmem:[%s5173_s9 + $0xf88] sm:$0xff] }
 0x1b1   : > { %v6182_v22 = vadd.f32 %v4255_v47, %v2512_v54  ;;  %v4144_v16 = vpop.f32.mrb[92].mxu1  ;;  %v4256_v32 = vpop.f32.mrb[92].mxu0  ;;  %v604_v47 = vld [vmem:[%s5173_s9 + $0xd50] sm:$0xff]  ;;  %v623_v54 = vld [vmem:[%s5173_s9 + $0xde8] sm:$0xff] }
 0x1b2   : > { %v4145_v30 = vpop.f32.mrb[93].mxu1  ;;  %v4257_v21 = vpop.f32.mrb[93].mxu0 }
 0x1b3   : > { %v4146_v25 = vadd.f32 %v4145_v30, %v4144_v16  ;;  %v4258_v31 = vadd.f32 %v4257_v21, %v4256_v32  ;;  %v4147_v26 = vpop.f32.mrb[94].mxu1  ;;  %v4259_v28 = vpop.f32.mrb[94].mxu0  ;;  %v964_v16 = vpack.c.bf16 %v604_v47, %v586_v20  ;;  %v677_v20 = vld [vmem:[%s5173_s9 + $0xf98] sm:$0xff] }
 0x1b4   : > { %v4148_v35 = vpop.f32.mrb[95].mxu1  ;;  %v4260_v55 = vpop.f32.mrb[95].mxu0 }
 0x1b5   : > { %v2517_v36 = vadd.f32 %v4146_v25, %v5854_v0  ;;  %v4149_v29 = vadd.f32 %v4148_v35, %v4147_v26  ;;  %v4261_v38 = vadd.f32 %v4260_v55, %v4259_v28  ;;  %v638_v35 = vld [vmem:[%s5173_s9 + $0xe60] sm:$0xff] }
 0x1b6   : > { %3119 = vmatmul.mubr.bf16.gmra.mrb[200].mxu1 %v944_v23  ;;  %3280 = vmatmul.mubr.bf16.gmra.mrb[200].mxu0 %v946_v24  ;;  %v981_v23 = vpack.c.bf16 %v639_v37, %v621_v27  ;;  %v983_v24 = vpack.c.bf16 %v641_v58, %v623_v54 }
 0x1b7   : > { %v6187_v19 = vadd.f32 %v4258_v31, %v2517_v36  ;;  %v2520_v43 = vadd.f32 %v4149_v29, %v5863_v15  ;;  %3126 = vmatprep.mubr.bf16.mxu1 %v963_v33  ;;  %3287 = vmatprep.mubr.bf16.mxu0 %v965_v60  ;;  %v620_v60 = vld [vmem:[%s5173_s9 + $0xdd0] sm:$0xff]  ;;  %v622_v29 = vld [vmem:[%s5173_s9 + $0xde0] sm:$0xff] }
 0x1b8   : > { %v980_v58 = vpack.c.bf16 %v638_v35, %v620_v60  ;;  %v693_v60 = vld [vmem:[%s5173_s9 + $0x1018] sm:$0xff]  ;;  %v711_v35 = vld [vmem:[%s5173_s9 + $0x10a8] sm:$0xff] }
 0x1b9   : > { %v6196_v0 = vadd.f32 %v4261_v38, %v2520_v43  ;;  %v4278_v1 = vpop.f32.mrb[96].mxu1  ;;  %v4390_v3 = vpop.f32.mrb[96].mxu0  ;;  %v640_v38 = vld [vmem:[%s5173_s9 + $0xe70] sm:$0xff]  ;;  %v659_v43 = vld [vmem:[%s5173_s9 + $0xf08] sm:$0xff] }
 0x1ba   : > { %v4279_v45 = vpop.f32.mrb[97].mxu1  ;;  %v4391_v7 = vpop.f32.mrb[97].mxu0 }
 0x1bb   : > { %v4280_v32 = vadd.f32 %v4279_v45, %v4278_v1  ;;  %v4392_v15 = vadd.f32 %v4391_v7, %v4390_v3  ;;  %v4281_v30 = vpop.f32.mrb[98].mxu1  ;;  %v4393_v21 = vpop.f32.mrb[98].mxu0  ;;  %v982_v1 = vpack.c.bf16 %v640_v38, %v622_v29  ;;  %v713_v29 = vld [vmem:[%s5173_s9 + $0x10b8] sm:$0xff] }
 0x1bc   : > { %v4282_v25 = vpop.f32.mrb[99].mxu1  ;;  %v4394_v31 = vpop.f32.mrb[99].mxu0 }
 0x1bd   : > { %v2719_v26 = vadd.f32 %v4280_v32, %v5874_v59  ;;  %v4283_v28 = vadd.f32 %v4282_v25, %v4281_v30  ;;  %v4395_v33 = vadd.f32 %v4394_v31, %v4393_v21  ;;  %v674_v25 = vld [vmem:[%s5173_s9 + $0xf80] sm:$0xff] }
 0x1be   : > { %3127 = vmatmul.mubr.bf16.gmra.mrb[204].mxu1 %v962_v13  ;;  %3288 = vmatmul.mubr.bf16.gmra.mrb[204].mxu0 %v964_v16  ;;  %v999_v13 = vpack.c.bf16 %v675_v61, %v657_v40  ;;  %v1001_v16 = vpack.c.bf16 %v677_v20, %v659_v43 }
 0x1bf   : > { %v6201_v55 = vadd.f32 %v4392_v15, %v2719_v26  ;;  %v2722_v36 = vadd.f32 %v4283_v28, %v5881_v14  ;;  %3134 = vmatprep.mubr.bf16.mxu1 %v981_v23  ;;  %3295 = vmatprep.mubr.bf16.mxu0 %v983_v24  ;;  %v656_v24 = vld [vmem:[%s5173_s9 + $0xef0] sm:$0xff]  ;;  %v658_v28 = vld [vmem:[%s5173_s9 + $0xf00] sm:$0xff] }
 0x1c0   : > { %v998_v20 = vpack.c.bf16 %v674_v25, %v656_v24  ;;  %v729_v24 = vld [vmem:[%s5173_s9 + $0x1138] sm:$0xff]  ;;  %v747_v25 = vld [vmem:[%s5173_s9 + $0x11c8] sm:$0xff] }
 0x1c1   : > { %v6210_v59 = vadd.f32 %v4395_v33, %v2722_v36  ;;  %v4284_v47 = vpop.f32.mrb[100].mxu1  ;;  %v4396_v27 = vpop.f32.mrb[100].mxu0  ;;  %v676_v33 = vld [vmem:[%s5173_s9 + $0xf90] sm:$0xff]  ;;  %v695_v36 = vld [vmem:[%s5173_s9 + $0x1028] sm:$0xff] }
 0x1c2   : > { %v4285_v37 = vpop.f32.mrb[101].mxu1  ;;  %v4397_v54 = vpop.f32.mrb[101].mxu0 }
 0x1c3   : > { %v4286_v3 = vadd.f32 %v4285_v37, %v4284_v47  ;;  %v4398_v14 = vadd.f32 %v4397_v54, %v4396_v27  ;;  %v4287_v45 = vpop.f32.mrb[102].mxu1  ;;  %v4399_v7 = vpop.f32.mrb[102].mxu0  ;;  %v1000_v47 = vpack.c.bf16 %v676_v33, %v658_v28  ;;  %v749_v28 = vld [vmem:[%s5173_s9 + $0x11d8] sm:$0xff] }
 0x1c4   : > { %v4288_v32 = vpop.f32.mrb[103].mxu1  ;;  %v4400_v15 = vpop.f32.mrb[103].mxu0 }
 0x1c5   : > { %v2727_v30 = vadd.f32 %v4286_v3, %v5890_v56  ;;  %v4289_v21 = vadd.f32 %v4288_v32, %v4287_v45  ;;  %v4401_v23 = vadd.f32 %v4400_v15, %v4399_v7  ;;  %v710_v32 = vld [vmem:[%s5173_s9 + $0x10a0] sm:$0xff] }
 0x1c6   : > { %3135 = vmatmul.mubr.bf16.gmra.mrb[208].mxu1 %v980_v58  ;;  %3296 = vmatmul.mubr.bf16.gmra.mrb[208].mxu0 %v982_v1  ;;  %v1017_v58 = vpack.c.bf16 %v711_v35, %v693_v60  ;;  %v1019_v1 = vpack.c.bf16 %v713_v29, %v695_v36 }
 0x1c7   : > { %v6215_v31 = vadd.f32 %v4398_v14, %v2727_v30  ;;  %v2730_v26 = vadd.f32 %v4289_v21, %v5897_v5  ;;  %3142 = vmatprep.mubr.bf16.mxu1 %v999_v13  ;;  %3303 = vmatprep.mubr.bf16.mxu0 %v1001_v16  ;;  %v692_v16 = vld [vmem:[%s5173_s9 + $0x1010] sm:$0xff]  ;;  %v694_v21 = vld [vmem:[%s5173_s9 + $0x1020] sm:$0xff] }
 0x1c8   : > { %v1016_v29 = vpack.c.bf16 %v710_v32, %v692_v16  ;;  %v193_v16 = vld [vmem:[%s5173_s9 + $0x78] sm:$0xff]  ;;  %v211_v32 = vld [vmem:[%s5173_s9 + $0x108] sm:$0xff] }
 0x1c9   : > { %v6224_v56 = vadd.f32 %v4401_v23, %v2730_v26  ;;  %v4290_v38 = vpop.f32.mrb[104].mxu1  ;;  %v4402_v40 = vpop.f32.mrb[104].mxu0  ;;  %v712_v23 = vld [vmem:[%s5173_s9 + $0x10b0] sm:$0xff]  ;;  %v731_v26 = vld [vmem:[%s5173_s9 + $0x1148] sm:$0xff] }
 0x1ca   : > { %v4291_v61 = vpop.f32.mrb[105].mxu1  ;;  %v4403_v43 = vpop.f32.mrb[105].mxu0 }
 0x1cb   : > { %v4292_v27 = vadd.f32 %v4291_v61, %v4290_v38  ;;  %v4404_v5 = vadd.f32 %v4403_v43, %v4402_v40  ;;  %v4293_v37 = vpop.f32.mrb[106].mxu1  ;;  %v4405_v54 = vpop.f32.mrb[106].mxu0  ;;  %v1018_v38 = vpack.c.bf16 %v712_v23, %v694_v21  ;;  %v213_v21 = vld [vmem:[%s5173_s9 + $0x118] sm:$0xff] }
 0x1cc   : > { %v4294_v3 = vpop.f32.mrb[107].mxu1  ;;  %v4406_v14 = vpop.f32.mrb[107].mxu0 }
 0x1cd   : > { %v2735_v45 = vadd.f32 %v4292_v27, %v5906_v51  ;;  %v4295_v7 = vadd.f32 %v4294_v3, %v4293_v37  ;;  %v4407_v13 = vadd.f32 %v4406_v14, %v4405_v54  ;;  %v746_v3 = vld [vmem:[%s5173_s9 + $0x11c0] sm:$0xff] }
 0x1ce   : > { %3143 = vmatmul.mubr.bf16.gmra.mrb[212].mxu1 %v998_v20  ;;  %3304 = vmatmul.mubr.bf16.gmra.mrb[212].mxu0 %v1000_v47  ;;  %v1035_v20 = vpack.c.bf16 %v747_v25, %v729_v24  ;;  %v1037_v47 = vpack.c.bf16 %v749_v28, %v731_v26 }
 0x1cf   : > { %v6229_v15 = vadd.f32 %v4404_v5, %v2735_v45  ;;  %v2738_v30 = vadd.f32 %v4295_v7, %v5913_v62  ;;  %3150 = vmatprep.mubr.bf16.mxu1 %v1017_v58  ;;  %3311 = vmatprep.mubr.bf16.mxu0 %v1019_v1  ;;  %v728_v1 = vld [vmem:[%s5173_s9 + $0x1130] sm:$0xff]  ;;  %v730_v7 = vld [vmem:[%s5173_s9 + $0x1140] sm:$0xff] }
 0x1d0   : > { %v1034_v28 = vpack.c.bf16 %v746_v3, %v728_v1  ;;  %v229_v1 = vld [vmem:[%s5173_s9 + $0x198] sm:$0xff]  ;;  %v247_v3 = vld [vmem:[%s5173_s9 + $0x228] sm:$0xff] }
 0x1d1   : > { %v6238_v51 = vadd.f32 %v4407_v13, %v2738_v30  ;;  %v4296_v33 = vpop.f32.mrb[108].mxu1  ;;  %v4408_v60 = vpop.f32.mrb[108].mxu0  ;;  %v748_v13 = vld [vmem:[%s5173_s9 + $0x11d0] sm:$0xff]  ;;  %v195_v30 = vld [vmem:[%s5173_s9 + $0x88] sm:$0xff] }
 0x1d2   : > { %v4297_v35 = vpop.f32.mrb[109].mxu1  ;;  %v4409_v36 = vpop.f32.mrb[109].mxu0 }
 0x1d3   : > { %v4298_v40 = vadd.f32 %v4297_v35, %v4296_v33  ;;  %v4410_v62 = vadd.f32 %v4409_v36, %v4408_v60  ;;  %v4299_v61 = vpop.f32.mrb[110].mxu1  ;;  %v4411_v43 = vpop.f32.mrb[110].mxu0  ;;  %v1036_v33 = vpack.c.bf16 %v748_v13, %v730_v7  ;;  %v249_v7 = vld [vmem:[%s5173_s9 + $0x238] sm:$0xff] }
 0x1d4   : > { %v4300_v27 = vpop.f32.mrb[111].mxu1  ;;  %v4412_v5 = vpop.f32.mrb[111].mxu0 }
 0x1d5   : > { %v2743_v37 = vadd.f32 %v4298_v40, %v5922_v42  ;;  %v4301_v54 = vadd.f32 %v4300_v27, %v4299_v61  ;;  %v4413_v58 = vadd.f32 %v4412_v5, %v4411_v43  ;;  %v210_v27 = vld [vmem:[%s5173_s9 + $0x100] sm:$0xff] }
 0x1d6   : > { %3151 = vmatmul.mubr.bf16.gmra.mrb[216].mxu1 %v1016_v29  ;;  %3312 = vmatmul.mubr.bf16.gmra.mrb[216].mxu0 %v1018_v38  ;;  %v769_v29 = vpack.c.bf16 %v211_v32, %v193_v16  ;;  %v771_v38 = vpack.c.bf16 %v213_v21, %v195_v30 }
 0x1d7   : > { %v6243_v14 = vadd.f32 %v4410_v62, %v2743_v37  ;;  %v2746_v45 = vadd.f32 %v4301_v54, %v5929_v2  ;;  %3158 = vmatprep.mubr.bf16.mxu1 %v1035_v20  ;;  %3319 = vmatprep.mubr.bf16.mxu0 %v1037_v47  ;;  %v192_v47 = vld [vmem:[%s5173_s9 + $0x70] sm:$0xff]  ;;  %v194_v54 = vld [vmem:[%s5173_s9 + $0x80] sm:$0xff] }
 0x1d8   : > { %v768_v21 = vpack.c.bf16 %v210_v27, %v192_v47  ;;  %v265_v47 = vld [vmem:[%s5173_s9 + $0x2b8] sm:$0xff]  ;;  %v283_v27 = vld [vmem:[%s5173_s9 + $0x348] sm:$0xff] }
 0x1d9   : > { %v6252_v42 = vadd.f32 %v4413_v58, %v2746_v45  ;;  %v4302_v23 = vpop.f32.mrb[112].mxu1  ;;  %v4414_v24 = vpop.f32.mrb[112].mxu0  ;;  %v212_v58 = vld [vmem:[%s5173_s9 + $0x110] sm:$0xff]  ;;  %v231_v45 = vld [vmem:[%s5173_s9 + $0x1a8] sm:$0xff] }
 0x1da   : > { %v4303_v25 = vpop.f32.mrb[113].mxu1  ;;  %v4415_v26 = vpop.f32.mrb[113].mxu0 }
 0x1db   : > { %v4304_v60 = vadd.f32 %v4303_v25, %v4302_v23  ;;  %v4416_v2 = vadd.f32 %v4415_v26, %v4414_v24  ;;  %v4305_v35 = vpop.f32.mrb[114].mxu1  ;;  %v4417_v36 = vpop.f32.mrb[114].mxu0  ;;  %v770_v23 = vpack.c.bf16 %v212_v58, %v194_v54  ;;  %v285_v54 = vld [vmem:[%s5173_s9 + $0x358] sm:$0xff] }
 0x1dc   : > { %v4306_v40 = vpop.f32.mrb[115].mxu1  ;;  %v4418_v62 = vpop.f32.mrb[115].mxu0 }
 0x1dd   : > { %v2751_v61 = vadd.f32 %v4304_v60, %v5936_v34  ;;  %v4307_v43 = vadd.f32 %v4306_v40, %v4305_v35  ;;  %v4419_v20 = vadd.f32 %v4418_v62, %v4417_v36  ;;  %v246_v40 = vld [vmem:[%s5173_s9 + $0x220] sm:$0xff] }
 0x1de   : > { %3159 = vmatmul.mubr.bf16.gmra.mrb[220].mxu1 %v1034_v28  ;;  %3320 = vmatmul.mubr.bf16.gmra.mrb[220].mxu0 %v1036_v33  ;;  %v787_v28 = vpack.c.bf16 %v247_v3, %v229_v1  ;;  %v789_v33 = vpack.c.bf16 %v249_v7, %v231_v45 }
 0x1df   : > { %v6257_v5 = vadd.f32 %v4416_v2, %v2751_v61  ;;  %v2754_v37 = vadd.f32 %v4307_v43, %v5942_v63  ;;  %3360 = vmatprep.mubr.bf16.mxu1 %v769_v29  ;;  %3521 = vmatprep.mubr.bf16.mxu0 %v771_v38  ;;  %v228_v38 = vld [vmem:[%s5173_s9 + $0x190] sm:$0xff]  ;;  %v230_v43 = vld [vmem:[%s5173_s9 + $0x1a0] sm:$0xff] }
 0x1e0   : > { %v786_v7 = vpack.c.bf16 %v246_v40, %v228_v38  ;;  %v301_v38 = vld [vmem:[%s5173_s9 + $0x3d8] sm:$0xff]  ;;  %v319_v40 = vld [vmem:[%s5173_s9 + $0x468] sm:$0xff] }
 0x1e1   : > { %v6266_v34 = vadd.f32 %v4419_v20, %v2754_v37  ;;  %v4308_v13 = vpop.f32.mrb[116].mxu1  ;;  %v4420_v16 = vpop.f32.mrb[116].mxu0  ;;  %v248_v20 = vld [vmem:[%s5173_s9 + $0x230] sm:$0xff]  ;;  %v267_v37 = vld [vmem:[%s5173_s9 + $0x2c8] sm:$0xff] }
 0x1e2   : > { %v4309_v32 = vpop.f32.mrb[117].mxu1  ;;  %v4421_v30 = vpop.f32.mrb[117].mxu0 }
 0x1e3   : > { %v4310_v24 = vadd.f32 %v4309_v32, %v4308_v13  ;;  %v4422_v63 = vadd.f32 %v4421_v30, %v4420_v16  ;;  %v4311_v25 = vpop.f32.mrb[118].mxu1  ;;  %v4423_v26 = vpop.f32.mrb[118].mxu0  ;;  %v788_v13 = vpack.c.bf16 %v248_v20, %v230_v43  ;;  %v321_v43 = vld [vmem:[%s5173_s9 + $0x478] sm:$0xff] }
 0x1e4   : > { %v4312_v60 = vpop.f32.mrb[119].mxu1  ;;  %v4424_v2 = vpop.f32.mrb[119].mxu0 }
 0x1e5   : > { %v2759_v35 = vadd.f32 %v4310_v24, %v5970_v6  ;;  %v4313_v36 = vadd.f32 %v4312_v60, %v4311_v25  ;;  %v4425_v29 = vadd.f32 %v4424_v2, %v4423_v26  ;;  %v282_v60 = vld [vmem:[%s5173_s9 + $0x340] sm:$0xff] }
 0x1e6   : > { %3361 = vmatmul.mubr.bf16.vlgmr.msra.gmra.mrb[224].mxu1 %v768_v21  ;;  %3522 = vmatmul.mubr.bf16.vlgmr.msra.gmra.mrb[224].mxu0 %v770_v23  ;;  %v805_v21 = vpack.c.bf16 %v283_v27, %v265_v47  ;;  %v807_v23 = vpack.c.bf16 %v285_v54, %v267_v37 }
 0x1e7   : > { %v6271_v62 = vadd.f32 %v4422_v63, %v2759_v35  ;;  %v2762_v61 = vadd.f32 %v4313_v36, %v5985_v57  ;;  %3368 = vmatprep.mubr.bf16.mxu1 %v787_v28  ;;  %3529 = vmatprep.mubr.bf16.mxu0 %v789_v33  ;;  %v264_v33 = vld [vmem:[%s5173_s9 + $0x2b0] sm:$0xff]  ;;  %v266_v36 = vld [vmem:[%s5173_s9 + $0x2c0] sm:$0xff] }
 0x1e8   : > { %v804_v54 = vpack.c.bf16 %v282_v60, %v264_v33  ;;  %v337_v33 = vld [vmem:[%s5173_s9 + $0x4f8] sm:$0xff]  ;;  %v355_v60 = vld [vmem:[%s5173_s9 + $0x588] sm:$0xff] }
 0x1e9   : > { %v6280_v6 = vadd.f32 %v4425_v29, %v2762_v61  ;;  %v4314_v58 = vpop.f32.mrb[120].mxu1  ;;  %v4426_v1 = vpop.f32.mrb[120].mxu0  ;;  %v284_v29 = vld [vmem:[%s5173_s9 + $0x350] sm:$0xff]  ;;  %v303_v61 = vld [vmem:[%s5173_s9 + $0x3e8] sm:$0xff] }
 0x1ea   : > { %v4315_v3 = vpop.f32.mrb[121].mxu1  ;;  %v4427_v45 = vpop.f32.mrb[121].mxu0 }
 0x1eb   : > { %v4316_v16 = vadd.f32 %v4315_v3, %v4314_v58  ;;  %v4428_v57 = vadd.f32 %v4427_v45, %v4426_v1  ;;  %v4317_v32 = vpop.f32.mrb[122].mxu1  ;;  %v4429_v30 = vpop.f32.mrb[122].mxu0  ;;  %v806_v58 = vpack.c.bf16 %v284_v29, %v266_v36  ;;  %v357_v36 = vld [vmem:[%s5173_s9 + $0x598] sm:$0xff] }
 0x1ec   : > { %v4318_v24 = vpop.f32.mrb[123].mxu1  ;;  %v4430_v63 = vpop.f32.mrb[123].mxu0 }
 0x1ed   : > { %v2767_v25 = vadd.f32 %v4316_v16, %v6007_v8  ;;  %v4319_v26 = vadd.f32 %v4318_v24, %v4317_v32  ;;  %v4431_v28 = vadd.f32 %v4430_v63, %v4429_v30  ;;  %v318_v24 = vld [vmem:[%s5173_s9 + $0x460] sm:$0xff] }
 0x1ee   : > { %3369 = vmatmul.mubr.bf16.gmra.mrb[228].mxu1 %v786_v7  ;;  %3530 = vmatmul.mubr.bf16.gmra.mrb[228].mxu0 %v788_v13  ;;  %v823_v7 = vpack.c.bf16 %v319_v40, %v301_v38  ;;  %v825_v13 = vpack.c.bf16 %v321_v43, %v303_v61 }
 0x1ef   : > { %v6285_v2 = vadd.f32 %v4428_v57, %v2767_v25  ;;  %v2770_v35 = vadd.f32 %v4319_v26, %v6019_v9  ;;  %3376 = vmatprep.mubr.bf16.mxu1 %v805_v21  ;;  %3537 = vmatprep.mubr.bf16.mxu0 %v807_v23  ;;  %v300_v23 = vld [vmem:[%s5173_s9 + $0x3d0] sm:$0xff]  ;;  %v302_v26 = vld [vmem:[%s5173_s9 + $0x3e0] sm:$0xff] }
 0x1f0   : > { %v822_v43 = vpack.c.bf16 %v318_v24, %v300_v23  ;;  %v373_v23 = vld [vmem:[%s5173_s9 + $0x618] sm:$0xff]  ;;  %v391_v24 = vld [vmem:[%s5173_s9 + $0x6a8] sm:$0xff] }
 0x1f1   : > { %v6294_v8 = vadd.f32 %v4431_v28, %v2770_v35  ;;  %v4320_v20 = vpop.f32.mrb[124].mxu1  ;;  %v4432_v47 = vpop.f32.mrb[124].mxu0  ;;  %v320_v28 = vld [vmem:[%s5173_s9 + $0x470] sm:$0xff]  ;;  %v339_v35 = vld [vmem:[%s5173_s9 + $0x508] sm:$0xff] }
 0x1f2   : > { %v4321_v27 = vpop.f32.mrb[125].mxu1  ;;  %v4433_v37 = vpop.f32.mrb[125].mxu0 }
 0x1f3   : > { %v4322_v1 = vadd.f32 %v4321_v27, %v4320_v20  ;;  %v4434_v9 = vadd.f32 %v4433_v37, %v4432_v47  ;;  %v4323_v3 = vpop.f32.mrb[126].mxu1  ;;  %v4435_v45 = vpop.f32.mrb[126].mxu0  ;;  %v824_v20 = vpack.c.bf16 %v320_v28, %v302_v26  ;;  %v393_v26 = vld [vmem:[%s5173_s9 + $0x6b8] sm:$0xff] }
 0x1f4   : > { %v4324_v16 = vpop.f32.mrb[127].mxu1  ;;  %v4436_v57 = vpop.f32.mrb[127].mxu0 }
 0x1f5   : > { %v2775_v32 = vadd.f32 %v4322_v1, %v6048_v52  ;;  %v4325_v30 = vadd.f32 %v4324_v16, %v4323_v3  ;;  %v4437_v21 = vadd.f32 %v4436_v57, %v4435_v45  ;;  %v354_v16 = vld [vmem:[%s5173_s9 + $0x580] sm:$0xff] }
 0x1f6   : > { %3377 = vmatmul.mubr.bf16.gmra.mrb[232].mxu1 %v804_v54  ;;  %3538 = vmatmul.mubr.bf16.gmra.mrb[232].mxu0 %v806_v58  ;;  %v841_v54 = vpack.c.bf16 %v355_v60, %v337_v33  ;;  %v843_v58 = vpack.c.bf16 %v357_v36, %v339_v35 }
 0x1f7   : > { %v6299_v63 = vadd.f32 %v4434_v9, %v2775_v32  ;;  %v2778_v25 = vadd.f32 %v4325_v30, %v6060_v12  ;;  %3384 = vmatprep.mubr.bf16.mxu1 %v823_v7  ;;  %3545 = vmatprep.mubr.bf16.mxu0 %v825_v13  ;;  %v336_v13 = vld [vmem:[%s5173_s9 + $0x4f0] sm:$0xff]  ;;  %v338_v30 = vld [vmem:[%s5173_s9 + $0x500] sm:$0xff] }
 0x1f8   : > { %v840_v36 = vpack.c.bf16 %v354_v16, %v336_v13  ;;  %v409_v13 = vld [vmem:[%s5173_s9 + $0x738] sm:$0xff]  ;;  %v427_v16 = vld [vmem:[%s5173_s9 + $0x7c8] sm:$0xff] }
 0x1f9   : > { %v6308_v52 = vadd.f32 %v4437_v21, %v2778_v25  ;;  %v4326_v29 = vpop.f32.mrb[128].mxu1  ;;  %v4438_v38 = vpop.f32.mrb[128].mxu0  ;;  %v356_v21 = vld [vmem:[%s5173_s9 + $0x590] sm:$0xff]  ;;  %v375_v25 = vld [vmem:[%s5173_s9 + $0x628] sm:$0xff] }
 0x1fa   : > { %v4327_v40 = vpop.f32.mrb[129].mxu1  ;;  %v4439_v61 = vpop.f32.mrb[129].mxu0 }
 0x1fb   : > { %v4328_v47 = vadd.f32 %v4327_v40, %v4326_v29  ;;  %v4440_v12 = vadd.f32 %v4439_v61, %v4438_v38  ;;  %v4329_v27 = vpop.f32.mrb[130].mxu1  ;;  %v4441_v37 = vpop.f32.mrb[130].mxu0  ;;  %v842_v29 = vpack.c.bf16 %v356_v21, %v338_v30  ;;  %v429_v30 = vld [vmem:[%s5173_s9 + $0x7d8] sm:$0xff] }
 0x1fc   : > { %v4330_v1 = vpop.f32.mrb[131].mxu1  ;;  %v4442_v9 = vpop.f32.mrb[131].mxu0 }
 0x1fd   : > { %v2783_v3 = vadd.f32 %v4328_v47, %v6085_v39  ;;  %v4331_v45 = vadd.f32 %v4330_v1, %v4329_v27  ;;  %v4443_v7 = vadd.f32 %v4442_v9, %v4441_v37  ;;  %v390_v1 = vld [vmem:[%s5173_s9 + $0x6a0] sm:$0xff] }
 0x1fe   : > { %3385 = vmatmul.mubr.bf16.gmra.mrb[236].mxu1 %v822_v43  ;;  %3546 = vmatmul.mubr.bf16.gmra.mrb[236].mxu0 %v824_v20  ;;  %v859_v43 = vpack.c.bf16 %v391_v24, %v373_v23  ;;  %v861_v20 = vpack.c.bf16 %v393_v26, %v375_v25 }
 0x1ff   : > { %v6313_v57 = vadd.f32 %v4440_v12, %v2783_v3  ;;  %v2786_v32 = vadd.f32 %v4331_v45, %v6098_v17  ;;  %3392 = vmatprep.mubr.bf16.mxu1 %v841_v54  ;;  %3553 = vmatprep.mubr.bf16.mxu0 %v843_v58  ;;  %v372_v58 = vld [vmem:[%s5173_s9 + $0x610] sm:$0xff]  ;;  %v374_v45 = vld [vmem:[%s5173_s9 + $0x620] sm:$0xff] }
 0x200   : > { %v858_v26 = vpack.c.bf16 %v390_v1, %v372_v58  ;;  %v445_v58 = vld [vmem:[%s5173_s9 + $0x858] sm:$0xff]  ;;  %v463_v1 = vld [vmem:[%s5173_s9 + $0x8e8] sm:$0xff] }
 0x201   : > { %v6322_v39 = vadd.f32 %v4443_v7, %v2786_v32  ;;  %v4332_v28 = vpop.f32.mrb[132].mxu1  ;;  %v4444_v33 = vpop.f32.mrb[132].mxu0  ;;  %v392_v7 = vld [vmem:[%s5173_s9 + $0x6b0] sm:$0xff]  ;;  %v411_v32 = vld [vmem:[%s5173_s9 + $0x748] sm:$0xff] }
 0x202   : > { %v4333_v60 = vpop.f32.mrb[133].mxu1  ;;  %v4445_v35 = vpop.f32.mrb[133].mxu0 }
 0x203   : > { %v4334_v38 = vadd.f32 %v4333_v60, %v4332_v28  ;;  %v4446_v17 = vadd.f32 %v4445_v35, %v4444_v33  ;;  %v4335_v40 = vpop.f32.mrb[134].mxu1  ;;  %v4447_v61 = vpop.f32.mrb[134].mxu0  ;;  %v860_v28 = vpack.c.bf16 %v392_v7, %v374_v45  ;;  %v465_v45 = vld [vmem:[%s5173_s9 + $0x8f8] sm:$0xff] }
 0x204   : > { %v4336_v47 = vpop.f32.mrb[135].mxu1  ;;  %v4448_v12 = vpop.f32.mrb[135].mxu0 }
 0x205   : > { %v2791_v27 = vadd.f32 %v4334_v38, %v6103_v44  ;;  %v4337_v37 = vadd.f32 %v4336_v47, %v4335_v40  ;;  %v4449_v54 = vadd.f32 %v4448_v12, %v4447_v61  ;;  %v426_v47 = vld [vmem:[%s5173_s9 + $0x7c0] sm:$0xff] }
 0x206   : > { %3393 = vmatmul.mubr.bf16.gmra.mrb[240].mxu1 %v840_v36  ;;  %3554 = vmatmul.mubr.bf16.gmra.mrb[240].mxu0 %v842_v29  ;;  %v877_v36 = vpack.c.bf16 %v427_v16, %v409_v13  ;;  %v879_v29 = vpack.c.bf16 %v429_v30, %v411_v32 }
 0x207   : > { %v6327_v9 = vadd.f32 %v4446_v17, %v2791_v27  ;;  %v2794_v3 = vadd.f32 %v4337_v37, %v6112_v49  ;;  %3400 = vmatprep.mubr.bf16.mxu1 %v859_v43  ;;  %3561 = vmatprep.mubr.bf16.mxu0 %v861_v20  ;;  %v408_v20 = vld [vmem:[%s5173_s9 + $0x730] sm:$0xff]  ;;  %v410_v37 = vld [vmem:[%s5173_s9 + $0x740] sm:$0xff] }
 0x208   : > { %v876_v30 = vpack.c.bf16 %v426_v47, %v408_v20  ;;  %v481_v20 = vld [vmem:[%s5173_s9 + $0x978] sm:$0xff]  ;;  %v499_v47 = vld [vmem:[%s5173_s9 + $0xa08] sm:$0xff] }
 0x209   : > { %v6336_v44 = vadd.f32 %v4449_v54, %v2794_v3  ;;  %v4338_v21 = vpop.f32.mrb[136].mxu1  ;;  %v4450_v23 = vpop.f32.mrb[136].mxu0  ;;  %v428_v54 = vld [vmem:[%s5173_s9 + $0x7d0] sm:$0xff]  ;;  %v447_v3 = vld [vmem:[%s5173_s9 + $0x868] sm:$0xff] }
 0x20a   : > { %v4339_v24 = vpop.f32.mrb[137].mxu1  ;;  %v4451_v25 = vpop.f32.mrb[137].mxu0 }
 0x20b   : > { %v4340_v33 = vadd.f32 %v4339_v24, %v4338_v21  ;;  %v4452_v49 = vadd.f32 %v4451_v25, %v4450_v23  ;;  %v4341_v60 = vpop.f32.mrb[138].mxu1  ;;  %v4453_v35 = vpop.f32.mrb[138].mxu0  ;;  %v878_v21 = vpack.c.bf16 %v428_v54, %v410_v37  ;;  %v501_v37 = vld [vmem:[%s5173_s9 + $0xa18] sm:$0xff] }
 0x20c   : > { %v4342_v38 = vpop.f32.mrb[139].mxu1  ;;  %v4454_v17 = vpop.f32.mrb[139].mxu0 }
 0x20d   : > { %v2799_v40 = vadd.f32 %v4340_v33, %v6117_v50  ;;  %v4343_v61 = vadd.f32 %v4342_v38, %v4341_v60  ;;  %v4455_v43 = vadd.f32 %v4454_v17, %v4453_v35  ;;  %v462_v38 = vld [vmem:[%s5173_s9 + $0x8e0] sm:$0xff] }
 0x20e   : > { %3401 = vmatmul.mubr.bf16.gmra.mrb[244].mxu1 %v858_v26  ;;  %3562 = vmatmul.mubr.bf16.gmra.mrb[244].mxu0 %v860_v28  ;;  %v895_v26 = vpack.c.bf16 %v463_v1, %v445_v58  ;;  %v897_v28 = vpack.c.bf16 %v465_v45, %v447_v3 }
 0x20f   : > { %v6341_v12 = vadd.f32 %v4452_v49, %v2799_v40  ;;  %v2802_v27 = vadd.f32 %v4343_v61, %v6126_v11  ;;  %3408 = vmatprep.mubr.bf16.mxu1 %v877_v36  ;;  %3569 = vmatprep.mubr.bf16.mxu0 %v879_v29  ;;  %v444_v29 = vld [vmem:[%s5173_s9 + $0x850] sm:$0xff]  ;;  %v446_v61 = vld [vmem:[%s5173_s9 + $0x860] sm:$0xff] }
 0x210   : > { %v894_v45 = vpack.c.bf16 %v462_v38, %v444_v29  ;;  %v517_v29 = vld [vmem:[%s5173_s9 + $0xa98] sm:$0xff]  ;;  %v535_v38 = vld [vmem:[%s5173_s9 + $0xb28] sm:$0xff] }
 0x211   : > { %v6350_v50 = vadd.f32 %v4455_v43, %v2802_v27  ;;  %v4344_v7 = vpop.f32.mrb[140].mxu1  ;;  %v4456_v13 = vpop.f32.mrb[140].mxu0  ;;  %v464_v43 = vld [vmem:[%s5173_s9 + $0x8f0] sm:$0xff]  ;;  %v483_v27 = vld [vmem:[%s5173_s9 + $0x988] sm:$0xff] }
 0x212   : > { %v4345_v16 = vpop.f32.mrb[141].mxu1  ;;  %v4457_v32 = vpop.f32.mrb[141].mxu0 }
 0x213   : > { %v4346_v23 = vadd.f32 %v4345_v16, %v4344_v7  ;;  %v4458_v11 = vadd.f32 %v4457_v32, %v4456_v13  ;;  %v4347_v24 = vpop.f32.mrb[142].mxu1  ;;  %v4459_v25 = vpop.f32.mrb[142].mxu0  ;;  %v896_v7 = vpack.c.bf16 %v464_v43, %v446_v61  ;;  %v537_v61 = vld [vmem:[%s5173_s9 + $0xb38] sm:$0xff] }
 0x214   : > { %v4348_v33 = vpop.f32.mrb[143].mxu1  ;;  %v4460_v49 = vpop.f32.mrb[143].mxu0 }
 0x215   : > { %v2807_v60 = vadd.f32 %v4346_v23, %v6131_v4  ;;  %v4349_v35 = vadd.f32 %v4348_v33, %v4347_v24  ;;  %v4461_v36 = vadd.f32 %v4460_v49, %v4459_v25  ;;  %v498_v33 = vld [vmem:[%s5173_s9 + $0xa00] sm:$0xff] }
 0x216   : > { %3409 = vmatmul.mubr.bf16.gmra.mrb[248].mxu1 %v876_v30  ;;  %3570 = vmatmul.mubr.bf16.gmra.mrb[248].mxu0 %v878_v21  ;;  %v913_v30 = vpack.c.bf16 %v499_v47, %v481_v20  ;;  %v915_v21 = vpack.c.bf16 %v501_v37, %v483_v27 }
 0x217   : > { %v6355_v17 = vadd.f32 %v4458_v11, %v2807_v60  ;;  %v2810_v40 = vadd.f32 %v4349_v35, %v6140_v41  ;;  %3416 = vmatprep.mubr.bf16.mxu1 %v895_v26  ;;  %3577 = vmatprep.mubr.bf16.mxu0 %v897_v28  ;;  %v480_v28 = vld [vmem:[%s5173_s9 + $0x970] sm:$0xff]  ;;  %v482_v35 = vld [vmem:[%s5173_s9 + $0x980] sm:$0xff] }
 0x218   : > { %v912_v37 = vpack.c.bf16 %v498_v33, %v480_v28  ;;  %v553_v28 = vld [vmem:[%s5173_s9 + $0xbb8] sm:$0xff]  ;;  %v571_v33 = vld [vmem:[%s5173_s9 + $0xc48] sm:$0xff] }
 0x219   : > { %v6364_v4 = vadd.f32 %v4461_v36, %v2810_v40  ;;  %v4350_v54 = vpop.f32.mrb[144].mxu1  ;;  %v4462_v58 = vpop.f32.mrb[144].mxu0  ;;  %v500_v36 = vld [vmem:[%s5173_s9 + $0xa10] sm:$0xff]  ;;  %v519_v40 = vld [vmem:[%s5173_s9 + $0xaa8] sm:$0xff] }
 0x21a   : > { %v4351_v1 = vpop.f32.mrb[145].mxu1  ;;  %v4463_v3 = vpop.f32.mrb[145].mxu0 }
 0x21b   : > { %v4352_v13 = vadd.f32 %v4351_v1, %v4350_v54  ;;  %v4464_v41 = vadd.f32 %v4463_v3, %v4462_v58  ;;  %v4353_v16 = vpop.f32.mrb[146].mxu1  ;;  %v4465_v32 = vpop.f32.mrb[146].mxu0  ;;  %v914_v54 = vpack.c.bf16 %v500_v36, %v482_v35  ;;  %v573_v35 = vld [vmem:[%s5173_s9 + $0xc58] sm:$0xff] }
 0x21c   : > { %v4354_v23 = vpop.f32.mrb[147].mxu1  ;;  %v4466_v11 = vpop.f32.mrb[147].mxu0 }
 0x21d   : > { %v2815_v24 = vadd.f32 %v4352_v13, %v6145_v53  ;;  %v4355_v25 = vadd.f32 %v4354_v23, %v4353_v16  ;;  %v4467_v26 = vadd.f32 %v4466_v11, %v4465_v32  ;;  %v534_v23 = vld [vmem:[%s5173_s9 + $0xb20] sm:$0xff] }
 0x21e   : > { %3417 = vmatmul.mubr.bf16.gmra.mrb[252].mxu1 %v894_v45  ;;  %3578 = vmatmul.mubr.bf16.gmra.mrb[252].mxu0 %v896_v7  ;;  %v931_v45 = vpack.c.bf16 %v535_v38, %v517_v29  ;;  %v933_v7 = vpack.c.bf16 %v537_v61, %v519_v40 }
 0x21f   : > { %v6369_v49 = vadd.f32 %v4464_v41, %v2815_v24  ;;  %v2818_v60 = vadd.f32 %v4355_v25, %v6154_v10  ;;  %3424 = vmatprep.mubr.bf16.mxu1 %v913_v30  ;;  %3585 = vmatprep.mubr.bf16.mxu0 %v915_v21  ;;  %v516_v21 = vld [vmem:[%s5173_s9 + $0xa90] sm:$0xff]  ;;  %v518_v25 = vld [vmem:[%s5173_s9 + $0xaa0] sm:$0xff] }
 0x220   : > { %v930_v61 = vpack.c.bf16 %v534_v23, %v516_v21  ;;  %v589_v21 = vld [vmem:[%s5173_s9 + $0xcd8] sm:$0xff]  ;;  %v607_v23 = vld [vmem:[%s5173_s9 + $0xd68] sm:$0xff] }
 0x221   : > { %v6378_v53 = vadd.f32 %v4467_v26, %v2818_v60  ;;  %v4356_v43 = vpop.f32.mrb[148].mxu1  ;;  %v4468_v20 = vpop.f32.mrb[148].mxu0  ;;  %v536_v26 = vld [vmem:[%s5173_s9 + $0xb30] sm:$0xff]  ;;  %v555_v60 = vld [vmem:[%s5173_s9 + $0xbc8] sm:$0xff] }
 0x222   : > { %v4357_v47 = vpop.f32.mrb[149].mxu1  ;;  %v4469_v27 = vpop.f32.mrb[149].mxu0 }
 0x223   : > { %v4358_v58 = vadd.f32 %v4357_v47, %v4356_v43  ;;  %v4470_v10 = vadd.f32 %v4469_v27, %v4468_v20  ;;  %v4359_v1 = vpop.f32.mrb[150].mxu1  ;;  %v4471_v3 = vpop.f32.mrb[150].mxu0  ;;  %v932_v43 = vpack.c.bf16 %v536_v26, %v518_v25  ;;  %v609_v25 = vld [vmem:[%s5173_s9 + $0xd78] sm:$0xff] }
 0x224   : > { %v4360_v13 = vpop.f32.mrb[151].mxu1  ;;  %v4472_v41 = vpop.f32.mrb[151].mxu0 }
 0x225   : > { %v2823_v16 = vadd.f32 %v4358_v58, %v6159_v18  ;;  %v4361_v32 = vadd.f32 %v4360_v13, %v4359_v1  ;;  %v4473_v30 = vadd.f32 %v4472_v41, %v4471_v3  ;;  %v570_v13 = vld [vmem:[%s5173_s9 + $0xc40] sm:$0xff] }
 0x226   : > { %3425 = vmatmul.mubr.bf16.gmra.mrb[0].mxu1 %v912_v37  ;;  %3586 = vmatmul.mubr.bf16.gmra.mrb[0].mxu0 %v914_v54  ;;  %v949_v37 = vpack.c.bf16 %v571_v33, %v553_v28  ;;  %v951_v54 = vpack.c.bf16 %v573_v35, %v555_v60 }
 0x227   : > { %v6383_v11 = vadd.f32 %v4470_v10, %v2823_v16  ;;  %v2826_v24 = vadd.f32 %v4361_v32, %v6168_v46  ;;  %3432 = vmatprep.mubr.bf16.mxu1 %v931_v45  ;;  %3593 = vmatprep.mubr.bf16.mxu0 %v933_v7  ;;  %v552_v7 = vld [vmem:[%s5173_s9 + $0xbb0] sm:$0xff]  ;;  %v554_v32 = vld [vmem:[%s5173_s9 + $0xbc0] sm:$0xff] }
 0x228   : > { %v948_v35 = vpack.c.bf16 %v570_v13, %v552_v7  ;;  %v625_v7 = vld [vmem:[%s5173_s9 + $0xdf8] sm:$0xff]  ;;  %v643_v13 = vld [vmem:[%s5173_s9 + $0xe88] sm:$0xff] }
 0x229   : > { %v6392_v18 = vadd.f32 %v4473_v30, %v2826_v24  ;;  %v4362_v36 = vpop.f32.mrb[152].mxu1  ;;  %v4474_v29 = vpop.f32.mrb[152].mxu0  ;;  %v572_v30 = vld [vmem:[%s5173_s9 + $0xc50] sm:$0xff]  ;;  %v591_v24 = vld [vmem:[%s5173_s9 + $0xce8] sm:$0xff] }
 0x22a   : > { %v4363_v38 = vpop.f32.mrb[153].mxu1  ;;  %v4475_v40 = vpop.f32.mrb[153].mxu0 }
 0x22b   : > { %v4364_v20 = vadd.f32 %v4363_v38, %v4362_v36  ;;  %v4476_v46 = vadd.f32 %v4475_v40, %v4474_v29  ;;  %v4365_v47 = vpop.f32.mrb[154].mxu1  ;;  %v4477_v27 = vpop.f32.mrb[154].mxu0  ;;  %v950_v36 = vpack.c.bf16 %v572_v30, %v554_v32  ;;  %v645_v32 = vld [vmem:[%s5173_s9 + $0xe98] sm:$0xff] }
 0x22c   : > { %v4366_v58 = vpop.f32.mrb[155].mxu1  ;;  %v4478_v10 = vpop.f32.mrb[155].mxu0 }
 0x22d   : > { %v2831_v1 = vadd.f32 %v4364_v20, %v6173_v48  ;;  %v4367_v3 = vadd.f32 %v4366_v58, %v4365_v47  ;;  %v4479_v45 = vadd.f32 %v4478_v10, %v4477_v27  ;;  %v606_v58 = vld [vmem:[%s5173_s9 + $0xd60] sm:$0xff] }
 0x22e   : > { %3433 = vmatmul.mubr.bf16.gmra.mrb[4].mxu1 %v930_v61  ;;  %3594 = vmatmul.mubr.bf16.gmra.mrb[4].mxu0 %v932_v43  ;;  %v967_v61 = vpack.c.bf16 %v607_v23, %v589_v21  ;;  %v969_v43 = vpack.c.bf16 %v609_v25, %v591_v24 }
 0x22f   : > { %v6397_v41 = vadd.f32 %v4476_v46, %v2831_v1  ;;  %v2834_v16 = vadd.f32 %v4367_v3, %v6182_v22  ;;  %3440 = vmatprep.mubr.bf16.mxu1 %v949_v37  ;;  %3601 = vmatprep.mubr.bf16.mxu0 %v951_v54  ;;  %v588_v54 = vld [vmem:[%s5173_s9 + $0xcd0] sm:$0xff]  ;;  %v590_v3 = vld [vmem:[%s5173_s9 + $0xce0] sm:$0xff] }
 0x230   : > { %v966_v25 = vpack.c.bf16 %v606_v58, %v588_v54  ;;  %v661_v54 = vld [vmem:[%s5173_s9 + $0xf18] sm:$0xff]  ;;  %v679_v58 = vld [vmem:[%s5173_s9 + $0xfa8] sm:$0xff] }
 0x231   : > { %v6406_v48 = vadd.f32 %v4479_v45, %v2834_v16  ;;  %v4368_v26 = vpop.f32.mrb[156].mxu1  ;;  %v4480_v28 = vpop.f32.mrb[156].mxu0  ;;  %v608_v45 = vld [vmem:[%s5173_s9 + $0xd70] sm:$0xff]  ;;  %v627_v16 = vld [vmem:[%s5173_s9 + $0xe08] sm:$0xff] }
 0x232   : > { %v4369_v33 = vpop.f32.mrb[157].mxu1  ;;  %v4481_v60 = vpop.f32.mrb[157].mxu0 }
 0x233   : > { %v4370_v29 = vadd.f32 %v4369_v33, %v4368_v26  ;;  %v4482_v22 = vadd.f32 %v4481_v60, %v4480_v28  ;;  %v4371_v38 = vpop.f32.mrb[158].mxu1  ;;  %v4483_v40 = vpop.f32.mrb[158].mxu0  ;;  %v968_v26 = vpack.c.bf16 %v608_v45, %v590_v3  ;;  %v681_v3 = vld [vmem:[%s5173_s9 + $0xfb8] sm:$0xff] }
 0x234   : > { %v4372_v20 = vpop.f32.mrb[159].mxu1  ;;  %v4484_v46 = vpop.f32.mrb[159].mxu0 }
 0x235   : > { %v2839_v47 = vadd.f32 %v4370_v29, %v6187_v19  ;;  %v4373_v27 = vadd.f32 %v4372_v20, %v4371_v38  ;;  %v4485_v37 = vadd.f32 %v4484_v46, %v4483_v40  ;;  %v642_v20 = vld [vmem:[%s5173_s9 + $0xe80] sm:$0xff] }
 0x236   : > { %3441 = vmatmul.mubr.bf16.gmra.mrb[8].mxu1 %v948_v35  ;;  %3602 = vmatmul.mubr.bf16.gmra.mrb[8].mxu0 %v950_v36  ;;  %v985_v35 = vpack.c.bf16 %v643_v13, %v625_v7  ;;  %v987_v36 = vpack.c.bf16 %v645_v32, %v627_v16 }
 0x237   : > { %v6411_v10 = vadd.f32 %v4482_v22, %v2839_v47  ;;  %v2842_v1 = vadd.f32 %v4373_v27, %v6196_v0  ;;  %3448 = vmatprep.mubr.bf16.mxu1 %v967_v61  ;;  %3609 = vmatprep.mubr.bf16.mxu0 %v969_v43  ;;  %v624_v43 = vld [vmem:[%s5173_s9 + $0xdf0] sm:$0xff]  ;;  %v626_v27 = vld [vmem:[%s5173_s9 + $0xe00] sm:$0xff] }
 0x238   : > { %v984_v32 = vpack.c.bf16 %v642_v20, %v624_v43  ;;  %v697_v43 = vld [vmem:[%s5173_s9 + $0x1038] sm:$0xff]  ;;  %v715_v20 = vld [vmem:[%s5173_s9 + $0x10c8] sm:$0xff] }
 0x239   : > { %v6420_v19 = vadd.f32 %v4485_v37, %v2842_v1  ;;  %v4502_v30 = vpop.f32.mrb[160].mxu1  ;;  %v4614_v21 = vpop.f32.mrb[160].mxu0  ;;  %v644_v37 = vld [vmem:[%s5173_s9 + $0xe90] sm:$0xff]  ;;  %v663_v1 = vld [vmem:[%s5173_s9 + $0xf28] sm:$0xff] }
 0x23a   : > { %v4503_v23 = vpop.f32.mrb[161].mxu1  ;;  %v4615_v24 = vpop.f32.mrb[161].mxu0 }
 0x23b   : > { %v4504_v28 = vadd.f32 %v4503_v23, %v4502_v30  ;;  %v4616_v0 = vadd.f32 %v4615_v24, %v4614_v21  ;;  %v4505_v33 = vpop.f32.mrb[162].mxu1  ;;  %v4617_v60 = vpop.f32.mrb[162].mxu0  ;;  %v986_v30 = vpack.c.bf16 %v644_v37, %v626_v27  ;;  %v717_v27 = vld [vmem:[%s5173_s9 + $0x10d8] sm:$0xff] }
 0x23c   : > { %v4506_v29 = vpop.f32.mrb[163].mxu1  ;;  %v4618_v22 = vpop.f32.mrb[163].mxu0 }
 0x23d   : > { %v3041_v38 = vadd.f32 %v4504_v28, %v6201_v55  ;;  %v4507_v40 = vadd.f32 %v4506_v29, %v4505_v33  ;;  %v4619_v61 = vadd.f32 %v4618_v22, %v4617_v60  ;;  %v678_v29 = vld [vmem:[%s5173_s9 + $0xfa0] sm:$0xff] }
 0x23e   : > { %3449 = vmatmul.mubr.bf16.gmra.mrb[12].mxu1 %v966_v25  ;;  %3610 = vmatmul.mubr.bf16.gmra.mrb[12].mxu0 %v968_v26  ;;  %v1003_v25 = vpack.c.bf16 %v679_v58, %v661_v54  ;;  %v1005_v26 = vpack.c.bf16 %v681_v3, %v663_v1 }
 0x23f   : > { %v6425_v46 = vadd.f32 %v4616_v0, %v3041_v38  ;;  %v3044_v47 = vadd.f32 %v4507_v40, %v6210_v59  ;;  %3456 = vmatprep.mubr.bf16.mxu1 %v985_v35  ;;  %3617 = vmatprep.mubr.bf16.mxu0 %v987_v36  ;;  %v660_v36 = vld [vmem:[%s5173_s9 + $0xf10] sm:$0xff]  ;;  %v662_v40 = vld [vmem:[%s5173_s9 + $0xf20] sm:$0xff] }
 0x240   : > { %v1002_v3 = vpack.c.bf16 %v678_v29, %v660_v36  ;;  %v733_v36 = vld [vmem:[%s5173_s9 + $0x1158] sm:$0xff]  ;;  %v751_v29 = vld [vmem:[%s5173_s9 + $0x11e8] sm:$0xff] }
 0x241   : > { %v6434_v55 = vadd.f32 %v4619_v61, %v3044_v47  ;;  %v4508_v45 = vpop.f32.mrb[164].mxu1  ;;  %v4620_v7 = vpop.f32.mrb[164].mxu0  ;;  %v680_v61 = vld [vmem:[%s5173_s9 + $0xfb0] sm:$0xff]  ;;  %v699_v47 = vld [vmem:[%s5173_s9 + $0x1048] sm:$0xff] }
 0x242   : > { %v4509_v13 = vpop.f32.mrb[165].mxu1  ;;  %v4621_v16 = vpop.f32.mrb[165].mxu0 }
 0x243   : > { %v4510_v21 = vadd.f32 %v4509_v13, %v4508_v45  ;;  %v4622_v59 = vadd.f32 %v4621_v16, %v4620_v7  ;;  %v4511_v23 = vpop.f32.mrb[166].mxu1  ;;  %v4623_v24 = vpop.f32.mrb[166].mxu0  ;;  %v1004_v45 = vpack.c.bf16 %v680_v61, %v662_v40  ;;  %v753_v40 = vld [vmem:[%s5173_s9 + $0x11f8] sm:$0xff] }
 0x244   : > { %v4512_v28 = vpop.f32.mrb[167].mxu1  ;;  %v4624_v0 = vpop.f32.mrb[167].mxu0 }
 0x245   : > { %v3049_v33 = vadd.f32 %v4510_v21, %v6215_v31  ;;  %v4513_v60 = vadd.f32 %v4512_v28, %v4511_v23  ;;  %v4625_v35 = vadd.f32 %v4624_v0, %v4623_v24  ;;  %v714_v28 = vld [vmem:[%s5173_s9 + $0x10c0] sm:$0xff] }
 0x246   : > { %3457 = vmatmul.mubr.bf16.gmra.mrb[16].mxu1 %v984_v32  ;;  %3618 = vmatmul.mubr.bf16.gmra.mrb[16].mxu0 %v986_v30  ;;  %v1021_v32 = vpack.c.bf16 %v715_v20, %v697_v43  ;;  %v1023_v30 = vpack.c.bf16 %v717_v27, %v699_v47 }
 0x247   : > { %v6439_v22 = vadd.f32 %v4622_v59, %v3049_v33  ;;  %v3052_v38 = vadd.f32 %v4513_v60, %v6224_v56  ;;  %3464 = vmatprep.mubr.bf16.mxu1 %v1003_v25  ;;  %3625 = vmatprep.mubr.bf16.mxu0 %v1005_v26  ;;  %v696_v26 = vld [vmem:[%s5173_s9 + $0x1030] sm:$0xff]  ;;  %v698_v60 = vld [vmem:[%s5173_s9 + $0x1040] sm:$0xff] }
 0x248   : > { %v1020_v27 = vpack.c.bf16 %v714_v28, %v696_v26 }
 0x249   : > { %v6448_v31 = vadd.f32 %v4625_v35, %v3052_v38  ;;  %v4514_v37 = vpop.f32.mrb[168].mxu1  ;;  %v4626_v54 = vpop.f32.mrb[168].mxu0  ;;  %v716_v35 = vld [vmem:[%s5173_s9 + $0x10d0] sm:$0xff]  ;;  %v735_v38 = vld [vmem:[%s5173_s9 + $0x1168] sm:$0xff] }
 0x24a   : > { %v4515_v58 = vpop.f32.mrb[169].mxu1  ;;  %v4627_v1 = vpop.f32.mrb[169].mxu0 }
 0x24b   : > { %v4516_v7 = vadd.f32 %v4515_v58, %v4514_v37  ;;  %v4628_v56 = vadd.f32 %v4627_v1, %v4626_v54  ;;  %v4517_v13 = vpop.f32.mrb[170].mxu1  ;;  %v4629_v16 = vpop.f32.mrb[170].mxu0  ;;  %v1022_v37 = vpack.c.bf16 %v716_v35, %v698_v60 }
 0x24c   : > { %v4518_v21 = vpop.f32.mrb[171].mxu1  ;;  %v4630_v59 = vpop.f32.mrb[171].mxu0 }
 0x24d   : > { %v3057_v23 = vadd.f32 %v4516_v7, %v6229_v15  ;;  %v4519_v24 = vadd.f32 %v4518_v21, %v4517_v13  ;;  %v4631_v25 = vadd.f32 %v4630_v59, %v4629_v16 }
 0x24e   : > { %3465 = vmatmul.mubr.bf16.gmra.mrb[20].mxu1 %v1002_v3  ;;  %3626 = vmatmul.mubr.bf16.gmra.mrb[20].mxu0 %v1004_v45  ;;  %v1039_v3 = vpack.c.bf16 %v751_v29, %v733_v36  ;;  %v1041_v45 = vpack.c.bf16 %v753_v40, %v735_v38 }
 0x24f   : > { %v6453_v0 = vadd.f32 %v4628_v56, %v3057_v23  ;;  %v3060_v33 = vadd.f32 %v4519_v24, %v6238_v51  ;;  %3472 = vmatprep.mubr.bf16.mxu1 %v1021_v32  ;;  %3633 = vmatprep.mubr.bf16.mxu0 %v1023_v30  ;;  %v732_v30 = vld [vmem:[%s5173_s9 + $0x1150] sm:$0xff]  ;;  %v750_v23 = vld [vmem:[%s5173_s9 + $0x11e0] sm:$0xff] }
 0x250   : > { %v734_v24 = vld [vmem:[%s5173_s9 + $0x1160] sm:$0xff]  ;;  %v1038_v35 = vpack.c.bf16 %v750_v23, %v732_v30 }
 0x251   : > { %v6462_v15 = vadd.f32 %v4631_v25, %v3060_v33  ;;  %v4520_v61 = vpop.f32.mrb[172].mxu1  ;;  %v4632_v43 = vpop.f32.mrb[172].mxu0  ;;  %v752_v25 = vld [vmem:[%s5173_s9 + $0x11f0] sm:$0xff]  ;;  %s3778_s9 = sshll.u32 %s6624_s16, 3 }
 0x252   : > { %v4521_v20 = vpop.f32.mrb[173].mxu1  ;;  %v4633_v47 = vpop.f32.mrb[173].mxu0  ;;  %v1040_v36 = vpack.c.bf16 %v752_v25, %v734_v24  ;;  %s6552_s24 = scalar_lea.vmem %s6622_s3, %s3778_s9 }
 0x253   : > { %v4522_v54 = vadd.f32 %v4521_v20, %v4520_v61  ;;  %v4634_v58 = vadd.f32 %v4633_v47, %v4632_v43  ;;  %v4523_v51 = vpop.f32.mrb[174].mxu1  ;;  %v4635_v1 = vpop.f32.mrb[174].mxu0 }
 0x254   : > { %v4524_v7 = vpop.f32.mrb[175].mxu1  ;;  %v4636_v56 = vpop.f32.mrb[175].mxu0 }
 0x255   : > { %v3065_v13 = vadd.f32 %v4522_v54, %v6243_v14  ;;  %v4525_v16 = vadd.f32 %v4524_v7, %v4523_v51  ;;  %v4637_v32 = vadd.f32 %v4636_v56, %v4635_v1 }
 0x256   : > { %3473 = vmatmul.mubr.bf16.gmra.mrb[24].mxu1 %v1020_v27  ;;  %3634 = vmatmul.mubr.bf16.gmra.mrb[24].mxu0 %v1022_v37 }
 0x257   : > { %v6466_v21 = vadd.f32 %v4634_v58, %v3065_v13  ;;  %v3068_v59 = vadd.f32 %v4525_v16, %v6252_v42  ;;  %3480 = vmatprep.mubr.bf16.mxu1 %v1039_v3  ;;  %3641 = vmatprep.mubr.bf16.mxu0 %v1041_v45 }
 0x259   : > { %v6472_v26 = vadd.f32 %v4637_v32, %v3068_v59  ;;  %v4526_v28 = vpop.f32.mrb[176].mxu1  ;;  %v4638_v33 = vpop.f32.mrb[176].mxu0 }
 0x25a   : > { %v4527_v60 = vpop.f32.mrb[177].mxu1  ;;  %v4639_v14 = vpop.f32.mrb[177].mxu0 }
 0x25b   : > { %v4528_v29 = vadd.f32 %v4527_v60, %v4526_v28  ;;  %v4640_v38 = vadd.f32 %v4639_v14, %v4638_v33  ;;  %v4529_v40 = vpop.f32.mrb[178].mxu1  ;;  %v4641_v61 = vpop.f32.mrb[178].mxu0 }
 0x25c   : > { %v4530_v43 = vpop.f32.mrb[179].mxu1  ;;  %v4642_v20 = vpop.f32.mrb[179].mxu0 }
 0x25d   : > { %v3073_v42 = vadd.f32 %v4528_v29, %v6257_v5  ;;  %v4531_v47 = vadd.f32 %v4530_v43, %v4529_v40  ;;  %v4643_v27 = vadd.f32 %v4642_v20, %v4641_v61 }
 0x25e   : > { %3481 = vmatmul.mubr.bf16.gmra.mrb[28].mxu1 %v1038_v35  ;;  %3642 = vmatmul.mubr.bf16.gmra.mrb[28].mxu0 %v1040_v36 }
 0x25f   : > { %v6475_v37 = vadd.f32 %v4640_v38, %v3073_v42  ;;  %v3076_v54 = vadd.f32 %v4531_v47, %v6266_v34 }
 0x261   : > { %v6478_v58 = vadd.f32 %v4643_v27, %v3076_v54  ;;  %v4532_v51 = vpop.f32.mrb[180].mxu1  ;;  %v4644_v1 = vpop.f32.mrb[180].mxu0 }
 0x262   : > { %v4533_v3 = vpop.f32.mrb[181].mxu1  ;;  %v4645_v45 = vpop.f32.mrb[181].mxu0 }
 0x263   : > { %v4534_v7 = vadd.f32 %v4533_v3, %v4532_v51  ;;  %v4646_v56 = vadd.f32 %v4645_v45, %v4644_v1  ;;  %v4535_v13 = vpop.f32.mrb[182].mxu1  ;;  %v4647_v16 = vpop.f32.mrb[182].mxu0 }
 0x264   : > { %v4536_v32 = vpop.f32.mrb[183].mxu1  ;;  %v4648_v5 = vpop.f32.mrb[183].mxu0 }
 0x265   : > { %v3081_v30 = vadd.f32 %v4534_v7, %v6271_v62  ;;  %v4537_v59 = vadd.f32 %v4536_v32, %v4535_v13  ;;  %v4649_v23 = vadd.f32 %v4648_v5, %v4647_v16 }
 0x267   : > { %v6481_v24 = vadd.f32 %v4646_v56, %v3081_v30  ;;  %v3084_v34 = vadd.f32 %v4537_v59, %v6280_v6 }
 0x269   : > { %v6484_v25 = vadd.f32 %v4649_v23, %v3084_v34  ;;  %v4538_v28 = vpop.f32.mrb[184].mxu1  ;;  %v4650_v33 = vpop.f32.mrb[184].mxu0 }
 0x26a   : > { %v4539_v60 = vpop.f32.mrb[185].mxu1  ;;  %v4651_v14 = vpop.f32.mrb[185].mxu0 }
 0x26b   : > { %v4540_v35 = vadd.f32 %v4539_v60, %v4538_v28  ;;  %v4652_v36 = vadd.f32 %v4651_v14, %v4650_v33  ;;  %v4541_v29 = vpop.f32.mrb[186].mxu1  ;;  %v4653_v38 = vpop.f32.mrb[186].mxu0 }
 0x26c   : > { %v4542_v40 = vpop.f32.mrb[187].mxu1  ;;  %v4654_v61 = vpop.f32.mrb[187].mxu0 }
 0x26d   : > { %v3089_v62 = vadd.f32 %v4540_v35, %v6285_v2  ;;  %v4543_v43 = vadd.f32 %v4542_v40, %v4541_v29  ;;  %v4655_v20 = vadd.f32 %v4654_v61, %v4653_v38 }
 0x26f   : > { %v6487_v42 = vadd.f32 %v4652_v36, %v3089_v62  ;;  %v3092_v6 = vadd.f32 %v4543_v43, %v6294_v8 }
 0x271   : > { %v6490_v47 = vadd.f32 %v4655_v20, %v3092_v6  ;;  %v4544_v27 = vpop.f32.mrb[188].mxu1  ;;  %v4656_v54 = vpop.f32.mrb[188].mxu0 }
 0x272   : > { %v4545_v51 = vpop.f32.mrb[189].mxu1  ;;  %v4657_v1 = vpop.f32.mrb[189].mxu0 }
 0x273   : > { %v4546_v3 = vadd.f32 %v4545_v51, %v4544_v27  ;;  %v4658_v45 = vadd.f32 %v4657_v1, %v4656_v54  ;;  %v4547_v7 = vpop.f32.mrb[190].mxu1  ;;  %v4659_v56 = vpop.f32.mrb[190].mxu0 }
 0x274   : > { %v4548_v13 = vpop.f32.mrb[191].mxu1  ;;  %v4660_v16 = vpop.f32.mrb[191].mxu0 }
 0x275   : > { %v3097_v2 = vadd.f32 %v4546_v3, %v6299_v63  ;;  %v4549_v32 = vadd.f32 %v4548_v13, %v4547_v7  ;;  %v4661_v5 = vadd.f32 %v4660_v16, %v4659_v56 }
 0x277   : > { %v6493_v30 = vadd.f32 %v4658_v45, %v3097_v2  ;;  %v3100_v8 = vadd.f32 %v4549_v32, %v6308_v52 }
 0x279   : > { %v6496_v59 = vadd.f32 %v4661_v5, %v3100_v8  ;;  %v4550_v23 = vpop.f32.mrb[192].mxu1  ;;  %v4662_v34 = vpop.f32.mrb[192].mxu0 }
 0x27a   : > { %v4551_v28 = vpop.f32.mrb[193].mxu1  ;;  %v4663_v33 = vpop.f32.mrb[193].mxu0 }
 0x27b   : > { %v4552_v60 = vadd.f32 %v4551_v28, %v4550_v23  ;;  %v4664_v14 = vadd.f32 %v4663_v33, %v4662_v34  ;;  %v4553_v35 = vpop.f32.mrb[194].mxu1  ;;  %v4665_v36 = vpop.f32.mrb[194].mxu0 }
 0x27c   : > { %v4554_v29 = vpop.f32.mrb[195].mxu1  ;;  %v4666_v38 = vpop.f32.mrb[195].mxu0 }
 0x27d   : > { %v3105_v63 = vadd.f32 %v4552_v60, %v6313_v57  ;;  %v4555_v40 = vadd.f32 %v4554_v29, %v4553_v35  ;;  %v4667_v61 = vadd.f32 %v4666_v38, %v4665_v36 }
 0x27f   : > { %v6499_v62 = vadd.f32 %v4664_v14, %v3105_v63  ;;  %v3108_v52 = vadd.f32 %v4555_v40, %v6322_v39 }
 0x281   : > { %v6502_v43 = vadd.f32 %v4667_v61, %v3108_v52  ;;  %v4556_v20 = vpop.f32.mrb[196].mxu1  ;;  %v4668_v6 = vpop.f32.mrb[196].mxu0 }
 0x282   : > { %v4557_v27 = vpop.f32.mrb[197].mxu1  ;;  %v4669_v54 = vpop.f32.mrb[197].mxu0 }
 0x283   : > { %v4558_v51 = vadd.f32 %v4557_v27, %v4556_v20  ;;  %v4670_v1 = vadd.f32 %v4669_v54, %v4668_v6  ;;  %v4559_v3 = vpop.f32.mrb[198].mxu1  ;;  %v4671_v45 = vpop.f32.mrb[198].mxu0 }
 0x284   : > { %v4560_v7 = vpop.f32.mrb[199].mxu1  ;;  %v4672_v56 = vpop.f32.mrb[199].mxu0 }
 0x285   : > { %v3113_v57 = vadd.f32 %v4558_v51, %v6327_v9  ;;  %v4561_v13 = vadd.f32 %v4560_v7, %v4559_v3  ;;  %v4673_v16 = vadd.f32 %v4672_v56, %v4671_v45 }
 0x287   : > { %v6505_v2 = vadd.f32 %v4670_v1, %v3113_v57  ;;  %v3116_v39 = vadd.f32 %v4561_v13, %v6336_v44 }
 0x289   : > { %v6508_v32 = vadd.f32 %v4673_v16, %v3116_v39  ;;  %v4562_v5 = vpop.f32.mrb[200].mxu1  ;;  %v4674_v8 = vpop.f32.mrb[200].mxu0 }
 0x28a   : > { %v4563_v23 = vpop.f32.mrb[201].mxu1  ;;  %v4675_v34 = vpop.f32.mrb[201].mxu0 }
 0x28b   : > { %v4564_v28 = vadd.f32 %v4563_v23, %v4562_v5  ;;  %v4676_v33 = vadd.f32 %v4675_v34, %v4674_v8  ;;  %v4565_v60 = vpop.f32.mrb[202].mxu1  ;;  %v4677_v14 = vpop.f32.mrb[202].mxu0 }
 0x28c   : > { %v4566_v35 = vpop.f32.mrb[203].mxu1  ;;  %v4678_v36 = vpop.f32.mrb[203].mxu0 }
 0x28d   : > { %v3121_v9 = vadd.f32 %v4564_v28, %v6341_v12  ;;  %v4567_v29 = vadd.f32 %v4566_v35, %v4565_v60  ;;  %v4679_v38 = vadd.f32 %v4678_v36, %v4677_v14 }
 0x28f   : > { %v6511_v63 = vadd.f32 %v4676_v33, %v3121_v9  ;;  %v3124_v44 = vadd.f32 %v4567_v29, %v6350_v50 }
 0x291   : > { %v6514_v40 = vadd.f32 %v4679_v38, %v3124_v44  ;;  %v4568_v61 = vpop.f32.mrb[204].mxu1  ;;  %v4680_v52 = vpop.f32.mrb[204].mxu0 }
 0x292   : > { %v4569_v20 = vpop.f32.mrb[205].mxu1  ;;  %v4681_v6 = vpop.f32.mrb[205].mxu0 }
 0x293   : > { %v4570_v27 = vadd.f32 %v4569_v20, %v4568_v61  ;;  %v4682_v54 = vadd.f32 %v4681_v6, %v4680_v52  ;;  %v4571_v51 = vpop.f32.mrb[206].mxu1  ;;  %v4683_v1 = vpop.f32.mrb[206].mxu0 }
 0x294   : > { %v4572_v3 = vpop.f32.mrb[207].mxu1  ;;  %v4684_v45 = vpop.f32.mrb[207].mxu0 }
 0x295   : > { %v3129_v12 = vadd.f32 %v4570_v27, %v6355_v17  ;;  %v4573_v7 = vadd.f32 %v4572_v3, %v4571_v51  ;;  %v4685_v56 = vadd.f32 %v4684_v45, %v4683_v1 }
 0x297   : > { %v6517_v57 = vadd.f32 %v4682_v54, %v3129_v12  ;;  %v3132_v50 = vadd.f32 %v4573_v7, %v6364_v4 }
 0x299   : > { %v6520_v13 = vadd.f32 %v4685_v56, %v3132_v50  ;;  %v4574_v16 = vpop.f32.mrb[208].mxu1  ;;  %v4686_v39 = vpop.f32.mrb[208].mxu0 }
 0x29a   : > { %v4575_v5 = vpop.f32.mrb[209].mxu1  ;;  %v4687_v8 = vpop.f32.mrb[209].mxu0 }
 0x29b   : > { %v4576_v23 = vadd.f32 %v4575_v5, %v4574_v16  ;;  %v4688_v34 = vadd.f32 %v4687_v8, %v4686_v39  ;;  %v4577_v28 = vpop.f32.mrb[210].mxu1  ;;  %v4689_v33 = vpop.f32.mrb[210].mxu0 }
 0x29c   : > { %v4578_v60 = vpop.f32.mrb[211].mxu1  ;;  %v4690_v14 = vpop.f32.mrb[211].mxu0 }
 0x29d   : > { %v3137_v17 = vadd.f32 %v4576_v23, %v6369_v49  ;;  %v4579_v35 = vadd.f32 %v4578_v60, %v4577_v28  ;;  %v4691_v36 = vadd.f32 %v4690_v14, %v4689_v33 }
 0x29f   : > { %v6523_v9 = vadd.f32 %v4688_v34, %v3137_v17  ;;  %v3140_v4 = vadd.f32 %v4579_v35, %v6378_v53 }
 0x2a1   : > { %v6526_v29 = vadd.f32 %v4691_v36, %v3140_v4  ;;  %v4580_v38 = vpop.f32.mrb[212].mxu1  ;;  %v4692_v44 = vpop.f32.mrb[212].mxu0 }
 0x2a2   : > { %v4581_v61 = vpop.f32.mrb[213].mxu1  ;;  %v4693_v52 = vpop.f32.mrb[213].mxu0 }
 0x2a3   : > { %v4582_v20 = vadd.f32 %v4581_v61, %v4580_v38  ;;  %v4694_v6 = vadd.f32 %v4693_v52, %v4692_v44  ;;  %v4583_v27 = vpop.f32.mrb[214].mxu1  ;;  %v4695_v54 = vpop.f32.mrb[214].mxu0 }
 0x2a4   : > { %v4584_v51 = vpop.f32.mrb[215].mxu1  ;;  %v4696_v1 = vpop.f32.mrb[215].mxu0 }
 0x2a5   : > { %v3145_v49 = vadd.f32 %v4582_v20, %v6383_v11  ;;  %v4585_v3 = vadd.f32 %v4584_v51, %v4583_v27  ;;  %v4697_v45 = vadd.f32 %v4696_v1, %v4695_v54 }
 0x2a7   : > { %v6529_v12 = vadd.f32 %v4694_v6, %v3145_v49  ;;  %v3148_v53 = vadd.f32 %v4585_v3, %v6392_v18 }
 0x2a9   : > { %v6532_v7 = vadd.f32 %v4697_v45, %v3148_v53  ;;  %v4586_v56 = vpop.f32.mrb[216].mxu1  ;;  %v4698_v50 = vpop.f32.mrb[216].mxu0 }
 0x2aa   : > { %v4587_v16 = vpop.f32.mrb[217].mxu1  ;;  %v4699_v39 = vpop.f32.mrb[217].mxu0 }
 0x2ab   : > { %v4588_v5 = vadd.f32 %v4587_v16, %v4586_v56  ;;  %v4700_v8 = vadd.f32 %v4699_v39, %v4698_v50  ;;  %v4589_v23 = vpop.f32.mrb[218].mxu1  ;;  %v4701_v34 = vpop.f32.mrb[218].mxu0 }
 0x2ac   : > { %v4590_v28 = vpop.f32.mrb[219].mxu1  ;;  %v4702_v33 = vpop.f32.mrb[219].mxu0 }
 0x2ad   : > { %v3153_v11 = vadd.f32 %v4588_v5, %v6397_v41  ;;  %v4591_v60 = vadd.f32 %v4590_v28, %v4589_v23  ;;  %v4703_v14 = vadd.f32 %v4702_v33, %v4701_v34 }
 0x2af   : > { %v6535_v17 = vadd.f32 %v4700_v8, %v3153_v11  ;;  %v3156_v18 = vadd.f32 %v4591_v60, %v6406_v48 }
 0x2b1   : > { %v6538_v35 = vadd.f32 %v4703_v14, %v3156_v18  ;;  %v4592_v36 = vpop.f32.mrb[220].mxu1  ;;  %v4704_v4 = vpop.f32.mrb[220].mxu0 }
 0x2b2   : > { %v4593_v38 = vpop.f32.mrb[221].mxu1  ;;  %v4705_v44 = vpop.f32.mrb[221].mxu0 }
 0x2b3   : > { %v4594_v61 = vadd.f32 %v4593_v38, %v4592_v36  ;;  %v4706_v52 = vadd.f32 %v4705_v44, %v4704_v4  ;;  %v4595_v20 = vpop.f32.mrb[222].mxu1  ;;  %v4707_v6 = vpop.f32.mrb[222].mxu0 }
 0x2b4   : > { %v4596_v27 = vpop.f32.mrb[223].mxu1  ;;  %v4708_v54 = vpop.f32.mrb[223].mxu0 }
 0x2b5   : > { %v3161_v41 = vadd.f32 %v4594_v61, %v6411_v10  ;;  %v4597_v51 = vadd.f32 %v4596_v27, %v4595_v20  ;;  %v4709_v1 = vadd.f32 %v4708_v54, %v4707_v6 }
 0x2b7   : > { %v6541_v49 = vadd.f32 %v4706_v52, %v3161_v41  ;;  %v3164_v48 = vadd.f32 %v4597_v51, %v6420_v19 }
 0x2b9   : > { %v6544_v3 = vadd.f32 %v4709_v1, %v3164_v48  ;;  %v4726_v45 = vpop.f32.mrb[224].mxu1  ;;  %v4838_v53 = vpop.f32.mrb[224].mxu0 }
 0x2ba   : > { %v4727_v56 = vpop.f32.mrb[225].mxu1  ;;  %v4839_v50 = vpop.f32.mrb[225].mxu0 }
 0x2bb   : > { %v4728_v16 = vadd.f32 %v4727_v56, %v4726_v45  ;;  %v4840_v39 = vadd.f32 %v4839_v50, %v4838_v53  ;;  %v4729_v5 = vpop.f32.mrb[226].mxu1  ;;  %v4841_v8 = vpop.f32.mrb[226].mxu0 }
 0x2bc   : > { %v4730_v23 = vpop.f32.mrb[227].mxu1  ;;  %v4842_v34 = vpop.f32.mrb[227].mxu0 }
 0x2bd   : > { %v3363_v10 = vadd.f32 %v4728_v16, %v6425_v46  ;;  %v4731_v28 = vadd.f32 %v4730_v23, %v4729_v5  ;;  %v4843_v33 = vadd.f32 %v4842_v34, %v4841_v8 }
 0x2bf   : > { %v3524_v11 = vadd.f32 %v4840_v39, %v3363_v10  ;;  %v3366_v19 = vadd.f32 %v4731_v28, %v6434_v55 }
 0x2c1   : > { %v3650_v60 = vmax.f32 %v3524_v11, 0.0  ;;  %v3527_v14 = vadd.f32 %v4843_v33, %v3366_v19  ;;  %v4732_v18 = vpop.f32.mrb[228].mxu1  ;;  %v4844_v36 = vpop.f32.mrb[228].mxu0 }
 0x2c2   : > { %v4733_v4 = vpop.f32.mrb[229].mxu1  ;;  %v4845_v38 = vpop.f32.mrb[229].mxu0 }
 0x2c3   : > { %3682 = vst [vmem:[%s6552_s24] sm:$0xff] %v3650_v60  ;;  %v3651_v46 = vmax.f32 %v3527_v14, 0.0  ;;  %v4734_v44 = vadd.f32 %v4733_v4, %v4732_v18  ;;  %v4846_v61 = vadd.f32 %v4845_v38, %v4844_v36  ;;  %v4735_v52 = vpop.f32.mrb[230].mxu1  ;;  %v4847_v55 = vpop.f32.mrb[230].mxu0 }
 0x2c4   : > { %v4736_v20 = vpop.f32.mrb[231].mxu1  ;;  %v4848_v6 = vpop.f32.mrb[231].mxu0 }
 0x2c5   : > { %3683 = vst [vmem:[%s6552_s24 + $0x8] sm:$0xff] %v3651_v46  ;;  %v3371_v27 = vadd.f32 %v4734_v44, %v6439_v22  ;;  %v4737_v54 = vadd.f32 %v4736_v20, %v4735_v52  ;;  %v4849_v41 = vadd.f32 %v4848_v6, %v4847_v55 }
 0x2c7   : > { %v3532_v51 = vadd.f32 %v4846_v61, %v3371_v27  ;;  %v3374_v1 = vadd.f32 %v4737_v54, %v6448_v31 }
 0x2c9   : > { %v3652_v48 = vmax.f32 %v3532_v51, 0.0  ;;  %v3535_v45 = vadd.f32 %v4849_v41, %v3374_v1  ;;  %v4738_v53 = vpop.f32.mrb[232].mxu1  ;;  %v4850_v56 = vpop.f32.mrb[232].mxu0 }
 0x2ca   : > { %v4739_v50 = vpop.f32.mrb[233].mxu1  ;;  %v4851_v16 = vpop.f32.mrb[233].mxu0 }
 0x2cb   : > { %3684 = vst [vmem:[%s6552_s24 + $0x10] sm:$0xff] %v3652_v48  ;;  %v3653_v39 = vmax.f32 %v3535_v45, 0.0  ;;  %v4740_v5 = vadd.f32 %v4739_v50, %v4738_v53  ;;  %v4852_v8 = vadd.f32 %v4851_v16, %v4850_v56  ;;  %v4741_v23 = vpop.f32.mrb[234].mxu1  ;;  %v4853_v34 = vpop.f32.mrb[234].mxu0 }
 0x2cc   : > { %v4742_v22 = vpop.f32.mrb[235].mxu1  ;;  %v4854_v10 = vpop.f32.mrb[235].mxu0 }
 0x2cd   : > { %3685 = vst [vmem:[%s6552_s24 + $0x18] sm:$0xff] %v3653_v39  ;;  %v3379_v28 = vadd.f32 %v4740_v5, %v6453_v0  ;;  %v4743_v33 = vadd.f32 %v4742_v22, %v4741_v23  ;;  %v4855_v31 = vadd.f32 %v4854_v10, %v4853_v34 }
 0x2cf   : > { %v3540_v11 = vadd.f32 %v4852_v8, %v3379_v28  ;;  %v3382_v19 = vadd.f32 %v4743_v33, %v6462_v15 }
 0x2d1   : > { %v3654_v60 = vmax.f32 %v3540_v11, 0.0  ;;  %v3543_v14 = vadd.f32 %v4855_v31, %v3382_v19  ;;  %v4744_v18 = vpop.f32.mrb[236].mxu1  ;;  %v4856_v36 = vpop.f32.mrb[236].mxu0 }
 0x2d2   : > { %v4745_v4 = vpop.f32.mrb[237].mxu1  ;;  %v4857_v38 = vpop.f32.mrb[237].mxu0 }
 0x2d3   : > { %3686 = vst [vmem:[%s6552_s24 + $0x20] sm:$0xff] %v3654_v60  ;;  %v3655_v46 = vmax.f32 %v3543_v14, 0.0  ;;  %v4746_v44 = vadd.f32 %v4745_v4, %v4744_v18  ;;  %v4858_v61 = vadd.f32 %v4857_v38, %v4856_v36  ;;  %v4747_v52 = vpop.f32.mrb[238].mxu1  ;;  %v4859_v55 = vpop.f32.mrb[238].mxu0 }
 0x2d4   : > { %v4748_v0 = vpop.f32.mrb[239].mxu1  ;;  %v4860_v20 = vpop.f32.mrb[239].mxu0 }
 0x2d5   : > { %3687 = vst [vmem:[%s6552_s24 + $0x28] sm:$0xff] %v3655_v46  ;;  %v3387_v6 = vadd.f32 %v4746_v44, %v6466_v21  ;;  %v4749_v27 = vadd.f32 %v4748_v0, %v4747_v52  ;;  %v4861_v15 = vadd.f32 %v4860_v20, %v4859_v55 }
 0x2d7   : > { %v3548_v54 = vadd.f32 %v4858_v61, %v3387_v6  ;;  %v3390_v41 = vadd.f32 %v4749_v27, %v6472_v26 }
 0x2d9   : > { %v3656_v51 = vmax.f32 %v3548_v54, 0.0  ;;  %v3551_v1 = vadd.f32 %v4861_v15, %v3390_v41  ;;  %v4750_v48 = vpop.f32.mrb[240].mxu1  ;;  %v4862_v45 = vpop.f32.mrb[240].mxu0 }
 0x2da   : > { %v4751_v53 = vpop.f32.mrb[241].mxu1  ;;  %v4863_v56 = vpop.f32.mrb[241].mxu0 }
 0x2db   : > { %3688 = vst [vmem:[%s6552_s24 + $0x30] sm:$0xff] %v3656_v51  ;;  %v3657_v50 = vmax.f32 %v3551_v1, 0.0  ;;  %v4752_v16 = vadd.f32 %v4751_v53, %v4750_v48  ;;  %v4864_v39 = vadd.f32 %v4863_v56, %v4862_v45  ;;  %v4753_v5 = vpop.f32.mrb[242].mxu1  ;;  %v4865_v8 = vpop.f32.mrb[242].mxu0 }
 0x2dc   : > { %v4754_v21 = vpop.f32.mrb[243].mxu1  ;;  %v4866_v23 = vpop.f32.mrb[243].mxu0 }
 0x2dd   : > { %3689 = vst [vmem:[%s6552_s24 + $0x38] sm:$0xff] %v3657_v50  ;;  %v3395_v34 = vadd.f32 %v4752_v16, %v6475_v37  ;;  %v4755_v22 = vadd.f32 %v4754_v21, %v4753_v5  ;;  %v4867_v26 = vadd.f32 %v4866_v23, %v4865_v8 }
 0x2df   : > { %v3556_v10 = vadd.f32 %v4864_v39, %v3395_v34  ;;  %v3398_v28 = vadd.f32 %v4755_v22, %v6478_v58 }
 0x2e1   : > { %v3658_v33 = vmax.f32 %v3556_v10, 0.0  ;;  %v3559_v31 = vadd.f32 %v4867_v26, %v3398_v28  ;;  %v4756_v11 = vpop.f32.mrb[244].mxu1  ;;  %v4868_v19 = vpop.f32.mrb[244].mxu0 }
 0x2e2   : > { %v4757_v60 = vpop.f32.mrb[245].mxu1  ;;  %v4869_v14 = vpop.f32.mrb[245].mxu0 }
 0x2e3   : > { %3690 = vst [vmem:[%s6552_s24 + $0x40] sm:$0xff] %v3658_v33  ;;  %v3659_v18 = vmax.f32 %v3559_v31, 0.0  ;;  %v4758_v36 = vadd.f32 %v4757_v60, %v4756_v11  ;;  %v4870_v4 = vadd.f32 %v4869_v14, %v4868_v19  ;;  %v4759_v38 = vpop.f32.mrb[246].mxu1  ;;  %v4871_v46 = vpop.f32.mrb[246].mxu0 }
 0x2e4   : > { %v4760_v37 = vpop.f32.mrb[247].mxu1  ;;  %v4872_v44 = vpop.f32.mrb[247].mxu0 }
 0x2e5   : > { %3691 = vst [vmem:[%s6552_s24 + $0x48] sm:$0xff] %v3659_v18  ;;  %v3403_v61 = vadd.f32 %v4758_v36, %v6481_v24  ;;  %v4761_v52 = vadd.f32 %v4760_v37, %v4759_v38  ;;  %v4873_v58 = vadd.f32 %v4872_v44, %v4871_v46 }
 0x2e7   : > { %v3564_v55 = vadd.f32 %v4870_v4, %v3403_v61  ;;  %v3406_v0 = vadd.f32 %v4761_v52, %v6484_v25 }
 0x2e9   : > { %v3660_v20 = vmax.f32 %v3564_v55, 0.0  ;;  %v3567_v6 = vadd.f32 %v4873_v58, %v3406_v0  ;;  %v4762_v27 = vpop.f32.mrb[248].mxu1  ;;  %v4874_v15 = vpop.f32.mrb[248].mxu0 }
 0x2ea   : > { %v4763_v54 = vpop.f32.mrb[249].mxu1  ;;  %v4875_v41 = vpop.f32.mrb[249].mxu0 }
 0x2eb   : > { %3692 = vst [vmem:[%s6552_s24 + $0x50] sm:$0xff] %v3660_v20  ;;  %v3661_v51 = vmax.f32 %v3567_v6, 0.0  ;;  %v4764_v1 = vadd.f32 %v4763_v54, %v4762_v27  ;;  %v4876_v48 = vadd.f32 %v4875_v41, %v4874_v15  ;;  %v4765_v45 = vpop.f32.mrb[250].mxu1  ;;  %v4877_v53 = vpop.f32.mrb[250].mxu0 }
 0x2ec   : > { %v4766_v24 = vpop.f32.mrb[251].mxu1  ;;  %v4878_v56 = vpop.f32.mrb[251].mxu0 }
 0x2ed   : > { %3693 = vst [vmem:[%s6552_s24 + $0x58] sm:$0xff] %v3661_v51  ;;  %v3411_v50 = vadd.f32 %v4764_v1, %v6487_v42  ;;  %v4767_v16 = vadd.f32 %v4766_v24, %v4765_v45  ;;  %v4879_v25 = vadd.f32 %v4878_v56, %v4877_v53 }
 0x2ef   : > { %v3572_v39 = vadd.f32 %v4876_v48, %v3411_v50  ;;  %v3414_v5 = vadd.f32 %v4767_v16, %v6490_v47 }
 0x2f1   : > { %v3662_v8 = vmax.f32 %v3572_v39, 0.0  ;;  %v3575_v21 = vadd.f32 %v4879_v25, %v3414_v5  ;;  %v4768_v23 = vpop.f32.mrb[252].mxu1  ;;  %v4880_v34 = vpop.f32.mrb[252].mxu0 }
 0x2f2   : > { %v4769_v22 = vpop.f32.mrb[253].mxu1  ;;  %v4881_v26 = vpop.f32.mrb[253].mxu0 }
 0x2f3   : > { %3694 = vst [vmem:[%s6552_s24 + $0x60] sm:$0xff] %v3662_v8  ;;  %v3663_v10 = vmax.f32 %v3575_v21, 0.0  ;;  %v4770_v28 = vadd.f32 %v4769_v22, %v4768_v23  ;;  %v4882_v33 = vadd.f32 %v4881_v26, %v4880_v34  ;;  %v4771_v31 = vpop.f32.mrb[254].mxu1  ;;  %v4883_v11 = vpop.f32.mrb[254].mxu0 }
 0x2f4   : > { %v4772_v42 = vpop.f32.mrb[255].mxu1  ;;  %v4884_v19 = vpop.f32.mrb[255].mxu0 }
 0x2f5   : > { %3695 = vst [vmem:[%s6552_s24 + $0x68] sm:$0xff] %v3663_v10  ;;  %v3419_v60 = vadd.f32 %v4770_v28, %v6493_v30  ;;  %v4773_v14 = vadd.f32 %v4772_v42, %v4771_v31  ;;  %v4885_v47 = vadd.f32 %v4884_v19, %v4883_v11 }
 0x2f7   : > { %v3580_v18 = vadd.f32 %v4882_v33, %v3419_v60  ;;  %v3422_v36 = vadd.f32 %v4773_v14, %v6496_v59 }
 0x2f9   : > { %v3664_v4 = vmax.f32 %v3580_v18, 0.0  ;;  %v3583_v38 = vadd.f32 %v4885_v47, %v3422_v36  ;;  %v4774_v46 = vpop.f32.mrb[0].mxu1  ;;  %v4886_v37 = vpop.f32.mrb[0].mxu0 }
 0x2fa   : > { %v4775_v44 = vpop.f32.mrb[1].mxu1  ;;  %v4887_v61 = vpop.f32.mrb[1].mxu0 }
 0x2fb   : > { %3696 = vst [vmem:[%s6552_s24 + $0x70] sm:$0xff] %v3664_v4  ;;  %v3665_v52 = vmax.f32 %v3583_v38, 0.0  ;;  %v4776_v58 = vadd.f32 %v4775_v44, %v4774_v46  ;;  %v4888_v55 = vadd.f32 %v4887_v61, %v4886_v37  ;;  %v4777_v0 = vpop.f32.mrb[2].mxu1  ;;  %v4889_v20 = vpop.f32.mrb[2].mxu0 }
 0x2fc   : > { %v4778_v30 = vpop.f32.mrb[3].mxu1  ;;  %v4890_v6 = vpop.f32.mrb[3].mxu0 }
 0x2fd   : > { %3697 = vst [vmem:[%s6552_s24 + $0x78] sm:$0xff] %v3665_v52  ;;  %v3427_v27 = vadd.f32 %v4776_v58, %v6499_v62  ;;  %v4779_v15 = vadd.f32 %v4778_v30, %v4777_v0  ;;  %v4891_v59 = vadd.f32 %v4890_v6, %v4889_v20 }
 0x2ff   : > { %v3588_v54 = vadd.f32 %v4888_v55, %v3427_v27  ;;  %v3430_v41 = vadd.f32 %v4779_v15, %v6502_v43 }
 0x301   : > { %v3666_v51 = vmax.f32 %v3588_v54, 0.0  ;;  %v3591_v1 = vadd.f32 %v4891_v59, %v3430_v41  ;;  %v4780_v48 = vpop.f32.mrb[4].mxu1  ;;  %v4892_v45 = vpop.f32.mrb[4].mxu0 }
 0x302   : > { %v4781_v53 = vpop.f32.mrb[5].mxu1  ;;  %v4893_v24 = vpop.f32.mrb[5].mxu0 }
 0x303   : > { %3698 = vst [vmem:[%s6552_s24 + $0x80] sm:$0xff] %v3666_v51  ;;  %v3667_v56 = vmax.f32 %v3591_v1, 0.0  ;;  %v4782_v50 = vadd.f32 %v4781_v53, %v4780_v48  ;;  %v4894_v16 = vadd.f32 %v4893_v24, %v4892_v45  ;;  %v4783_v25 = vpop.f32.mrb[6].mxu1  ;;  %v4895_v39 = vpop.f32.mrb[6].mxu0 }
 0x304   : > { %v4784_v62 = vpop.f32.mrb[7].mxu1  ;;  %v4896_v5 = vpop.f32.mrb[7].mxu0 }
 0x305   : > { %3699 = vst [vmem:[%s6552_s24 + $0x88] sm:$0xff] %v3667_v56  ;;  %v3435_v8 = vadd.f32 %v4782_v50, %v6505_v2  ;;  %v4785_v21 = vadd.f32 %v4784_v62, %v4783_v25  ;;  %v4897_v43 = vadd.f32 %v4896_v5, %v4895_v39 }
 0x307   : > { %v3596_v23 = vadd.f32 %v4894_v16, %v3435_v8  ;;  %v3438_v34 = vadd.f32 %v4785_v21, %v6508_v32 }
 0x309   : > { %v3668_v22 = vmax.f32 %v3596_v23, 0.0  ;;  %v3599_v26 = vadd.f32 %v4897_v43, %v3438_v34  ;;  %v4786_v10 = vpop.f32.mrb[8].mxu1  ;;  %v4898_v28 = vpop.f32.mrb[8].mxu0 }
 0x30a   : > { %v4787_v33 = vpop.f32.mrb[9].mxu1  ;;  %v4899_v31 = vpop.f32.mrb[9].mxu0 }
 0x30b   : > { %3700 = vst [vmem:[%s6552_s24 + $0x90] sm:$0xff] %v3668_v22  ;;  %v3669_v11 = vmax.f32 %v3599_v26, 0.0  ;;  %v4788_v42 = vadd.f32 %v4787_v33, %v4786_v10  ;;  %v4900_v19 = vadd.f32 %v4899_v31, %v4898_v28  ;;  %v4789_v60 = vpop.f32.mrb[10].mxu1  ;;  %v4901_v14 = vpop.f32.mrb[10].mxu0 }
 0x30c   : > { %v4790_v2 = vpop.f32.mrb[11].mxu1  ;;  %v4902_v47 = vpop.f32.mrb[11].mxu0 }
 0x30d   : > { %3701 = vst [vmem:[%s6552_s24 + $0x98] sm:$0xff] %v3669_v11  ;;  %v3443_v18 = vadd.f32 %v4788_v42, %v6511_v63  ;;  %v4791_v36 = vadd.f32 %v4790_v2, %v4789_v60  ;;  %v4903_v32 = vadd.f32 %v4902_v47, %v4901_v14 }
 0x30f   : > { %v3604_v4 = vadd.f32 %v4900_v19, %v3443_v18  ;;  %v3446_v38 = vadd.f32 %v4791_v36, %v6514_v40 }
 0x311   : > { %v3670_v46 = vmax.f32 %v3604_v4, 0.0  ;;  %v3607_v37 = vadd.f32 %v4903_v32, %v3446_v38  ;;  %v4792_v44 = vpop.f32.mrb[12].mxu1  ;;  %v4904_v61 = vpop.f32.mrb[12].mxu0 }
 0x312   : > { %v4793_v52 = vpop.f32.mrb[13].mxu1  ;;  %v4905_v58 = vpop.f32.mrb[13].mxu0 }
 0x313   : > { %3702 = vst [vmem:[%s6552_s24 + $0xa0] sm:$0xff] %v3670_v46  ;;  %v3671_v55 = vmax.f32 %v3607_v37, 0.0  ;;  %v4794_v0 = vadd.f32 %v4793_v52, %v4792_v44  ;;  %v4906_v20 = vadd.f32 %v4905_v58, %v4904_v61  ;;  %v4795_v30 = vpop.f32.mrb[14].mxu1  ;;  %v4907_v6 = vpop.f32.mrb[14].mxu0 }
 0x314   : > { %v4796_v63 = vpop.f32.mrb[15].mxu1  ;;  %v4908_v27 = vpop.f32.mrb[15].mxu0 }
 0x315   : > { %3703 = vst [vmem:[%s6552_s24 + $0xa8] sm:$0xff] %v3671_v55  ;;  %v3451_v15 = vadd.f32 %v4794_v0, %v6517_v57  ;;  %v4797_v59 = vadd.f32 %v4796_v63, %v4795_v30  ;;  %v4909_v40 = vadd.f32 %v4908_v27, %v4907_v6 }
 0x317   : > { %v3612_v54 = vadd.f32 %v4906_v20, %v3451_v15  ;;  %v3454_v41 = vadd.f32 %v4797_v59, %v6520_v13 }
 0x319   : > { %v3672_v51 = vmax.f32 %v3612_v54, 0.0  ;;  %v3615_v1 = vadd.f32 %v4909_v40, %v3454_v41  ;;  %v4798_v48 = vpop.f32.mrb[16].mxu1  ;;  %v4910_v45 = vpop.f32.mrb[16].mxu0 }
 0x31a   : > { %v4799_v53 = vpop.f32.mrb[17].mxu1  ;;  %v4911_v24 = vpop.f32.mrb[17].mxu0 }
 0x31b   : > { %3704 = vst [vmem:[%s6552_s24 + $0xb0] sm:$0xff] %v3672_v51  ;;  %v3673_v56 = vmax.f32 %v3615_v1, 0.0  ;;  %v4800_v50 = vadd.f32 %v4799_v53, %v4798_v48  ;;  %v4912_v16 = vadd.f32 %v4911_v24, %v4910_v45  ;;  %v4801_v25 = vpop.f32.mrb[18].mxu1  ;;  %v4913_v39 = vpop.f32.mrb[18].mxu0 }
 0x31c   : > { %v4802_v57 = vpop.f32.mrb[19].mxu1  ;;  %v4914_v62 = vpop.f32.mrb[19].mxu0 }
 0x31d   : > { %3705 = vst [vmem:[%s6552_s24 + $0xb8] sm:$0xff] %v3673_v56  ;;  %v3459_v5 = vadd.f32 %v4800_v50, %v6523_v9  ;;  %v4803_v8 = vadd.f32 %v4802_v57, %v4801_v25  ;;  %v4915_v13 = vadd.f32 %v4914_v62, %v4913_v39 }
 0x31f   : > { %v3620_v21 = vadd.f32 %v4912_v16, %v3459_v5  ;;  %v3462_v43 = vadd.f32 %v4803_v8, %v6526_v29 }
 0x321   : > { %v3674_v23 = vmax.f32 %v3620_v21, 0.0  ;;  %v3623_v34 = vadd.f32 %v4915_v13, %v3462_v43  ;;  %v4804_v22 = vpop.f32.mrb[20].mxu1  ;;  %v4916_v26 = vpop.f32.mrb[20].mxu0 }
 0x322   : > { %v4805_v10 = vpop.f32.mrb[21].mxu1  ;;  %v4917_v28 = vpop.f32.mrb[21].mxu0 }
 0x323   : > { %3706 = vst [vmem:[%s6552_s24 + $0xc0] sm:$0xff] %v3674_v23  ;;  %v3675_v33 = vmax.f32 %v3623_v34, 0.0  ;;  %v4806_v31 = vadd.f32 %v4805_v10, %v4804_v22  ;;  %v4918_v11 = vadd.f32 %v4917_v28, %v4916_v26  ;;  %v4807_v42 = vpop.f32.mrb[22].mxu1  ;;  %v4919_v19 = vpop.f32.mrb[22].mxu0 }
 0x324   : > { %v4808_v9 = vpop.f32.mrb[23].mxu1  ;;  %v4920_v60 = vpop.f32.mrb[23].mxu0 }
 0x325   : > { %3707 = vst [vmem:[%s6552_s24 + $0xc8] sm:$0xff] %v3675_v33  ;;  %v3467_v14 = vadd.f32 %v4806_v31, %v6529_v12  ;;  %v4809_v2 = vadd.f32 %v4808_v9, %v4807_v42  ;;  %v4921_v29 = vadd.f32 %v4920_v60, %v4919_v19 }
 0x327   : > { %v3628_v47 = vadd.f32 %v4918_v11, %v3467_v14  ;;  %v3470_v18 = vadd.f32 %v4809_v2, %v6532_v7 }
 0x329   : > { %v3676_v36 = vmax.f32 %v3628_v47, 0.0  ;;  %v3631_v32 = vadd.f32 %v4921_v29, %v3470_v18  ;;  %v4810_v4 = vpop.f32.mrb[24].mxu1  ;;  %v4922_v38 = vpop.f32.mrb[24].mxu0 }
 0x32a   : > { %v4811_v46 = vpop.f32.mrb[25].mxu1  ;;  %v4923_v37 = vpop.f32.mrb[25].mxu0 }
 0x32b   : > { %3708 = vst [vmem:[%s6552_s24 + $0xd0] sm:$0xff] %v3676_v36  ;;  %v3677_v44 = vmax.f32 %v3631_v32, 0.0  ;;  %v4812_v61 = vadd.f32 %v4811_v46, %v4810_v4  ;;  %v4924_v52 = vadd.f32 %v4923_v37, %v4922_v38  ;;  %v4813_v58 = vpop.f32.mrb[26].mxu1  ;;  %v4925_v55 = vpop.f32.mrb[26].mxu0 }
 0x32c   : > { %v4814_v12 = vpop.f32.mrb[27].mxu1  ;;  %v4926_v0 = vpop.f32.mrb[27].mxu0 }
 0x32d   : > { %3709 = vst [vmem:[%s6552_s24 + $0xd8] sm:$0xff] %v3677_v44  ;;  %v3475_v20 = vadd.f32 %v4812_v61, %v6535_v17  ;;  %v4815_v30 = vadd.f32 %v4814_v12, %v4813_v58  ;;  %v4927_v7 = vadd.f32 %v4926_v0, %v4925_v55 }
 0x32f   : > { %v3636_v6 = vadd.f32 %v4924_v52, %v3475_v20  ;;  %v3478_v63 = vadd.f32 %v4815_v30, %v6538_v35 }
 0x331   : > { %v3678_v27 = vmax.f32 %v3636_v6, 0.0  ;;  %v3639_v15 = vadd.f32 %v4927_v7, %v3478_v63  ;;  %v4816_v59 = vpop.f32.mrb[28].mxu1  ;;  %v4928_v40 = vpop.f32.mrb[28].mxu0 }
 0x332   : > { %v4817_v54 = vpop.f32.mrb[29].mxu1  ;;  %v4929_v41 = vpop.f32.mrb[29].mxu0 }
 0x333   : > { %3710 = vst [vmem:[%s6552_s24 + $0xe0] sm:$0xff] %v3678_v27  ;;  %v3679_v51 = vmax.f32 %v3639_v15, 0.0  ;;  %v4818_v1 = vadd.f32 %v4817_v54, %v4816_v59  ;;  %v4930_v48 = vadd.f32 %v4929_v41, %v4928_v40  ;;  %v4819_v45 = vpop.f32.mrb[30].mxu1  ;;  %v4931_v17 = vpop.f32.mrb[30].mxu0 }
 0x334   : > { %v4820_v53 = vpop.f32.mrb[31].mxu1  ;;  %v4932_v24 = vpop.f32.mrb[31].mxu0 }
 0x335   : > { %3711 = vst [vmem:[%s6552_s24 + $0xe8] sm:$0xff] %v3679_v51  ;;  %v3483_v56 = vadd.f32 %v4818_v1, %v6541_v49  ;;  %v4821_v35 = vadd.f32 %v4820_v53, %v4819_v45  ;;  %v4933_v50 = vadd.f32 %v4932_v24, %v4931_v17 }
 0x337   : > { %v3644_v16 = vadd.f32 %v4930_v48, %v3483_v56  ;;  %v3486_v25 = vadd.f32 %v4821_v35, %v6544_v3 }
 0x339   : > { %v3680_v39 = vmax.f32 %v3644_v16, 0.0  ;;  %v3647_v57 = vadd.f32 %v4933_v50, %v3486_v25 }
 0x33b   : > { %3712 = vst [vmem:[%s6552_s24 + $0xf0] sm:$0xff] %v3680_v39  ;;  %v3681_v62 = vmax.f32 %v3647_v57, 0.0 }
 0x33d   : > { %3713 = vst [vmem:[%s6552_s24 + $0xf8] sm:$0xff] %v3681_v62 }
 0x33e PF: > { %s13_s12 = sadd.s32 1, %s5110_s12  }
 0x33f   : > { %p10_p4 = scmp.ge.s32.totalorder %s13_s12, 4  }
 0x341   :  { %12 = sbr.rel (!%p10_p4) target bundleno = 1 (0x1), region = 62 }

// kernel: ssd_head_forward.16
= control target key start
LH: loop header
LB: loop body
LE: loop exit
PB: predicated region body
PF: predicated region fallthrough
CT: control target
= control target key end

     0   :  { %s271_s1 = inlined_call_operand.vmem [shape: bf16[128,128], index: 1, kind: input, shape index: {}]   ;;  %s272_s0 = inlined_call_operand.vmem [shape: f32[32,128], index: 0, kind: input, shape index: {}]   ;;  %s273_s2 = inlined_call_operand.vmem [shape: f32[1,128], index: 2, kind: input, shape index: {}]   ;;  %s274_s3 = inlined_call_operand.vmem [shape: f32[32,128], index: 3, kind: output, shape index: {}]  }
   0x1   :  { %v192_v0 = vld [vmem:[%s271_s1] sm:$0xff]   ;;  %v193_v1 = vld [vmem:[%s271_s1 + $0x8] sm:$0xff]   ;;  %v194_v2 = vld [vmem:[%s271_s1 + $0x10] sm:$0xff]  }
   0x2   :  { %172 = vmatprep.subr.bf16.mxu0 %v192_v0  ;;  %v195_v3 = vld [vmem:[%s271_s1 + $0x18] sm:$0xff]   ;;  %v15_v4 = vld [vmem:[%s272_s0] sm:$0xff]  ;;  %v16_v5 = vld [vmem:[%s272_s0 + $0x8] sm:$0xff] }
   0x3   :  { %173 = vmatpush3.bf16.msra.mxu0 %v192_v0  ;;  %v19_v6 = vpack.c.bf16 %v16_v5, %v15_v4  ;;  %v196_v7 = vld [vmem:[%s271_s1 + $0x20] sm:$0xff]   ;;  %v197_v8 = vld [vmem:[%s271_s1 + $0x28] sm:$0xff]   ;;  %v198_v9 = vld [vmem:[%s271_s1 + $0x30] sm:$0xff]  }
   0x4   :  { %174 = vmatprep.subr.bf16.mxu0 %v193_v1  ;;  %v199_v10 = vld [vmem:[%s271_s1 + $0x38] sm:$0xff]   ;;  %v17_v11 = vld [vmem:[%s272_s0 + $0x10] sm:$0xff]  ;;  %v153_v14 = vld [vmem:[%s273_s2] ss:$0 sm:$0xff] }
   0x5   :  { %188 = vmatprep.mubr.bf16.mxu0 %v19_v6  ;;  %v18_v12 = vld [vmem:[%s272_s0 + $0x18] sm:$0xff] }
   0x6   :  { %v20_v13 = vpack.c.bf16 %v18_v12, %v17_v11 }
   0x7   :  { %175 = vmatpush3.bf16.msra.mxu0 %v193_v1 }
   0x8   :  { %176 = vmatprep.subr.bf16.mxu0 %v194_v2 }
   0xb   :  { %177 = vmatpush3.bf16.msra.mxu0 %v194_v2 }
   0xc   :  { %178 = vmatprep.subr.bf16.mxu0 %v195_v3 }
   0xf   :  { %179 = vmatpush3.bf16.msra.mxu0 %v195_v3 }
  0x10   :  { %180 = vmatprep.subr.bf16.mxu0 %v196_v7 }
  0x13   :  { %181 = vmatpush3.bf16.msra.mxu0 %v196_v7 }
  0x14   :  { %182 = vmatprep.subr.bf16.mxu0 %v197_v8 }
  0x17   :  { %183 = vmatpush3.bf16.msra.mxu0 %v197_v8 }
  0x18   :  { %184 = vmatprep.subr.bf16.mxu0 %v198_v9 }
  0x1b   :  { %185 = vmatpush3.bf16.msra.mxu0 %v198_v9 }
  0x1c   :  { %186 = vmatprep.subr.bf16.mxu0 %v199_v10 }
  0x1f   :  { %187 = vmatpush3.bf16.msra.mxu0 %v199_v10 }
  0x22   :  { %189 = vmatmul.mubr.bf16.vlgmr.msra.gmra.mrb[0].mxu0 %v20_v13 }
  0xf5   :  { %v190_v15 = vpop.f32.mrb[0].mxu0 }
  0xf6   :  { %v135_v16 = vadd.f32 %v190_v15, %v153_v14  ;;  %v126_v17 = vpop.f32.mrb[1].mxu0 }
  0xf7   :  { %v127_v18 = vadd.f32 %v153_v14, %v126_v17  ;;  %v191_v19 = vpop.f32.mrb[2].mxu0 }
  0xf8   :  { %v143_v20 = vmax.f32 %v135_v16, 0.0  ;;  %v138_v21 = vadd.f32 %v191_v19, %v153_v14  ;;  %v129_v22 = vpop.f32.mrb[3].mxu0 }
  0xf9   :  { %v141_v23 = vmax.f32 %v127_v18, 0.0  ;;  %v130_v24 = vadd.f32 %v153_v14, %v129_v22 }
  0xfa   :  { %147 = vst [vmem:[%s274_s3 + $0x10] sm:$0xff] %v143_v20  ;;  %v144_v25 = vmax.f32 %v138_v21, 0.0 }
  0xfb   :  { %145 = vst [vmem:[%s274_s3] sm:$0xff] %v141_v23  ;;  %v142_v26 = vmax.f32 %v130_v24, 0.0 }
  0xfc   :  { %148 = vst [vmem:[%s274_s3 + $0x18] sm:$0xff] %v144_v25 }
  0xfd   :  { %146 = vst [vmem:[%s274_s3 + $0x8] sm:$0xff] %v142_v26 }

// kernel: ssd_head_forward.15
= control target key start
LH: loop header
LB: loop body
LE: loop exit
PB: predicated region body
PF: predicated region fallthrough
CT: control target
= control target key end

     0   :  { %s1555_s1 = inlined_call_operand.vmem [shape: bf16[1152,128], index: 1, kind: input, shape index: {}]   ;;  %s1556_s0 = inlined_call_operand.vmem [shape: f32[32,1152], index: 0, kind: input, shape index: {}]   ;;  %s1557_s2 = inlined_call_operand.vmem [shape: f32[1,128], index: 2, kind: input, shape index: {}]   ;;  %s1558_s3 = inlined_call_operand.vmem [shape: f32[32,128], index: 3, kind: output, shape index: {}]  }
   0x1   :  { %v1124_v0 = vld [vmem:[%s1555_s1 + $0x40] sm:$0xff]   ;;  %v1128_v4 = vld [vmem:[%s1555_s1 + $0x48] sm:$0xff]   ;;  %v1132_v8 = vld [vmem:[%s1555_s1 + $0x50] sm:$0xff]  }
   0x2   :  { %v1125_v1 = vld [vmem:[%s1555_s1] sm:$0xff]   ;;  %982 = vmatprep.subr.bf16.mxu0 %v1124_v0  ;;  %v1129_v5 = vld [vmem:[%s1555_s1 + $0x8] sm:$0xff]   ;;  %v1133_v9 = vld [vmem:[%s1555_s1 + $0x10] sm:$0xff]  }
   0x3   :  { %v1126_v2 = vld [vmem:[%s1555_s1 + $0xc0] sm:$0xff]   ;;  %983 = vmatpush3.bf16.msra.mxu0 %v1125_v1  ;;  %v1130_v6 = vld [vmem:[%s1555_s1 + $0xc8] sm:$0xff]   ;;  %v1134_v10 = vld [vmem:[%s1555_s1 + $0xd0] sm:$0xff]  }
   0x4   :  { %v1127_v3 = vld [vmem:[%s1555_s1 + $0x80] sm:$0xff]   ;;  %1010 = vmatprep.subr.bf16.mxu1 %v1126_v2  ;;  %984 = vmatprep.subr.bf16.mxu0 %v1128_v4  ;;  %v1131_v7 = vld [vmem:[%s1555_s1 + $0x88] sm:$0xff]   ;;  %v1135_v11 = vld [vmem:[%s1555_s1 + $0x90] sm:$0xff]  }
   0x5   :  { %1011 = vmatpush3.bf16.msra.mxu1 %v1127_v3  ;;  %v1136_v12 = vld [vmem:[%s1555_s1 + $0x58] sm:$0xff]   ;;  %v1140_v16 = vld [vmem:[%s1555_s1 + $0x60] sm:$0xff]   ;;  %v1144_v20 = vld [vmem:[%s1555_s1 + $0x68] sm:$0xff]  }
   0x6   :  { %1012 = vmatprep.subr.bf16.mxu1 %v1130_v6  ;;  %v1137_v13 = vld [vmem:[%s1555_s1 + $0x18] sm:$0xff]   ;;  %v1141_v17 = vld [vmem:[%s1555_s1 + $0x20] sm:$0xff]   ;;  %v1145_v21 = vld [vmem:[%s1555_s1 + $0x28] sm:$0xff]  }
   0x7   :  { %985 = vmatpush3.bf16.msra.mxu0 %v1129_v5  ;;  %v1138_v14 = vld [vmem:[%s1555_s1 + $0xd8] sm:$0xff]   ;;  %v1142_v18 = vld [vmem:[%s1555_s1 + $0xe0] sm:$0xff]   ;;  %v1146_v22 = vld [vmem:[%s1555_s1 + $0xe8] sm:$0xff]  }
   0x8   :  { %986 = vmatprep.subr.bf16.mxu0 %v1132_v8  ;;  %v1139_v15 = vld [vmem:[%s1555_s1 + $0x98] sm:$0xff]   ;;  %v1143_v19 = vld [vmem:[%s1555_s1 + $0xa0] sm:$0xff]   ;;  %v1147_v23 = vld [vmem:[%s1555_s1 + $0xa8] sm:$0xff]  }
   0x9   :  { %1013 = vmatpush3.bf16.msra.mxu1 %v1131_v7  ;;  %v1148_v24 = vld [vmem:[%s1555_s1 + $0x70] sm:$0xff]   ;;  %v1152_v28 = vld [vmem:[%s1555_s1 + $0x78] sm:$0xff]   ;;  %v16_v31 = vld [vmem:[%s1556_s0 + $0x8] sm:$0xff] }
   0xa   :  { %1014 = vmatprep.subr.bf16.mxu1 %v1134_v10  ;;  %v1149_v25 = vld [vmem:[%s1555_s1 + $0x30] sm:$0xff]   ;;  %v1153_v29 = vld [vmem:[%s1555_s1 + $0x38] sm:$0xff]   ;;  %v15_v35 = vld [vmem:[%s1556_s0] sm:$0xff] }
   0xb   :  { %987 = vmatpush3.bf16.msra.mxu0 %v1133_v9  ;;  %v1150_v26 = vld [vmem:[%s1555_s1 + $0xf0] sm:$0xff]   ;;  %v1154_v30 = vld [vmem:[%s1555_s1 + $0xf8] sm:$0xff]   ;;  %v24_v36 = vld [vmem:[%s1556_s0 + $0x48] sm:$0xff] }
   0xc   :  { %988 = vmatprep.subr.bf16.mxu0 %v1136_v12  ;;  %v1151_v27 = vld [vmem:[%s1555_s1 + $0xb0] sm:$0xff]   ;;  %v1155_v34 = vld [vmem:[%s1555_s1 + $0xb8] sm:$0xff]   ;;  %v51_v37 = vpack.c.bf16 %v24_v36, %v15_v35  ;;  %v1156_v38 = vld [vmem:[%s1555_s1 + $0x140] sm:$0xff]  }
   0xd   :  { %1015 = vmatpush3.bf16.msra.mxu1 %v1135_v11  ;;  %v25_v32 = vld [vmem:[%s1556_s0 + $0x50] sm:$0xff]  ;;  %v18_v39 = vld [vmem:[%s1556_s0 + $0x18] sm:$0xff]  ;;  %v27_v40 = vld [vmem:[%s1556_s0 + $0x60] sm:$0xff] }
   0xe   :  { %1016 = vmatprep.subr.bf16.mxu1 %v1138_v14  ;;  %v52_v33 = vpack.c.bf16 %v25_v32, %v16_v31  ;;  %v54_v41 = vpack.c.bf16 %v27_v40, %v18_v39  ;;  %v1157_v42 = vld [vmem:[%s1555_s1 + $0x100] sm:$0xff]   ;;  %v17_v43 = vld [vmem:[%s1556_s0 + $0x10] sm:$0xff]  ;;  %v26_v44 = vld [vmem:[%s1556_s0 + $0x58] sm:$0xff] }
   0xf   :  { %989 = vmatpush3.bf16.msra.mxu0 %v1137_v13  ;;  %v53_v45 = vpack.c.bf16 %v26_v44, %v17_v43  ;;  %v1158_v46 = vld [vmem:[%s1555_s1 + $0x1c0] sm:$0xff]   ;;  %v1160_v48 = vld [vmem:[%s1555_s1 + $0x148] sm:$0xff]   ;;  %v1164_v52 = vld [vmem:[%s1555_s1 + $0x150] sm:$0xff]  }
  0x10   :  { %990 = vmatprep.subr.bf16.mxu0 %v1140_v16  ;;  %684 = vmatprep.mubr.bf16.mxu0 %v52_v33  ;;  %v1159_v47 = vld [vmem:[%s1555_s1 + $0x180] sm:$0xff]   ;;  %v1161_v49 = vld [vmem:[%s1555_s1 + $0x108] sm:$0xff]   ;;  %v1165_v53 = vld [vmem:[%s1555_s1 + $0x110] sm:$0xff]  }
  0x11   :  { %1017 = vmatpush3.bf16.msra.mxu1 %v1139_v15  ;;  %733 = vmatprep.mubr.bf16.mxu1 %v54_v41  ;;  %v1162_v50 = vld [vmem:[%s1555_s1 + $0x1c8] sm:$0xff]   ;;  %v1166_v54 = vld [vmem:[%s1555_s1 + $0x1d0] sm:$0xff]   ;;  %v1168_v56 = vld [vmem:[%s1555_s1 + $0x158] sm:$0xff]  }
  0x12   :  { %1018 = vmatprep.subr.bf16.mxu1 %v1142_v18  ;;  %v1163_v51 = vld [vmem:[%s1555_s1 + $0x188] sm:$0xff]   ;;  %v1167_v55 = vld [vmem:[%s1555_s1 + $0x190] sm:$0xff]   ;;  %v1169_v57 = vld [vmem:[%s1555_s1 + $0x118] sm:$0xff]  }
  0x13   :  { %991 = vmatpush3.bf16.msra.mxu0 %v1141_v17  ;;  %v1170_v58 = vld [vmem:[%s1555_s1 + $0x1d8] sm:$0xff]   ;;  %v1172_v60 = vld [vmem:[%s1555_s1 + $0x160] sm:$0xff]   ;;  %v1176_v0 = vld [vmem:[%s1555_s1 + $0x168] sm:$0xff]  }
  0x14   :  { %992 = vmatprep.subr.bf16.mxu0 %v1144_v20  ;;  %v1171_v59 = vld [vmem:[%s1555_s1 + $0x198] sm:$0xff]   ;;  %v1173_v61 = vld [vmem:[%s1555_s1 + $0x120] sm:$0xff]   ;;  %v1177_v4 = vld [vmem:[%s1555_s1 + $0x128] sm:$0xff]  }
  0x15   :  { %1019 = vmatpush3.bf16.msra.mxu1 %v1143_v19  ;;  %v1174_v62 = vld [vmem:[%s1555_s1 + $0x1e0] sm:$0xff]   ;;  %v34_v1 = vld [vmem:[%s1556_s0 + $0x98] sm:$0xff]  ;;  %v33_v5 = vld [vmem:[%s1556_s0 + $0x90] sm:$0xff] }
  0x16   :  { %1020 = vmatprep.subr.bf16.mxu1 %v1146_v22  ;;  %v1175_v63 = vld [vmem:[%s1555_s1 + $0x1a0] sm:$0xff]   ;;  %v42_v6 = vld [vmem:[%s1556_s0 + $0xd8] sm:$0xff]  ;;  %v1178_v8 = vld [vmem:[%s1555_s1 + $0x1e8] sm:$0xff]  }
  0x17   :  { %993 = vmatpush3.bf16.msra.mxu0 %v1145_v21  ;;  %v43_v2 = vld [vmem:[%s1556_s0 + $0xe0] sm:$0xff]  ;;  %v60_v7 = vpack.c.bf16 %v42_v6, %v33_v5  ;;  %v36_v9 = vld [vmem:[%s1556_s0 + $0xa8] sm:$0xff]  ;;  %v45_v10 = vld [vmem:[%s1556_s0 + $0xf0] sm:$0xff] }
  0x18   :  { %994 = vmatprep.subr.bf16.mxu0 %v1148_v24  ;;  %v61_v3 = vpack.c.bf16 %v43_v2, %v34_v1  ;;  %v63_v11 = vpack.c.bf16 %v45_v10, %v36_v9  ;;  %v1179_v12 = vld [vmem:[%s1555_s1 + $0x1a8] sm:$0xff]   ;;  %v35_v13 = vld [vmem:[%s1556_s0 + $0xa0] sm:$0xff]  ;;  %v1180_v16 = vld [vmem:[%s1555_s1 + $0x170] sm:$0xff]  }
  0x19   :  { %1021 = vmatpush3.bf16.msra.mxu1 %v1147_v23  ;;  %v44_v14 = vld [vmem:[%s1556_s0 + $0xe8] sm:$0xff]  ;;  %v1181_v17 = vld [vmem:[%s1555_s1 + $0x130] sm:$0xff]   ;;  %v1184_v20 = vld [vmem:[%s1555_s1 + $0x178] sm:$0xff]  }
  0x1a   :  { %1022 = vmatprep.subr.bf16.mxu1 %v1150_v26  ;;  %v62_v15 = vpack.c.bf16 %v44_v14, %v35_v13  ;;  %v1182_v18 = vld [vmem:[%s1555_s1 + $0x1f0] sm:$0xff]   ;;  %v1185_v21 = vld [vmem:[%s1555_s1 + $0x138] sm:$0xff]   ;;  %v20_v23 = vld [vmem:[%s1556_s0 + $0x28] sm:$0xff] }
  0x1b   :  { %995 = vmatpush3.bf16.msra.mxu0 %v1149_v25  ;;  %v1183_v19 = vld [vmem:[%s1555_s1 + $0x1b0] sm:$0xff]   ;;  %v1186_v22 = vld [vmem:[%s1555_s1 + $0x1f8] sm:$0xff]   ;;  %v31_v32 = vld [vmem:[%s1556_s0 + $0x80] sm:$0xff] }
  0x1c   :  { %996 = vmatprep.subr.bf16.mxu0 %v1152_v28  ;;  %v29_v24 = vld [vmem:[%s1556_s0 + $0x70] sm:$0xff]  ;;  %v1187_v26 = vld [vmem:[%s1555_s1 + $0x1b8] sm:$0xff]   ;;  %v28_v28 = vld [vmem:[%s1556_s0 + $0x68] sm:$0xff] }
  0x1d   :  { %1023 = vmatpush3.bf16.msra.mxu1 %v1151_v27  ;;  %v56_v25 = vpack.c.bf16 %v29_v24, %v20_v23  ;;  %v19_v27 = vld [vmem:[%s1556_s0 + $0x20] sm:$0xff]  ;;  %v22_v31 = vld [vmem:[%s1556_s0 + $0x38] sm:$0xff]  ;;  %v21_v33 = vld [vmem:[%s1556_s0 + $0x30] sm:$0xff] }
  0x1e   :  { %1024 = vmatprep.subr.bf16.mxu1 %v1154_v30  ;;  %v1188_v30 = vld [vmem:[%s1555_s1 + $0x200] sm:$0xff]   ;;  %v58_v35 = vpack.c.bf16 %v31_v32, %v22_v31  ;;  %v37_v40 = vld [vmem:[%s1556_s0 + $0xb0] sm:$0xff]  ;;  %v40_v44 = vld [vmem:[%s1556_s0 + $0xc8] sm:$0xff] }
  0x1f   :  { %997 = vmatpush3.bf16.msra.mxu0 %v1153_v29  ;;  %v55_v29 = vpack.c.bf16 %v28_v28, %v19_v27  ;;  %v47_v39 = vld [vmem:[%s1556_s0 + $0x100] sm:$0xff]  ;;  %v1190_v43 = vld [vmem:[%s1555_s1 + $0x210] sm:$0xff]  }
  0x20   :  { %1038 = vmatprep.subr.bf16.mxu0 %v1156_v38  ;;  %v38_v38 = vld [vmem:[%s1556_s0 + $0xb8] sm:$0xff] }
  0x21   :  { %1025 = vmatpush3.bf16.msra.mxu1 %v1155_v34  ;;  %v30_v34 = vld [vmem:[%s1556_s0 + $0x78] sm:$0xff]  ;;  %v65_v41 = vpack.c.bf16 %v47_v39, %v38_v38 }
  0x22   :  { %685 = vmatmul.mubr.bf16.vlgmr.msra.gmra.mrb[0].mxu0 %v51_v37  ;;  %1066 = vmatprep.subr.bf16.mxu1 %v1158_v46  ;;  %v57_v36 = vpack.c.bf16 %v30_v34, %v21_v33  ;;  %v1189_v37 = vld [vmem:[%s1555_s1 + $0x208] sm:$0xff]  }
  0x23   :  { %1039 = vmatpush3.bf16.msra.mxu0 %v1157_v42  ;;  %692 = vmatprep.mubr.bf16.mxu0 %v61_v3  ;;  %v46_v42 = vld [vmem:[%s1556_s0 + $0xf8] sm:$0xff] }
  0x24   :  { %734 = vmatmul.mubr.bf16.vlgmr.msra.gmra.mrb[0].mxu1 %v53_v45  ;;  %1040 = vmatprep.subr.bf16.mxu0 %v1160_v48  ;;  %v49_v45 = vld [vmem:[%s1556_s0 + $0x110] sm:$0xff]  ;;  %v64_v46 = vpack.c.bf16 %v46_v42, %v37_v40  ;;  %v39_v48 = vld [vmem:[%s1556_s0 + $0xc0] sm:$0xff] }
  0x25   :  { %1067 = vmatpush3.bf16.msra.mxu1 %v1159_v47  ;;  %741 = vmatprep.mubr.bf16.mxu1 %v63_v11  ;;  %v67_v47 = vpack.c.bf16 %v49_v45, %v40_v44 }
  0x26   :  { %1068 = vmatprep.subr.bf16.mxu1 %v1162_v50  ;;  %v1191_v50 = vld [vmem:[%s1555_s1 + $0x218] sm:$0xff]  }
  0x27   :  { %1041 = vmatpush3.bf16.msra.mxu0 %v1161_v49  ;;  %v48_v49 = vld [vmem:[%s1556_s0 + $0x108] sm:$0xff] }
  0x28   :  { %1042 = vmatprep.subr.bf16.mxu0 %v1164_v52  ;;  %v23_v52 = vld [vmem:[%s1556_s0 + $0x40] sm:$0xff] }
  0x29   :  { %1069 = vmatpush3.bf16.msra.mxu1 %v1163_v51  ;;  %v66_v51 = vpack.c.bf16 %v48_v49, %v39_v48 }
  0x2a   :  { %1070 = vmatprep.subr.bf16.mxu1 %v1166_v54  ;;  %693 = vmatmul.mubr.bf16.gmra.mrb[4].mxu0 %v60_v7  ;;  %v32_v54 = vld [vmem:[%s1556_s0 + $0x88] sm:$0xff] }
  0x2b   :  { %1043 = vmatpush3.bf16.msra.mxu0 %v1165_v53  ;;  %782 = vmatprep.mubr.bf16.mxu0 %v56_v25  ;;  %v1192_v53 = vld [vmem:[%s1555_s1 + $0x220] sm:$0xff]  }
  0x2c   :  { %1044 = vmatprep.subr.bf16.mxu0 %v1168_v56  ;;  %742 = vmatmul.mubr.bf16.gmra.mrb[4].mxu1 %v62_v15  ;;  %v1193_v56 = vld [vmem:[%s1555_s1 + $0x228] sm:$0xff]  }
  0x2d   :  { %1071 = vmatpush3.bf16.msra.mxu1 %v1167_v55  ;;  %831 = vmatprep.mubr.bf16.mxu1 %v58_v35  ;;  %v59_v55 = vpack.c.bf16 %v32_v54, %v23_v52 }
  0x2e   :  { %1072 = vmatprep.subr.bf16.mxu1 %v1170_v58  ;;  %v1195_v58 = vld [vmem:[%s1555_s1 + $0x238] sm:$0xff]  }
  0x2f   :  { %1045 = vmatpush3.bf16.msra.mxu0 %v1169_v57  ;;  %v1194_v57 = vld [vmem:[%s1555_s1 + $0x230] sm:$0xff]  }
  0x30   :  { %1046 = vmatprep.subr.bf16.mxu0 %v1172_v60  ;;  %v50_v60 = vld [vmem:[%s1556_s0 + $0x118] sm:$0xff] }
  0x31   :  { %1073 = vmatpush3.bf16.msra.mxu1 %v1171_v59  ;;  %v41_v59 = vld [vmem:[%s1556_s0 + $0xd0] sm:$0xff] }
  0x32   :  { %1074 = vmatprep.subr.bf16.mxu1 %v1174_v62 }
  0x33   :  { %1047 = vmatpush3.bf16.msra.mxu0 %v1173_v61  ;;  %v68_v61 = vpack.c.bf16 %v50_v60, %v41_v59 }
  0x34   :  { %1048 = vmatprep.subr.bf16.mxu0 %v1176_v0 }
  0x35   :  { %1075 = vmatpush3.bf16.msra.mxu1 %v1175_v63  ;;  %v909_v63 = vld [vmem:[%s1557_s2] ss:$0 sm:$0xff] }
  0x36   :  { %1076 = vmatprep.subr.bf16.mxu1 %v1178_v8 }
  0x37   :  { %1049 = vmatpush3.bf16.msra.mxu0 %v1177_v4 }
  0x38   :  { %1050 = vmatprep.subr.bf16.mxu0 %v1180_v16 }
  0x39   :  { %1077 = vmatpush3.bf16.msra.mxu1 %v1179_v12 }
  0x3a   :  { %1078 = vmatprep.subr.bf16.mxu1 %v1182_v18 }
  0x3b   :  { %1051 = vmatpush3.bf16.msra.mxu0 %v1181_v17 }
  0x3c   :  { %1052 = vmatprep.subr.bf16.mxu0 %v1184_v20 }
  0x3d   :  { %1079 = vmatpush3.bf16.msra.mxu1 %v1183_v19 }
  0x3e   :  { %1080 = vmatprep.subr.bf16.mxu1 %v1186_v22 }
  0x3f   :  { %1053 = vmatpush3.bf16.msra.mxu0 %v1185_v21 }
  0x40   :  { %1104 = vmatprep.subr.bf16.mxu0 %v1188_v30 }
  0x41   :  { %1081 = vmatpush3.bf16.msra.mxu1 %v1187_v26 }
  0x42   :  { %783 = vmatmul.mubr.bf16.vlgmr.msra.gmra.mrb[8].mxu0 %v55_v29 }
  0x43   :  { %1105 = vmatpush3.bf16.msra.mxu0 %v1188_v30  ;;  %790 = vmatprep.mubr.bf16.mxu0 %v65_v41 }
  0x44   :  { %1106 = vmatprep.subr.bf16.mxu0 %v1189_v37  ;;  %832 = vmatmul.mubr.bf16.vlgmr.msra.gmra.mrb[8].mxu1 %v57_v36 }
  0x45   :  { %839 = vmatprep.mubr.bf16.mxu1 %v67_v47 }
  0x47   :  { %1107 = vmatpush3.bf16.msra.mxu0 %v1189_v37 }
  0x48   :  { %1108 = vmatprep.subr.bf16.mxu0 %v1190_v43 }
  0x4a   :  { %791 = vmatmul.mubr.bf16.gmra.mrb[12].mxu0 %v64_v46 }
  0x4b   :  { %1109 = vmatpush3.bf16.msra.mxu0 %v1190_v43  ;;  %1120 = vmatprep.mubr.bf16.mxu0 %v59_v55 }
  0x4c   :  { %1110 = vmatprep.subr.bf16.mxu0 %v1191_v50  ;;  %840 = vmatmul.mubr.bf16.gmra.mrb[12].mxu1 %v66_v51 }
  0x4f   :  { %1111 = vmatpush3.bf16.msra.mxu0 %v1191_v50 }
  0x50   :  { %1112 = vmatprep.subr.bf16.mxu0 %v1192_v53 }
  0x53   :  { %1113 = vmatpush3.bf16.msra.mxu0 %v1192_v53 }
  0x54   :  { %1114 = vmatprep.subr.bf16.mxu0 %v1193_v56 }
  0x57   :  { %1115 = vmatpush3.bf16.msra.mxu0 %v1193_v56 }
  0x58   :  { %1116 = vmatprep.subr.bf16.mxu0 %v1194_v57 }
  0x5b   :  { %1117 = vmatpush3.bf16.msra.mxu0 %v1194_v57 }
  0x5c   :  { %1118 = vmatprep.subr.bf16.mxu0 %v1195_v58 }
  0x5f   :  { %1119 = vmatpush3.bf16.msra.mxu0 %v1195_v58 }
  0x62   :  { %1121 = vmatmul.mubr.bf16.vlgmr.msra.gmra.mrb[16].mxu0 %v68_v61 }
  0xf5   :  { %v998_v62 = vpop.f32.mrb[0].mxu0 }
  0xf6   :  { %v999_v0 = vpop.f32.mrb[1].mxu0 }
  0xf7   :  { %v1000_v1 = vadd.f32 %v999_v0, %v998_v62  ;;  %v1001_v2 = vpop.f32.mrb[2].mxu0  ;;  %v1026_v3 = vpop.f32.mrb[0].mxu1 }
  0xf8   :  { %v1002_v4 = vpop.f32.mrb[3].mxu0  ;;  %v1027_v7 = vpop.f32.mrb[1].mxu1 }
  0xf9   :  { %v687_v5 = vadd.f32 %v1000_v1, %v909_v63  ;;  %v1003_v6 = vadd.f32 %v1002_v4, %v1001_v2  ;;  %v1028_v8 = vadd.f32 %v1027_v7, %v1026_v3  ;;  %v1029_v9 = vpop.f32.mrb[2].mxu1 }
  0xfa   :  { %v1030_v11 = vpop.f32.mrb[3].mxu1 }
  0xfb   :  { %v690_v10 = vadd.f32 %v1003_v6, %v909_v63  ;;  %v736_v12 = vadd.f32 %v1028_v8, %v687_v5  ;;  %v1031_v13 = vadd.f32 %v1030_v11, %v1029_v9 }
  0xfd   :  { %v739_v14 = vadd.f32 %v1031_v13, %v690_v10  ;;  %v1004_v15 = vpop.f32.mrb[4].mxu0 }
  0xfe   :  { %v1005_v16 = vpop.f32.mrb[5].mxu0 }
  0xff   :  { %v1006_v17 = vadd.f32 %v1005_v16, %v1004_v15  ;;  %v1007_v18 = vpop.f32.mrb[6].mxu0  ;;  %v1032_v21 = vpop.f32.mrb[4].mxu1 }
 0x100   :  { %v1008_v19 = vpop.f32.mrb[7].mxu0  ;;  %v1033_v23 = vpop.f32.mrb[5].mxu1 }
 0x101   :  { %v695_v20 = vadd.f32 %v1006_v17, %v909_v63  ;;  %v1009_v22 = vadd.f32 %v1008_v19, %v1007_v18  ;;  %v1034_v25 = vadd.f32 %v1033_v23, %v1032_v21  ;;  %v1035_v26 = vpop.f32.mrb[6].mxu1 }
 0x102   :  { %v1036_v27 = vpop.f32.mrb[7].mxu1 }
 0x103   :  { %v698_v24 = vadd.f32 %v1009_v22, %v909_v63  ;;  %v744_v28 = vadd.f32 %v1034_v25, %v695_v20  ;;  %v1037_v29 = vadd.f32 %v1036_v27, %v1035_v26 }
 0x105   :  { %v747_v30 = vadd.f32 %v1037_v29, %v698_v24 }
 0x115   :  { %v1054_v31 = vpop.f32.mrb[8].mxu0 }
 0x116   :  { %v1055_v32 = vpop.f32.mrb[9].mxu0 }
 0x117   :  { %v1056_v33 = vadd.f32 %v1055_v32, %v1054_v31  ;;  %v1057_v34 = vpop.f32.mrb[10].mxu0  ;;  %v1082_v35 = vpop.f32.mrb[8].mxu1 }
 0x118   :  { %v1058_v36 = vpop.f32.mrb[11].mxu0  ;;  %v1083_v39 = vpop.f32.mrb[9].mxu1 }
 0x119   :  { %v785_v37 = vadd.f32 %v1056_v33, %v736_v12  ;;  %v1059_v38 = vadd.f32 %v1058_v36, %v1057_v34  ;;  %v1084_v40 = vadd.f32 %v1083_v39, %v1082_v35  ;;  %v1085_v41 = vpop.f32.mrb[10].mxu1 }
 0x11a   :  { %v1086_v43 = vpop.f32.mrb[11].mxu1 }
 0x11b   :  { %v788_v42 = vadd.f32 %v1059_v38, %v739_v14  ;;  %v1087_v44 = vadd.f32 %v1086_v43, %v1085_v41  ;;  %v834_v45 = vadd.f32 %v1084_v40, %v785_v37 }
 0x11d   :  { %v1060_v46 = vpop.f32.mrb[12].mxu0  ;;  %v837_v48 = vadd.f32 %v1087_v44, %v788_v42 }
 0x11e   :  { %v1061_v47 = vpop.f32.mrb[13].mxu0 }
 0x11f   :  { %v1062_v49 = vadd.f32 %v1061_v47, %v1060_v46  ;;  %v1063_v50 = vpop.f32.mrb[14].mxu0  ;;  %v1088_v51 = vpop.f32.mrb[12].mxu1 }
 0x120   :  { %v1064_v52 = vpop.f32.mrb[15].mxu0  ;;  %v1089_v55 = vpop.f32.mrb[13].mxu1 }
 0x121   :  { %v793_v53 = vadd.f32 %v1062_v49, %v744_v28  ;;  %v1065_v54 = vadd.f32 %v1064_v52, %v1063_v50  ;;  %v1090_v56 = vadd.f32 %v1089_v55, %v1088_v51  ;;  %v1091_v57 = vpop.f32.mrb[14].mxu1 }
 0x122   :  { %v1092_v59 = vpop.f32.mrb[15].mxu1 }
 0x123   :  { %v796_v58 = vadd.f32 %v1065_v54, %v747_v30  ;;  %v1093_v60 = vadd.f32 %v1092_v59, %v1091_v57  ;;  %v842_v61 = vadd.f32 %v1090_v56, %v793_v53 }
 0x125   :  { %v845_v62 = vadd.f32 %v1093_v60, %v796_v58 }
 0x135   :  { %v1122_v63 = vpop.f32.mrb[16].mxu0 }
 0x136   :  { %v891_v0 = vadd.f32 %v1122_v63, %v842_v61  ;;  %v882_v1 = vpop.f32.mrb[17].mxu0 }
 0x137   :  { %v883_v2 = vadd.f32 %v882_v1, %v834_v45  ;;  %v1123_v3 = vpop.f32.mrb[18].mxu0 }
 0x138   :  { %v899_v4 = vmax.f32 %v891_v0, 0.0  ;;  %v894_v5 = vadd.f32 %v1123_v3, %v845_v62  ;;  %v885_v6 = vpop.f32.mrb[19].mxu0 }
 0x139   :  { %v897_v7 = vmax.f32 %v883_v2, 0.0  ;;  %v886_v8 = vadd.f32 %v885_v6, %v837_v48 }
 0x13a   :  { %903 = vst [vmem:[%s1558_s3 + $0x10] sm:$0xff] %v899_v4  ;;  %v900_v9 = vmax.f32 %v894_v5, 0.0 }
 0x13b   :  { %901 = vst [vmem:[%s1558_s3] sm:$0xff] %v897_v7  ;;  %v898_v10 = vmax.f32 %v886_v8, 0.0 }
 0x13c   :  { %904 = vst [vmem:[%s1558_s3 + $0x18] sm:$0xff] %v900_v9 }
 0x13d   :  { %902 = vst [vmem:[%s1558_s3 + $0x8] sm:$0xff] %v898_v10 }

// kernel: ssd_head_forward.18
= control target key start
LH: loop header
LB: loop body
LE: loop exit
PB: predicated region body
PF: predicated region fallthrough
CT: control target
= control target key end

     0   :  { %s335_s1 = inlined_call_operand.vmem [shape: bf16[256,128], index: 1, kind: input, shape index: {}]   ;;  %s336_s0 = inlined_call_operand.vmem [shape: f32[8,256], index: 0, kind: input, shape index: {}]   ;;  %s337_s2 = inlined_call_operand.vmem [shape: f32[1,128], index: 2, kind: input, shape index: {}]   ;;  %s338_s3 = inlined_call_operand.vmem [shape: f32[8,128], index: 3, kind: output, shape index: {}]  }
   0x1   :  { %v239_v0 = vld [vmem:[%s335_s1 + $0x40] sm:$0xff]   ;;  %v241_v2 = vld [vmem:[%s335_s1 + $0x48] sm:$0xff]   ;;  %v243_v4 = vld [vmem:[%s335_s1 + $0x50] sm:$0xff]  }
   0x2   :  { %v240_v1 = vld [vmem:[%s335_s1] sm:$0xff]   ;;  %217 = vmatprep.subr.bf16.mxu0 %v239_v0  ;;  %v242_v3 = vld [vmem:[%s335_s1 + $0x8] sm:$0xff]   ;;  %v244_v5 = vld [vmem:[%s335_s1 + $0x10] sm:$0xff]  }
   0x3   :  { %218 = vmatpush3.bf16.msra.mxu0 %v240_v1  ;;  %v245_v6 = vld [vmem:[%s335_s1 + $0x58] sm:$0xff]   ;;  %v247_v8 = vld [vmem:[%s335_s1 + $0x60] sm:$0xff]   ;;  %v249_v10 = vld [vmem:[%s335_s1 + $0x68] sm:$0xff]  }
   0x4   :  { %219 = vmatprep.subr.bf16.mxu0 %v241_v2  ;;  %v246_v7 = vld [vmem:[%s335_s1 + $0x18] sm:$0xff]   ;;  %v248_v9 = vld [vmem:[%s335_s1 + $0x20] sm:$0xff]   ;;  %v16_v11 = vld [vmem:[%s336_s0 + $0x8] sm:$0xff] }
   0x5   :  { %v18_v12 = vpack.c.bf16 %v16_v11, %v16_v11  ;;  %v250_v13 = vld [vmem:[%s335_s1 + $0x28] sm:$0xff]   ;;  %v251_v14 = vld [vmem:[%s335_s1 + $0x70] sm:$0xff]   ;;  %v253_v16 = vld [vmem:[%s335_s1 + $0x78] sm:$0xff]  }
   0x6   :  { %v252_v15 = vld [vmem:[%s335_s1 + $0x30] sm:$0xff]   ;;  %v254_v17 = vld [vmem:[%s335_s1 + $0x38] sm:$0xff]   ;;  %v15_v18 = vld [vmem:[%s336_s0] sm:$0xff] }
   0x7   :  { %220 = vmatpush3.bf16.msra.mxu0 %v242_v3  ;;  %186 = vmatprep.mubr.bf16.mxu0 %v18_v12  ;;  %v17_v19 = vpack.c.bf16 %v15_v18, %v15_v18  ;;  %v200_v21 = vld [vmem:[%s337_s2] ss:$0 sm:$0xff] }
   0x8   :  { %221 = vmatprep.subr.bf16.mxu0 %v243_v4 }
   0xb   :  { %222 = vmatpush3.bf16.msra.mxu0 %v244_v5 }
   0xc   :  { %223 = vmatprep.subr.bf16.mxu0 %v245_v6 }
   0xf   :  { %224 = vmatpush3.bf16.msra.mxu0 %v246_v7 }
  0x10   :  { %225 = vmatprep.subr.bf16.mxu0 %v247_v8 }
  0x13   :  { %226 = vmatpush3.bf16.msra.mxu0 %v248_v9 }
  0x14   :  { %227 = vmatprep.subr.bf16.mxu0 %v249_v10 }
  0x17   :  { %228 = vmatpush3.bf16.msra.mxu0 %v250_v13 }
  0x18   :  { %229 = vmatprep.subr.bf16.mxu0 %v251_v14 }
  0x1b   :  { %230 = vmatpush3.bf16.msra.mxu0 %v252_v15 }
  0x1c   :  { %231 = vmatprep.subr.bf16.mxu0 %v253_v16 }
  0x1f   :  { %232 = vmatpush3.bf16.msra.mxu0 %v254_v17 }
  0x22   :  { %187 = vmatmul.mubr.bf16.vlgmr.msra.gmra.mrb[0].mxu0 %v17_v19 }
  0xf5   :  { %v233_v20 = vpop.f32.mrb[0].mxu0 }
  0xf6   :  { %v234_v22 = vpop.f32.mrb[1].mxu0 }
  0xf7   :  { %v235_v23 = vadd.f32 %v234_v22, %v233_v20  ;;  %v236_v24 = vpop.f32.mrb[2].mxu0 }
  0xf8   :  { %v237_v25 = vpop.f32.mrb[3].mxu0 }
  0xf9   :  { %v189_v26 = vadd.f32 %v235_v23, %v200_v21 }
  0xfb   :  { %v194_v27 = vmax.f32 %v189_v26, 0.0 }
  0xfd   :  { %195 = vst [vmem:[%s338_s3] sm:$0xff] %v194_v27 }

// kernel: ssd_head_forward.19
= control target key start
LH: loop header
LB: loop body
LE: loop exit
PB: predicated region body
PF: predicated region fallthrough
CT: control target
= control target key end

     0   :  { %v704_v36 = vmov 1983009808   ;;  %v20_v38 = vlaneseq  ;;  %s931_s1 = inlined_call_operand.vmem [shape: bf16[512,256], index: 1, kind: input, shape index: {}]   ;;  %s932_s0 = inlined_call_operand.vmem [shape: f32[2,512], index: 0, kind: input, shape index: {}]   ;;  %s933_s2 = inlined_call_operand.vmem [shape: f32[1,256], index: 2, kind: input, shape index: {}]   ;;  %s934_s3 = inlined_call_operand.vmem [shape: f32[2,256], index: 3, kind: output, shape index: {}]  }
   0x1   :  { %v607_v0 = vld [vmem:[%s931_s1 + $0x4] ss:$8 sps:$4 sm:$0xff]   ;;  %v611_v2 = vld [vmem:[%s931_s1] ss:$8 sps:$4 sm:$0xff]   ;;  %v613_v4 = vld [vmem:[%s931_s1 + $0x14] ss:$8 sps:$4 sm:$0xff]   ;;  %v18_v37 = vunpack.c.l.s4 %v704_v36 }
   0x2   :  { %v609_v1 = vld [vmem:[%s931_s1 + $0x104] ss:$8 sps:$4 sm:$0xff]   ;;  %437 = vmatprep.subr.bf16.mxu1 %v607_v0  ;;  %v612_v3 = vld [vmem:[%s931_s1 + $0x100] ss:$8 sps:$4 sm:$0xff]   ;;  %v615_v5 = vld [vmem:[%s931_s1 + $0x114] ss:$8 sps:$4 sm:$0xff]  }
   0x3   :  { %478 = vmatprep.subr.bf16.mxu0 %v609_v1  ;;  %438 = vmatpush1.bf16.msra.mxu1 %v611_v2  ;;  %v617_v6 = vld [vmem:[%s931_s1 + $0x10] ss:$8 sps:$4 sm:$0xff]   ;;  %v619_v8 = vld [vmem:[%s931_s1 + $0x24] ss:$8 sps:$4 sm:$0xff]   ;;  %v623_v10 = vld [vmem:[%s931_s1 + $0x20] ss:$8 sps:$4 sm:$0xff]   ;;  %v19_v42 = vunpack.c.0.s8 %v18_v37 }
   0x4   :  { %479 = vmatpush1.bf16.msra.mxu0 %v612_v3  ;;  %439 = vmatprep.subr.bf16.mxu1 %v613_v4  ;;  %v618_v7 = vld [vmem:[%s931_s1 + $0x110] ss:$8 sps:$4 sm:$0xff]   ;;  %v621_v9 = vld [vmem:[%s931_s1 + $0x124] ss:$8 sps:$4 sm:$0xff]   ;;  %v624_v11 = vld [vmem:[%s931_s1 + $0x120] ss:$8 sps:$4 sm:$0xff]  }
   0x5   :  { %480 = vmatprep.subr.bf16.mxu0 %v615_v5  ;;  %v625_v12 = vld [vmem:[%s931_s1 + $0x34] ss:$8 sps:$4 sm:$0xff]   ;;  %v629_v14 = vld [vmem:[%s931_s1 + $0x30] ss:$8 sps:$4 sm:$0xff]   ;;  %v631_v16 = vld [vmem:[%s931_s1 + $0x44] ss:$8 sps:$4 sm:$0xff]  }
   0x6   :  { %v627_v13 = vld [vmem:[%s931_s1 + $0x134] ss:$8 sps:$4 sm:$0xff]   ;;  %v630_v15 = vld [vmem:[%s931_s1 + $0x130] ss:$8 sps:$4 sm:$0xff]   ;;  %v633_v17 = vld [vmem:[%s931_s1 + $0x144] ss:$8 sps:$4 sm:$0xff]  }
   0x7   :  { %440 = vmatpush1.bf16.msra.mxu1 %v617_v6  ;;  %v635_v18 = vld [vmem:[%s931_s1 + $0x40] ss:$8 sps:$4 sm:$0xff]   ;;  %v637_v20 = vld [vmem:[%s931_s1 + $0x54] ss:$8 sps:$4 sm:$0xff]   ;;  %v641_v22 = vld [vmem:[%s931_s1 + $0x50] ss:$8 sps:$4 sm:$0xff]  }
   0x8   :  { %481 = vmatpush1.bf16.msra.mxu0 %v618_v7  ;;  %441 = vmatprep.subr.bf16.mxu1 %v619_v8  ;;  %v636_v19 = vld [vmem:[%s931_s1 + $0x140] ss:$8 sps:$4 sm:$0xff]   ;;  %v639_v21 = vld [vmem:[%s931_s1 + $0x154] ss:$8 sps:$4 sm:$0xff]   ;;  %v642_v23 = vld [vmem:[%s931_s1 + $0x150] ss:$8 sps:$4 sm:$0xff]  }
   0x9   :  { %482 = vmatprep.subr.bf16.mxu0 %v621_v9  ;;  %v643_v24 = vld [vmem:[%s931_s1 + $0x64] ss:$8 sps:$4 sm:$0xff]   ;;  %v647_v26 = vld [vmem:[%s931_s1 + $0x60] ss:$8 sps:$4 sm:$0xff]   ;;  %v649_v28 = vld [vmem:[%s931_s1 + $0x74] ss:$8 sps:$4 sm:$0xff]  }
   0xa   :  { %v645_v25 = vld [vmem:[%s931_s1 + $0x164] ss:$8 sps:$4 sm:$0xff]   ;;  %v648_v27 = vld [vmem:[%s931_s1 + $0x160] ss:$8 sps:$4 sm:$0xff]   ;;  %v651_v29 = vld [vmem:[%s931_s1 + $0x174] ss:$8 sps:$4 sm:$0xff]  }
   0xb   :  { %442 = vmatpush1.bf16.msra.mxu1 %v623_v10  ;;  %v653_v30 = vld [vmem:[%s931_s1 + $0x70] ss:$8 sps:$4 sm:$0xff]   ;;  %v655_v32 = vld [vmem:[%s931_s1 + $0x84] ss:$8 sps:$4 sm:$0xff]   ;;  %v659_v34 = vld [vmem:[%s931_s1 + $0x80] ss:$8 sps:$4 sm:$0xff]  }
   0xc   :  { %483 = vmatpush1.bf16.msra.mxu0 %v624_v11  ;;  %443 = vmatprep.subr.bf16.mxu1 %v625_v12  ;;  %v654_v31 = vld [vmem:[%s931_s1 + $0x170] ss:$8 sps:$4 sm:$0xff]   ;;  %v657_v33 = vld [vmem:[%s931_s1 + $0x184] ss:$8 sps:$4 sm:$0xff]   ;;  %v660_v35 = vld [vmem:[%s931_s1 + $0x180] ss:$8 sps:$4 sm:$0xff]  }
   0xd   :  { %484 = vmatprep.subr.bf16.mxu0 %v627_v13  ;;  %v661_v39 = vld [vmem:[%s931_s1 + $0x94] ss:$8 sps:$4 sm:$0xff]   ;;  %v665_v41 = vld [vmem:[%s931_s1 + $0x90] ss:$8 sps:$4 sm:$0xff]   ;;  %v842_v43 = vshrl.u32 %v20_v38, 7  ;;  %v14_v52 = vld [vmem:[%s932_s0] sm:$0xff] }
   0xe   :  { %v663_v40 = vld [vmem:[%s931_s1 + $0x194] ss:$8 sps:$4 sm:$0xff]   ;;  %v666_v44 = vld [vmem:[%s931_s1 + $0x190] ss:$8 sps:$4 sm:$0xff]   ;;  %v667_v45 = vld [vmem:[%s931_s1 + $0xa4] ss:$8 sps:$4 sm:$0xff]   ;;  %v16_v54 = vcombine.high %v14_v52, %v14_v52 }
   0xf   :  { %444 = vmatpush1.bf16.msra.mxu1 %v629_v14  ;;  %v669_v46 = vld [vmem:[%s931_s1 + $0x1a4] ss:$8 sps:$4 sm:$0xff]   ;;  %v671_v47 = vld [vmem:[%s931_s1 + $0xa0] ss:$8 sps:$4 sm:$0xff]   ;;  %v22_v49 = vsub.s32 %v19_v42, %v842_v43  ;;  %v673_v50 = vld [vmem:[%s931_s1 + $0xb4] ss:$8 sps:$4 sm:$0xff]  }
  0x10   :  { %485 = vmatpush1.bf16.msra.mxu0 %v630_v15  ;;  %445 = vmatprep.subr.bf16.mxu1 %v631_v16  ;;  %v672_v48 = vld [vmem:[%s931_s1 + $0x1a0] ss:$8 sps:$4 sm:$0xff]   ;;  %v675_v51 = vld [vmem:[%s931_s1 + $0x1b4] ss:$8 sps:$4 sm:$0xff]   ;;  %v677_v55 = vld [vmem:[%s931_s1 + $0xb0] ss:$8 sps:$4 sm:$0xff]  }
  0x11   :  { %486 = vmatprep.subr.bf16.mxu0 %v633_v17  ;;  %v23_v53 = vrot.slane %v14_v52, %v22_v49  ;;  %v678_v56 = vld [vmem:[%s931_s1 + $0x1b0] ss:$8 sps:$4 sm:$0xff]   ;;  %v679_v57 = vld [vmem:[%s931_s1 + $0xc4] ss:$8 sps:$4 sm:$0xff]   ;;  %v30_v60 = vrot.slane %v16_v54, %v22_v49  ;;  %v683_v63 = vld [vmem:[%s931_s1 + $0xc0] ss:$8 sps:$4 sm:$0xff]  }
  0x12   :  { %v681_v58 = vld [vmem:[%s931_s1 + $0x1c4] ss:$8 sps:$4 sm:$0xff]   ;;  %v684_v0 = vld [vmem:[%s931_s1 + $0x1c0] ss:$8 sps:$4 sm:$0xff]   ;;  %v685_v1 = vld [vmem:[%s931_s1 + $0xd4] ss:$8 sps:$4 sm:$0xff]  }
  0x13   :  { %446 = vmatpush1.bf16.msra.mxu1 %v635_v18  ;;  %v31_v59 = vcombine.high %v23_v53, %v23_v53  ;;  %v32_v62 = vcombine.high %v30_v60, %v30_v60  ;;  %v687_v2 = vld [vmem:[%s931_s1 + $0x1d4] ss:$8 sps:$4 sm:$0xff]   ;;  %v689_v4 = vld [vmem:[%s931_s1 + $0xd0] ss:$8 sps:$4 sm:$0xff]   ;;  %v691_v6 = vld [vmem:[%s931_s1 + $0xe4] ss:$8 sps:$4 sm:$0xff]   ;;  %v37_v14 = vpack.c.bf16 %v23_v53, %v23_v53  ;;  %v39_v15 = vpack.c.bf16 %v30_v60, %v30_v60 }
  0x14   :  { %487 = vmatpush1.bf16.msra.mxu0 %v636_v19  ;;  %447 = vmatprep.subr.bf16.mxu1 %v637_v20  ;;  %v690_v5 = vld [vmem:[%s931_s1 + $0x1d0] ss:$8 sps:$4 sm:$0xff]   ;;  %v693_v7 = vld [vmem:[%s931_s1 + $0x1e4] ss:$8 sps:$4 sm:$0xff]   ;;  %v695_v8 = vld [vmem:[%s931_s1 + $0xe0] ss:$8 sps:$4 sm:$0xff]  }
  0x15   :  { %488 = vmatprep.subr.bf16.mxu0 %v639_v21  ;;  %v38_v61 = vpack.c.bf16 %v31_v59, %v31_v59  ;;  %v40_v3 = vpack.c.bf16 %v32_v62, %v32_v62  ;;  %v696_v9 = vld [vmem:[%s931_s1 + $0x1e0] ss:$8 sps:$4 sm:$0xff]   ;;  %v697_v10 = vld [vmem:[%s931_s1 + $0xf4] ss:$8 sps:$4 sm:$0xff]   ;;  %v701_v12 = vld [vmem:[%s931_s1 + $0xf0] ss:$8 sps:$4 sm:$0xff]  }
  0x16   :  { %v699_v11 = vld [vmem:[%s931_s1 + $0x1f4] ss:$8 sps:$4 sm:$0xff]   ;;  %v702_v13 = vld [vmem:[%s931_s1 + $0x1f0] ss:$8 sps:$4 sm:$0xff]   ;;  %v109_v16 = vsub.s32 0, %v842_v43  ;;  %v113_v18 = vsub.s32 1, %v842_v43 }
  0x17   :  { %448 = vmatpush1.bf16.msra.mxu1 %v641_v22  ;;  %469 = vmatprep.mubr.bf16.mxu1 %v38_v61  ;;  %v105_v17 = vld [vmem:[%s933_s2] sm:$0x3] }
  0x18   :  { %489 = vmatpush1.bf16.msra.mxu0 %v642_v23  ;;  %449 = vmatprep.subr.bf16.mxu1 %v643_v24  ;;  %v110_v19 = vrot.slane %v105_v17, %v109_v16  ;;  %v114_v20 = vrot.slane %v105_v17, %v113_v18 }
  0x19   :  { %490 = vmatprep.subr.bf16.mxu0 %v645_v25  ;;  %510 = vmatprep.mubr.bf16.mxu0 %v40_v3 }
  0x1b   :  { %450 = vmatpush1.bf16.msra.mxu1 %v647_v26 }
  0x1c   :  { %491 = vmatpush1.bf16.msra.mxu0 %v648_v27  ;;  %451 = vmatprep.subr.bf16.mxu1 %v649_v28 }
  0x1d   :  { %492 = vmatprep.subr.bf16.mxu0 %v651_v29 }
  0x1f   :  { %452 = vmatpush1.bf16.msra.mxu1 %v653_v30 }
  0x20   :  { %493 = vmatpush1.bf16.msra.mxu0 %v654_v31  ;;  %453 = vmatprep.subr.bf16.mxu1 %v655_v32 }
  0x21   :  { %494 = vmatprep.subr.bf16.mxu0 %v657_v33 }
  0x23   :  { %454 = vmatpush1.bf16.msra.mxu1 %v659_v34 }
  0x24   :  { %495 = vmatpush1.bf16.msra.mxu0 %v660_v35  ;;  %455 = vmatprep.subr.bf16.mxu1 %v661_v39 }
  0x25   :  { %496 = vmatprep.subr.bf16.mxu0 %v663_v40 }
  0x27   :  { %456 = vmatpush1.bf16.msra.mxu1 %v665_v41 }
  0x28   :  { %497 = vmatpush1.bf16.msra.mxu0 %v666_v44  ;;  %457 = vmatprep.subr.bf16.mxu1 %v667_v45 }
  0x29   :  { %498 = vmatprep.subr.bf16.mxu0 %v669_v46 }
  0x2b   :  { %458 = vmatpush1.bf16.msra.mxu1 %v671_v47 }
  0x2c   :  { %499 = vmatpush1.bf16.msra.mxu0 %v672_v48  ;;  %459 = vmatprep.subr.bf16.mxu1 %v673_v50 }
  0x2d   :  { %500 = vmatprep.subr.bf16.mxu0 %v675_v51 }
  0x2f   :  { %460 = vmatpush1.bf16.msra.mxu1 %v677_v55 }
  0x30   :  { %501 = vmatpush1.bf16.msra.mxu0 %v678_v56  ;;  %461 = vmatprep.subr.bf16.mxu1 %v679_v57 }
  0x31   :  { %502 = vmatprep.subr.bf16.mxu0 %v681_v58 }
  0x33   :  { %462 = vmatpush1.bf16.msra.mxu1 %v683_v63 }
  0x34   :  { %503 = vmatpush1.bf16.msra.mxu0 %v684_v0  ;;  %463 = vmatprep.subr.bf16.mxu1 %v685_v1 }
  0x35   :  { %504 = vmatprep.subr.bf16.mxu0 %v687_v2 }
  0x37   :  { %464 = vmatpush1.bf16.msra.mxu1 %v689_v4 }
  0x38   :  { %505 = vmatpush1.bf16.msra.mxu0 %v690_v5  ;;  %465 = vmatprep.subr.bf16.mxu1 %v691_v6 }
  0x39   :  { %506 = vmatprep.subr.bf16.mxu0 %v693_v7 }
  0x3b   :  { %466 = vmatpush1.bf16.msra.mxu1 %v695_v8 }
  0x3c   :  { %507 = vmatpush1.bf16.msra.mxu0 %v696_v9  ;;  %467 = vmatprep.subr.bf16.mxu1 %v697_v10 }
  0x3d   :  { %508 = vmatprep.subr.bf16.mxu0 %v699_v11 }
  0x3f   :  { %468 = vmatpush1.bf16.msra.mxu1 %v701_v12 }
  0x40   :  { %509 = vmatpush1.bf16.msra.mxu0 %v702_v13 }
  0x42   :  { %470 = vmatmul.mubr.bf16.vlgmr.msra.gmra.mrb[0].mxu1 %v37_v14 }
  0x43   :  { %511 = vmatmul.mubr.bf16.vlgmr.msra.gmra.mrb[0].mxu0 %v39_v15 }
 0x115   :  { %v471_v21 = vpop.f32.mrb[0].mxu1 }
 0x116   :  { %v512_v22 = vpop.f32.mrb[0].mxu0  ;;  %v472_v23 = vadd.f32 %v471_v21, %v110_v19  ;;  %v473_v24 = vpop.f32.mrb[1].mxu1 }
 0x117   :  { %v514_v25 = vpop.f32.mrb[1].mxu0  ;;  %v474_v26 = vadd.f32 %v473_v24, %v114_v20  ;;  %v475_v27 = vpop.f32.mrb[2].mxu1 }
 0x118   :  { %v516_v28 = vpop.f32.mrb[2].mxu0  ;;  %v513_v29 = vadd.f32 %v512_v22, %v472_v23  ;;  %v476_v30 = vpop.f32.mrb[3].mxu1 }
 0x119   :  { %v517_v31 = vpop.f32.mrb[3].mxu0  ;;  %v515_v32 = vadd.f32 %v514_v25, %v474_v26 }
 0x11a   :  { %v519_v33 = vmax.f32 %v513_v29, 0.0 }
 0x11b   :  { %v520_v34 = vmax.f32 %v515_v32, 0.0 }
 0x11d   :  { %v523_v35 = vcombine.low %v519_v33, %v520_v34 }
 0x11f   :  { %601 = vst.sshfl [vmem:[%s934_s3] sm:$0x33 pattern:$0x76325410] %v523_v35 }

// kernel: ssd_head_forward.17
= control target key start
LH: loop header
LB: loop body
LE: loop exit
PB: predicated region body
PF: predicated region fallthrough
CT: control target
= control target key end

     0   :  { %s1988_s1 = inlined_call_operand.vmem [shape: bf16[1152,256], index: 1, kind: input, shape index: {}]   ;;  %s1989_s0 = inlined_call_operand.vmem [shape: f32[8,1152], index: 0, kind: input, shape index: {}]   ;;  %s1990_s2 = inlined_call_operand.vmem [shape: f32[1,256], index: 2, kind: input, shape index: {}]   ;;  %s1991_s3 = inlined_call_operand.vmem [shape: f32[8,256], index: 3, kind: output, shape index: {}]  }
   0x1   :  { %v1283_v0 = vld [vmem:[%s1988_s1 + $0x4] ss:$8 sps:$4 sm:$0xff]   ;;  %v1287_v2 = vld [vmem:[%s1988_s1] ss:$8 sps:$4 sm:$0xff]   ;;  %v1289_v4 = vld [vmem:[%s1988_s1 + $0x14] ss:$8 sps:$4 sm:$0xff]  }
   0x2   :  { %v1285_v1 = vld [vmem:[%s1988_s1 + $0x204] ss:$8 sps:$4 sm:$0xff]   ;;  %909 = vmatprep.subr.bf16.mxu1 %v1283_v0  ;;  %v1288_v3 = vld [vmem:[%s1988_s1 + $0x200] ss:$8 sps:$4 sm:$0xff]   ;;  %v1291_v5 = vld [vmem:[%s1988_s1 + $0x214] ss:$8 sps:$4 sm:$0xff]  }
   0x3   :  { %991 = vmatprep.subr.bf16.mxu0 %v1285_v1  ;;  %910 = vmatpush1.bf16.msra.mxu1 %v1287_v2  ;;  %v1293_v6 = vld [vmem:[%s1988_s1 + $0x10] ss:$8 sps:$4 sm:$0xff]   ;;  %v1295_v8 = vld [vmem:[%s1988_s1 + $0x24] ss:$8 sps:$4 sm:$0xff]   ;;  %v1299_v10 = vld [vmem:[%s1988_s1 + $0x20] ss:$8 sps:$4 sm:$0xff]  }
   0x4   :  { %992 = vmatpush1.bf16.msra.mxu0 %v1288_v3  ;;  %911 = vmatprep.subr.bf16.mxu1 %v1289_v4  ;;  %v1294_v7 = vld [vmem:[%s1988_s1 + $0x210] ss:$8 sps:$4 sm:$0xff]   ;;  %v1297_v9 = vld [vmem:[%s1988_s1 + $0x224] ss:$8 sps:$4 sm:$0xff]   ;;  %v1300_v11 = vld [vmem:[%s1988_s1 + $0x220] ss:$8 sps:$4 sm:$0xff]  }
   0x5   :  { %993 = vmatprep.subr.bf16.mxu0 %v1291_v5  ;;  %v1301_v12 = vld [vmem:[%s1988_s1 + $0x34] ss:$8 sps:$4 sm:$0xff]   ;;  %v1305_v14 = vld [vmem:[%s1988_s1 + $0x30] ss:$8 sps:$4 sm:$0xff]   ;;  %v1307_v16 = vld [vmem:[%s1988_s1 + $0x44] ss:$8 sps:$4 sm:$0xff]  }
   0x6   :  { %v1303_v13 = vld [vmem:[%s1988_s1 + $0x234] ss:$8 sps:$4 sm:$0xff]   ;;  %v1306_v15 = vld [vmem:[%s1988_s1 + $0x230] ss:$8 sps:$4 sm:$0xff]   ;;  %v1309_v17 = vld [vmem:[%s1988_s1 + $0x244] ss:$8 sps:$4 sm:$0xff]  }
   0x7   :  { %912 = vmatpush1.bf16.msra.mxu1 %v1293_v6  ;;  %v1311_v18 = vld [vmem:[%s1988_s1 + $0x40] ss:$8 sps:$4 sm:$0xff]   ;;  %v1313_v20 = vld [vmem:[%s1988_s1 + $0x54] ss:$8 sps:$4 sm:$0xff]   ;;  %v1317_v22 = vld [vmem:[%s1988_s1 + $0x50] ss:$8 sps:$4 sm:$0xff]  }
   0x8   :  { %994 = vmatpush1.bf16.msra.mxu0 %v1294_v7  ;;  %913 = vmatprep.subr.bf16.mxu1 %v1295_v8  ;;  %v1312_v19 = vld [vmem:[%s1988_s1 + $0x240] ss:$8 sps:$4 sm:$0xff]   ;;  %v1315_v21 = vld [vmem:[%s1988_s1 + $0x254] ss:$8 sps:$4 sm:$0xff]   ;;  %v1318_v23 = vld [vmem:[%s1988_s1 + $0x250] ss:$8 sps:$4 sm:$0xff]  }
   0x9   :  { %995 = vmatprep.subr.bf16.mxu0 %v1297_v9  ;;  %v1319_v24 = vld [vmem:[%s1988_s1 + $0x64] ss:$8 sps:$4 sm:$0xff]   ;;  %v1323_v26 = vld [vmem:[%s1988_s1 + $0x60] ss:$8 sps:$4 sm:$0xff]   ;;  %v1325_v28 = vld [vmem:[%s1988_s1 + $0x74] ss:$8 sps:$4 sm:$0xff]  }
   0xa   :  { %v1321_v25 = vld [vmem:[%s1988_s1 + $0x264] ss:$8 sps:$4 sm:$0xff]   ;;  %v1324_v27 = vld [vmem:[%s1988_s1 + $0x260] ss:$8 sps:$4 sm:$0xff]   ;;  %v1327_v29 = vld [vmem:[%s1988_s1 + $0x274] ss:$8 sps:$4 sm:$0xff]  }
   0xb   :  { %914 = vmatpush1.bf16.msra.mxu1 %v1299_v10  ;;  %v1329_v30 = vld [vmem:[%s1988_s1 + $0x70] ss:$8 sps:$4 sm:$0xff]   ;;  %v1331_v32 = vld [vmem:[%s1988_s1 + $0x84] ss:$8 sps:$4 sm:$0xff]   ;;  %v1335_v34 = vld [vmem:[%s1988_s1 + $0x80] ss:$8 sps:$4 sm:$0xff]  }
   0xc   :  { %996 = vmatpush1.bf16.msra.mxu0 %v1300_v11  ;;  %915 = vmatprep.subr.bf16.mxu1 %v1301_v12  ;;  %v1330_v31 = vld [vmem:[%s1988_s1 + $0x270] ss:$8 sps:$4 sm:$0xff]   ;;  %v1333_v33 = vld [vmem:[%s1988_s1 + $0x284] ss:$8 sps:$4 sm:$0xff]   ;;  %v1336_v35 = vld [vmem:[%s1988_s1 + $0x280] ss:$8 sps:$4 sm:$0xff]  }
   0xd   :  { %997 = vmatprep.subr.bf16.mxu0 %v1303_v13  ;;  %v1337_v36 = vld [vmem:[%s1988_s1 + $0x94] ss:$8 sps:$4 sm:$0xff]   ;;  %v1341_v38 = vld [vmem:[%s1988_s1 + $0x90] ss:$8 sps:$4 sm:$0xff]   ;;  %v1343_v40 = vld [vmem:[%s1988_s1 + $0xa4] ss:$8 sps:$4 sm:$0xff]  }
   0xe   :  { %v1339_v37 = vld [vmem:[%s1988_s1 + $0x294] ss:$8 sps:$4 sm:$0xff]   ;;  %v1342_v39 = vld [vmem:[%s1988_s1 + $0x290] ss:$8 sps:$4 sm:$0xff]   ;;  %v1345_v41 = vld [vmem:[%s1988_s1 + $0x2a4] ss:$8 sps:$4 sm:$0xff]  }
   0xf   :  { %916 = vmatpush1.bf16.msra.mxu1 %v1305_v14  ;;  %v1347_v42 = vld [vmem:[%s1988_s1 + $0xa0] ss:$8 sps:$4 sm:$0xff]   ;;  %v1349_v44 = vld [vmem:[%s1988_s1 + $0xb4] ss:$8 sps:$4 sm:$0xff]   ;;  %v1353_v47 = vld [vmem:[%s1988_s1 + $0xb0] ss:$8 sps:$4 sm:$0xff]  }
  0x10   :  { %998 = vmatpush1.bf16.msra.mxu0 %v1306_v15  ;;  %917 = vmatprep.subr.bf16.mxu1 %v1307_v16  ;;  %v1348_v43 = vld [vmem:[%s1988_s1 + $0x2a0] ss:$8 sps:$4 sm:$0xff]   ;;  %v1351_v45 = vld [vmem:[%s1988_s1 + $0x2b4] ss:$8 sps:$4 sm:$0xff]   ;;  %v1354_v49 = vld [vmem:[%s1988_s1 + $0x2b0] ss:$8 sps:$4 sm:$0xff]  }
  0x11   :  { %999 = vmatprep.subr.bf16.mxu0 %v1309_v17  ;;  %v16_v46 = vld [vmem:[%s1989_s0 + $0x8] sm:$0xff]  ;;  %v1361_v56 = vld [vmem:[%s1988_s1 + $0xd4] ss:$8 sps:$4 sm:$0xff]   ;;  %v1365_v58 = vld [vmem:[%s1988_s1 + $0xd0] ss:$8 sps:$4 sm:$0xff]  }
  0x12   :  { %v25_v48 = vpack.c.bf16 %v16_v46, %v16_v46  ;;  %v20_v50 = vld [vmem:[%s1989_s0 + $0x28] sm:$0xff]  ;;  %v1363_v57 = vld [vmem:[%s1988_s1 + $0x2d4] ss:$8 sps:$4 sm:$0xff]   ;;  %v1366_v59 = vld [vmem:[%s1988_s1 + $0x2d0] ss:$8 sps:$4 sm:$0xff]  }
  0x13   :  { %918 = vmatpush1.bf16.msra.mxu1 %v1311_v18  ;;  %v1355_v51 = vld [vmem:[%s1988_s1 + $0xc4] ss:$8 sps:$4 sm:$0xff]   ;;  %v29_v53 = vpack.c.bf16 %v20_v50, %v20_v50  ;;  %v1359_v54 = vld [vmem:[%s1988_s1 + $0xc0] ss:$8 sps:$4 sm:$0xff]   ;;  %v1373_v0 = vld [vmem:[%s1988_s1 + $0xf4] ss:$8 sps:$4 sm:$0xff]  }
  0x14   :  { %1000 = vmatpush1.bf16.msra.mxu0 %v1312_v19  ;;  %919 = vmatprep.subr.bf16.mxu1 %v1313_v20  ;;  %v1357_v52 = vld [vmem:[%s1988_s1 + $0x2c4] ss:$8 sps:$4 sm:$0xff]   ;;  %v1360_v55 = vld [vmem:[%s1988_s1 + $0x2c0] ss:$8 sps:$4 sm:$0xff]   ;;  %v1375_v1 = vld [vmem:[%s1988_s1 + $0x2f4] ss:$8 sps:$4 sm:$0xff]  }
  0x15   :  { %1001 = vmatprep.subr.bf16.mxu0 %v1315_v21  ;;  %941 = vmatprep.mubr.bf16.mxu1 %v25_v48  ;;  %v1367_v60 = vld [vmem:[%s1988_s1 + $0xe4] ss:$8 sps:$4 sm:$0xff]   ;;  %v1371_v62 = vld [vmem:[%s1988_s1 + $0xe0] ss:$8 sps:$4 sm:$0xff]   ;;  %v1377_v2 = vld [vmem:[%s1988_s1 + $0xf0] ss:$8 sps:$4 sm:$0xff]  }
  0x16   :  { %1023 = vmatprep.mubr.bf16.mxu0 %v29_v53  ;;  %v1369_v61 = vld [vmem:[%s1988_s1 + $0x2e4] ss:$8 sps:$4 sm:$0xff]   ;;  %v1372_v63 = vld [vmem:[%s1988_s1 + $0x2e0] ss:$8 sps:$4 sm:$0xff]   ;;  %v1378_v3 = vld [vmem:[%s1988_s1 + $0x2f0] ss:$8 sps:$4 sm:$0xff]  }
  0x17   :  { %920 = vmatpush1.bf16.msra.mxu1 %v1317_v22  ;;  %v1381_v4 = vld [vmem:[%s1988_s1 + $0x104] ss:$8 sps:$4 sm:$0xff]   ;;  %v1379_v8 = vld [vmem:[%s1988_s1 + $0x100] ss:$8 sps:$4 sm:$0xff]   ;;  %v1387_v12 = vld [vmem:[%s1988_s1 + $0x114] ss:$8 sps:$4 sm:$0xff]  }
  0x18   :  { %1002 = vmatpush1.bf16.msra.mxu0 %v1318_v23  ;;  %921 = vmatprep.subr.bf16.mxu1 %v1319_v24  ;;  %v15_v5 = vld [vmem:[%s1989_s0] sm:$0xff]  ;;  %v1390_v13 = vld [vmem:[%s1988_s1 + $0x314] ss:$8 sps:$4 sm:$0xff]   ;;  %v1385_v14 = vld [vmem:[%s1988_s1 + $0x110] ss:$8 sps:$4 sm:$0xff]  }
  0x19   :  { %1003 = vmatprep.subr.bf16.mxu0 %v1321_v25  ;;  %v19_v6 = vld [vmem:[%s1989_s0 + $0x20] sm:$0xff]  ;;  %v24_v10 = vpack.c.bf16 %v15_v5, %v15_v5  ;;  %v1388_v15 = vld [vmem:[%s1988_s1 + $0x310] ss:$8 sps:$4 sm:$0xff]   ;;  %v1399_v20 = vld [vmem:[%s1988_s1 + $0x134] ss:$8 sps:$4 sm:$0xff]  }
  0x1a   :  { %v1384_v7 = vld [vmem:[%s1988_s1 + $0x304] ss:$8 sps:$4 sm:$0xff]   ;;  %v1382_v9 = vld [vmem:[%s1988_s1 + $0x300] ss:$8 sps:$4 sm:$0xff]   ;;  %v28_v11 = vpack.c.bf16 %v19_v6, %v19_v6  ;;  %v1402_v21 = vld [vmem:[%s1988_s1 + $0x334] ss:$8 sps:$4 sm:$0xff]  }
  0x1b   :  { %922 = vmatpush1.bf16.msra.mxu1 %v1323_v26  ;;  %v1393_v16 = vld [vmem:[%s1988_s1 + $0x124] ss:$8 sps:$4 sm:$0xff]   ;;  %v1391_v18 = vld [vmem:[%s1988_s1 + $0x120] ss:$8 sps:$4 sm:$0xff]   ;;  %v1397_v22 = vld [vmem:[%s1988_s1 + $0x130] ss:$8 sps:$4 sm:$0xff]  }
  0x1c   :  { %1004 = vmatpush1.bf16.msra.mxu0 %v1324_v27  ;;  %923 = vmatprep.subr.bf16.mxu1 %v1325_v28  ;;  %v1396_v17 = vld [vmem:[%s1988_s1 + $0x324] ss:$8 sps:$4 sm:$0xff]   ;;  %v1394_v19 = vld [vmem:[%s1988_s1 + $0x320] ss:$8 sps:$4 sm:$0xff]   ;;  %v1400_v23 = vld [vmem:[%s1988_s1 + $0x330] ss:$8 sps:$4 sm:$0xff]  }
  0x1d   :  { %1005 = vmatprep.subr.bf16.mxu0 %v1327_v29  ;;  %v1405_v24 = vld [vmem:[%s1988_s1 + $0x144] ss:$8 sps:$4 sm:$0xff]   ;;  %v1403_v26 = vld [vmem:[%s1988_s1 + $0x140] ss:$8 sps:$4 sm:$0xff]   ;;  %v1411_v28 = vld [vmem:[%s1988_s1 + $0x154] ss:$8 sps:$4 sm:$0xff]  }
  0x1e   :  { %v1408_v25 = vld [vmem:[%s1988_s1 + $0x344] ss:$8 sps:$4 sm:$0xff]   ;;  %v1406_v27 = vld [vmem:[%s1988_s1 + $0x340] ss:$8 sps:$4 sm:$0xff]   ;;  %v1414_v29 = vld [vmem:[%s1988_s1 + $0x354] ss:$8 sps:$4 sm:$0xff]  }
  0x1f   :  { %924 = vmatpush1.bf16.msra.mxu1 %v1329_v30  ;;  %v1409_v30 = vld [vmem:[%s1988_s1 + $0x150] ss:$8 sps:$4 sm:$0xff]   ;;  %v1427_v46 = vld [vmem:[%s1988_s1 + $0x180] ss:$8 sps:$4 sm:$0xff]   ;;  %v1435_v48 = vld [vmem:[%s1988_s1 + $0x194] ss:$8 sps:$4 sm:$0xff]  }
  0x20   :  { %1006 = vmatpush1.bf16.msra.mxu0 %v1330_v31  ;;  %925 = vmatprep.subr.bf16.mxu1 %v1331_v32  ;;  %v1412_v31 = vld [vmem:[%s1988_s1 + $0x350] ss:$8 sps:$4 sm:$0xff]   ;;  %v1417_v32 = vld [vmem:[%s1988_s1 + $0x164] ss:$8 sps:$4 sm:$0xff]   ;;  %v1463_v6 = vld [vmem:[%s1988_s1 + $0x1e0] ss:$8 sps:$4 sm:$0xff]  }
  0x21   :  { %1007 = vmatprep.subr.bf16.mxu0 %v1333_v33  ;;  %v1420_v33 = vld [vmem:[%s1988_s1 + $0x364] ss:$8 sps:$4 sm:$0xff]   ;;  %v1433_v50 = vld [vmem:[%s1988_s1 + $0x190] ss:$8 sps:$4 sm:$0xff]  }
  0x22   :  { %v1444_v53 = vld [vmem:[%s1988_s1 + $0x3a4] ss:$8 sps:$4 sm:$0xff]  }
  0x23   :  { %926 = vmatpush1.bf16.msra.mxu1 %v1335_v34  ;;  %v18_v34 = vld [vmem:[%s1989_s0 + $0x18] sm:$0xff]  ;;  %v1468_v5 = vld [vmem:[%s1988_s1 + $0x3e4] ss:$8 sps:$4 sm:$0xff]  }
  0x24   :  { %1008 = vmatpush1.bf16.msra.mxu0 %v1336_v35  ;;  %927 = vmatprep.subr.bf16.mxu1 %v1337_v36  ;;  %v1415_v35 = vld [vmem:[%s1988_s1 + $0x160] ss:$8 sps:$4 sm:$0xff]   ;;  %v27_v36 = vpack.c.bf16 %v18_v34, %v18_v34 }
  0x25   :  { %1009 = vmatprep.subr.bf16.mxu0 %v1339_v37  ;;  %v22_v37 = vld [vmem:[%s1989_s0 + $0x38] sm:$0xff] }
  0x27   :  { %928 = vmatpush1.bf16.msra.mxu1 %v1341_v38  ;;  %v1418_v38 = vld [vmem:[%s1988_s1 + $0x360] ss:$8 sps:$4 sm:$0xff]  }
  0x28   :  { %1010 = vmatpush1.bf16.msra.mxu0 %v1342_v39  ;;  %929 = vmatprep.subr.bf16.mxu1 %v1343_v40  ;;  %v1423_v39 = vld [vmem:[%s1988_s1 + $0x174] ss:$8 sps:$4 sm:$0xff]   ;;  %v31_v40 = vpack.c.bf16 %v22_v37, %v22_v37 }
  0x29   :  { %1011 = vmatprep.subr.bf16.mxu0 %v1345_v41  ;;  %v1426_v41 = vld [vmem:[%s1988_s1 + $0x374] ss:$8 sps:$4 sm:$0xff]  }
  0x2b   :  { %930 = vmatpush1.bf16.msra.mxu1 %v1347_v42  ;;  %v1421_v42 = vld [vmem:[%s1988_s1 + $0x170] ss:$8 sps:$4 sm:$0xff]  }
  0x2c   :  { %1012 = vmatpush1.bf16.msra.mxu0 %v1348_v43  ;;  %931 = vmatprep.subr.bf16.mxu1 %v1349_v44  ;;  %v1424_v43 = vld [vmem:[%s1988_s1 + $0x370] ss:$8 sps:$4 sm:$0xff]   ;;  %v1429_v44 = vld [vmem:[%s1988_s1 + $0x184] ss:$8 sps:$4 sm:$0xff]  }
  0x2d   :  { %1013 = vmatprep.subr.bf16.mxu0 %v1351_v45  ;;  %v1432_v45 = vld [vmem:[%s1988_s1 + $0x384] ss:$8 sps:$4 sm:$0xff]  }
  0x2f   :  { %932 = vmatpush1.bf16.msra.mxu1 %v1353_v47  ;;  %v1430_v47 = vld [vmem:[%s1988_s1 + $0x380] ss:$8 sps:$4 sm:$0xff]  }
  0x30   :  { %1014 = vmatpush1.bf16.msra.mxu0 %v1354_v49  ;;  %933 = vmatprep.subr.bf16.mxu1 %v1355_v51  ;;  %v1438_v49 = vld [vmem:[%s1988_s1 + $0x394] ss:$8 sps:$4 sm:$0xff]   ;;  %v1436_v51 = vld [vmem:[%s1988_s1 + $0x390] ss:$8 sps:$4 sm:$0xff]  }
  0x31   :  { %1015 = vmatprep.subr.bf16.mxu0 %v1357_v52  ;;  %v1441_v52 = vld [vmem:[%s1988_s1 + $0x1a4] ss:$8 sps:$4 sm:$0xff]  }
  0x33   :  { %934 = vmatpush1.bf16.msra.mxu1 %v1359_v54  ;;  %v1439_v54 = vld [vmem:[%s1988_s1 + $0x1a0] ss:$8 sps:$4 sm:$0xff]  }
  0x34   :  { %1016 = vmatpush1.bf16.msra.mxu0 %v1360_v55  ;;  %935 = vmatprep.subr.bf16.mxu1 %v1361_v56  ;;  %v1442_v55 = vld [vmem:[%s1988_s1 + $0x3a0] ss:$8 sps:$4 sm:$0xff]   ;;  %v1447_v56 = vld [vmem:[%s1988_s1 + $0x1b4] ss:$8 sps:$4 sm:$0xff]  }
  0x35   :  { %1017 = vmatprep.subr.bf16.mxu0 %v1363_v57  ;;  %v1450_v57 = vld [vmem:[%s1988_s1 + $0x3b4] ss:$8 sps:$4 sm:$0xff]  }
  0x37   :  { %936 = vmatpush1.bf16.msra.mxu1 %v1365_v58  ;;  %v1445_v58 = vld [vmem:[%s1988_s1 + $0x1b0] ss:$8 sps:$4 sm:$0xff]  }
  0x38   :  { %1018 = vmatpush1.bf16.msra.mxu0 %v1366_v59  ;;  %937 = vmatprep.subr.bf16.mxu1 %v1367_v60  ;;  %v1448_v59 = vld [vmem:[%s1988_s1 + $0x3b0] ss:$8 sps:$4 sm:$0xff]   ;;  %v1453_v60 = vld [vmem:[%s1988_s1 + $0x1c4] ss:$8 sps:$4 sm:$0xff]  }
  0x39   :  { %1019 = vmatprep.subr.bf16.mxu0 %v1369_v61  ;;  %v1456_v61 = vld [vmem:[%s1988_s1 + $0x3c4] ss:$8 sps:$4 sm:$0xff]  }
  0x3b   :  { %938 = vmatpush1.bf16.msra.mxu1 %v1371_v62  ;;  %v1451_v62 = vld [vmem:[%s1988_s1 + $0x1c0] ss:$8 sps:$4 sm:$0xff]  }
  0x3c   :  { %1020 = vmatpush1.bf16.msra.mxu0 %v1372_v63  ;;  %939 = vmatprep.subr.bf16.mxu1 %v1373_v0  ;;  %v1454_v63 = vld [vmem:[%s1988_s1 + $0x3c0] ss:$8 sps:$4 sm:$0xff]   ;;  %v1459_v0 = vld [vmem:[%s1988_s1 + $0x1d4] ss:$8 sps:$4 sm:$0xff]  }
  0x3d   :  { %1021 = vmatprep.subr.bf16.mxu0 %v1375_v1  ;;  %v1462_v1 = vld [vmem:[%s1988_s1 + $0x3d4] ss:$8 sps:$4 sm:$0xff]  }
  0x3f   :  { %940 = vmatpush1.bf16.msra.mxu1 %v1377_v2  ;;  %v1457_v2 = vld [vmem:[%s1988_s1 + $0x1d0] ss:$8 sps:$4 sm:$0xff]  }
  0x40   :  { %1022 = vmatpush1.bf16.msra.mxu0 %v1378_v3  ;;  %950 = vmatprep.subr.bf16.mxu1 %v1381_v4  ;;  %v1460_v3 = vld [vmem:[%s1988_s1 + $0x3d0] ss:$8 sps:$4 sm:$0xff]   ;;  %v1465_v4 = vld [vmem:[%s1988_s1 + $0x1e4] ss:$8 sps:$4 sm:$0xff]  }
  0x41   :  { %1032 = vmatprep.subr.bf16.mxu0 %v1384_v7  ;;  %v1466_v7 = vld [vmem:[%s1988_s1 + $0x3e0] ss:$8 sps:$4 sm:$0xff]  }
  0x42   :  { %942 = vmatmul.mubr.bf16.vlgmr.msra.gmra.mrb[0].mxu1 %v24_v10  ;;  %v1469_v10 = vld [vmem:[%s1988_s1 + $0x1f0] ss:$8 sps:$4 sm:$0xff]  }
  0x43   :  { %1024 = vmatmul.mubr.bf16.vlgmr.msra.gmra.mrb[0].mxu0 %v28_v11  ;;  %951 = vmatpush1.bf16.msra.mxu1 %v1379_v8  ;;  %v1471_v8 = vld [vmem:[%s1988_s1 + $0x1f4] ss:$8 sps:$4 sm:$0xff]   ;;  %v1472_v11 = vld [vmem:[%s1988_s1 + $0x3f0] ss:$8 sps:$4 sm:$0xff]  }
  0x44   :  { %1033 = vmatpush1.bf16.msra.mxu0 %v1382_v9  ;;  %952 = vmatprep.subr.bf16.mxu1 %v1387_v12  ;;  %v1474_v9 = vld [vmem:[%s1988_s1 + $0x3f4] ss:$8 sps:$4 sm:$0xff]  }
  0x45   :  { %1034 = vmatprep.subr.bf16.mxu0 %v1390_v13  ;;  %982 = vmatprep.mubr.bf16.mxu1 %v27_v36  ;;  %v17_v12 = vld [vmem:[%s1989_s0 + $0x10] sm:$0xff] }
  0x46   :  { %1064 = vmatprep.mubr.bf16.mxu0 %v31_v40  ;;  %v21_v13 = vld [vmem:[%s1989_s0 + $0x30] sm:$0xff] }
  0x47   :  { %953 = vmatpush1.bf16.msra.mxu1 %v1385_v14  ;;  %v1477_v14 = vld [vmem:[%s1988_s1 + $0x404] ss:$8 sps:$4 sm:$0xff]  }
  0x48   :  { %1035 = vmatpush1.bf16.msra.mxu0 %v1388_v15  ;;  %954 = vmatprep.subr.bf16.mxu1 %v1393_v16  ;;  %v26_v15 = vpack.c.bf16 %v17_v12, %v17_v12  ;;  %v30_v16 = vpack.c.bf16 %v21_v13, %v21_v13 }
  0x49   :  { %1036 = vmatprep.subr.bf16.mxu0 %v1396_v17  ;;  %v1475_v17 = vld [vmem:[%s1988_s1 + $0x400] ss:$8 sps:$4 sm:$0xff]  }
  0x4b   :  { %955 = vmatpush1.bf16.msra.mxu1 %v1391_v18  ;;  %v1480_v18 = vld [vmem:[%s1988_s1 + $0x414] ss:$8 sps:$4 sm:$0xff]  }
  0x4c   :  { %1037 = vmatpush1.bf16.msra.mxu0 %v1394_v19  ;;  %956 = vmatprep.subr.bf16.mxu1 %v1399_v20  ;;  %v1478_v19 = vld [vmem:[%s1988_s1 + $0x410] ss:$8 sps:$4 sm:$0xff]   ;;  %v1499_v20 = vmov 0  }
  0x4d   :  { %1038 = vmatprep.subr.bf16.mxu0 %v1402_v21  ;;  %v1483_v21 = vld [vmem:[%s1988_s1 + $0x424] ss:$8 sps:$4 sm:$0xff]  }
  0x4f   :  { %957 = vmatpush1.bf16.msra.mxu1 %v1397_v22  ;;  %v1481_v22 = vld [vmem:[%s1988_s1 + $0x420] ss:$8 sps:$4 sm:$0xff]  }
  0x50   :  { %1039 = vmatpush1.bf16.msra.mxu0 %v1400_v23  ;;  %958 = vmatprep.subr.bf16.mxu1 %v1405_v24  ;;  %v1486_v23 = vld [vmem:[%s1988_s1 + $0x434] ss:$8 sps:$4 sm:$0xff]   ;;  %v1484_v24 = vld [vmem:[%s1988_s1 + $0x430] ss:$8 sps:$4 sm:$0xff]  }
  0x51   :  { %1040 = vmatprep.subr.bf16.mxu0 %v1408_v25  ;;  %v1489_v25 = vld [vmem:[%s1988_s1 + $0x444] ss:$8 sps:$4 sm:$0xff]  }
  0x53   :  { %959 = vmatpush1.bf16.msra.mxu1 %v1403_v26  ;;  %v1487_v26 = vld [vmem:[%s1988_s1 + $0x440] ss:$8 sps:$4 sm:$0xff]  }
  0x54   :  { %1041 = vmatpush1.bf16.msra.mxu0 %v1406_v27  ;;  %960 = vmatprep.subr.bf16.mxu1 %v1411_v28  ;;  %v1492_v27 = vld [vmem:[%s1988_s1 + $0x454] ss:$8 sps:$4 sm:$0xff]   ;;  %v1490_v28 = vld [vmem:[%s1988_s1 + $0x450] ss:$8 sps:$4 sm:$0xff]  }
  0x55   :  { %1042 = vmatprep.subr.bf16.mxu0 %v1414_v29  ;;  %v1495_v29 = vld [vmem:[%s1988_s1 + $0x464] ss:$8 sps:$4 sm:$0xff]  }
  0x57   :  { %961 = vmatpush1.bf16.msra.mxu1 %v1409_v30  ;;  %v1493_v30 = vld [vmem:[%s1988_s1 + $0x460] ss:$8 sps:$4 sm:$0xff]  }
  0x58   :  { %1043 = vmatpush1.bf16.msra.mxu0 %v1412_v31  ;;  %962 = vmatprep.subr.bf16.mxu1 %v1417_v32  ;;  %v1498_v31 = vld [vmem:[%s1988_s1 + $0x474] ss:$8 sps:$4 sm:$0xff]   ;;  %v1496_v32 = vld [vmem:[%s1988_s1 + $0x470] ss:$8 sps:$4 sm:$0xff]  }
  0x59   :  { %1044 = vmatprep.subr.bf16.mxu0 %v1420_v33  ;;  %v23_v33 = vld [vmem:[%s1989_s0 + $0x40] sm:$0xff] }
  0x5a   :  { %v32_v34 = vpack.c.bf16 %v23_v33, %v23_v33 }
  0x5b   :  { %963 = vmatpush1.bf16.msra.mxu1 %v1415_v35 }
  0x5c   :  { %1045 = vmatpush1.bf16.msra.mxu0 %v1418_v38  ;;  %964 = vmatprep.subr.bf16.mxu1 %v1423_v39  ;;  %v179_v39 = vlaneseq }
  0x5d   :  { %1046 = vmatprep.subr.bf16.mxu0 %v1426_v41 }
  0x5e   :  { %v180_v40 = vshrl.u32 %v179_v39, 7 }
  0x5f   :  { %965 = vmatpush1.bf16.msra.mxu1 %v1421_v42  ;;  %v177_v42 = vld [vmem:[%s1990_s2] sm:$0x3] }
  0x60   :  { %1047 = vmatpush1.bf16.msra.mxu0 %v1424_v43  ;;  %966 = vmatprep.subr.bf16.mxu1 %v1429_v44  ;;  %v181_v41 = vsub.s32 0, %v180_v40  ;;  %v185_v43 = vsub.s32 1, %v180_v40 }
  0x61   :  { %1048 = vmatprep.subr.bf16.mxu0 %v1432_v45 }
  0x62   :  { %v182_v44 = vrot.slane %v177_v42, %v181_v41  ;;  %v186_v45 = vrot.slane %v177_v42, %v185_v43 }
  0x63   :  { %967 = vmatpush1.bf16.msra.mxu1 %v1427_v46 }
  0x64   :  { %1049 = vmatpush1.bf16.msra.mxu0 %v1430_v47  ;;  %968 = vmatprep.subr.bf16.mxu1 %v1435_v48 }
  0x65   :  { %1050 = vmatprep.subr.bf16.mxu0 %v1438_v49 }
  0x67   :  { %969 = vmatpush1.bf16.msra.mxu1 %v1433_v50 }
  0x68   :  { %1051 = vmatpush1.bf16.msra.mxu0 %v1436_v51  ;;  %970 = vmatprep.subr.bf16.mxu1 %v1441_v52 }
  0x69   :  { %1052 = vmatprep.subr.bf16.mxu0 %v1444_v53 }
  0x6b   :  { %971 = vmatpush1.bf16.msra.mxu1 %v1439_v54 }
  0x6c   :  { %1053 = vmatpush1.bf16.msra.mxu0 %v1442_v55  ;;  %972 = vmatprep.subr.bf16.mxu1 %v1447_v56 }
  0x6d   :  { %1054 = vmatprep.subr.bf16.mxu0 %v1450_v57 }
  0x6f   :  { %973 = vmatpush1.bf16.msra.mxu1 %v1445_v58 }
  0x70   :  { %1055 = vmatpush1.bf16.msra.mxu0 %v1448_v59  ;;  %974 = vmatprep.subr.bf16.mxu1 %v1453_v60 }
  0x71   :  { %1056 = vmatprep.subr.bf16.mxu0 %v1456_v61 }
  0x73   :  { %975 = vmatpush1.bf16.msra.mxu1 %v1451_v62 }
  0x74   :  { %1057 = vmatpush1.bf16.msra.mxu0 %v1454_v63  ;;  %976 = vmatprep.subr.bf16.mxu1 %v1459_v0 }
  0x75   :  { %1058 = vmatprep.subr.bf16.mxu0 %v1462_v1 }
  0x77   :  { %977 = vmatpush1.bf16.msra.mxu1 %v1457_v2 }
  0x78   :  { %1059 = vmatpush1.bf16.msra.mxu0 %v1460_v3  ;;  %978 = vmatprep.subr.bf16.mxu1 %v1465_v4 }
  0x79   :  { %1060 = vmatprep.subr.bf16.mxu0 %v1468_v5 }
  0x7b   :  { %979 = vmatpush1.bf16.msra.mxu1 %v1463_v6 }
  0x7c   :  { %1061 = vmatpush1.bf16.msra.mxu0 %v1466_v7  ;;  %980 = vmatprep.subr.bf16.mxu1 %v1471_v8 }
  0x7d   :  { %1062 = vmatprep.subr.bf16.mxu0 %v1474_v9 }
  0x7f   :  { %981 = vmatpush1.bf16.msra.mxu1 %v1469_v10 }
  0x80   :  { %1063 = vmatpush1.bf16.msra.mxu0 %v1472_v11 }
  0x81   :  { %1073 = vmatprep.subr.bf16.mxu0 %v1477_v14 }
  0x82   :  { %983 = vmatmul.mubr.bf16.vlgmr.msra.gmra.mrb[0].mxu1 %v26_v15 }
  0x83   :  { %1065 = vmatmul.mubr.bf16.vlgmr.msra.gmra.mrb[0].mxu0 %v30_v16 }
  0x84   :  { %1074 = vmatpush1.bf16.msra.mxu0 %v1475_v17  ;;  %1105 = vmatprep.mubr.bf16.mxu0 %v1499_v20 }
  0x85   :  { %1075 = vmatprep.subr.bf16.mxu0 %v1480_v18 }
  0x88   :  { %1076 = vmatpush1.bf16.msra.mxu0 %v1478_v19 }
  0x89   :  { %1077 = vmatprep.subr.bf16.mxu0 %v1483_v21 }
  0x8c   :  { %1078 = vmatpush1.bf16.msra.mxu0 %v1481_v22 }
  0x8d   :  { %1079 = vmatprep.subr.bf16.mxu0 %v1486_v23 }
  0x90   :  { %1080 = vmatpush1.bf16.msra.mxu0 %v1484_v24 }
  0x91   :  { %1081 = vmatprep.subr.bf16.mxu0 %v1489_v25 }
  0x94   :  { %1082 = vmatpush1.bf16.msra.mxu0 %v1487_v26 }
  0x95   :  { %1083 = vmatprep.subr.bf16.mxu0 %v1492_v27 }
  0x98   :  { %1084 = vmatpush1.bf16.msra.mxu0 %v1490_v28 }
  0x99   :  { %1085 = vmatprep.subr.bf16.mxu0 %v1495_v29 }
  0x9c   :  { %1086 = vmatpush1.bf16.msra.mxu0 %v1493_v30 }
  0x9d   :  { %1087 = vmatprep.subr.bf16.mxu0 %v1498_v31 }
  0xa0   :  { %1088 = vmatpush1.bf16.msra.mxu0 %v1496_v32 }
  0xa3   :  { %1106 = vmatmul.mubr.bf16.vlgmr.msra.gmra.mrb[0].mxu0 %v32_v34 }
 0x155   :  { %v984_v35 = vpop.f32.mrb[0].mxu1 }
 0x156   :  { %v986_v36 = vpop.f32.mrb[1].mxu1  ;;  %v1266_v46 = vadd.f32 %v984_v35, %v182_v44 }
 0x157   :  { %v988_v37 = vpop.f32.mrb[2].mxu1  ;;  %v1268_v47 = vadd.f32 %v986_v36, %v186_v45 }
 0x158   :  { %v989_v38 = vpop.f32.mrb[3].mxu1 }
 0x176   :  { %v1107_v48 = vpop.f32.mrb[0].mxu0 }
 0x177   :  { %v1267_v49 = vadd.f32 %v1266_v46, %v1107_v48  ;;  %v1109_v50 = vpop.f32.mrb[1].mxu0 }
 0x178   :  { %v1269_v51 = vadd.f32 %v1268_v47, %v1109_v50  ;;  %v1111_v52 = vpop.f32.mrb[2].mxu0 }
 0x179   :  { %v1114_v53 = vmax.f32 %v1267_v49, 0.0  ;;  %v1112_v54 = vpop.f32.mrb[3].mxu0 }
 0x17a   :  { %v1115_v55 = vmax.f32 %v1269_v51, 0.0 }
 0x17b   :  { %1116 = vst [vmem:[%s1991_s3] sm:$0xff] %v1114_v53 }
 0x17c   :  { %1117 = vst [vmem:[%s1991_s3 + $0x8] sm:$0xff] %v1115_v55 }

</bundles_post_ra>
